<compile_context>
chip_gen: v7x
topology: tpu7x:2x2x1
jax: 0.10.0
libtpu: 0.0.40
codegen_flags: <defaults>
</compile_context>

<pallas_src>
import jax
import jax.numpy as jnp
from jax.experimental import pallas as pl
from jax.experimental.pallas import tpu as pltpu

_BN_EPS = 1e-5
_CONV_ROW_TILE = 512          # M-rows per conv grid step (fits VMEM on v5e/v6e/v7x)
_VMEM_LIMIT = 32 * 1024 * 1024


def _round_up(x, m):
    return ((x + m - 1) // m) * m


# ----------------------------------------------------------------------------
# Kernel 1: tiled conv matmul (bf16 MXU, f32 acc) + per-tile BN partial stats
# ----------------------------------------------------------------------------
def _conv_stats_kernel(p_ref, w_ref, y_ref, s_ref):
    """p_ref: (TM, K) bf16 patches, w_ref: (K, Cout) bf16 weights.

    y_ref: (TM, Cout) f32 raw conv output tile.
    s_ref: (1, 8, 128) f32 per-tile stats; row 0 = column sums, row 1 = column
           sums of squares (first Cout lanes).  Zero-padded patch rows
           contribute exactly zero, so the wrapper can divide by the true M.
    """
    y = jnp.dot(p_ref[...], w_ref[...], preferred_element_type=jnp.float32)
    # TODO(synk): (TM, 64) stores are lane-masked; folding two rows into the
    #             128-lane axis would widen the store path further.
    y_ref[...] = y

    cout = y.shape[1]
    csum = jnp.sum(y, axis=0, keepdims=True)          # (1, Cout)
    csq = jnp.sum(y * y, axis=0, keepdims=True)       # (1, Cout)
    if cout < 128:
        zlane = jnp.zeros((1, 128 - cout), jnp.float32)
        row0 = jnp.concatenate([csum, zlane], axis=1)
        row1 = jnp.concatenate([csq, zlane], axis=1)
    else:
        row0, row1 = csum, csq
    rest = jnp.zeros((6, 128), jnp.float32)
    s_ref[...] = jnp.concatenate([row0, row1, rest], axis=0)[None, :, :]


# ----------------------------------------------------------------------------
# Kernel 2: fused BN-affine + ReLU + MaxPool(kernel=3, stride=2)
# ----------------------------------------------------------------------------
def _bn_relu_pool_kernel(ee_ref, eo_ref, oe_ref, oo_ref, sc_ref, sh_ref, o_ref):
    """One batch element.  The four inputs are the even/odd row x even/odd
    column parity planes of the (spatially padded) raw conv output.

    Output pixel (ho, wo) pools padded pixels (2ho+i, 2wo+j), i,j in {0,1,2}:
        rows 2ho, 2ho+2 -> even-row plane at ho, ho+1 ; row 2ho+1 -> odd plane at ho
        cols 2wo, 2wo+2 -> even-col plane at wo, wo+1 ; col 2wo+1 -> odd plane at wo
    """
    sc = sc_ref[...][None, None]      # (1, 1, 1, C)
    sh = sh_ref[...][None, None]

    def act(v):                       # BN affine + ReLU (f32)
        return jnp.maximum(v * sc + sh, 0.0)

    ee = act(ee_ref[...])             # (1, Ho+1, Wo+1, C)
    eo = act(eo_ref[...])             # (1, Ho+1, Wo,   C)
    oe = act(oe_ref[...])             # (1, Ho,   Wo+1, C)
    oo = act(oo_ref[...])             # (1, Ho,   Wo,   C)

    ho = o_ref.shape[1]
    wo = o_ref.shape[2]
    m = oo
    m = jnp.maximum(m, ee[:, :ho, :wo, :])
    m = jnp.maximum(m, ee[:, :ho, 1:wo + 1, :])
    m = jnp.maximum(m, ee[:, 1:ho + 1, :wo, :])
    m = jnp.maximum(m, ee[:, 1:ho + 1, 1:wo + 1, :])
    m = jnp.maximum(m, eo[:, :ho, :, :])
    m = jnp.maximum(m, eo[:, 1:ho + 1, :, :])
    m = jnp.maximum(m, oe[:, :, :wo, :])
    m = jnp.maximum(m, oe[:, :, 1:wo + 1, :])
    o_ref[...] = m


# ----------------------------------------------------------------------------
# Wrappers (padding / patch extraction / parity split are pure data movement)
# ----------------------------------------------------------------------------
def _extract_patches(x_nhwc, kh, kw, stride, pad):
    """(B,H,W,C) -> ((B,Ho,Wo,kh*kw,C), Ho, Wo) zero-padded conv patches.

    TODO(synk): block-1's 7x7 im2col still inflates HBM traffic; building the
    patches in-kernel from an NHWC halo tile would remove that round trip.
    """
    B, H, W, C = x_nhwc.shape
    xp = jnp.pad(x_nhwc, ((0, 0), (pad, pad), (pad, pad), (0, 0)))
    Ho = (H + 2 * pad - kh) // stride + 1
    Wo = (W + 2 * pad - kw) // stride + 1
    views = []
    for i in range(kh):
        for j in range(kw):
            views.append(xp[:, i:i + stride * Ho:stride, j:j + stride * Wo:stride, :])
    return jnp.stack(views, axis=3), Ho, Wo


def conv_bn_stats(x_nhwc, w_hwio, gamma, beta, stride, pad):
    """Conv (no bias) + training-mode BN statistics.

    Returns (y, scale, shift) with y the raw conv output (B,Ho,Wo,Cout, f32)
    and BN+ReLU == relu(y * scale + shift), applied fused in the pool kernel.
    """
    B, H, W, Cin = x_nhwc.shape
    kh, kw, _, Cout = w_hwio.shape

    patches, Ho, Wo = _extract_patches(x_nhwc.astype(jnp.bfloat16), kh, kw, stride, pad)
    M = B * Ho * Wo
    K = kh * kw * Cin
    p_mat = patches.reshape(M, K)
    w_mat = w_hwio.reshape(K, Cout).astype(jnp.bfloat16)

    TM = _CONV_ROW_TILE if M >= _CONV_ROW_TILE else _round_up(M, 8)
    Mp = _round_up(M, TM)
    if Mp != M:
        p_mat = jnp.pad(p_mat, ((0, Mp - M), (0, 0)))   # zero rows: 0 contribution to stats
    n_tiles = Mp // TM

    y, stats = pl.pallas_call(
        _conv_stats_kernel,
        out_shape=(jax.ShapeDtypeStruct((Mp, Cout), jnp.float32),
                   jax.ShapeDtypeStruct((n_tiles, 8, 128), jnp.float32)),
        grid=(n_tiles,),
        in_specs=[pl.BlockSpec((TM, K), lambda i: (i, 0)),
                  pl.BlockSpec((K, Cout), lambda i: (0, 0))],
        out_specs=(pl.BlockSpec((TM, Cout), lambda i: (i, 0)),
                   pl.BlockSpec((1, 8, 128), lambda i: (i, 0, 0))),
        compiler_params=pltpu.CompilerParams(
            dimension_semantics=("parallel",),
            vmem_limit_bytes=_VMEM_LIMIT),
        cost_estimate=pl.CostEstimate(
            flops=2 * Mp * K * Cout,
            transcendentals=0,
            bytes_accessed=Mp * K * 2 + K * Cout * 2 + Mp * Cout * 4),
    )(p_mat, w_mat)

    # Finalize BN batch statistics (tiny: n_tiles x Cout reduction in XLA).
    ssum = jnp.sum(stats[:, 0, :Cout], axis=0)
    ssq = jnp.sum(stats[:, 1, :Cout], axis=0)
    mean = ssum / M
    var = jnp.maximum(ssq / M - mean * mean, 0.0)   # biased var (PyTorch training BN)
    inv_std = jax.lax.rsqrt(var + _BN_EPS)
    scale = gamma * inv_std
    shift = beta - mean * scale

    return y[:M].reshape(B, Ho, Wo, Cout), scale, shift


def bn_relu_maxpool(y, scale, shift, pool_pad):
    """Fused BN-affine + ReLU + MaxPool2d(kernel=3, stride=2, padding=pool_pad)."""
    B, H, W, C = y.shape
    Hout = (H + 2 * pool_pad - 3) // 2 + 1
    Wout = (W + 2 * pool_pad - 3) // 2 + 1

    if pool_pad > 0:
        # Per-channel "neutral" pad value: maps to 0 after the BN affine + ReLU,
        # equivalent to PyTorch's -inf pad because every pooling window contains
        # at least one real (>= 0 after ReLU) element.
        safe = jnp.where(jnp.abs(scale) > 1e-12, scale, 1.0)
        pad_val = jnp.where(jnp.abs(scale) > 1e-12, -shift / safe, 0.0)
        base = jnp.broadcast_to(pad_val.astype(y.dtype),
                                (B, H + 2 * pool_pad, W + 2 * pool_pad, C))
        yp = jax.lax.dynamic_update_slice(base, y, (0, pool_pad, pool_pad, 0))
    else:
        yp = y

    # Even/odd parity split: total bytes == input bytes (no 9x window tensor).
    ee = yp[:, 0::2, 0::2, :][:, :Hout + 1, :Wout + 1, :]
    eo = yp[:, 0::2, 1::2, :][:, :Hout + 1, :Wout, :]
    oe = yp[:, 1::2, 0::2, :][:, :Hout, :Wout + 1, :]
    oo = yp[:, 1::2, 1::2, :][:, :Hout, :Wout, :]

    sc2 = scale.reshape(1, C).astype(jnp.float32)
    sh2 = shift.reshape(1, C).astype(jnp.float32)

    return pl.pallas_call(
        _bn_relu_pool_kernel,
        out_shape=jax.ShapeDtypeStruct((B, Hout, Wout, C), jnp.float32),
        grid=(B,),
        in_specs=[
            pl.BlockSpec((1, Hout + 1, Wout + 1, C), lambda b: (b, 0, 0, 0)),
            pl.BlockSpec((1, Hout + 1, Wout, C), lambda b: (b, 0, 0, 0)),
            pl.BlockSpec((1, Hout, Wout + 1, C), lambda b: (b, 0, 0, 0)),
            pl.BlockSpec((1, Hout, Wout, C), lambda b: (b, 0, 0, 0)),
            pl.BlockSpec((1, C), lambda b: (0, 0)),
            pl.BlockSpec((1, C), lambda b: (0, 0)),
        ],
        out_specs=pl.BlockSpec((1, Hout, Wout, C), lambda b: (b, 0, 0, 0)),
        compiler_params=pltpu.CompilerParams(
            dimension_semantics=("parallel",),
            vmem_limit_bytes=_VMEM_LIMIT),
    )(ee, eo, oe, oo, sc2, sh2)


# ----------------------------------------------------------------------------
# Full encoder forward (== BaseModelAutoEncoder.forward / getStates)
# ----------------------------------------------------------------------------
@jax.jit
def base_model_autoencoder_forward(x_nchw, params):
    x = jnp.transpose(x_nchw, (0, 2, 3, 1)).astype(jnp.float32)   # NCHW -> NHWC

    # Block 1: Conv(k7,s2,p3) + BN + ReLU + MaxPool(k3,s2,p1)
    y, sc, sh = conv_bn_stats(x, params["w1"], params["g1"], params["b1"], stride=2, pad=3)
    x = bn_relu_maxpool(y, sc, sh, pool_pad=1)

    # Block 2: conv3x3(s1) + BN + ReLU + MaxPool(k3,s2)
    y, sc, sh = conv_bn_stats(x, params["w2"], params["g2"], params["b2"], stride=1, pad=1)
    x = bn_relu_maxpool(y, sc, sh, pool_pad=0)

    # Block 3: conv3x3(s2) + BN + ReLU + MaxPool(k3,s2)
    y, sc, sh = conv_bn_stats(x, params["w3"], params["g3"], params["b3"], stride=2, pad=1)
    x = bn_relu_maxpool(y, sc, sh, pool_pad=0)

    return jnp.transpose(x, (0, 3, 1, 2))                          # NHWC -> NCHW


def init_params(key, in_channels):
    """Deterministic synthetic parameters (conv weights in HWIO layout)."""
    ks = jax.random.split(key, 9)

    def he(k, shape):
        fan_in = shape[0] * shape[1] * shape[2]
        return (jax.random.normal(k, shape, jnp.float32) *
                jnp.sqrt(2.0 / fan_in)).astype(jnp.float32)

    return {
        "w1": he(ks[0], (7, 7, in_channels, 64)),
        "g1": 1.0 + 0.1 * jax.random.normal(ks[1], (64,), jnp.float32),
        "b1": 0.1 * jax.random.normal(ks[2], (64,), jnp.float32),
        "w2": he(ks[3], (3, 3, 64, 64)),
        "g2": 1.0 + 0.1 * jax.random.normal(ks[4], (64,), jnp.float32),
        "b2": 0.1 * jax.random.normal(ks[5], (64,), jnp.float32),
        "w3": he(ks[6], (3, 3, 64, 64)),
        "g3": 1.0 + 0.1 * jax.random.normal(ks[7], (64,), jnp.float32),
        "b3": 0.1 * jax.random.normal(ks[8], (64,), jnp.float32),
    }


if __name__ == "__main__":
    key = jax.random.PRNGKey(0)
    k_x, k_p = jax.random.split(key)

    # Small, shape-consistent input (PyTorch default img_shape is (3,224,224);
    # 64x64 keeps every stage valid: 64->32->16->16->7->4->1).
    B, C, H, W = 2, 3, 64, 64
    x = jax.random.normal(k_x, (B, C, H, W), jnp.float32)
    params = init_params(k_p, C)

    out = base_model_autoencoder_forward(x, params)
    out = jax.block_until_ready(out)

    assert out.shape == (B, 64, 1, 1), out.shape
    assert bool(jnp.all(jnp.isfinite(out)))
    assert bool(jnp.all(out >= 0.0))   # post-ReLU max-pool output must be >= 0
    print("KERNEL_OK")
</pallas_src>

<mosaic_0001>
module attributes {stable_mosaic.version = 11 : i64} {
  func.func @_conv_stats_kernel(%arg0: i32, %arg1: memref<512x147xbf16, #tpu.memory_space<vmem>>, %arg2: memref<147x64xbf16, #tpu.memory_space<vmem>>, %arg3: memref<512x64xf32, #tpu.memory_space<vmem>>, %arg4: memref<1x8x128xf32, #tpu.memory_space<vmem>>) attributes {dimension_semantics = [#tpu.dimension_semantics<parallel>], iteration_bounds = array<i64: 4>, scalar_prefetch = 0 : i64, scratch_operands = 0 : i64, tpu.core_type = #tpu.core_type<tc>, window_params = [{transform_indices = @transform_0, window_bounds = array<i64: 512, 147>}, {pipeline_mode = #tpu.pipeline_mode<synchronous>, transform_indices = @transform_1, window_bounds = array<i64: 147, 64>}, {transform_indices = @transform_2, window_bounds = array<i64: 512, 64>}, {transform_indices = @transform_3, window_bounds = array<i64: 1, 8, 128>}]} {
    %c0 = arith.constant 0 : index
    %c0_0 = arith.constant 0 : index
    %0 = vector.load %arg1[%c0, %c0_0] : memref<512x147xbf16, #tpu.memory_space<vmem>>, vector<512x147xbf16>
    %c0_1 = arith.constant 0 : index
    %c0_2 = arith.constant 0 : index
    %1 = vector.load %arg2[%c0_1, %c0_2] : memref<147x64xbf16, #tpu.memory_space<vmem>>, vector<147x64xbf16>
    %cst = arith.constant dense<0.000000e+00> : vector<512x64xf32>
    %2 = tpu.matmul %0, %1, %cst {dimension_numbers = #tpu.dot_dimension_numbers<[1], [0], [0], [1], [0, 0, 1, 1], [], []>} : vector<512x147xbf16>, vector<147x64xbf16>, vector<512x64xf32> -> vector<512x64xf32>
    %c0_3 = arith.constant 0 : index
    %c0_4 = arith.constant 0 : index
    %3 = vector.load %arg3[%c0_3, %c0_4] : memref<512x64xf32, #tpu.memory_space<vmem>>, vector<512x64xf32>
    tpu.vector_store %arg3[%c0_3, %c0_4], %2 {strides = array<i32>} : memref<512x64xf32, #tpu.memory_space<vmem>>, vector<512x64xf32>,
    %cst_5 = arith.constant dense<0.000000e+00> : vector<64xf32>
    %4 = vector.multi_reduction <add>, %2, %cst_5 [0] : vector<512x64xf32> to vector<64xf32>
    %5 = vector.shape_cast %4 : vector<64xf32> to vector<1x64xf32>
    %6 = arith.mulf %2, %2 : vector<512x64xf32>
    %cst_6 = arith.constant dense<0.000000e+00> : vector<64xf32>
    %7 = vector.multi_reduction <add>, %6, %cst_6 [0] : vector<512x64xf32> to vector<64xf32>
    %8 = vector.shape_cast %7 : vector<64xf32> to vector<1x64xf32>
    %cst_7 = arith.constant 0.000000e+00 : f32
    %9 = vector.broadcast %cst_7 : f32 to vector<1x64xf32>
    %10 = tpu.concatenate %5, %9 in 1 : vector<1x64xf32>, vector<1x64xf32> -> vector<1x128xf32>
    %11 = tpu.concatenate %8, %9 in 1 : vector<1x64xf32>, vector<1x64xf32> -> vector<1x128xf32>
    %cst_8 = arith.constant 0.000000e+00 : f32
    %12 = vector.broadcast %cst_8 : f32 to vector<6x128xf32>
    %13 = tpu.concatenate %10, %11, %12 in 0 : vector<1x128xf32>, vector<1x128xf32>, vector<6x128xf32> -> vector<8x128xf32>
    %14 = vector.shape_cast %13 : vector<8x128xf32> to vector<1x8x128xf32>
    %c0_9 = arith.constant 0 : index
    %c0_10 = arith.constant 0 : index
    %c0_11 = arith.constant 0 : index
    %15 = vector.load %arg4[%c0_9, %c0_10, %c0_11] : memref<1x8x128xf32, #tpu.memory_space<vmem>>, vector<1x8x128xf32>
    tpu.vector_store %arg4[%c0_9, %c0_10, %c0_11], %14 {strides = array<i32>} : memref<1x8x128xf32, #tpu.memory_space<vmem>>, vector<1x8x128xf32>,
    return
  }
  func.func @transform_0(%arg0: i32) -> (i32, i32) {
    %c0_i32 = arith.constant 0 : i32
    %c0_i32_0 = arith.constant 0 : i32
    return %arg0, %c0_i32 : i32, i32
  }
  func.func @transform_1(%arg0: i32) -> (i32, i32) {
    %c0_i32 = arith.constant 0 : i32
    %c0_i32_0 = arith.constant 0 : i32
    %c0_i32_1 = arith.constant 0 : i32
    return %c0_i32, %c0_i32_0 : i32, i32
  }
  func.func @transform_2(%arg0: i32) -> (i32, i32) {
    %c0_i32 = arith.constant 0 : i32
    %c0_i32_0 = arith.constant 0 : i32
    return %arg0, %c0_i32 : i32, i32
  }
  func.func @transform_3(%arg0: i32) -> (i32, i32, i32) {
    %c0_i32 = arith.constant 0 : i32
    %c0_i32_0 = arith.constant 0 : i32
    %c0_i32_1 = arith.constant 0 : i32
    return %arg0, %c0_i32, %c0_i32_0 : i32, i32, i32
  }
}

module attributes {stable_mosaic.version = 11 : i64} {
  func.func @_bn_relu_pool_kernel(%arg0: i32, %arg1: memref<1x17x17x64xf32, #tpu.memory_space<vmem>>, %arg2: memref<1x17x16x64xf32, #tpu.memory_space<vmem>>, %arg3: memref<1x16x17x64xf32, #tpu.memory_space<vmem>>, %arg4: memref<1x16x16x64xf32, #tpu.memory_space<vmem>>, %arg5: memref<1x64xf32, #tpu.memory_space<vmem>>, %arg6: memref<1x64xf32, #tpu.memory_space<vmem>>, %arg7: memref<1x16x16x64xf32, #tpu.memory_space<vmem>>) attributes {dimension_semantics = [#tpu.dimension_semantics<parallel>], iteration_bounds = array<i64: 2>, scalar_prefetch = 0 : i64, scratch_operands = 0 : i64, tpu.core_type = #tpu.core_type<tc>, window_params = [{transform_indices = @transform_0, window_bounds = array<i64: 1, 17, 17, 64>}, {transform_indices = @transform_1, window_bounds = array<i64: 1, 17, 16, 64>}, {transform_indices = @transform_2, window_bounds = array<i64: 1, 16, 17, 64>}, {transform_indices = @transform_3, window_bounds = array<i64: 1, 16, 16, 64>}, {pipeline_mode = #tpu.pipeline_mode<synchronous>, transform_indices = @transform_4, window_bounds = array<i64: 1, 64>}, {pipeline_mode = #tpu.pipeline_mode<synchronous>, transform_indices = @transform_5, window_bounds = array<i64: 1, 64>}, {transform_indices = @transform_6, window_bounds = array<i64: 1, 16, 16, 64>}]} {
    %c0 = arith.constant 0 : index
    %c0_0 = arith.constant 0 : index
    %0 = vector.load %arg5[%c0, %c0_0] : memref<1x64xf32, #tpu.memory_space<vmem>>, vector<1x64xf32>
    %1 = vector.shape_cast %0 : vector<1x64xf32> to vector<1x1x1x64xf32>
    %c0_1 = arith.constant 0 : index
    %c0_2 = arith.constant 0 : index
    %2 = vector.load %arg6[%c0_1, %c0_2] : memref<1x64xf32, #tpu.memory_space<vmem>>, vector<1x64xf32>
    %3 = vector.shape_cast %2 : vector<1x64xf32> to vector<1x1x1x64xf32>
    %c0_3 = arith.constant 0 : index
    %c0_4 = arith.constant 0 : index
    %c0_5 = arith.constant 0 : index
    %c0_6 = arith.constant 0 : index
    %4 = vector.load %arg1[%c0_3, %c0_4, %c0_5, %c0_6] : memref<1x17x17x64xf32, #tpu.memory_space<vmem>>, vector<1x17x17x64xf32>
    %5 = vector.broadcast %1 : vector<1x1x1x64xf32> to vector<1x17x17x64xf32>
    %6 = arith.mulf %4, %5 : vector<1x17x17x64xf32>
    %7 = vector.broadcast %3 : vector<1x1x1x64xf32> to vector<1x17x17x64xf32>
    %8 = arith.addf %6, %7 : vector<1x17x17x64xf32>
    %cst = arith.constant 0.000000e+00 : f32
    %9 = vector.broadcast %cst : f32 to vector<1x17x17x64xf32>
    %10 = arith.maximumf %8, %9 : vector<1x17x17x64xf32>
    %c0_7 = arith.constant 0 : index
    %c0_8 = arith.constant 0 : index
    %c0_9 = arith.constant 0 : index
    %c0_10 = arith.constant 0 : index
    %11 = vector.load %arg2[%c0_7, %c0_8, %c0_9, %c0_10] : memref<1x17x16x64xf32, #tpu.memory_space<vmem>>, vector<1x17x16x64xf32>
    %12 = vector.broadcast %1 : vector<1x1x1x64xf32> to vector<1x17x16x64xf32>
    %13 = arith.mulf %11, %12 : vector<1x17x16x64xf32>
    %14 = vector.broadcast %3 : vector<1x1x1x64xf32> to vector<1x17x16x64xf32>
    %15 = arith.addf %13, %14 : vector<1x17x16x64xf32>
    %cst_11 = arith.constant 0.000000e+00 : f32
    %16 = vector.broadcast %cst_11 : f32 to vector<1x17x16x64xf32>
    %17 = arith.maximumf %15, %16 : vector<1x17x16x64xf32>
    %c0_12 = arith.constant 0 : index
    %c0_13 = arith.constant 0 : index
    %c0_14 = arith.constant 0 : index
    %c0_15 = arith.constant 0 : index
    %18 = vector.load %arg3[%c0_12, %c0_13, %c0_14, %c0_15] : memref<1x16x17x64xf32, #tpu.memory_space<vmem>>, vector<1x16x17x64xf32>
    %19 = vector.broadcast %1 : vector<1x1x1x64xf32> to vector<1x16x17x64xf32>
    %20 = arith.mulf %18, %19 : vector<1x16x17x64xf32>
    %21 = vector.broadcast %3 : vector<1x1x1x64xf32> to vector<1x16x17x64xf32>
    %22 = arith.addf %20, %21 : vector<1x16x17x64xf32>
    %cst_16 = arith.constant 0.000000e+00 : f32
    %23 = vector.broadcast %cst_16 : f32 to vector<1x16x17x64xf32>
    %24 = arith.maximumf %22, %23 : vector<1x16x17x64xf32>
    %c0_17 = arith.constant 0 : index
    %c0_18 = arith.constant 0 : index
    %c0_19 = arith.constant 0 : index
    %c0_20 = arith.constant 0 : index
    %25 = vector.load %arg4[%c0_17, %c0_18, %c0_19, %c0_20] : memref<1x16x16x64xf32, #tpu.memory_space<vmem>>, vector<1x16x16x64xf32>
    %26 = vector.broadcast %1 : vector<1x1x1x64xf32> to vector<1x16x16x64xf32>
    %27 = arith.mulf %25, %26 : vector<1x16x16x64xf32>
    %28 = vector.broadcast %3 : vector<1x1x1x64xf32> to vector<1x16x16x64xf32>
    %29 = arith.addf %27, %28 : vector<1x16x16x64xf32>
    %cst_21 = arith.constant 0.000000e+00 : f32
    %30 = vector.broadcast %cst_21 : f32 to vector<1x16x16x64xf32>
    %31 = arith.maximumf %29, %30 : vector<1x16x16x64xf32>
    %32 = vector.extract_strided_slice %10 {offsets = [0, 0, 0, 0], sizes = [1, 16, 16, 64], strides = [1, 1, 1, 1]} : vector<1x17x17x64xf32> to vector<1x16x16x64xf32>
    %33 = arith.maximumf %31, %32 : vector<1x16x16x64xf32>
    %34 = vector.extract_strided_slice %10 {offsets = [0, 0, 1, 0], sizes = [1, 16, 16, 64], strides = [1, 1, 1, 1]} : vector<1x17x17x64xf32> to vector<1x16x16x64xf32>
    %35 = arith.maximumf %33, %34 : vector<1x16x16x64xf32>
    %36 = vector.extract_strided_slice %10 {offsets = [0, 1, 0, 0], sizes = [1, 16, 16, 64], strides = [1, 1, 1, 1]} : vector<1x17x17x64xf32> to vector<1x16x16x64xf32>
    %37 = arith.maximumf %35, %36 : vector<1x16x16x64xf32>
    %38 = vector.extract_strided_slice %10 {offsets = [0, 1, 1, 0], sizes = [1, 16, 16, 64], strides = [1, 1, 1, 1]} : vector<1x17x17x64xf32> to vector<1x16x16x64xf32>
    %39 = arith.maximumf %37, %38 : vector<1x16x16x64xf32>
    %40 = vector.extract_strided_slice %17 {offsets = [0, 0, 0, 0], sizes = [1, 16, 16, 64], strides = [1, 1, 1, 1]} : vector<1x17x16x64xf32> to vector<1x16x16x64xf32>
    %41 = arith.maximumf %39, %40 : vector<1x16x16x64xf32>
    %42 = vector.extract_strided_slice %17 {offsets = [0, 1, 0, 0], sizes = [1, 16, 16, 64], strides = [1, 1, 1, 1]} : vector<1x17x16x64xf32> to vector<1x16x16x64xf32>
    %43 = arith.maximumf %41, %42 : vector<1x16x16x64xf32>
    %44 = vector.extract_strided_slice %24 {offsets = [0, 0, 0, 0], sizes = [1, 16, 16, 64], strides = [1, 1, 1, 1]} : vector<1x16x17x64xf32> to vector<1x16x16x64xf32>
    %45 = arith.maximumf %43, %44 : vector<1x16x16x64xf32>
    %46 = vector.extract_strided_slice %24 {offsets = [0, 0, 1, 0], sizes = [1, 16, 16, 64], strides = [1, 1, 1, 1]} : vector<1x16x17x64xf32> to vector<1x16x16x64xf32>
    %47 = arith.maximumf %45, %46 : vector<1x16x16x64xf32>
    %c0_22 = arith.constant 0 : index
    %c0_23 = arith.constant 0 : index
    %c0_24 = arith.constant 0 : index
    %c0_25 = arith.constant 0 : index
    %48 = vector.load %arg7[%c0_22, %c0_23, %c0_24, %c0_25] : memref<1x16x16x64xf32, #tpu.memory_space<vmem>>, vector<1x16x16x64xf32>
    tpu.vector_store %arg7[%c0_22, %c0_23, %c0_24, %c0_25], %47 {strides = array<i32>} : memref<1x16x16x64xf32, #tpu.memory_space<vmem>>, vector<1x16x16x64xf32>,
    return
  }
  func.func @transform_0(%arg0: i32) -> (i32, i32, i32, i32) {
    %c0_i32 = arith.constant 0 : i32
    %c0_i32_0 = arith.constant 0 : i32
    %c0_i32_1 = arith.constant 0 : i32
    %c0_i32_2 = arith.constant 0 : i32
    return %arg0, %c0_i32, %c0_i32_0, %c0_i32_1 : i32, i32, i32, i32
  }
  func.func @transform_1(%arg0: i32) -> (i32, i32, i32, i32) {
    %c0_i32 = arith.constant 0 : i32
    %c0_i32_0 = arith.constant 0 : i32
    %c0_i32_1 = arith.constant 0 : i32
    %c0_i32_2 = arith.constant 0 : i32
    return %arg0, %c0_i32, %c0_i32_0, %c0_i32_1 : i32, i32, i32, i32
  }
  func.func @transform_2(%arg0: i32) -> (i32, i32, i32, i32) {
    %c0_i32 = arith.constant 0 : i32
    %c0_i32_0 = arith.constant 0 : i32
    %c0_i32_1 = arith.constant 0 : i32
    %c0_i32_2 = arith.constant 0 : i32
    return %arg0, %c0_i32, %c0_i32_0, %c0_i32_1 : i32, i32, i32, i32
  }
  func.func @transform_3(%arg0: i32) -> (i32, i32, i32, i32) {
    %c0_i32 = arith.constant 0 : i32
    %c0_i32_0 = arith.constant 0 : i32
    %c0_i32_1 = arith.constant 0 : i32
    %c0_i32_2 = arith.constant 0 : i32
    return %arg0, %c0_i32, %c0_i32_0, %c0_i32_1 : i32, i32, i32, i32
  }
  func.func @transform_4(%arg0: i32) -> (i32, i32) {
    %c0_i32 = arith.constant 0 : i32
    %c0_i32_0 = arith.constant 0 : i32
    %c0_i32_1 = arith.constant 0 : i32
    return %c0_i32, %c0_i32_0 : i32, i32
  }
  func.func @transform_5(%arg0: i32) -> (i32, i32) {
    %c0_i32 = arith.constant 0 : i32
    %c0_i32_0 = arith.constant 0 : i32
    %c0_i32_1 = arith.constant 0 : i32
    return %c0_i32, %c0_i32_0 : i32, i32
  }
  func.func @transform_6(%arg0: i32) -> (i32, i32, i32, i32) {
    %c0_i32 = arith.constant 0 : i32
    %c0_i32_0 = arith.constant 0 : i32
    %c0_i32_1 = arith.constant 0 : i32
    %c0_i32_2 = arith.constant 0 : i32
    return %arg0, %c0_i32, %c0_i32_0, %c0_i32_1 : i32, i32, i32, i32
  }
}

module attributes {stable_mosaic.version = 11 : i64} {
  func.func @_conv_stats_kernel(%arg0: i32, %arg1: memref<512x576xbf16, #tpu.memory_space<vmem>>, %arg2: memref<576x64xbf16, #tpu.memory_space<vmem>>, %arg3: memref<512x64xf32, #tpu.memory_space<vmem>>, %arg4: memref<1x8x128xf32, #tpu.memory_space<vmem>>) attributes {dimension_semantics = [#tpu.dimension_semantics<parallel>], iteration_bounds = array<i64: 1>, scalar_prefetch = 0 : i64, scratch_operands = 0 : i64, tpu.core_type = #tpu.core_type<tc>, window_params = [{transform_indices = @transform_0, window_bounds = array<i64: 512, 576>}, {pipeline_mode = #tpu.pipeline_mode<synchronous>, transform_indices = @transform_1, window_bounds = array<i64: 576, 64>}, {transform_indices = @transform_2, window_bounds = array<i64: 512, 64>}, {transform_indices = @transform_3, window_bounds = array<i64: 1, 8, 128>}]} {
    %c0 = arith.constant 0 : index
    %c0_0 = arith.constant 0 : index
    %0 = vector.load %arg1[%c0, %c0_0] : memref<512x576xbf16, #tpu.memory_space<vmem>>, vector<512x576xbf16>
    %c0_1 = arith.constant 0 : index
    %c0_2 = arith.constant 0 : index
    %1 = vector.load %arg2[%c0_1, %c0_2] : memref<576x64xbf16, #tpu.memory_space<vmem>>, vector<576x64xbf16>
    %cst = arith.constant dense<0.000000e+00> : vector<512x64xf32>
    %2 = tpu.matmul %0, %1, %cst {dimension_numbers = #tpu.dot_dimension_numbers<[1], [0], [0], [1], [0, 0, 1, 1], [], []>} : vector<512x576xbf16>, vector<576x64xbf16>, vector<512x64xf32> -> vector<512x64xf32>
    %c0_3 = arith.constant 0 : index
    %c0_4 = arith.constant 0 : index
    %3 = vector.load %arg3[%c0_3, %c0_4] : memref<512x64xf32, #tpu.memory_space<vmem>>, vector<512x64xf32>
    tpu.vector_store %arg3[%c0_3, %c0_4], %2 {strides = array<i32>} : memref<512x64xf32, #tpu.memory_space<vmem>>, vector<512x64xf32>,
    %cst_5 = arith.constant dense<0.000000e+00> : vector<64xf32>
    %4 = vector.multi_reduction <add>, %2, %cst_5 [0] : vector<512x64xf32> to vector<64xf32>
    %5 = vector.shape_cast %4 : vector<64xf32> to vector<1x64xf32>
    %6 = arith.mulf %2, %2 : vector<512x64xf32>
    %cst_6 = arith.constant dense<0.000000e+00> : vector<64xf32>
    %7 = vector.multi_reduction <add>, %6, %cst_6 [0] : vector<512x64xf32> to vector<64xf32>
    %8 = vector.shape_cast %7 : vector<64xf32> to vector<1x64xf32>
    %cst_7 = arith.constant 0.000000e+00 : f32
    %9 = vector.broadcast %cst_7 : f32 to vector<1x64xf32>
    %10 = tpu.concatenate %5, %9 in 1 : vector<1x64xf32>, vector<1x64xf32> -> vector<1x128xf32>
    %11 = tpu.concatenate %8, %9 in 1 : vector<1x64xf32>, vector<1x64xf32> -> vector<1x128xf32>
    %cst_8 = arith.constant 0.000000e+00 : f32
    %12 = vector.broadcast %cst_8 : f32 to vector<6x128xf32>
    %13 = tpu.concatenate %10, %11, %12 in 0 : vector<1x128xf32>, vector<1x128xf32>, vector<6x128xf32> -> vector<8x128xf32>
    %14 = vector.shape_cast %13 : vector<8x128xf32> to vector<1x8x128xf32>
    %c0_9 = arith.constant 0 : index
    %c0_10 = arith.constant 0 : index
    %c0_11 = arith.constant 0 : index
    %15 = vector.load %arg4[%c0_9, %c0_10, %c0_11] : memref<1x8x128xf32, #tpu.memory_space<vmem>>, vector<1x8x128xf32>
    tpu.vector_store %arg4[%c0_9, %c0_10, %c0_11], %14 {strides = array<i32>} : memref<1x8x128xf32, #tpu.memory_space<vmem>>, vector<1x8x128xf32>,
    return
  }
  func.func @transform_0(%arg0: i32) -> (i32, i32) {
    %c0_i32 = arith.constant 0 : i32
    %c0_i32_0 = arith.constant 0 : i32
    return %arg0, %c0_i32 : i32, i32
  }
  func.func @transform_1(%arg0: i32) -> (i32, i32) {
    %c0_i32 = arith.constant 0 : i32
    %c0_i32_0 = arith.constant 0 : i32
    %c0_i32_1 = arith.constant 0 : i32
    return %c0_i32, %c0_i32_0 : i32, i32
  }
  func.func @transform_2(%arg0: i32) -> (i32, i32) {
    %c0_i32 = arith.constant 0 : i32
    %c0_i32_0 = arith.constant 0 : i32
    return %arg0, %c0_i32 : i32, i32
  }
  func.func @transform_3(%arg0: i32) -> (i32, i32, i32) {
    %c0_i32 = arith.constant 0 : i32
    %c0_i32_0 = arith.constant 0 : i32
    %c0_i32_1 = arith.constant 0 : i32
    return %arg0, %c0_i32, %c0_i32_0 : i32, i32, i32
  }
}

module attributes {stable_mosaic.version = 11 : i64} {
  func.func @_bn_relu_pool_kernel(%arg0: i32, %arg1: memref<1x8x8x64xf32, #tpu.memory_space<vmem>>, %arg2: memref<1x8x7x64xf32, #tpu.memory_space<vmem>>, %arg3: memref<1x7x8x64xf32, #tpu.memory_space<vmem>>, %arg4: memref<1x7x7x64xf32, #tpu.memory_space<vmem>>, %arg5: memref<1x64xf32, #tpu.memory_space<vmem>>, %arg6: memref<1x64xf32, #tpu.memory_space<vmem>>, %arg7: memref<1x7x7x64xf32, #tpu.memory_space<vmem>>) attributes {dimension_semantics = [#tpu.dimension_semantics<parallel>], iteration_bounds = array<i64: 2>, scalar_prefetch = 0 : i64, scratch_operands = 0 : i64, tpu.core_type = #tpu.core_type<tc>, window_params = [{transform_indices = @transform_0, window_bounds = array<i64: 1, 8, 8, 64>}, {transform_indices = @transform_1, window_bounds = array<i64: 1, 8, 7, 64>}, {transform_indices = @transform_2, window_bounds = array<i64: 1, 7, 8, 64>}, {transform_indices = @transform_3, window_bounds = array<i64: 1, 7, 7, 64>}, {pipeline_mode = #tpu.pipeline_mode<synchronous>, transform_indices = @transform_4, window_bounds = array<i64: 1, 64>}, {pipeline_mode = #tpu.pipeline_mode<synchronous>, transform_indices = @transform_5, window_bounds = array<i64: 1, 64>}, {transform_indices = @transform_6, window_bounds = array<i64: 1, 7, 7, 64>}]} {
    %c0 = arith.constant 0 : index
    %c0_0 = arith.constant 0 : index
    %0 = vector.load %arg5[%c0, %c0_0] : memref<1x64xf32, #tpu.memory_space<vmem>>, vector<1x64xf32>
    %1 = vector.shape_cast %0 : vector<1x64xf32> to vector<1x1x1x64xf32>
    %c0_1 = arith.constant 0 : index
    %c0_2 = arith.constant 0 : index
    %2 = vector.load %arg6[%c0_1, %c0_2] : memref<1x64xf32, #tpu.memory_space<vmem>>, vector<1x64xf32>
    %3 = vector.shape_cast %2 : vector<1x64xf32> to vector<1x1x1x64xf32>
    %c0_3 = arith.constant 0 : index
    %c0_4 = arith.constant 0 : index
    %c0_5 = arith.constant 0 : index
    %c0_6 = arith.constant 0 : index
    %4 = vector.load %arg1[%c0_3, %c0_4, %c0_5, %c0_6] : memref<1x8x8x64xf32, #tpu.memory_space<vmem>>, vector<1x8x8x64xf32>
    %5 = vector.broadcast %1 : vector<1x1x1x64xf32> to vector<1x8x8x64xf32>
    %6 = arith.mulf %4, %5 : vector<1x8x8x64xf32>
    %7 = vector.broadcast %3 : vector<1x1x1x64xf32> to vector<1x8x8x64xf32>
    %8 = arith.addf %6, %7 : vector<1x8x8x64xf32>
    %cst = arith.constant 0.000000e+00 : f32
    %9 = vector.broadcast %cst : f32 to vector<1x8x8x64xf32>
    %10 = arith.maximumf %8, %9 : vector<1x8x8x64xf32>
    %c0_7 = arith.constant 0 : index
    %c0_8 = arith.constant 0 : index
    %c0_9 = arith.constant 0 : index
    %c0_10 = arith.constant 0 : index
    %11 = vector.load %arg2[%c0_7, %c0_8, %c0_9, %c0_10] : memref<1x8x7x64xf32, #tpu.memory_space<vmem>>, vector<1x8x7x64xf32>
    %12 = vector.broadcast %1 : vector<1x1x1x64xf32> to vector<1x8x7x64xf32>
    %13 = arith.mulf %11, %12 : vector<1x8x7x64xf32>
    %14 = vector.broadcast %3 : vector<1x1x1x64xf32> to vector<1x8x7x64xf32>
    %15 = arith.addf %13, %14 : vector<1x8x7x64xf32>
    %cst_11 = arith.constant 0.000000e+00 : f32
    %16 = vector.broadcast %cst_11 : f32 to vector<1x8x7x64xf32>
    %17 = arith.maximumf %15, %16 : vector<1x8x7x64xf32>
    %c0_12 = arith.constant 0 : index
    %c0_13 = arith.constant 0 : index
    %c0_14 = arith.constant 0 : index
    %c0_15 = arith.constant 0 : index
    %18 = vector.load %arg3[%c0_12, %c0_13, %c0_14, %c0_15] : memref<1x7x8x64xf32, #tpu.memory_space<vmem>>, vector<1x7x8x64xf32>
    %19 = vector.broadcast %1 : vector<1x1x1x64xf32> to vector<1x7x8x64xf32>
    %20 = arith.mulf %18, %19 : vector<1x7x8x64xf32>
    %21 = vector.broadcast %3 : vector<1x1x1x64xf32> to vector<1x7x8x64xf32>
    %22 = arith.addf %20, %21 : vector<1x7x8x64xf32>
    %cst_16 = arith.constant 0.000000e+00 : f32
    %23 = vector.broadcast %cst_16 : f32 to vector<1x7x8x64xf32>
    %24 = arith.maximumf %22, %23 : vector<1x7x8x64xf32>
    %c0_17 = arith.constant 0 : index
    %c0_18 = arith.constant 0 : index
    %c0_19 = arith.constant 0 : index
    %c0_20 = arith.constant 0 : index
    %25 = vector.load %arg4[%c0_17, %c0_18, %c0_19, %c0_20] : memref<1x7x7x64xf32, #tpu.memory_space<vmem>>, vector<1x7x7x64xf32>
    %26 = vector.broadcast %1 : vector<1x1x1x64xf32> to vector<1x7x7x64xf32>
    %27 = arith.mulf %25, %26 : vector<1x7x7x64xf32>
    %28 = vector.broadcast %3 : vector<1x1x1x64xf32> to vector<1x7x7x64xf32>
    %29 = arith.addf %27, %28 : vector<1x7x7x64xf32>
    %cst_21 = arith.constant 0.000000e+00 : f32
    %30 = vector.broadcast %cst_21 : f32 to vector<1x7x7x64xf32>
    %31 = arith.maximumf %29, %30 : vector<1x7x7x64xf32>
    %32 = vector.extract_strided_slice %10 {offsets = [0, 0, 0, 0], sizes = [1, 7, 7, 64], strides = [1, 1, 1, 1]} : vector<1x8x8x64xf32> to vector<1x7x7x64xf32>
    %33 = arith.maximumf %31, %32 : vector<1x7x7x64xf32>
    %34 = vector.extract_strided_slice %10 {offsets = [0, 0, 1, 0], sizes = [1, 7, 7, 64], strides = [1, 1, 1, 1]} : vector<1x8x8x64xf32> to vector<1x7x7x64xf32>
    %35 = arith.maximumf %33, %34 : vector<1x7x7x64xf32>
    %36 = vector.extract_strided_slice %10 {offsets = [0, 1, 0, 0], sizes = [1, 7, 7, 64], strides = [1, 1, 1, 1]} : vector<1x8x8x64xf32> to vector<1x7x7x64xf32>
    %37 = arith.maximumf %35, %36 : vector<1x7x7x64xf32>
    %38 = vector.extract_strided_slice %10 {offsets = [0, 1, 1, 0], sizes = [1, 7, 7, 64], strides = [1, 1, 1, 1]} : vector<1x8x8x64xf32> to vector<1x7x7x64xf32>
    %39 = arith.maximumf %37, %38 : vector<1x7x7x64xf32>
    %40 = vector.extract_strided_slice %17 {offsets = [0, 0, 0, 0], sizes = [1, 7, 7, 64], strides = [1, 1, 1, 1]} : vector<1x8x7x64xf32> to vector<1x7x7x64xf32>
    %41 = arith.maximumf %39, %40 : vector<1x7x7x64xf32>
    %42 = vector.extract_strided_slice %17 {offsets = [0, 1, 0, 0], sizes = [1, 7, 7, 64], strides = [1, 1, 1, 1]} : vector<1x8x7x64xf32> to vector<1x7x7x64xf32>
    %43 = arith.maximumf %41, %42 : vector<1x7x7x64xf32>
    %44 = vector.extract_strided_slice %24 {offsets = [0, 0, 0, 0], sizes = [1, 7, 7, 64], strides = [1, 1, 1, 1]} : vector<1x7x8x64xf32> to vector<1x7x7x64xf32>
    %45 = arith.maximumf %43, %44 : vector<1x7x7x64xf32>
    %46 = vector.extract_strided_slice %24 {offsets = [0, 0, 1, 0], sizes = [1, 7, 7, 64], strides = [1, 1, 1, 1]} : vector<1x7x8x64xf32> to vector<1x7x7x64xf32>
    %47 = arith.maximumf %45, %46 : vector<1x7x7x64xf32>
    %c0_22 = arith.constant 0 : index
    %c0_23 = arith.constant 0 : index
    %c0_24 = arith.constant 0 : index
    %c0_25 = arith.constant 0 : index
    %48 = vector.load %arg7[%c0_22, %c0_23, %c0_24, %c0_25] : memref<1x7x7x64xf32, #tpu.memory_space<vmem>>, vector<1x7x7x64xf32>
    tpu.vector_store %arg7[%c0_22, %c0_23, %c0_24, %c0_25], %47 {strides = array<i32>} : memref<1x7x7x64xf32, #tpu.memory_space<vmem>>, vector<1x7x7x64xf32>,
    return
  }
  func.func @transform_0(%arg0: i32) -> (i32, i32, i32, i32) {
    %c0_i32 = arith.constant 0 : i32
    %c0_i32_0 = arith.constant 0 : i32
    %c0_i32_1 = arith.constant 0 : i32
    %c0_i32_2 = arith.constant 0 : i32
    return %arg0, %c0_i32, %c0_i32_0, %c0_i32_1 : i32, i32, i32, i32
  }
  func.func @transform_1(%arg0: i32) -> (i32, i32, i32, i32) {
    %c0_i32 = arith.constant 0 : i32
    %c0_i32_0 = arith.constant 0 : i32
    %c0_i32_1 = arith.constant 0 : i32
    %c0_i32_2 = arith.constant 0 : i32
    return %arg0, %c0_i32, %c0_i32_0, %c0_i32_1 : i32, i32, i32, i32
  }
  func.func @transform_2(%arg0: i32) -> (i32, i32, i32, i32) {
    %c0_i32 = arith.constant 0 : i32
    %c0_i32_0 = arith.constant 0 : i32
    %c0_i32_1 = arith.constant 0 : i32
    %c0_i32_2 = arith.constant 0 : i32
    return %arg0, %c0_i32, %c0_i32_0, %c0_i32_1 : i32, i32, i32, i32
  }
  func.func @transform_3(%arg0: i32) -> (i32, i32, i32, i32) {
    %c0_i32 = arith.constant 0 : i32
    %c0_i32_0 = arith.constant 0 : i32
    %c0_i32_1 = arith.constant 0 : i32
    %c0_i32_2 = arith.constant 0 : i32
    return %arg0, %c0_i32, %c0_i32_0, %c0_i32_1 : i32, i32, i32, i32
  }
  func.func @transform_4(%arg0: i32) -> (i32, i32) {
    %c0_i32 = arith.constant 0 : i32
    %c0_i32_0 = arith.constant 0 : i32
    %c0_i32_1 = arith.constant 0 : i32
    return %c0_i32, %c0_i32_0 : i32, i32
  }
  func.func @transform_5(%arg0: i32) -> (i32, i32) {
    %c0_i32 = arith.constant 0 : i32
    %c0_i32_0 = arith.constant 0 : i32
    %c0_i32_1 = arith.constant 0 : i32
    return %c0_i32, %c0_i32_0 : i32, i32
  }
  func.func @transform_6(%arg0: i32) -> (i32, i32, i32, i32) {
    %c0_i32 = arith.constant 0 : i32
    %c0_i32_0 = arith.constant 0 : i32
    %c0_i32_1 = arith.constant 0 : i32
    %c0_i32_2 = arith.constant 0 : i32
    return %arg0, %c0_i32, %c0_i32_0, %c0_i32_1 : i32, i32, i32, i32
  }
}

module attributes {stable_mosaic.version = 11 : i64} {
  func.func @_conv_stats_kernel(%arg0: i32, %arg1: memref<32x576xbf16, #tpu.memory_space<vmem>>, %arg2: memref<576x64xbf16, #tpu.memory_space<vmem>>, %arg3: memref<32x64xf32, #tpu.memory_space<vmem>>, %arg4: memref<1x8x128xf32, #tpu.memory_space<vmem>>) attributes {dimension_semantics = [#tpu.dimension_semantics<parallel>], iteration_bounds = array<i64: 1>, scalar_prefetch = 0 : i64, scratch_operands = 0 : i64, tpu.core_type = #tpu.core_type<tc>, window_params = [{transform_indices = @transform_0, window_bounds = array<i64: 32, 576>}, {pipeline_mode = #tpu.pipeline_mode<synchronous>, transform_indices = @transform_1, window_bounds = array<i64: 576, 64>}, {transform_indices = @transform_2, window_bounds = array<i64: 32, 64>}, {transform_indices = @transform_3, window_bounds = array<i64: 1, 8, 128>}]} {
    %c0 = arith.constant 0 : index
    %c0_0 = arith.constant 0 : index
    %0 = vector.load %arg1[%c0, %c0_0] : memref<32x576xbf16, #tpu.memory_space<vmem>>, vector<32x576xbf16>
    %c0_1 = arith.constant 0 : index
    %c0_2 = arith.constant 0 : index
    %1 = vector.load %arg2[%c0_1, %c0_2] : memref<576x64xbf16, #tpu.memory_space<vmem>>, vector<576x64xbf16>
    %cst = arith.constant dense<0.000000e+00> : vector<32x64xf32>
    %2 = tpu.matmul %0, %1, %cst {dimension_numbers = #tpu.dot_dimension_numbers<[1], [0], [0], [1], [0, 0, 1, 1], [], []>} : vector<32x576xbf16>, vector<576x64xbf16>, vector<32x64xf32> -> vector<32x64xf32>
    %c0_3 = arith.constant 0 : index
    %c0_4 = arith.constant 0 : index
    %3 = vector.load %arg3[%c0_3, %c0_4] : memref<32x64xf32, #tpu.memory_space<vmem>>, vector<32x64xf32>
    tpu.vector_store %arg3[%c0_3, %c0_4], %2 {strides = array<i32>} : memref<32x64xf32, #tpu.memory_space<vmem>>, vector<32x64xf32>,
    %cst_5 = arith.constant dense<0.000000e+00> : vector<64xf32>
    %4 = vector.multi_reduction <add>, %2, %cst_5 [0] : vector<32x64xf32> to vector<64xf32>
    %5 = vector.shape_cast %4 : vector<64xf32> to vector<1x64xf32>
    %6 = arith.mulf %2, %2 : vector<32x64xf32>
    %cst_6 = arith.constant dense<0.000000e+00> : vector<64xf32>
    %7 = vector.multi_reduction <add>, %6, %cst_6 [0] : vector<32x64xf32> to vector<64xf32>
    %8 = vector.shape_cast %7 : vector<64xf32> to vector<1x64xf32>
    %cst_7 = arith.constant 0.000000e+00 : f32
    %9 = vector.broadcast %cst_7 : f32 to vector<1x64xf32>
    %10 = tpu.concatenate %5, %9 in 1 : vector<1x64xf32>, vector<1x64xf32> -> vector<1x128xf32>
    %11 = tpu.concatenate %8, %9 in 1 : vector<1x64xf32>, vector<1x64xf32> -> vector<1x128xf32>
    %cst_8 = arith.constant 0.000000e+00 : f32
    %12 = vector.broadcast %cst_8 : f32 to vector<6x128xf32>
    %13 = tpu.concatenate %10, %11, %12 in 0 : vector<1x128xf32>, vector<1x128xf32>, vector<6x128xf32> -> vector<8x128xf32>
    %14 = vector.shape_cast %13 : vector<8x128xf32> to vector<1x8x128xf32>
    %c0_9 = arith.constant 0 : index
    %c0_10 = arith.constant 0 : index
    %c0_11 = arith.constant 0 : index
    %15 = vector.load %arg4[%c0_9, %c0_10, %c0_11] : memref<1x8x128xf32, #tpu.memory_space<vmem>>, vector<1x8x128xf32>
    tpu.vector_store %arg4[%c0_9, %c0_10, %c0_11], %14 {strides = array<i32>} : memref<1x8x128xf32, #tpu.memory_space<vmem>>, vector<1x8x128xf32>,
    return
  }
  func.func @transform_0(%arg0: i32) -> (i32, i32) {
    %c0_i32 = arith.constant 0 : i32
    %c0_i32_0 = arith.constant 0 : i32
    return %arg0, %c0_i32 : i32, i32
  }
  func.func @transform_1(%arg0: i32) -> (i32, i32) {
    %c0_i32 = arith.constant 0 : i32
    %c0_i32_0 = arith.constant 0 : i32
    %c0_i32_1 = arith.constant 0 : i32
    return %c0_i32, %c0_i32_0 : i32, i32
  }
  func.func @transform_2(%arg0: i32) -> (i32, i32) {
    %c0_i32 = arith.constant 0 : i32
    %c0_i32_0 = arith.constant 0 : i32
    return %arg0, %c0_i32 : i32, i32
  }
  func.func @transform_3(%arg0: i32) -> (i32, i32, i32) {
    %c0_i32 = arith.constant 0 : i32
    %c0_i32_0 = arith.constant 0 : i32
    %c0_i32_1 = arith.constant 0 : i32
    return %arg0, %c0_i32, %c0_i32_0 : i32, i32, i32
  }
}

module attributes {stable_mosaic.version = 11 : i64} {
  func.func @_bn_relu_pool_kernel(%arg0: i32, %arg1: memref<1x2x2x64xf32, #tpu.memory_space<vmem>>, %arg2: memref<1x2x1x64xf32, #tpu.memory_space<vmem>>, %arg3: memref<1x1x2x64xf32, #tpu.memory_space<vmem>>, %arg4: memref<1x1x1x64xf32, #tpu.memory_space<vmem>>, %arg5: memref<1x64xf32, #tpu.memory_space<vmem>>, %arg6: memref<1x64xf32, #tpu.memory_space<vmem>>, %arg7: memref<1x1x1x64xf32, #tpu.memory_space<vmem>>) attributes {dimension_semantics = [#tpu.dimension_semantics<parallel>], iteration_bounds = array<i64: 2>, scalar_prefetch = 0 : i64, scratch_operands = 0 : i64, tpu.core_type = #tpu.core_type<tc>, window_params = [{transform_indices = @transform_0, window_bounds = array<i64: 1, 2, 2, 64>}, {transform_indices = @transform_1, window_bounds = array<i64: 1, 2, 1, 64>}, {transform_indices = @transform_2, window_bounds = array<i64: 1, 1, 2, 64>}, {transform_indices = @transform_3, window_bounds = array<i64: 1, 1, 1, 64>}, {pipeline_mode = #tpu.pipeline_mode<synchronous>, transform_indices = @transform_4, window_bounds = array<i64: 1, 64>}, {pipeline_mode = #tpu.pipeline_mode<synchronous>, transform_indices = @transform_5, window_bounds = array<i64: 1, 64>}, {transform_indices = @transform_6, window_bounds = array<i64: 1, 1, 1, 64>}]} {
    %c0 = arith.constant 0 : index
    %c0_0 = arith.constant 0 : index
    %0 = vector.load %arg5[%c0, %c0_0] : memref<1x64xf32, #tpu.memory_space<vmem>>, vector<1x64xf32>
    %1 = vector.shape_cast %0 : vector<1x64xf32> to vector<1x1x1x64xf32>
    %c0_1 = arith.constant 0 : index
    %c0_2 = arith.constant 0 : index
    %2 = vector.load %arg6[%c0_1, %c0_2] : memref<1x64xf32, #tpu.memory_space<vmem>>, vector<1x64xf32>
    %3 = vector.shape_cast %2 : vector<1x64xf32> to vector<1x1x1x64xf32>
    %c0_3 = arith.constant 0 : index
    %c0_4 = arith.constant 0 : index
    %c0_5 = arith.constant 0 : index
    %c0_6 = arith.constant 0 : index
    %4 = vector.load %arg1[%c0_3, %c0_4, %c0_5, %c0_6] : memref<1x2x2x64xf32, #tpu.memory_space<vmem>>, vector<1x2x2x64xf32>
    %5 = vector.broadcast %1 : vector<1x1x1x64xf32> to vector<1x2x2x64xf32>
    %6 = arith.mulf %4, %5 : vector<1x2x2x64xf32>
    %7 = vector.broadcast %3 : vector<1x1x1x64xf32> to vector<1x2x2x64xf32>
    %8 = arith.addf %6, %7 : vector<1x2x2x64xf32>
    %cst = arith.constant 0.000000e+00 : f32
    %9 = vector.broadcast %cst : f32 to vector<1x2x2x64xf32>
    %10 = arith.maximumf %8, %9 : vector<1x2x2x64xf32>
    %c0_7 = arith.constant 0 : index
    %c0_8 = arith.constant 0 : index
    %c0_9 = arith.constant 0 : index
    %c0_10 = arith.constant 0 : index
    %11 = vector.load %arg2[%c0_7, %c0_8, %c0_9, %c0_10] : memref<1x2x1x64xf32, #tpu.memory_space<vmem>>, vector<1x2x1x64xf32>
    %12 = vector.broadcast %1 : vector<1x1x1x64xf32> to vector<1x2x1x64xf32>
    %13 = arith.mulf %11, %12 : vector<1x2x1x64xf32>
    %14 = vector.broadcast %3 : vector<1x1x1x64xf32> to vector<1x2x1x64xf32>
    %15 = arith.addf %13, %14 : vector<1x2x1x64xf32>
    %cst_11 = arith.constant 0.000000e+00 : f32
    %16 = vector.broadcast %cst_11 : f32 to vector<1x2x1x64xf32>
    %17 = arith.maximumf %15, %16 : vector<1x2x1x64xf32>
    %c0_12 = arith.constant 0 : index
    %c0_13 = arith.constant 0 : index
    %c0_14 = arith.constant 0 : index
    %c0_15 = arith.constant 0 : index
    %18 = vector.load %arg3[%c0_12, %c0_13, %c0_14, %c0_15] : memref<1x1x2x64xf32, #tpu.memory_space<vmem>>, vector<1x1x2x64xf32>
    %19 = vector.broadcast %1 : vector<1x1x1x64xf32> to vector<1x1x2x64xf32>
    %20 = arith.mulf %18, %19 : vector<1x1x2x64xf32>
    %21 = vector.broadcast %3 : vector<1x1x1x64xf32> to vector<1x1x2x64xf32>
    %22 = arith.addf %20, %21 : vector<1x1x2x64xf32>
    %cst_16 = arith.constant 0.000000e+00 : f32
    %23 = vector.broadcast %cst_16 : f32 to vector<1x1x2x64xf32>
    %24 = arith.maximumf %22, %23 : vector<1x1x2x64xf32>
    %c0_17 = arith.constant 0 : index
    %c0_18 = arith.constant 0 : index
    %c0_19 = arith.constant 0 : index
    %c0_20 = arith.constant 0 : index
    %25 = vector.load %arg4[%c0_17, %c0_18, %c0_19, %c0_20] : memref<1x1x1x64xf32, #tpu.memory_space<vmem>>, vector<1x1x1x64xf32>
    %26 = arith.mulf %25, %1 : vector<1x1x1x64xf32>
    %27 = arith.addf %26, %3 : vector<1x1x1x64xf32>
    %cst_21 = arith.constant 0.000000e+00 : f32
    %28 = vector.broadcast %cst_21 : f32 to vector<1x1x1x64xf32>
    %29 = arith.maximumf %27, %28 : vector<1x1x1x64xf32>
    %30 = vector.extract_strided_slice %10 {offsets = [0, 0, 0, 0], sizes = [1, 1, 1, 64], strides = [1, 1, 1, 1]} : vector<1x2x2x64xf32> to vector<1x1x1x64xf32>
    %31 = arith.maximumf %29, %30 : vector<1x1x1x64xf32>
    %32 = vector.extract_strided_slice %10 {offsets = [0, 0, 1, 0], sizes = [1, 1, 1, 64], strides = [1, 1, 1, 1]} : vector<1x2x2x64xf32> to vector<1x1x1x64xf32>
    %33 = arith.maximumf %31, %32 : vector<1x1x1x64xf32>
    %34 = vector.extract_strided_slice %10 {offsets = [0, 1, 0, 0], sizes = [1, 1, 1, 64], strides = [1, 1, 1, 1]} : vector<1x2x2x64xf32> to vector<1x1x1x64xf32>
    %35 = arith.maximumf %33, %34 : vector<1x1x1x64xf32>
    %36 = vector.extract_strided_slice %10 {offsets = [0, 1, 1, 0], sizes = [1, 1, 1, 64], strides = [1, 1, 1, 1]} : vector<1x2x2x64xf32> to vector<1x1x1x64xf32>
    %37 = arith.maximumf %35, %36 : vector<1x1x1x64xf32>
    %38 = vector.extract_strided_slice %17 {offsets = [0, 0, 0, 0], sizes = [1, 1, 1, 64], strides = [1, 1, 1, 1]} : vector<1x2x1x64xf32> to vector<1x1x1x64xf32>
    %39 = arith.maximumf %37, %38 : vector<1x1x1x64xf32>
    %40 = vector.extract_strided_slice %17 {offsets = [0, 1, 0, 0], sizes = [1, 1, 1, 64], strides = [1, 1, 1, 1]} : vector<1x2x1x64xf32> to vector<1x1x1x64xf32>
    %41 = arith.maximumf %39, %40 : vector<1x1x1x64xf32>
    %42 = vector.extract_strided_slice %24 {offsets = [0, 0, 0, 0], sizes = [1, 1, 1, 64], strides = [1, 1, 1, 1]} : vector<1x1x2x64xf32> to vector<1x1x1x64xf32>
    %43 = arith.maximumf %41, %42 : vector<1x1x1x64xf32>
    %44 = vector.extract_strided_slice %24 {offsets = [0, 0, 1, 0], sizes = [1, 1, 1, 64], strides = [1, 1, 1, 1]} : vector<1x1x2x64xf32> to vector<1x1x1x64xf32>
    %45 = arith.maximumf %43, %44 : vector<1x1x1x64xf32>
    %c0_22 = arith.constant 0 : index
    %c0_23 = arith.constant 0 : index
    %c0_24 = arith.constant 0 : index
    %c0_25 = arith.constant 0 : index
    %46 = vector.load %arg7[%c0_22, %c0_23, %c0_24, %c0_25] : memref<1x1x1x64xf32, #tpu.memory_space<vmem>>, vector<1x1x1x64xf32>
    tpu.vector_store %arg7[%c0_22, %c0_23, %c0_24, %c0_25], %45 {strides = array<i32>} : memref<1x1x1x64xf32, #tpu.memory_space<vmem>>, vector<1x1x1x64xf32>,
    return
  }
  func.func @transform_0(%arg0: i32) -> (i32, i32, i32, i32) {
    %c0_i32 = arith.constant 0 : i32
    %c0_i32_0 = arith.constant 0 : i32
    %c0_i32_1 = arith.constant 0 : i32
    %c0_i32_2 = arith.constant 0 : i32
    return %arg0, %c0_i32, %c0_i32_0, %c0_i32_1 : i32, i32, i32, i32
  }
  func.func @transform_1(%arg0: i32) -> (i32, i32, i32, i32) {
    %c0_i32 = arith.constant 0 : i32
    %c0_i32_0 = arith.constant 0 : i32
    %c0_i32_1 = arith.constant 0 : i32
    %c0_i32_2 = arith.constant 0 : i32
    return %arg0, %c0_i32, %c0_i32_0, %c0_i32_1 : i32, i32, i32, i32
  }
  func.func @transform_2(%arg0: i32) -> (i32, i32, i32, i32) {
    %c0_i32 = arith.constant 0 : i32
    %c0_i32_0 = arith.constant 0 : i32
    %c0_i32_1 = arith.constant 0 : i32
    %c0_i32_2 = arith.constant 0 : i32
    return %arg0, %c0_i32, %c0_i32_0, %c0_i32_1 : i32, i32, i32, i32
  }
  func.func @transform_3(%arg0: i32) -> (i32, i32, i32, i32) {
    %c0_i32 = arith.constant 0 : i32
    %c0_i32_0 = arith.constant 0 : i32
    %c0_i32_1 = arith.constant 0 : i32
    %c0_i32_2 = arith.constant 0 : i32
    return %arg0, %c0_i32, %c0_i32_0, %c0_i32_1 : i32, i32, i32, i32
  }
  func.func @transform_4(%arg0: i32) -> (i32, i32) {
    %c0_i32 = arith.constant 0 : i32
    %c0_i32_0 = arith.constant 0 : i32
    %c0_i32_1 = arith.constant 0 : i32
    return %c0_i32, %c0_i32_0 : i32, i32
  }
  func.func @transform_5(%arg0: i32) -> (i32, i32) {
    %c0_i32 = arith.constant 0 : i32
    %c0_i32_0 = arith.constant 0 : i32
    %c0_i32_1 = arith.constant 0 : i32
    return %c0_i32, %c0_i32_0 : i32, i32
  }
  func.func @transform_6(%arg0: i32) -> (i32, i32, i32, i32) {
    %c0_i32 = arith.constant 0 : i32
    %c0_i32_0 = arith.constant 0 : i32
    %c0_i32_1 = arith.constant 0 : i32
    %c0_i32_2 = arith.constant 0 : i32
    return %arg0, %c0_i32, %c0_i32_0, %c0_i32_1 : i32, i32, i32, i32
  }
}

</mosaic_0001>

<bundles_post_ra>
// kernel: base_model_autoencoder_forward.6
= control target key start
LH: loop header
LB: loop body
LE: loop exit
PB: predicated region body
PF: predicated region fallthrough
CT: control target
= control target key end

     0   :  { %s1786_s12 = smov 0   ;;  %s2402_s0 = inlined_call_operand.vmem [shape: bf16[2048,147], index: 0, kind: input, shape index: {}]   ;;  %s2403_s1 = inlined_call_operand.vmem [shape: bf16[147,64], index: 1, kind: input, shape index: {}]   ;;  %s2404_s2 = inlined_call_operand.vmem [shape: f32[2048,64], index: 2, kind: output, shape index: {0}]   ;;  %s2405_s3 = inlined_call_operand.vmem [shape: f32[4,8,128], index: 3, kind: output, shape index: {1}]  }
   0x1 LB: > { %s1792_s13 = sadd.s32 4294967295, %s1762_s12   ;;  %p1504_p0 = scmp.ge.s32.totalorder %s1762_s12, 1  ;;  %s1762_s12 = sphi %s1786_s12, %s14_s12  }
   0x2   : > { %p142_p1 = scmp.lt.s32.totalorder %s1762_s12, 5 }
   0x4   : > { %p143_p2 = pnand %p1504_p0, %p142_p1 }
   0x5   : > { %v1650_v0 = vld [vmem:[%s2403_s1] sm:$0xff] (!%p143_p2)   ;;  %v1764_v1 = vmov (!%p143_p2), 0   ;;  %v1651_v2 = vld [vmem:[%s2403_s1 + $0x8] sm:$0xff] (!%p143_p2)   ;;  %v1652_v3 = vld [vmem:[%s2403_s1 + $0x10] sm:$0xff] (!%p143_p2)   ;;  %s1505_s20 = sshll.u32 (!%p143_p2), %s1792_s13, 6  ;;  %vm617_vm0 = vcmask (!%p143_p2), 154624  }
   0x6   : > { %146 = sbr.rel (%p143_p2) target bundleno = 467 (0x1d3), region = 28  ;;  %721 = vmatprep.subr.bf16.mxu0 (!%p143_p2), %v1764_v1  ;;  %1620 = vmatprep.subr.bf16.mxu1 (!%p143_p2), %v1764_v1  ;;  %p172_p3 = scmp.lt.s32.totalorder (!%p143_p2), %s1505_s20, 255  ;;  %v1653_v4 = vld [vmem:[%s2403_s1 + $0x18] sm:$0xff] (!%p143_p2)   ;;  %v1654_v5 = vld [vmem:[%s2403_s1 + $0x20] sm:$0xff] (!%p143_p2)   ;;  %v1655_v7 = vld [vmem:[%s2403_s1 + $0x28] sm:$0xff] (!%p143_p2)   ;;  %vm714_vm1 = vcmask (!%p143_p2), 1040384  }
   0x7   : > { %722 = vmatpush1.bf16.msra.mxu0 (!%p143_p2), %v1650_v0  ;;  %1630 = vmatpush1.bf16.msra.mxu1 (!%p143_p2), %v1650_v0  ;;  %v1656_v8 = vld [vmem:[%s2403_s1 + $0x30] sm:$0xff] (!%p143_p2)   ;;  %v1657_v10 = vld [vmem:[%s2403_s1 + $0x38] sm:$0xff] (!%p143_p2)   ;;  %vm715_vm2 = vcmask (!%p143_p2), 1041408   ;;  %v1765_v11 = vmov (!%p143_p2), 65535   ;;  %v1658_v13 = vld [vmem:[%s2403_s1 + $0x40] sm:$0xff] (!%p143_p2)   ;;  %vm1010_vm3 = vcmask (!%p143_p2), 523264  }
   0x8   : > { %723 = vmatprep.subr.bf16.mxu0 (!%p143_p2), %v1764_v1  ;;  %1621 = vmatprep.subr.bf16.mxu1 (!%p143_p2), %v1764_v1  ;;  %v716_v12 = vsel (!%p143_p2), %vm714_vm1, 4294967295, %v1765_v11  ;;  %v1659_v14 = vld [vmem:[%s2403_s1 + $0x48] ss:$0 sps:$4 sm:$0x33] (!%p143_p2)   ;;  %p184_p4 = scmp.lt.s32.totalorder (!%p143_p2), %s1792_s13, 3 }
   0x9   : > { %v717_v15 = vsel (!%p143_p2), %vm715_vm2, %v716_v12, 0 }
   0xa   : > { %v719_v16 = vand.u32 (!%p143_p2), %v1659_v14, %v717_v15 }
   0xb   : > { %724 = vmatpush1.bf16.msra.mxu0 (!%p143_p2), %v1651_v2  ;;  %1631 = vmatpush1.bf16.msra.mxu1 (!%p143_p2), %v1651_v2 }
   0xc   : > { %725 = vmatprep.subr.bf16.mxu0 (!%p143_p2), %v1764_v1  ;;  %1622 = vmatprep.subr.bf16.mxu1 (!%p143_p2), %v1764_v1 }
   0xd   : > { %s2407_s20 = smov (!%p172_p3, %s1505_s20), 255  ;;  %s2409_s13 = smov (!%p184_p4, %s1792_s13), 3 }
   0xe   : > { %s1619_s23 = sshll.u32 %s2407_s20, 3  ;;  %s1510_s17 = sshll.u32 %s2409_s13, 3 }
   0xf   : > { %726 = vmatpush1.bf16.msra.mxu0 %v1652_v3  ;;  %1632 = vmatpush1.bf16.msra.mxu1 %v1652_v3  ;;  %s1817_s26 = scalar_lea.vmem %s2402_s0, %s1619_s23  ;;  %s1940_s16 = scalar_lea.vmem %s2404_s2, %s1619_s23 }
  0x10   : > { %727 = vmatprep.subr.bf16.mxu0 %v1764_v1  ;;  %1623 = vmatprep.subr.bf16.mxu1 %v1764_v1  ;;  %v1662_v6 = vld [vmem:[%s1817_s26 + $0x4] ss:$8 sps:$4 sm:$0xff]   ;;  %v1660_v17 = vld [vmem:[%s1817_s26] ss:$8 sps:$4 sm:$0xff]   ;;  %v1663_v18 = vld [vmem:[%s1817_s26 + $0x14] ss:$8 sps:$4 sm:$0xff]   ;;  %s187_s20 = scalar_lea.vmem %s2405_s3, %s1510_s17 }
  0x11   : > { %1585 = vmatprep.mubr.msk.bf16.mxu0 %vm617_vm0, %v1662_v6  ;;  %v1686_v9 = vld [vmem:[%s1817_s26 + $0x104] ss:$8 sps:$4 sm:$0xff]   ;;  %v1684_v19 = vld [vmem:[%s1817_s26 + $0x100] ss:$8 sps:$4 sm:$0xff]   ;;  %v1690_v20 = vld [vmem:[%s1817_s26 + $0x114] ss:$8 sps:$4 sm:$0xff]  }
  0x12   : > { %1601 = vmatprep.mubr.msk.bf16.mxu1 %vm617_vm0, %v1686_v9  ;;  %v1665_v21 = vld [vmem:[%s1817_s26 + $0x10] ss:$8 sps:$4 sm:$0xff]   ;;  %v1666_v22 = vld [vmem:[%s1817_s26 + $0x24] ss:$8 sps:$4 sm:$0xff]   ;;  %v1668_v25 = vld [vmem:[%s1817_s26 + $0x20] ss:$8 sps:$4 sm:$0xff]  }
  0x13   : > { %728 = vmatpush1.bf16.msra.mxu0 %v1653_v4  ;;  %1633 = vmatpush1.bf16.msra.mxu1 %v1653_v4  ;;  %v1692_v23 = vld [vmem:[%s1817_s26 + $0x110] ss:$8 sps:$4 sm:$0xff]   ;;  %v1696_v24 = vld [vmem:[%s1817_s26 + $0x124] ss:$8 sps:$4 sm:$0xff]   ;;  %v1669_v26 = vld [vmem:[%s1817_s26 + $0x34] ss:$8 sps:$4 sm:$0xff]  }
  0x14   : > { %729 = vmatprep.subr.bf16.mxu0 %v1764_v1  ;;  %1624 = vmatprep.subr.bf16.mxu1 %v1764_v1  ;;  %v1698_v27 = vld [vmem:[%s1817_s26 + $0x120] ss:$8 sps:$4 sm:$0xff]   ;;  %v1702_v28 = vld [vmem:[%s1817_s26 + $0x134] ss:$8 sps:$4 sm:$0xff]   ;;  %v1671_v29 = vld [vmem:[%s1817_s26 + $0x30] ss:$8 sps:$4 sm:$0xff]  }
  0x15   : > { %v1704_v30 = vld [vmem:[%s1817_s26 + $0x130] ss:$8 sps:$4 sm:$0xff]   ;;  %v1672_v31 = vld [vmem:[%s1817_s26 + $0x44] ss:$8 sps:$4 sm:$0xff]   ;;  %v1674_v33 = vld [vmem:[%s1817_s26 + $0x40] ss:$8 sps:$4 sm:$0xff]  }
  0x16   : > { %v1708_v32 = vld [vmem:[%s1817_s26 + $0x144] ss:$8 sps:$4 sm:$0xff]   ;;  %v1710_v34 = vld [vmem:[%s1817_s26 + $0x140] ss:$8 sps:$4 sm:$0xff]   ;;  %v1675_v35 = vld [vmem:[%s1817_s26 + $0x54] ss:$8 sps:$4 sm:$0xff]  }
  0x17   : > { %730 = vmatpush1.bf16.msra.mxu0 %v1654_v5  ;;  %1634 = vmatpush1.bf16.msra.mxu1 %v1654_v5  ;;  %v1714_v36 = vld [vmem:[%s1817_s26 + $0x154] ss:$8 sps:$4 sm:$0xff]   ;;  %v1677_v37 = vld [vmem:[%s1817_s26 + $0x50] ss:$8 sps:$4 sm:$0xff]   ;;  %v1678_v39 = vld [vmem:[%s1817_s26 + $0x64] ss:$8 sps:$4 sm:$0xff]  }
  0x18   : > { %731 = vmatprep.subr.bf16.mxu0 %v1764_v1  ;;  %1625 = vmatprep.subr.bf16.mxu1 %v1764_v1  ;;  %v1716_v38 = vld [vmem:[%s1817_s26 + $0x150] ss:$8 sps:$4 sm:$0xff]   ;;  %v1720_v40 = vld [vmem:[%s1817_s26 + $0x164] ss:$8 sps:$4 sm:$0xff]   ;;  %v1680_v41 = vld [vmem:[%s1817_s26 + $0x60] ss:$8 sps:$4 sm:$0xff]  }
  0x19   : > { %v1722_v42 = vld [vmem:[%s1817_s26 + $0x160] ss:$8 sps:$4 sm:$0xff]   ;;  %v1681_v43 = vld [vmem:[%s1817_s26 + $0x74] ss:$8 sps:$4 sm:$0xff]   ;;  %v1683_v45 = vld [vmem:[%s1817_s26 + $0x70] ss:$8 sps:$4 sm:$0xff]  }
  0x1a   : > { %v1726_v44 = vld [vmem:[%s1817_s26 + $0x174] ss:$8 sps:$4 sm:$0xff]   ;;  %v1728_v46 = vld [vmem:[%s1817_s26 + $0x170] ss:$8 sps:$4 sm:$0xff]   ;;  %v1687_v47 = vld [vmem:[%s1817_s26 + $0x84] ss:$8 sps:$4 sm:$0xff]  }
  0x1b   : > { %732 = vmatpush1.bf16.msra.mxu0 %v1655_v7  ;;  %1635 = vmatpush1.bf16.msra.mxu1 %v1655_v7  ;;  %v1732_v48 = vld [vmem:[%s1817_s26 + $0x184] ss:$8 sps:$4 sm:$0xff]   ;;  %v1689_v49 = vld [vmem:[%s1817_s26 + $0x80] ss:$8 sps:$4 sm:$0xff]   ;;  %v1693_v51 = vld [vmem:[%s1817_s26 + $0x94] ss:$8 sps:$4 sm:$0xff]  }
  0x1c   : > { %733 = vmatprep.subr.bf16.mxu0 %v1764_v1  ;;  %1626 = vmatprep.subr.bf16.mxu1 %v1764_v1  ;;  %v1734_v50 = vld [vmem:[%s1817_s26 + $0x180] ss:$8 sps:$4 sm:$0xff]   ;;  %v1735_v52 = vld [vmem:[%s1817_s26 + $0x194] ss:$8 sps:$4 sm:$0xff]   ;;  %v1695_v53 = vld [vmem:[%s1817_s26 + $0x90] ss:$8 sps:$4 sm:$0xff]  }
  0x1d   : > { %v1737_v54 = vld [vmem:[%s1817_s26 + $0x190] ss:$8 sps:$4 sm:$0xff]   ;;  %v1699_v55 = vld [vmem:[%s1817_s26 + $0xa4] ss:$8 sps:$4 sm:$0xff]   ;;  %v1701_v57 = vld [vmem:[%s1817_s26 + $0xa0] ss:$8 sps:$4 sm:$0xff]  }
  0x1e   : > { %v1738_v56 = vld [vmem:[%s1817_s26 + $0x1a4] ss:$8 sps:$4 sm:$0xff]   ;;  %v1740_v58 = vld [vmem:[%s1817_s26 + $0x1a0] ss:$8 sps:$4 sm:$0xff]   ;;  %v1705_v59 = vld [vmem:[%s1817_s26 + $0xb4] ss:$8 sps:$4 sm:$0xff]  }
  0x1f   : > { %734 = vmatpush1.bf16.msra.mxu0 %v1656_v8  ;;  %1636 = vmatpush1.bf16.msra.mxu1 %v1656_v8  ;;  %v1741_v60 = vld [vmem:[%s1817_s26 + $0x1b4] ss:$8 sps:$4 sm:$0xff]   ;;  %v1707_v61 = vld [vmem:[%s1817_s26 + $0xb0] ss:$8 sps:$4 sm:$0xff]   ;;  %v1711_v63 = vld [vmem:[%s1817_s26 + $0xc4] ss:$8 sps:$4 sm:$0xff]  }
  0x20   : > { %735 = vmatprep.subr.bf16.mxu0 %v1764_v1  ;;  %1627 = vmatprep.subr.bf16.mxu1 %v1764_v1  ;;  %v1743_v62 = vld [vmem:[%s1817_s26 + $0x1b0] ss:$8 sps:$4 sm:$0xff]   ;;  %v1744_v0 = vld [vmem:[%s1817_s26 + $0x1c4] ss:$8 sps:$4 sm:$0xff]   ;;  %v1746_v2 = vld [vmem:[%s1817_s26 + $0x1c0] ss:$8 sps:$4 sm:$0xff]  }
  0x21   : > { %v1717_v3 = vld [vmem:[%s1817_s26 + $0xd4] ss:$8 sps:$4 sm:$0xff]   ;;  %v1719_v5 = vld [vmem:[%s1817_s26 + $0xd0] ss:$8 sps:$4 sm:$0xff]   ;;  %v1723_v7 = vld [vmem:[%s1817_s26 + $0xe4] ss:$8 sps:$4 sm:$0xff]  }
  0x22   : > { %v1747_v4 = vld [vmem:[%s1817_s26 + $0x1d4] ss:$8 sps:$4 sm:$0xff]   ;;  %v1749_v6 = vld [vmem:[%s1817_s26 + $0x1d0] ss:$8 sps:$4 sm:$0xff]   ;;  %v1750_v8 = vld [vmem:[%s1817_s26 + $0x1e4] ss:$8 sps:$4 sm:$0xff]  }
  0x23   : > { %736 = vmatpush1.bf16.msra.mxu0 %v1657_v10  ;;  %1637 = vmatpush1.bf16.msra.mxu1 %v1657_v10  ;;  %v1725_v9 = vld [vmem:[%s1817_s26 + $0xe0] ss:$8 sps:$4 sm:$0xff]   ;;  %v1729_v11 = vld [vmem:[%s1817_s26 + $0xf4] ss:$8 sps:$4 sm:$0xff]   ;;  %v1755_v14 = vld [vmem:[%s1817_s26 + $0x1f0] ss:$8 sps:$4 sm:$0xff]  }
  0x24   : > { %737 = vmatprep.subr.bf16.mxu0 %v1764_v1  ;;  %1628 = vmatprep.subr.bf16.mxu1 %v1764_v1  ;;  %v1752_v10 = vld [vmem:[%s1817_s26 + $0x1e0] ss:$8 sps:$4 sm:$0xff]   ;;  %v1753_v12 = vld [vmem:[%s1817_s26 + $0x1f4] ss:$8 sps:$4 sm:$0xff]  }
  0x27   : > { %738 = vmatpush1.bf16.msra.mxu0 %v1658_v13  ;;  %1638 = vmatpush1.bf16.msra.mxu1 %v1658_v13  ;;  %v1731_v13 = vld [vmem:[%s1817_s26 + $0xf0] ss:$8 sps:$4 sm:$0xff]  }
  0x28   : > { %739 = vmatprep.subr.bf16.mxu0 %v1764_v1  ;;  %1629 = vmatprep.subr.bf16.mxu1 %v1764_v1  ;;  %v1713_v1 = vld [vmem:[%s1817_s26 + $0xc0] ss:$8 sps:$4 sm:$0xff]  }
  0x2b   : > { %740 = vmatpush1.bf16.msra.mxu0 %v719_v16  ;;  %1639 = vmatpush1.bf16.msra.mxu1 %v719_v16 }
  0x2e   : > { %754 = vmatmul.mubr.bf16.vlgmr.msra.gmra.mrb[0].mxu0 %v1660_v17  ;;  %882 = vmatmul.mubr.bf16.vlgmr.msra.gmra.mrb[0].mxu1 %v1684_v19 }
  0x2f   : > { %1586 = vmatprep.mubr.msk.bf16.mxu0 %vm617_vm0, %v1663_v18  ;;  %1602 = vmatprep.mubr.msk.bf16.mxu1 %vm617_vm0, %v1690_v20 }
  0x36   : > { %762 = vmatmul.mubr.bf16.gmra.mrb[4].mxu0 %v1665_v21  ;;  %890 = vmatmul.mubr.bf16.gmra.mrb[4].mxu1 %v1692_v23 }
  0x37   : > { %1587 = vmatprep.mubr.msk.bf16.mxu0 %vm617_vm0, %v1666_v22  ;;  %1603 = vmatprep.mubr.msk.bf16.mxu1 %vm617_vm0, %v1696_v24 }
  0x3e   : > { %770 = vmatmul.mubr.bf16.gmra.mrb[8].mxu0 %v1668_v25  ;;  %898 = vmatmul.mubr.bf16.gmra.mrb[8].mxu1 %v1698_v27 }
  0x3f   : > { %1588 = vmatprep.mubr.msk.bf16.mxu0 %vm617_vm0, %v1669_v26  ;;  %1604 = vmatprep.mubr.msk.bf16.mxu1 %vm617_vm0, %v1702_v28 }
  0x46   : > { %778 = vmatmul.mubr.bf16.gmra.mrb[12].mxu0 %v1671_v29  ;;  %906 = vmatmul.mubr.bf16.gmra.mrb[12].mxu1 %v1704_v30 }
  0x47   : > { %1589 = vmatprep.mubr.msk.bf16.mxu0 %vm617_vm0, %v1672_v31  ;;  %1605 = vmatprep.mubr.msk.bf16.mxu1 %vm617_vm0, %v1708_v32 }
  0x4e   : > { %786 = vmatmul.mubr.bf16.gmra.mrb[16].mxu0 %v1674_v33  ;;  %914 = vmatmul.mubr.bf16.gmra.mrb[16].mxu1 %v1710_v34 }
  0x4f   : > { %1590 = vmatprep.mubr.msk.bf16.mxu0 %vm617_vm0, %v1675_v35  ;;  %1606 = vmatprep.mubr.msk.bf16.mxu1 %vm617_vm0, %v1714_v36 }
  0x56   : > { %794 = vmatmul.mubr.bf16.gmra.mrb[20].mxu0 %v1677_v37  ;;  %922 = vmatmul.mubr.bf16.gmra.mrb[20].mxu1 %v1716_v38 }
  0x57   : > { %1591 = vmatprep.mubr.msk.bf16.mxu0 %vm617_vm0, %v1678_v39  ;;  %1607 = vmatprep.mubr.msk.bf16.mxu1 %vm617_vm0, %v1720_v40 }
  0x5e   : > { %802 = vmatmul.mubr.bf16.gmra.mrb[24].mxu0 %v1680_v41  ;;  %930 = vmatmul.mubr.bf16.gmra.mrb[24].mxu1 %v1722_v42 }
  0x5f   : > { %1592 = vmatprep.mubr.msk.bf16.mxu0 %vm617_vm0, %v1681_v43  ;;  %1608 = vmatprep.mubr.msk.bf16.mxu1 %vm617_vm0, %v1726_v44 }
  0x66   : > { %810 = vmatmul.mubr.bf16.gmra.mrb[28].mxu0 %v1683_v45  ;;  %938 = vmatmul.mubr.bf16.gmra.mrb[28].mxu1 %v1728_v46 }
  0x67   : > { %1593 = vmatprep.mubr.msk.bf16.mxu0 %vm617_vm0, %v1687_v47  ;;  %1609 = vmatprep.mubr.msk.bf16.mxu1 %vm617_vm0, %v1732_v48 }
  0x6e   : > { %818 = vmatmul.mubr.bf16.gmra.mrb[32].mxu0 %v1689_v49  ;;  %946 = vmatmul.mubr.bf16.gmra.mrb[32].mxu1 %v1734_v50 }
  0x6f   : > { %1594 = vmatprep.mubr.msk.bf16.mxu0 %vm617_vm0, %v1693_v51  ;;  %1610 = vmatprep.mubr.msk.bf16.mxu1 %vm617_vm0, %v1735_v52 }
  0x76   : > { %826 = vmatmul.mubr.bf16.gmra.mrb[36].mxu0 %v1695_v53  ;;  %954 = vmatmul.mubr.bf16.gmra.mrb[36].mxu1 %v1737_v54 }
  0x77   : > { %1595 = vmatprep.mubr.msk.bf16.mxu0 %vm617_vm0, %v1699_v55  ;;  %1611 = vmatprep.mubr.msk.bf16.mxu1 %vm617_vm0, %v1738_v56 }
  0x7e   : > { %834 = vmatmul.mubr.bf16.gmra.mrb[40].mxu0 %v1701_v57  ;;  %962 = vmatmul.mubr.bf16.gmra.mrb[40].mxu1 %v1740_v58 }
  0x7f   : > { %1596 = vmatprep.mubr.msk.bf16.mxu0 %vm617_vm0, %v1705_v59  ;;  %1612 = vmatprep.mubr.msk.bf16.mxu1 %vm617_vm0, %v1741_v60 }
  0x86   : > { %842 = vmatmul.mubr.bf16.gmra.mrb[44].mxu0 %v1707_v61  ;;  %970 = vmatmul.mubr.bf16.gmra.mrb[44].mxu1 %v1743_v62 }
  0x87   : > { %1597 = vmatprep.mubr.msk.bf16.mxu0 %vm617_vm0, %v1711_v63  ;;  %1613 = vmatprep.mubr.msk.bf16.mxu1 %vm617_vm0, %v1744_v0 }
  0x8e   : > { %850 = vmatmul.mubr.bf16.gmra.mrb[48].mxu0 %v1713_v1  ;;  %978 = vmatmul.mubr.bf16.gmra.mrb[48].mxu1 %v1746_v2 }
  0x8f   : > { %1598 = vmatprep.mubr.msk.bf16.mxu0 %vm617_vm0, %v1717_v3  ;;  %1614 = vmatprep.mubr.msk.bf16.mxu1 %vm617_vm0, %v1747_v4 }
  0x96   : > { %858 = vmatmul.mubr.bf16.gmra.mrb[52].mxu0 %v1719_v5  ;;  %986 = vmatmul.mubr.bf16.gmra.mrb[52].mxu1 %v1749_v6 }
  0x97   : > { %1599 = vmatprep.mubr.msk.bf16.mxu0 %vm617_vm0, %v1723_v7  ;;  %1615 = vmatprep.mubr.msk.bf16.mxu1 %vm617_vm0, %v1750_v8 }
  0x9e   : > { %866 = vmatmul.mubr.bf16.gmra.mrb[56].mxu0 %v1725_v9  ;;  %994 = vmatmul.mubr.bf16.gmra.mrb[56].mxu1 %v1752_v10 }
  0x9f   : > { %1600 = vmatprep.mubr.msk.bf16.mxu0 %vm617_vm0, %v1729_v11  ;;  %1616 = vmatprep.mubr.msk.bf16.mxu1 %vm617_vm0, %v1753_v12 }
  0xa6   : > { %874 = vmatmul.mubr.bf16.gmra.mrb[60].mxu0 %v1731_v13  ;;  %1002 = vmatmul.mubr.bf16.gmra.mrb[60].mxu1 %v1755_v14 }
 0x101   : > { %v755_v15 = vpop.f32.mrb[0].mxu0  ;;  %v1942_v16 = vpop.f32.mrb[0].mxu1 }
 0x102   : > { %1011 = vst.msk [vmem:[%s1940_s16] sm:$0xff] %vm1010_vm3, %v755_v15  ;;  %v1208_v17 = vmul.f32 %v755_v15, %v755_v15  ;;  %v757_v18 = vpop.f32.mrb[1].mxu0  ;;  %1043 = vst.msk [vmem:[%s1940_s16 + $0x100] sm:$0xff] %vm1010_vm3, %v1942_v16  ;;  %v885_v19 = vpop.f32.mrb[1].mxu1  ;;  %v1075_v22 = vsel %vm1010_vm3, %v755_v15, 0.0 }
 0x103   : > { %v758_v20 = vpop.f32.mrb[2].mxu0  ;;  %v1949_v21 = vpop.f32.mrb[2].mxu1 }
 0x104   : > { %1012 = vst.msk [vmem:[%s1940_s16 + $0x8] sm:$0xff] %vm1010_vm3, %v758_v20  ;;  %v1076_v23 = vsel %vm1010_vm3, %v758_v20, 0.0  ;;  %v1209_v24 = vmul.f32 %v758_v20, %v758_v20  ;;  %v760_v25 = vpop.f32.mrb[3].mxu0  ;;  %1044 = vst.msk [vmem:[%s1940_s16 + $0x108] sm:$0xff] %vm1010_vm3, %v1949_v21  ;;  %v888_v26 = vpop.f32.mrb[3].mxu1  ;;  %v1272_v28 = vsel %vm1010_vm3, %v1208_v17, 0.0 }
 0x105   : > { %v1077_v27 = vadd.f32 %v1076_v23, %v1075_v22 }
 0x106   : > { %v1273_v29 = vsel %vm1010_vm3, %v1209_v24, 0.0 }
 0x107   : > { %v1274_v30 = vadd.f32 %v1273_v29, %v1272_v28 }
 0x109   : > { %v763_v31 = vpop.f32.mrb[4].mxu0  ;;  %v1960_v32 = vpop.f32.mrb[4].mxu1 }
 0x10a   : > { %1013 = vst.msk [vmem:[%s1940_s16 + $0x10] sm:$0xff] %vm1010_vm3, %v763_v31  ;;  %v1078_v33 = vsel %vm1010_vm3, %v763_v31, 0.0  ;;  %v1210_v34 = vmul.f32 %v763_v31, %v763_v31  ;;  %v765_v35 = vpop.f32.mrb[5].mxu0  ;;  %1045 = vst.msk [vmem:[%s1940_s16 + $0x110] sm:$0xff] %vm1010_vm3, %v1960_v32  ;;  %v893_v36 = vpop.f32.mrb[5].mxu1 }
 0x10b   : > { %v1079_v37 = vadd.f32 %v1078_v33, %v1077_v27  ;;  %v766_v38 = vpop.f32.mrb[6].mxu0  ;;  %v1968_v39 = vpop.f32.mrb[6].mxu1 }
 0x10c   : > { %v1275_v40 = vsel %vm1010_vm3, %v1210_v34, 0.0  ;;  %1014 = vst.msk [vmem:[%s1940_s16 + $0x18] sm:$0xff] %vm1010_vm3, %v766_v38  ;;  %v1080_v41 = vsel %vm1010_vm3, %v766_v38, 0.0  ;;  %v1211_v42 = vmul.f32 %v766_v38, %v766_v38  ;;  %v768_v43 = vpop.f32.mrb[7].mxu0  ;;  %1046 = vst.msk [vmem:[%s1940_s16 + $0x118] sm:$0xff] %vm1010_vm3, %v1968_v39  ;;  %v896_v44 = vpop.f32.mrb[7].mxu1 }
 0x10d   : > { %v1276_v45 = vadd.f32 %v1275_v40, %v1274_v30  ;;  %v1081_v46 = vadd.f32 %v1080_v41, %v1079_v37 }
 0x10e   : > { %v1277_v47 = vsel %vm1010_vm3, %v1211_v42, 0.0 }
 0x10f   : > { %v1278_v48 = vadd.f32 %v1277_v47, %v1276_v45 }
 0x111   : > { %v771_v49 = vpop.f32.mrb[8].mxu0  ;;  %v1978_v50 = vpop.f32.mrb[8].mxu1 }
 0x112   : > { %1015 = vst.msk [vmem:[%s1940_s16 + $0x20] sm:$0xff] %vm1010_vm3, %v771_v49  ;;  %v1082_v51 = vsel %vm1010_vm3, %v771_v49, 0.0  ;;  %v1212_v52 = vmul.f32 %v771_v49, %v771_v49  ;;  %v773_v53 = vpop.f32.mrb[9].mxu0  ;;  %1047 = vst.msk [vmem:[%s1940_s16 + $0x120] sm:$0xff] %vm1010_vm3, %v1978_v50  ;;  %v901_v54 = vpop.f32.mrb[9].mxu1 }
 0x113   : > { %v1083_v55 = vadd.f32 %v1082_v51, %v1081_v46  ;;  %v774_v56 = vpop.f32.mrb[10].mxu0  ;;  %v1986_v57 = vpop.f32.mrb[10].mxu1 }
 0x114   : > { %v1279_v58 = vsel %vm1010_vm3, %v1212_v52, 0.0  ;;  %1016 = vst.msk [vmem:[%s1940_s16 + $0x28] sm:$0xff] %vm1010_vm3, %v774_v56  ;;  %v1084_v59 = vsel %vm1010_vm3, %v774_v56, 0.0  ;;  %v1213_v60 = vmul.f32 %v774_v56, %v774_v56  ;;  %v776_v61 = vpop.f32.mrb[11].mxu0  ;;  %1048 = vst.msk [vmem:[%s1940_s16 + $0x128] sm:$0xff] %vm1010_vm3, %v1986_v57  ;;  %v904_v62 = vpop.f32.mrb[11].mxu1 }
 0x115   : > { %v1280_v63 = vadd.f32 %v1279_v58, %v1278_v48  ;;  %v1085_v0 = vadd.f32 %v1084_v59, %v1083_v55 }
 0x116   : > { %v1281_v1 = vsel %vm1010_vm3, %v1213_v60, 0.0 }
 0x117   : > { %v1282_v2 = vadd.f32 %v1281_v1, %v1280_v63 }
 0x119   : > { %v779_v3 = vpop.f32.mrb[12].mxu0  ;;  %v1996_v4 = vpop.f32.mrb[12].mxu1 }
 0x11a   : > { %1017 = vst.msk [vmem:[%s1940_s16 + $0x30] sm:$0xff] %vm1010_vm3, %v779_v3  ;;  %v1086_v5 = vsel %vm1010_vm3, %v779_v3, 0.0  ;;  %v1214_v6 = vmul.f32 %v779_v3, %v779_v3  ;;  %v781_v7 = vpop.f32.mrb[13].mxu0  ;;  %1049 = vst.msk [vmem:[%s1940_s16 + $0x130] sm:$0xff] %vm1010_vm3, %v1996_v4  ;;  %v909_v8 = vpop.f32.mrb[13].mxu1 }
 0x11b   : > { %v1087_v9 = vadd.f32 %v1086_v5, %v1085_v0  ;;  %v782_v10 = vpop.f32.mrb[14].mxu0  ;;  %v2004_v11 = vpop.f32.mrb[14].mxu1 }
 0x11c   : > { %v1283_v12 = vsel %vm1010_vm3, %v1214_v6, 0.0  ;;  %1018 = vst.msk [vmem:[%s1940_s16 + $0x38] sm:$0xff] %vm1010_vm3, %v782_v10  ;;  %v1088_v13 = vsel %vm1010_vm3, %v782_v10, 0.0  ;;  %v1215_v14 = vmul.f32 %v782_v10, %v782_v10  ;;  %v784_v15 = vpop.f32.mrb[15].mxu0  ;;  %1050 = vst.msk [vmem:[%s1940_s16 + $0x138] sm:$0xff] %vm1010_vm3, %v2004_v11  ;;  %v912_v17 = vpop.f32.mrb[15].mxu1 }
 0x11d   : > { %v1284_v18 = vadd.f32 %v1283_v12, %v1282_v2  ;;  %v1089_v19 = vadd.f32 %v1088_v13, %v1087_v9 }
 0x11e   : > { %v1285_v20 = vsel %vm1010_vm3, %v1215_v14, 0.0 }
 0x11f   : > { %v1286_v22 = vadd.f32 %v1285_v20, %v1284_v18 }
 0x121   : > { %v787_v23 = vpop.f32.mrb[16].mxu0  ;;  %v2014_v24 = vpop.f32.mrb[16].mxu1 }
 0x122   : > { %1019 = vst.msk [vmem:[%s1940_s16 + $0x40] sm:$0xff] %vm1010_vm3, %v787_v23  ;;  %v1090_v25 = vsel %vm1010_vm3, %v787_v23, 0.0  ;;  %v1216_v26 = vmul.f32 %v787_v23, %v787_v23  ;;  %v789_v27 = vpop.f32.mrb[17].mxu0  ;;  %1051 = vst.msk [vmem:[%s1940_s16 + $0x140] sm:$0xff] %vm1010_vm3, %v2014_v24  ;;  %v917_v28 = vpop.f32.mrb[17].mxu1 }
 0x123   : > { %v1091_v29 = vadd.f32 %v1090_v25, %v1089_v19  ;;  %v790_v30 = vpop.f32.mrb[18].mxu0  ;;  %v2022_v31 = vpop.f32.mrb[18].mxu1 }
 0x124   : > { %v1287_v33 = vsel %vm1010_vm3, %v1216_v26, 0.0  ;;  %1020 = vst.msk [vmem:[%s1940_s16 + $0x48] sm:$0xff] %vm1010_vm3, %v790_v30  ;;  %v1092_v34 = vsel %vm1010_vm3, %v790_v30, 0.0  ;;  %v1217_v35 = vmul.f32 %v790_v30, %v790_v30  ;;  %v792_v36 = vpop.f32.mrb[19].mxu0  ;;  %1052 = vst.msk [vmem:[%s1940_s16 + $0x148] sm:$0xff] %vm1010_vm3, %v2022_v31  ;;  %v920_v37 = vpop.f32.mrb[19].mxu1 }
 0x125   : > { %v1288_v38 = vadd.f32 %v1287_v33, %v1286_v22  ;;  %v1093_v40 = vadd.f32 %v1092_v34, %v1091_v29 }
 0x126   : > { %v1289_v41 = vsel %vm1010_vm3, %v1217_v35, 0.0 }
 0x127   : > { %v1290_v42 = vadd.f32 %v1289_v41, %v1288_v38 }
 0x129   : > { %v795_v43 = vpop.f32.mrb[20].mxu0  ;;  %v2032_v44 = vpop.f32.mrb[20].mxu1 }
 0x12a   : > { %1021 = vst.msk [vmem:[%s1940_s16 + $0x50] sm:$0xff] %vm1010_vm3, %v795_v43  ;;  %v1094_v45 = vsel %vm1010_vm3, %v795_v43, 0.0  ;;  %v1218_v46 = vmul.f32 %v795_v43, %v795_v43  ;;  %v797_v47 = vpop.f32.mrb[21].mxu0  ;;  %1053 = vst.msk [vmem:[%s1940_s16 + $0x150] sm:$0xff] %vm1010_vm3, %v2032_v44  ;;  %v925_v48 = vpop.f32.mrb[21].mxu1 }
 0x12b   : > { %v1095_v49 = vadd.f32 %v1094_v45, %v1093_v40  ;;  %v798_v51 = vpop.f32.mrb[22].mxu0  ;;  %v2040_v52 = vpop.f32.mrb[22].mxu1 }
 0x12c   : > { %v1291_v53 = vsel %vm1010_vm3, %v1218_v46, 0.0  ;;  %1022 = vst.msk [vmem:[%s1940_s16 + $0x58] sm:$0xff] %vm1010_vm3, %v798_v51  ;;  %v1096_v54 = vsel %vm1010_vm3, %v798_v51, 0.0  ;;  %v1219_v55 = vmul.f32 %v798_v51, %v798_v51  ;;  %v800_v56 = vpop.f32.mrb[23].mxu0  ;;  %1054 = vst.msk [vmem:[%s1940_s16 + $0x158] sm:$0xff] %vm1010_vm3, %v2040_v52  ;;  %v928_v58 = vpop.f32.mrb[23].mxu1 }
 0x12d   : > { %v1292_v59 = vadd.f32 %v1291_v53, %v1290_v42  ;;  %v1097_v60 = vadd.f32 %v1096_v54, %v1095_v49 }
 0x12e   : > { %v1293_v61 = vsel %vm1010_vm3, %v1219_v55, 0.0 }
 0x12f   : > { %v1294_v62 = vadd.f32 %v1293_v61, %v1292_v59 }
 0x131   : > { %v803_v63 = vpop.f32.mrb[24].mxu0  ;;  %v2050_v0 = vpop.f32.mrb[24].mxu1 }
 0x132   : > { %1023 = vst.msk [vmem:[%s1940_s16 + $0x60] sm:$0xff] %vm1010_vm3, %v803_v63  ;;  %v1098_v1 = vsel %vm1010_vm3, %v803_v63, 0.0  ;;  %v1220_v2 = vmul.f32 %v803_v63, %v803_v63  ;;  %v805_v3 = vpop.f32.mrb[25].mxu0  ;;  %1055 = vst.msk [vmem:[%s1940_s16 + $0x160] sm:$0xff] %vm1010_vm3, %v2050_v0  ;;  %v933_v5 = vpop.f32.mrb[25].mxu1 }
 0x133   : > { %v1099_v6 = vadd.f32 %v1098_v1, %v1097_v60  ;;  %v806_v7 = vpop.f32.mrb[26].mxu0  ;;  %v2058_v8 = vpop.f32.mrb[26].mxu1 }
 0x134   : > { %v1295_v9 = vsel %vm1010_vm3, %v1220_v2, 0.0  ;;  %1024 = vst.msk [vmem:[%s1940_s16 + $0x68] sm:$0xff] %vm1010_vm3, %v806_v7  ;;  %v1100_v10 = vsel %vm1010_vm3, %v806_v7, 0.0  ;;  %v1221_v12 = vmul.f32 %v806_v7, %v806_v7  ;;  %v808_v13 = vpop.f32.mrb[27].mxu0  ;;  %1056 = vst.msk [vmem:[%s1940_s16 + $0x168] sm:$0xff] %vm1010_vm3, %v2058_v8  ;;  %v936_v14 = vpop.f32.mrb[27].mxu1 }
 0x135   : > { %v1296_v15 = vadd.f32 %v1295_v9, %v1294_v62  ;;  %v1101_v17 = vadd.f32 %v1100_v10, %v1099_v6 }
 0x136   : > { %v1297_v18 = vsel %vm1010_vm3, %v1221_v12, 0.0 }
 0x137   : > { %v1298_v19 = vadd.f32 %v1297_v18, %v1296_v15 }
 0x139   : > { %v811_v20 = vpop.f32.mrb[28].mxu0  ;;  %v2068_v22 = vpop.f32.mrb[28].mxu1 }
 0x13a   : > { %1025 = vst.msk [vmem:[%s1940_s16 + $0x70] sm:$0xff] %vm1010_vm3, %v811_v20  ;;  %v1102_v23 = vsel %vm1010_vm3, %v811_v20, 0.0  ;;  %v1222_v25 = vmul.f32 %v811_v20, %v811_v20  ;;  %v813_v26 = vpop.f32.mrb[29].mxu0  ;;  %1057 = vst.msk [vmem:[%s1940_s16 + $0x170] sm:$0xff] %vm1010_vm3, %v2068_v22  ;;  %v941_v27 = vpop.f32.mrb[29].mxu1 }
 0x13b   : > { %v1103_v28 = vadd.f32 %v1102_v23, %v1101_v17  ;;  %v814_v29 = vpop.f32.mrb[30].mxu0  ;;  %v2076_v30 = vpop.f32.mrb[30].mxu1 }
 0x13c   : > { %v1299_v33 = vsel %vm1010_vm3, %v1222_v25, 0.0  ;;  %1026 = vst.msk [vmem:[%s1940_s16 + $0x78] sm:$0xff] %vm1010_vm3, %v814_v29  ;;  %v1104_v34 = vsel %vm1010_vm3, %v814_v29, 0.0  ;;  %v1223_v35 = vmul.f32 %v814_v29, %v814_v29  ;;  %v816_v36 = vpop.f32.mrb[31].mxu0  ;;  %1058 = vst.msk [vmem:[%s1940_s16 + $0x178] sm:$0xff] %vm1010_vm3, %v2076_v30  ;;  %v944_v37 = vpop.f32.mrb[31].mxu1 }
 0x13d   : > { %v1300_v38 = vadd.f32 %v1299_v33, %v1298_v19  ;;  %v1105_v40 = vadd.f32 %v1104_v34, %v1103_v28 }
 0x13e   : > { %v1301_v41 = vsel %vm1010_vm3, %v1223_v35, 0.0 }
 0x13f   : > { %v1302_v42 = vadd.f32 %v1301_v41, %v1300_v38 }
 0x141   : > { %v819_v43 = vpop.f32.mrb[32].mxu0  ;;  %v2086_v45 = vpop.f32.mrb[32].mxu1 }
 0x142   : > { %1027 = vst.msk [vmem:[%s1940_s16 + $0x80] sm:$0xff] %vm1010_vm3, %v819_v43  ;;  %v1106_v46 = vsel %vm1010_vm3, %v819_v43, 0.0  ;;  %v1224_v47 = vmul.f32 %v819_v43, %v819_v43  ;;  %v821_v48 = vpop.f32.mrb[33].mxu0  ;;  %1059 = vst.msk [vmem:[%s1940_s16 + $0x180] sm:$0xff] %vm1010_vm3, %v2086_v45  ;;  %v949_v49 = vpop.f32.mrb[33].mxu1 }
 0x143   : > { %v1107_v51 = vadd.f32 %v1106_v46, %v1105_v40  ;;  %v822_v53 = vpop.f32.mrb[34].mxu0  ;;  %v2094_v54 = vpop.f32.mrb[34].mxu1 }
 0x144   : > { %v1303_v55 = vsel %vm1010_vm3, %v1224_v47, 0.0  ;;  %1028 = vst.msk [vmem:[%s1940_s16 + $0x88] sm:$0xff] %vm1010_vm3, %v822_v53  ;;  %v1108_v56 = vsel %vm1010_vm3, %v822_v53, 0.0  ;;  %v1225_v58 = vmul.f32 %v822_v53, %v822_v53  ;;  %v824_v59 = vpop.f32.mrb[35].mxu0  ;;  %1060 = vst.msk [vmem:[%s1940_s16 + $0x188] sm:$0xff] %vm1010_vm3, %v2094_v54  ;;  %v952_v60 = vpop.f32.mrb[35].mxu1 }
 0x145   : > { %v1304_v61 = vadd.f32 %v1303_v55, %v1302_v42  ;;  %v1109_v62 = vadd.f32 %v1108_v56, %v1107_v51 }
 0x146   : > { %v1305_v63 = vsel %vm1010_vm3, %v1225_v58, 0.0 }
 0x147   : > { %v1306_v1 = vadd.f32 %v1305_v63, %v1304_v61 }
 0x149   : > { %v827_v2 = vpop.f32.mrb[36].mxu0  ;;  %v2104_v3 = vpop.f32.mrb[36].mxu1 }
 0x14a   : > { %1029 = vst.msk [vmem:[%s1940_s16 + $0x90] sm:$0xff] %vm1010_vm3, %v827_v2  ;;  %v1110_v5 = vsel %vm1010_vm3, %v827_v2, 0.0  ;;  %v1226_v6 = vmul.f32 %v827_v2, %v827_v2  ;;  %v829_v7 = vpop.f32.mrb[37].mxu0  ;;  %1061 = vst.msk [vmem:[%s1940_s16 + $0x190] sm:$0xff] %vm1010_vm3, %v2104_v3  ;;  %v957_v9 = vpop.f32.mrb[37].mxu1 }
 0x14b   : > { %v1111_v10 = vadd.f32 %v1110_v5, %v1109_v62  ;;  %v830_v12 = vpop.f32.mrb[38].mxu0  ;;  %v2112_v13 = vpop.f32.mrb[38].mxu1 }
 0x14c   : > { %v1307_v14 = vsel %vm1010_vm3, %v1226_v6, 0.0  ;;  %1030 = vst.msk [vmem:[%s1940_s16 + $0x98] sm:$0xff] %vm1010_vm3, %v830_v12  ;;  %v1112_v15 = vsel %vm1010_vm3, %v830_v12, 0.0  ;;  %v1227_v17 = vmul.f32 %v830_v12, %v830_v12  ;;  %v832_v18 = vpop.f32.mrb[39].mxu0  ;;  %1062 = vst.msk [vmem:[%s1940_s16 + $0x198] sm:$0xff] %vm1010_vm3, %v2112_v13  ;;  %v960_v19 = vpop.f32.mrb[39].mxu1 }
 0x14d   : > { %v1308_v20 = vadd.f32 %v1307_v14, %v1306_v1  ;;  %v1113_v23 = vadd.f32 %v1112_v15, %v1111_v10 }
 0x14e   : > { %v1309_v25 = vsel %vm1010_vm3, %v1227_v17, 0.0 }
 0x14f   : > { %v1310_v26 = vadd.f32 %v1309_v25, %v1308_v20 }
 0x151   : > { %v835_v27 = vpop.f32.mrb[40].mxu0  ;;  %v2122_v28 = vpop.f32.mrb[40].mxu1 }
 0x152   : > { %1031 = vst.msk [vmem:[%s1940_s16 + $0xa0] sm:$0xff] %vm1010_vm3, %v835_v27  ;;  %v1114_v29 = vsel %vm1010_vm3, %v835_v27, 0.0  ;;  %v1228_v33 = vmul.f32 %v835_v27, %v835_v27  ;;  %v837_v34 = vpop.f32.mrb[41].mxu0  ;;  %1063 = vst.msk [vmem:[%s1940_s16 + $0x1a0] sm:$0xff] %vm1010_vm3, %v2122_v28  ;;  %v965_v35 = vpop.f32.mrb[41].mxu1 }
 0x153   : > { %v1115_v36 = vadd.f32 %v1114_v29, %v1113_v23  ;;  %v838_v37 = vpop.f32.mrb[42].mxu0  ;;  %v2130_v38 = vpop.f32.mrb[42].mxu1 }
 0x154   : > { %v1311_v40 = vsel %vm1010_vm3, %v1228_v33, 0.0  ;;  %1032 = vst.msk [vmem:[%s1940_s16 + $0xa8] sm:$0xff] %vm1010_vm3, %v838_v37  ;;  %v1116_v41 = vsel %vm1010_vm3, %v838_v37, 0.0  ;;  %v1229_v42 = vmul.f32 %v838_v37, %v838_v37  ;;  %v840_v43 = vpop.f32.mrb[43].mxu0  ;;  %1064 = vst.msk [vmem:[%s1940_s16 + $0x1a8] sm:$0xff] %vm1010_vm3, %v2130_v38  ;;  %v968_v46 = vpop.f32.mrb[43].mxu1 }
 0x155   : > { %v1312_v47 = vadd.f32 %v1311_v40, %v1310_v26  ;;  %v1117_v48 = vadd.f32 %v1116_v41, %v1115_v36 }
 0x156   : > { %v1313_v49 = vsel %vm1010_vm3, %v1229_v42, 0.0 }
 0x157   : > { %v1314_v51 = vadd.f32 %v1313_v49, %v1312_v47 }
 0x159   : > { %v843_v53 = vpop.f32.mrb[44].mxu0  ;;  %v2140_v55 = vpop.f32.mrb[44].mxu1 }
 0x15a   : > { %1033 = vst.msk [vmem:[%s1940_s16 + $0xb0] sm:$0xff] %vm1010_vm3, %v843_v53  ;;  %v1118_v56 = vsel %vm1010_vm3, %v843_v53, 0.0  ;;  %v1230_v58 = vmul.f32 %v843_v53, %v843_v53  ;;  %v845_v59 = vpop.f32.mrb[45].mxu0  ;;  %1065 = vst.msk [vmem:[%s1940_s16 + $0x1b0] sm:$0xff] %vm1010_vm3, %v2140_v55  ;;  %v973_v60 = vpop.f32.mrb[45].mxu1 }
 0x15b   : > { %v1119_v61 = vadd.f32 %v1118_v56, %v1117_v48  ;;  %v846_v62 = vpop.f32.mrb[46].mxu0  ;;  %v2148_v63 = vpop.f32.mrb[46].mxu1 }
 0x15c   : > { %v1315_v1 = vsel %vm1010_vm3, %v1230_v58, 0.0  ;;  %1034 = vst.msk [vmem:[%s1940_s16 + $0xb8] sm:$0xff] %vm1010_vm3, %v846_v62  ;;  %v1120_v2 = vsel %vm1010_vm3, %v846_v62, 0.0  ;;  %v1231_v5 = vmul.f32 %v846_v62, %v846_v62  ;;  %v848_v6 = vpop.f32.mrb[47].mxu0  ;;  %1066 = vst.msk [vmem:[%s1940_s16 + $0x1b8] sm:$0xff] %vm1010_vm3, %v2148_v63  ;;  %v976_v7 = vpop.f32.mrb[47].mxu1 }
 0x15d   : > { %v1316_v9 = vadd.f32 %v1315_v1, %v1314_v51  ;;  %v1121_v10 = vadd.f32 %v1120_v2, %v1119_v61 }
 0x15e   : > { %v1317_v12 = vsel %vm1010_vm3, %v1231_v5, 0.0 }
 0x15f   : > { %v1318_v14 = vadd.f32 %v1317_v12, %v1316_v9 }
 0x161   : > { %v851_v15 = vpop.f32.mrb[48].mxu0  ;;  %v2158_v17 = vpop.f32.mrb[48].mxu1 }
 0x162   : > { %1035 = vst.msk [vmem:[%s1940_s16 + $0xc0] sm:$0xff] %vm1010_vm3, %v851_v15  ;;  %v1122_v18 = vsel %vm1010_vm3, %v851_v15, 0.0  ;;  %v1232_v19 = vmul.f32 %v851_v15, %v851_v15  ;;  %v853_v20 = vpop.f32.mrb[49].mxu0  ;;  %1067 = vst.msk [vmem:[%s1940_s16 + $0x1c0] sm:$0xff] %vm1010_vm3, %v2158_v17  ;;  %v981_v23 = vpop.f32.mrb[49].mxu1 }
 0x163   : > { %v1123_v25 = vadd.f32 %v1122_v18, %v1121_v10  ;;  %v854_v26 = vpop.f32.mrb[50].mxu0  ;;  %v2166_v27 = vpop.f32.mrb[50].mxu1 }
 0x164   : > { %v1319_v29 = vsel %vm1010_vm3, %v1232_v19, 0.0  ;;  %1036 = vst.msk [vmem:[%s1940_s16 + $0xc8] sm:$0xff] %vm1010_vm3, %v854_v26  ;;  %v1124_v33 = vsel %vm1010_vm3, %v854_v26, 0.0  ;;  %v1233_v34 = vmul.f32 %v854_v26, %v854_v26  ;;  %v856_v35 = vpop.f32.mrb[51].mxu0  ;;  %1068 = vst.msk [vmem:[%s1940_s16 + $0x1c8] sm:$0xff] %vm1010_vm3, %v2166_v27  ;;  %v984_v36 = vpop.f32.mrb[51].mxu1 }
 0x165   : > { %v1320_v37 = vadd.f32 %v1319_v29, %v1318_v14  ;;  %v1125_v40 = vadd.f32 %v1124_v33, %v1123_v25 }
 0x166   : > { %v1321_v41 = vsel %vm1010_vm3, %v1233_v34, 0.0 }
 0x167   : > { %v1322_v42 = vadd.f32 %v1321_v41, %v1320_v37 }
 0x169   : > { %v859_v43 = vpop.f32.mrb[52].mxu0  ;;  %v2176_v46 = vpop.f32.mrb[52].mxu1 }
 0x16a   : > { %1037 = vst.msk [vmem:[%s1940_s16 + $0xd0] sm:$0xff] %vm1010_vm3, %v859_v43  ;;  %v1126_v47 = vsel %vm1010_vm3, %v859_v43, 0.0  ;;  %v1234_v48 = vmul.f32 %v859_v43, %v859_v43  ;;  %v861_v49 = vpop.f32.mrb[53].mxu0  ;;  %1069 = vst.msk [vmem:[%s1940_s16 + $0x1d0] sm:$0xff] %vm1010_vm3, %v2176_v46  ;;  %v989_v51 = vpop.f32.mrb[53].mxu1 }
 0x16b   : > { %v1127_v53 = vadd.f32 %v1126_v47, %v1125_v40  ;;  %v862_v56 = vpop.f32.mrb[54].mxu0  ;;  %v2184_v58 = vpop.f32.mrb[54].mxu1 }
 0x16c   : > { %v1323_v59 = vsel %vm1010_vm3, %v1234_v48, 0.0  ;;  %1038 = vst.msk [vmem:[%s1940_s16 + $0xd8] sm:$0xff] %vm1010_vm3, %v862_v56  ;;  %v1128_v60 = vsel %vm1010_vm3, %v862_v56, 0.0  ;;  %v1235_v61 = vmul.f32 %v862_v56, %v862_v56  ;;  %v864_v62 = vpop.f32.mrb[55].mxu0  ;;  %1070 = vst.msk [vmem:[%s1940_s16 + $0x1d8] sm:$0xff] %vm1010_vm3, %v2184_v58  ;;  %v992_v1 = vpop.f32.mrb[55].mxu1 }
 0x16d   : > { %v1324_v2 = vadd.f32 %v1323_v59, %v1322_v42  ;;  %v1129_v5 = vadd.f32 %v1128_v60, %v1127_v53  ;;  %v1240_v59 = vmul.f32 %v1942_v16, %v1942_v16 }
 0x16e   : > { %v1325_v6 = vsel %vm1010_vm3, %v1235_v61, 0.0 }
 0x16f   : > { %v1326_v7 = vadd.f32 %v1325_v6, %v1324_v2 }
 0x171   : > { %v867_v9 = vpop.f32.mrb[56].mxu0  ;;  %v2194_v10 = vpop.f32.mrb[56].mxu1 }
 0x172   : > { %1039 = vst.msk [vmem:[%s1940_s16 + $0xe0] sm:$0xff] %vm1010_vm3, %v867_v9  ;;  %v1130_v12 = vsel %vm1010_vm3, %v867_v9, 0.0  ;;  %v1236_v14 = vmul.f32 %v867_v9, %v867_v9  ;;  %v869_v15 = vpop.f32.mrb[57].mxu0  ;;  %1071 = vst.msk [vmem:[%s1940_s16 + $0x1e0] sm:$0xff] %vm1010_vm3, %v2194_v10  ;;  %v997_v18 = vpop.f32.mrb[57].mxu1  ;;  %v1241_v9 = vmul.f32 %v1949_v21, %v1949_v21 }
 0x173   : > { %v1131_v19 = vadd.f32 %v1130_v12, %v1129_v5  ;;  %v870_v20 = vpop.f32.mrb[58].mxu0  ;;  %v2202_v23 = vpop.f32.mrb[58].mxu1  ;;  %v1335_v18 = vsel %vm1010_vm3, %v1240_v59, 0.0 }
 0x174   : > { %v1327_v25 = vsel %vm1010_vm3, %v1236_v14, 0.0  ;;  %1040 = vst.msk [vmem:[%s1940_s16 + $0xe8] sm:$0xff] %vm1010_vm3, %v870_v20  ;;  %v1132_v26 = vsel %vm1010_vm3, %v870_v20, 0.0  ;;  %v1237_v29 = vmul.f32 %v870_v20, %v870_v20  ;;  %v872_v33 = vpop.f32.mrb[59].mxu0  ;;  %1072 = vst.msk [vmem:[%s1940_s16 + $0x1e8] sm:$0xff] %vm1010_vm3, %v2202_v23  ;;  %v1000_v34 = vpop.f32.mrb[59].mxu1  ;;  %v1242_v20 = vmul.f32 %v1960_v32, %v1960_v32 }
 0x175   : > { %v1328_v35 = vadd.f32 %v1327_v25, %v1326_v7  ;;  %v1133_v36 = vadd.f32 %v1132_v26, %v1131_v19  ;;  %v1138_v7 = vsel %vm1010_vm3, %v1942_v16, 0.0  ;;  %v1140_v19 = vsel %vm1010_vm3, %v1949_v21, 0.0 }
 0x176   : > { %v1329_v37 = vsel %vm1010_vm3, %v1237_v29, 0.0  ;;  %v1337_v29 = vsel %vm1010_vm3, %v1241_v9, 0.0  ;;  %v1142_v16 = vsel %vm1010_vm3, %v1960_v32, 0.0  ;;  %v1243_v33 = vmul.f32 %v1968_v39, %v1968_v39 }
 0x177   : > { %v1330_v40 = vadd.f32 %v1329_v37, %v1328_v35  ;;  %v1144_v21 = vsel %vm1010_vm3, %v1968_v39, 0.0  ;;  %v1244_v37 = vmul.f32 %v1978_v50, %v1978_v50  ;;  %v1146_v32 = vsel %vm1010_vm3, %v1978_v50, 0.0 }
 0x178   : > { %v1148_v39 = vsel %vm1010_vm3, %v1986_v57, 0.0  ;;  %v1150_v50 = vsel %vm1010_vm3, %v1996_v4, 0.0 }
 0x179   : > { %v875_v41 = vpop.f32.mrb[60].mxu0  ;;  %v2212_v42 = vpop.f32.mrb[60].mxu1 }
 0x17a   : > { %1041 = vst.msk [vmem:[%s1940_s16 + $0xf0] sm:$0xff] %vm1010_vm3, %v875_v41  ;;  %v1134_v43 = vsel %vm1010_vm3, %v875_v41, 0.0  ;;  %v1238_v47 = vmul.f32 %v875_v41, %v875_v41  ;;  %v877_v48 = vpop.f32.mrb[61].mxu0  ;;  %1073 = vst.msk [vmem:[%s1940_s16 + $0x1f0] sm:$0xff] %vm1010_vm3, %v2212_v42  ;;  %v1005_v49 = vpop.f32.mrb[61].mxu1 }
 0x17b   : > { %v1135_v51 = vadd.f32 %v1134_v43, %v1133_v36  ;;  %v878_v53 = vpop.f32.mrb[62].mxu0  ;;  %v2220_v56 = vpop.f32.mrb[62].mxu1  ;;  %v1339_v36 = vsel %vm1010_vm3, %v1242_v20, 0.0  ;;  %v1341_v43 = vsel %vm1010_vm3, %v1243_v33, 0.0  ;;  %v1250_v20 = vmul.f32 %v2032_v44, %v2032_v44 }
 0x17c   : > { %v1331_v60 = vsel %vm1010_vm3, %v1238_v47, 0.0  ;;  %1042 = vst.msk [vmem:[%s1940_s16 + $0xf8] sm:$0xff] %vm1010_vm3, %v878_v53  ;;  %v1136_v61 = vsel %vm1010_vm3, %v878_v53, 0.0  ;;  %v1239_v62 = vmul.f32 %v878_v53, %v878_v53  ;;  %v880_v1 = vpop.f32.mrb[63].mxu0  ;;  %1074 = vst.msk [vmem:[%s1940_s16 + $0x1f8] sm:$0xff] %vm1010_vm3, %v2220_v56  ;;  %v1008_v2 = vpop.f32.mrb[63].mxu1  ;;  %v1245_v47 = vmul.f32 %v1986_v57, %v1986_v57 }
 0x17d   : > { %v1332_v5 = vadd.f32 %v1331_v60, %v1330_v40  ;;  %v1137_v6 = vadd.f32 %v1136_v61, %v1135_v51  ;;  %v1343_v51 = vsel %vm1010_vm3, %v1244_v37, 0.0  ;;  %v1246_v53 = vmul.f32 %v1996_v4, %v1996_v4 }
 0x17e   : > { %v1333_v12 = vsel %vm1010_vm3, %v1239_v62, 0.0  ;;  %v1345_v61 = vsel %vm1010_vm3, %v1245_v47, 0.0  ;;  %v1247_v62 = vmul.f32 %v2004_v11, %v2004_v11  ;;  %v1152_v57 = vsel %vm1010_vm3, %v2004_v11, 0.0 }
 0x17f   : > { %v1139_v14 = vadd.f32 %v1138_v7, %v1137_v6  ;;  %v1334_v15 = vadd.f32 %v1333_v12, %v1332_v5  ;;  %v1347_v5 = vsel %vm1010_vm3, %v1246_v53, 0.0  ;;  %v1248_v6 = vmul.f32 %v2014_v24, %v2014_v24 }
 0x180   : > { %v1349_v12 = vsel %vm1010_vm3, %v1247_v62, 0.0  ;;  %v1154_v4 = vsel %vm1010_vm3, %v2014_v24, 0.0  ;;  %v1156_v11 = vsel %vm1010_vm3, %v2022_v31, 0.0  ;;  %v1158_v24 = vsel %vm1010_vm3, %v2032_v44, 0.0 }
 0x181   : > { %v1141_v25 = vadd.f32 %v1140_v19, %v1139_v14  ;;  %v1336_v26 = vadd.f32 %v1335_v18, %v1334_v15  ;;  %v1249_v14 = vmul.f32 %v2022_v31, %v2022_v31  ;;  %v1351_v19 = vsel %vm1010_vm3, %v1248_v6, 0.0 }
 0x182   : > { %v1160_v31 = vsel %vm1010_vm3, %v2040_v52, 0.0  ;;  %v1162_v44 = vsel %vm1010_vm3, %v2050_v0, 0.0  ;;  %v1255_v53 = vmul.f32 %v2076_v30, %v2076_v30 }
 0x183   : > { %v1143_v34 = vadd.f32 %v1142_v16, %v1141_v25  ;;  %v1338_v35 = vadd.f32 %v1337_v29, %v1336_v26  ;;  %v1353_v29 = vsel %vm1010_vm3, %v1249_v14, 0.0  ;;  %v1251_v16 = vmul.f32 %v2040_v52, %v2040_v52 }
 0x184   : > { %v1164_v52 = vsel %vm1010_vm3, %v2058_v8, 0.0 }
 0x185   : > { %v1145_v40 = vadd.f32 %v1144_v21, %v1143_v34  ;;  %v1340_v41 = vadd.f32 %v1339_v36, %v1338_v35  ;;  %v1355_v35 = vsel %vm1010_vm3, %v1250_v20, 0.0  ;;  %v1252_v36 = vmul.f32 %v2050_v0, %v2050_v0 }
 0x186   : > { %v1166_v0 = vsel %vm1010_vm3, %v2068_v22, 0.0  ;;  %v1260_v20 = vmul.f32 %v2122_v28, %v2122_v28 }
 0x187   : > { %v1147_v48 = vadd.f32 %v1146_v32, %v1145_v40  ;;  %v1342_v49 = vadd.f32 %v1341_v43, %v1340_v41  ;;  %v1357_v40 = vsel %vm1010_vm3, %v1251_v16, 0.0  ;;  %v1253_v41 = vmul.f32 %v2058_v8, %v2058_v8 }
 0x188   : > { %v1359_v47 = vsel %vm1010_vm3, %v1252_v36, 0.0  ;;  %v1168_v8 = vsel %vm1010_vm3, %v2076_v30, 0.0  ;;  %v1172_v30 = vsel %vm1010_vm3, %v2094_v54, 0.0 }
 0x189   : > { %v1149_v59 = vadd.f32 %v1148_v39, %v1147_v48  ;;  %v1344_v60 = vadd.f32 %v1343_v51, %v1342_v49  ;;  %v1254_v48 = vmul.f32 %v2068_v22, %v2068_v22  ;;  %v1361_v39 = vsel %vm1010_vm3, %v1253_v41, 0.0 }
 0x18a   : > { %v1170_v22 = vsel %vm1010_vm3, %v2086_v45, 0.0 }
 0x18b   : > { %v1151_v1 = vadd.f32 %v1150_v50, %v1149_v59  ;;  %v1346_v2 = vadd.f32 %v1345_v61, %v1344_v60  ;;  %v1363_v61 = vsel %vm1010_vm3, %v1254_v48, 0.0  ;;  %v1256_v50 = vmul.f32 %v2086_v45, %v2086_v45 }
 0x18c   : > { %v1174_v45 = vsel %vm1010_vm3, %v2104_v3, 0.0  ;;  %v1265_v48 = vmul.f32 %v2166_v27, %v2166_v27 }
 0x18d   : > { %v1153_v7 = vadd.f32 %v1152_v57, %v1151_v1  ;;  %v1348_v9 = vadd.f32 %v1347_v5, %v1346_v2  ;;  %v1365_v2 = vsel %vm1010_vm3, %v1255_v53, 0.0  ;;  %v1257_v5 = vmul.f32 %v2094_v54, %v2094_v54 }
 0x18e   : > { %v1176_v54 = vsel %vm1010_vm3, %v2112_v13, 0.0 }
 0x18f   : > { %v1350_v15 = vadd.f32 %v1349_v12, %v1348_v9  ;;  %v1155_v18 = vadd.f32 %v1154_v4, %v1153_v7  ;;  %v1367_v7 = vsel %vm1010_vm3, %v1256_v50, 0.0  ;;  %v1258_v9 = vmul.f32 %v2104_v3, %v2104_v3 }
 0x190   : > { %v1369_v14 = vsel %vm1010_vm3, %v1257_v5, 0.0  ;;  %v1178_v3 = vsel %vm1010_vm3, %v2122_v28, 0.0  ;;  %v1182_v28 = vsel %vm1010_vm3, %v2140_v55, 0.0 }
 0x191   : > { %v1157_v25 = vadd.f32 %v1156_v11, %v1155_v18  ;;  %v1352_v26 = vadd.f32 %v1351_v19, %v1350_v15  ;;  %v1259_v15 = vmul.f32 %v2112_v13, %v2112_v13  ;;  %v1371_v11 = vsel %vm1010_vm3, %v1258_v9, 0.0 }
 0x192   : > { %v1180_v13 = vsel %vm1010_vm3, %v2130_v38, 0.0  ;;  %v1196_v9 = vsel %vm1010_vm3, %v2202_v23, 0.0 }
 0x193   : > { %v1159_v33 = vadd.f32 %v1158_v24, %v1157_v25  ;;  %v1354_v34 = vadd.f32 %v1353_v29, %v1352_v26  ;;  %v1373_v29 = vsel %vm1010_vm3, %v1259_v15, 0.0  ;;  %v1261_v24 = vmul.f32 %v2130_v38, %v2130_v38 }
 0x194   : > { %v1184_v38 = vsel %vm1010_vm3, %v2148_v63, 0.0  ;;  %v1271_v15 = vmul.f32 %v2220_v56, %v2220_v56 }
 0x195   : > { %v1161_v21 = vadd.f32 %v1160_v31, %v1159_v33  ;;  %v1356_v37 = vadd.f32 %v1355_v35, %v1354_v34  ;;  %v1375_v34 = vsel %vm1010_vm3, %v1260_v20, 0.0  ;;  %v1262_v35 = vmul.f32 %v2140_v55, %v2140_v55 }
 0x196   : > { %v1186_v55 = vsel %vm1010_vm3, %v2158_v17, 0.0 }
 0x197   : > { %v1163_v43 = vadd.f32 %v1162_v44, %v1161_v21  ;;  %v1358_v32 = vadd.f32 %v1357_v40, %v1356_v37  ;;  %v1377_v21 = vsel %vm1010_vm3, %v1261_v24, 0.0  ;;  %v1263_v37 = vmul.f32 %v2148_v63, %v2148_v63 }
 0x198   : > { %v1379_v41 = vsel %vm1010_vm3, %v1262_v35, 0.0  ;;  %v1188_v63 = vsel %vm1010_vm3, %v2166_v27, 0.0  ;;  %v1192_v27 = vsel %vm1010_vm3, %v2184_v58, 0.0 }
 0x199   : > { %v1165_v49 = vadd.f32 %v1164_v52, %v1163_v43  ;;  %v1360_v51 = vadd.f32 %v1359_v47, %v1358_v32  ;;  %v1264_v43 = vmul.f32 %v2158_v17, %v2158_v17  ;;  %v1381_v52 = vsel %vm1010_vm3, %v1263_v37, 0.0 }
 0x19a   : > { %v1190_v17 = vsel %vm1010_vm3, %v2176_v46, 0.0 }
 0x19b   : > { %v1167_v59 = vadd.f32 %v1166_v0, %v1165_v49  ;;  %v1362_v60 = vadd.f32 %v1361_v39, %v1360_v51  ;;  %v1383_v39 = vsel %vm1010_vm3, %v1264_v43, 0.0  ;;  %v1266_v0 = vmul.f32 %v2176_v46, %v2176_v46 }
 0x19c   : > { %v1194_v46 = vsel %vm1010_vm3, %v2194_v10, 0.0 }
 0x19d   : > { %v1169_v62 = vadd.f32 %v1168_v8, %v1167_v59  ;;  %v1364_v1 = vadd.f32 %v1363_v61, %v1362_v60  ;;  %v1385_v60 = vsel %vm1010_vm3, %v1265_v48, 0.0  ;;  %v1267_v61 = vmul.f32 %v2184_v58, %v2184_v58 }
 0x19f   : > { %v1171_v57 = vadd.f32 %v1170_v22, %v1169_v62  ;;  %v1366_v6 = vadd.f32 %v1365_v2, %v1364_v1  ;;  %v1387_v62 = vsel %vm1010_vm3, %v1266_v0, 0.0  ;;  %v1268_v1 = vmul.f32 %v2194_v10, %v2194_v10 }
 0x1a0   : > { %v1389_v5 = vsel %vm1010_vm3, %v1267_v61, 0.0 }
 0x1a1   : > { %v1368_v12 = vadd.f32 %v1367_v7, %v1366_v6  ;;  %v1173_v4 = vadd.f32 %v1172_v30, %v1171_v57  ;;  %v1269_v57 = vmul.f32 %v2202_v23, %v2202_v23  ;;  %v1270_v6 = vmul.f32 %v2212_v42, %v2212_v42 }
 0x1a2   : > { %v1391_v58 = vsel %vm1010_vm3, %v1268_v1, 0.0 }
 0x1a3   : > { %v1370_v18 = vadd.f32 %v1369_v14, %v1368_v12  ;;  %v1175_v19 = vadd.f32 %v1174_v45, %v1173_v4  ;;  %v1198_v12 = vsel %vm1010_vm3, %v2212_v42, 0.0  ;;  %v1393_v10 = vsel %vm1010_vm3, %v1269_v57, 0.0 }
 0x1a4   : > { %v1395_v45 = vsel %vm1010_vm3, %v1270_v6, 0.0  ;;  %v1397_v42 = vsel %vm1010_vm3, %v1271_v15, 0.0 }
 0x1a5   : > { %v1372_v25 = vadd.f32 %v1371_v11, %v1370_v18  ;;  %v1177_v26 = vadd.f32 %v1176_v54, %v1175_v19  ;;  %v1200_v11 = vsel %vm1010_vm3, %v2220_v56, 0.0 }
 0x1a7   : > { %v1374_v16 = vadd.f32 %v1373_v29, %v1372_v25  ;;  %v1179_v33 = vadd.f32 %v1178_v3, %v1177_v26 }
 0x1a9   : > { %v1376_v31 = vadd.f32 %v1375_v34, %v1374_v16  ;;  %v1181_v36 = vadd.f32 %v1180_v13, %v1179_v33 }
 0x1ab   : > { %v1378_v40 = vadd.f32 %v1377_v21, %v1376_v31  ;;  %v1183_v44 = vadd.f32 %v1182_v28, %v1181_v36 }
 0x1ad   : > { %v1380_v32 = vadd.f32 %v1379_v41, %v1378_v40  ;;  %v1185_v47 = vadd.f32 %v1184_v38, %v1183_v44 }
 0x1af   : > { %v1382_v49 = vadd.f32 %v1381_v52, %v1380_v32  ;;  %v1187_v51 = vadd.f32 %v1186_v55, %v1185_v47 }
 0x1b1   : > { %v1384_v53 = vadd.f32 %v1383_v39, %v1382_v49  ;;  %v1189_v59 = vadd.f32 %v1188_v63, %v1187_v51 }
 0x1b3   : > { %v1386_v8 = vadd.f32 %v1385_v60, %v1384_v53  ;;  %v1191_v50 = vadd.f32 %v1190_v17, %v1189_v59 }
 0x1b5   : > { %v1388_v2 = vadd.f32 %v1387_v62, %v1386_v8  ;;  %v1193_v22 = vadd.f32 %v1192_v27, %v1191_v50 }
 0x1b7   : > { %v1390_v7 = vadd.f32 %v1389_v5, %v1388_v2  ;;  %v1195_v30 = vadd.f32 %v1194_v46, %v1193_v22 }
 0x1b9   : > { %v1392_v4 = vadd.f32 %v1391_v58, %v1390_v7  ;;  %v1197_v14 = vadd.f32 %v1196_v9, %v1195_v30 }
 0x1bb   : > { %v1394_v18 = vadd.f32 %v1393_v10, %v1392_v4  ;;  %v1199_v19 = vadd.f32 %v1198_v12, %v1197_v14 }
 0x1bd   : > { %v1396_v23 = vadd.f32 %v1395_v45, %v1394_v18  ;;  %v1201_v54 = vadd.f32 %v1200_v11, %v1199_v19 }
 0x1bf   : > { %v1202_v20 = vrot.slane %v1201_v54, 4  ;;  %v1398_v25 = vadd.f32 %v1397_v42, %v1396_v23 }
 0x1c1   : > { %v1203_v26 = vadd.f32 %v1202_v20, %v1201_v54  ;;  %v1399_v29 = vrot.slane %v1398_v25, 4 }
 0x1c3   : > { %v1204_v3 = vrot.slane %v1203_v26, 2  ;;  %v1400_v24 = vadd.f32 %v1399_v29, %v1398_v25 }
 0x1c5   : > { %v1205_v16 = vadd.f32 %v1204_v3, %v1203_v26  ;;  %v1401_v33 = vrot.slane %v1400_v24, 2 }
 0x1c7   : > { %v1206_v34 = vrot.slane %v1205_v16, 1  ;;  %v1402_v13 = vadd.f32 %v1401_v33, %v1400_v24 }
 0x1c9   : > { %v1403_v35 = vrot.slane %v1402_v13, 1  ;;  %v1207_v31 = vadd.f32 %v1206_v34, %v1205_v16 }
 0x1cb   : > { %v1404_v36 = vadd.f32 %v1403_v35, %v1402_v13  ;;  %v1405_v28 = vsel %vm1010_vm3, %v1207_v31, 0.0 }
 0x1cd   : > { %v1406_v56 = vsel %vm1010_vm3, %v1404_v36, 0.0 }
 0x1ce   : > { %v1408_v21 = vrot.slane %v1406_v56, 7 }
 0x1d0   : > { %v1410_v37 = vsel %vm714_vm1, %v1405_v28, %v1408_v21 }
 0x1d1   : > { %v1411_v40 = vsel %vm715_vm2, %v1410_v37, 0.0 }
 0x1d2   : > { %1412 = vst [vmem:[%s187_s20] sm:$0xff] %v1411_v40 }
 0x1d3 PF: > { %s14_s12 = sadd.s32 1, %s1762_s12  }
 0x1d4   : > { %p11_p5 = scmp.ge.s32.totalorder %s14_s12, 6  }
 0x1d6   :  { %13 = sbr.rel (!%p11_p5) target bundleno = 1 (0x1), region = 70 }

// kernel: base_model_autoencoder_forward.7
= control target key start
LH: loop header
LB: loop body
LE: loop exit
PB: predicated region body
PF: predicated region fallthrough
CT: control target
= control target key end

     0   :  { %s1773_s21 = smov 0   ;;  %s2826_s0 = inlined_call_operand.vmem [shape: f32[2,17,17,64], index: 0, kind: input, shape index: {}]   ;;  %s2827_s1 = inlined_call_operand.vmem [shape: f32[2,17,16,64], index: 1, kind: input, shape index: {}]   ;;  %s2828_s2 = inlined_call_operand.vmem [shape: f32[2,16,17,64], index: 2, kind: input, shape index: {}]   ;;  %s2829_s3 = inlined_call_operand.vmem [shape: f32[2,16,16,64], index: 3, kind: input, shape index: {}]   ;;  %s2830_s4 = inlined_call_operand.vmem [shape: f32[1,64], index: 4, kind: input, shape index: {}]   ;;  %s2831_s5 = inlined_call_operand.vmem [shape: f32[1,64], index: 5, kind: input, shape index: {}]   ;;  %s2832_s6 = inlined_call_operand.vmem [shape: f32[2,16,16,64], index: 6, kind: output, shape index: {}]  }
   0x1 LB: > { %s1697_s22 = sadd.s32 4294967295, %s1736_s21   ;;  %p1701_p0 = scmp.ge.s32.totalorder %s1736_s21, 1  ;;  %s1736_s21 = sphi %s1773_s21, %s16_s21  }
   0x2   : > { %p242_p1 = scmp.lt.s32.totalorder %s1736_s21, 3 }
   0x4   : > { %p243_p2 = pnand %p1701_p0, %p242_p1 }
   0x5   : > { %p287_p3 = scmp.lt.s32.totalorder (!%p243_p2), %s1697_s22, 1  ;;  %v1788_v0 = vld [vmem:[%s2830_s4] ss:$0 sm:$0xff] (!%p243_p2)  ;;  %vm1066_vm0 = vcmask (!%p243_p2), 1046528   ;;  %vm1573_vm1 = vcmask (!%p243_p2), 523264  }
   0x6   : > { %246 = sbr.rel (%p243_p2) target bundleno = 257 (0x101), region = 44  ;;  %v1801_v1 = vld [vmem:[%s2831_s5] ss:$0 sm:$0xff] (!%p243_p2) }
   0xd   : > { %s2834_s22 = smov (!%p287_p3, %s1697_s22), 1 }
   0xe   : > { %s1715_s23 = smul.u32 408, %s2834_s22  ;;  %s1713_s24 = sshll.u32 %s2834_s22, 8 }
   0xf   : > { %s1716_s27 = smul.u32 272, %s2834_s22  ;;  %s1796_s30 = scalar_lea.vmem %s2829_s3, %s1713_s24 }
  0x10   : > { %s1806_s11 = scalar_lea.vmem %s2826_s0, %s1715_s23  ;;  %s1717_s12 = smul.u32 384, %s2834_s22  ;;  %v858_v2 = vld [vmem:[%s1796_s30] sm:$0xff]  ;;  %v860_v3 = vld [vmem:[%s1796_s30 + $0x10] sm:$0xff]  ;;  %v859_v4 = vld [vmem:[%s1796_s30 + $0x8] sm:$0xff] }
  0x11   : > { %s1815_s15 = scalar_lea.vmem %s2827_s1, %s1716_s27  ;;  %v314_v5 = vld [vmem:[%s1806_s11] sm:$0xff]  ;;  %v315_v6 = vld [vmem:[%s1806_s11 + $0x8] sm:$0xff]  ;;  %v317_v7 = vld [vmem:[%s1806_s11 + $0x18] sm:$0xff]  ;;  %v890_v8 = vmul.f32 %v1788_v0, %v858_v2  ;;  %v892_v15 = vmul.f32 %v1788_v0, %v860_v3  ;;  %v891_v29 = vmul.f32 %v1788_v0, %v859_v4  ;;  %s1936_s23 = scalar_lea.vmem %s2832_s6, %s1713_s24 }
  0x12   : > { %s1824_s18 = scalar_lea.vmem %s2828_s2, %s1717_s12  ;;  %v318_v9 = vld [vmem:[%s1806_s11 + $0x20] sm:$0xff]  ;;  %v371_v10 = vmul.f32 %v1788_v0, %v314_v5  ;;  %v372_v11 = vmul.f32 %v1788_v0, %v315_v6  ;;  %v374_v12 = vmul.f32 %v1788_v0, %v317_v7  ;;  %v532_v14 = vld [vmem:[%s1815_s15 + $0x10] sm:$0xff]  ;;  %v319_v43 = vld [vmem:[%s1806_s11 + $0x28] sm:$0x1] }
  0x13   : > { %v530_v13 = vld [vmem:[%s1815_s15] sm:$0xff]  ;;  %v375_v16 = vmul.f32 %v1788_v0, %v318_v9  ;;  %v566_v18 = vmul.f32 %v1788_v0, %v532_v14  ;;  %v667_v20 = vld [vmem:[%s1824_s18 + $0x8] sm:$0xff]  ;;  %v922_v21 = vadd.f32 %v1801_v1, %v890_v8  ;;  %v316_v38 = vld [vmem:[%s1806_s11 + $0x10] sm:$0x1]  ;;  %v924_v40 = vadd.f32 %v1801_v1, %v892_v15 }
  0x14   : > { %v564_v17 = vmul.f32 %v1788_v0, %v530_v13  ;;  %v666_v19 = vld [vmem:[%s1824_s18] sm:$0xff]  ;;  %v428_v22 = vadd.f32 %v1801_v1, %v371_v10  ;;  %v1841_v23 = vadd.f32 %v1801_v1, %v372_v11  ;;  %v431_v24 = vadd.f32 %v1801_v1, %v374_v12  ;;  %v531_v48 = vld [vmem:[%s1815_s15 + $0x8] sm:$0xff]  ;;  %v533_v53 = vld [vmem:[%s1815_s15 + $0x18] sm:$0xff] }
  0x15   : > { %v714_v25 = vmul.f32 %v1788_v0, %v666_v19  ;;  %v432_v26 = vadd.f32 %v1801_v1, %v375_v16  ;;  %v715_v28 = vmul.f32 %v1788_v0, %v667_v20  ;;  %v1856_v35 = vadd.f32 %v1801_v1, %v566_v18  ;;  %v668_v54 = vld [vmem:[%s1824_s18 + $0x10] sm:$0x1]  ;;  %v861_v63 = vld [vmem:[%s1796_s30 + $0x18] sm:$0xff] }
  0x16   : > { %v598_v27 = vadd.f32 %v1801_v1, %v564_v17  ;;  %v479_v30 = vmax.f32 %v428_v22, 0.0  ;;  %v480_v31 = vmax.f32 %v1841_v23, 0.0  ;;  %v482_v32 = vmax.f32 %v431_v24, 0.0  ;;  %v320_v14 = vld [vmem:[%s1806_s11 + $0x30] sm:$0xff]  ;;  %v321_v19 = vld [vmem:[%s1806_s11 + $0x38] sm:$0xff] }
  0x17   : > { %v1851_v33 = vadd.f32 %v1801_v1, %v714_v25  ;;  %v1853_v34 = vmax.f32 %v432_v26, 0.0  ;;  %v1859_v37 = vadd.f32 %v1801_v1, %v715_v28  ;;  %v954_v41 = vmax.f32 %v922_v21, 0.0  ;;  %v534_v25 = vld [vmem:[%s1815_s15 + $0x20] sm:$0xff] }
  0x18   : > { %v632_v36 = vmax.f32 %v598_v27, 0.0  ;;  %v1067_v42 = vrot.slane %v479_v30, 1  ;;  %v1068_v45 = vrot.slane %v480_v31, 1  ;;  %v1072_v46 = vrot.slane %v482_v32, 1 }
  0x19   : > { %v810_v39 = vmax.f32 %v1851_v33, 0.0  ;;  %v811_v44 = vmax.f32 %v1859_v37, 0.0  ;;  %v1073_v47 = vrot.slane %v1853_v34, 1  ;;  %v956_v49 = vmax.f32 %v924_v40, 0.0 }
  0x1a   : > { %v986_v50 = vmax.f32 %v954_v41, %v479_v30  ;;  %v373_v52 = vmul.f32 %v1788_v0, %v316_v38  ;;  %v634_v55 = vmax.f32 %v1856_v35, 0.0  ;;  %v1069_v56 = vsel %vm1066_vm0, %v1067_v42, %v1068_v45 }
  0x1b   : > { %v1429_v51 = vrot.slane %v810_v39, 1  ;;  %v1430_v57 = vrot.slane %v811_v44, 1  ;;  %v376_v58 = vmul.f32 %v1788_v0, %v319_v43  ;;  %v1880_v59 = vmax.f32 %v956_v49, %v482_v32 }
  0x1c   : > { %v1179_v60 = vmax.f32 %v986_v50, %v1069_v56  ;;  %v430_v61 = vadd.f32 %v1801_v1, %v373_v52  ;;  %v565_v62 = vmul.f32 %v1788_v0, %v531_v48  ;;  %v1886_v2 = vsel %vm1066_vm0, %v1072_v46, %v1073_v47  ;;  %v670_v48 = vld [vmem:[%s1824_s18 + $0x20] sm:$0xff] }
  0x1d   : > { %v433_v3 = vadd.f32 %v1801_v1, %v376_v58  ;;  %v567_v4 = vmul.f32 %v1788_v0, %v533_v53  ;;  %v716_v5 = vmul.f32 %v1788_v0, %v668_v54  ;;  %v1431_v7 = vsel %vm1066_vm0, %v1429_v51, %v1430_v57  ;;  %v862_v52 = vld [vmem:[%s1796_s30 + $0x20] sm:$0xff] }
  0x1e   : > { %v1211_v6 = vmax.f32 %v1179_v60, %v482_v32  ;;  %v481_v8 = vmax.f32 %v430_v61, 0.0  ;;  %v1893_v9 = vadd.f32 %v1801_v1, %v565_v62  ;;  %v893_v13 = vmul.f32 %v1788_v0, %v861_v63  ;;  %v669_v32 = vld [vmem:[%s1824_s18 + $0x18] sm:$0xff]  ;;  %v535_v62 = vld [vmem:[%s1815_s15 + $0x28] sm:$0xff] }
  0x1f   : > { %v484_v10 = vmax.f32 %v433_v3, 0.0  ;;  %v1896_v11 = vadd.f32 %v1801_v1, %v567_v4  ;;  %v764_v12 = vadd.f32 %v1801_v1, %v716_v5  ;;  %v1181_v15 = vmax.f32 %v1880_v59, %v1886_v2 }
  0x20   : > { %v1253_v16 = vmax.f32 %v1211_v6, %v1886_v2  ;;  %v923_v17 = vadd.f32 %v1801_v1, %v891_v29  ;;  %v1070_v18 = vrot.slane %v481_v8, 1  ;;  %v633_v20 = vmax.f32 %v1893_v9, 0.0  ;;  %v671_v9 = vld [vmem:[%s1824_s18 + $0x28] sm:$0x1] }
  0x21   : > { %v812_v21 = vmax.f32 %v764_v12, 0.0  ;;  %v925_v22 = vadd.f32 %v1801_v1, %v893_v13  ;;  %v1075_v24 = vrot.slane %v484_v10, 1  ;;  %v635_v27 = vmax.f32 %v1896_v11, 0.0  ;;  %v863_v10 = vld [vmem:[%s1796_s30 + $0x28] sm:$0xff] }
  0x22   : > { %v1285_v26 = vmax.f32 %v1253_v16, %v632_v36  ;;  %v955_v28 = vmax.f32 %v923_v17, 0.0  ;;  %v377_v30 = vmul.f32 %v1788_v0, %v320_v14  ;;  %v1071_v29 = vsel %vm1066_vm0, %v1068_v45, %v1070_v18 }
  0x23   : > { %v957_v38 = vmax.f32 %v925_v22, 0.0  ;;  %v1432_v40 = vrot.slane %v812_v21, 1  ;;  %v378_v41 = vmul.f32 %v1788_v0, %v321_v19  ;;  %v568_v46 = vmul.f32 %v1788_v0, %v534_v25 }
  0x24   : > { %v1317_v42 = vmax.f32 %v1285_v26, %v634_v55  ;;  %v987_v36 = vmax.f32 %v955_v28, %v480_v31  ;;  %v434_v43 = vadd.f32 %v1801_v1, %v377_v30  ;;  %v1076_v45 = vsel %vm1066_vm0, %v1073_v47, %v1075_v24  ;;  %v323_v30 = vld [vmem:[%s1806_s11 + $0x48] sm:$0xff] }
  0x25   : > { %v989_v49 = vmax.f32 %v957_v38, %v1853_v34  ;;  %v435_v50 = vadd.f32 %v1801_v1, %v378_v41  ;;  %v717_v51 = vmul.f32 %v1788_v0, %v669_v32  ;;  %v1929_v53 = vsel %vm1066_vm0, %v1430_v57, %v1432_v40  ;;  %v324_v41 = vld [vmem:[%s1806_s11 + $0x50] sm:$0xff] }
  0x26   : > { %v1349_v23 = vmax.f32 %v1317_v42, %v810_v39  ;;  %v1180_v31 = vmax.f32 %v987_v36, %v1071_v29  ;;  %v485_v54 = vmax.f32 %v434_v43, 0.0  ;;  %v1939_v56 = vadd.f32 %v1801_v1, %v568_v46  ;;  %v322_v39 = vld [vmem:[%s1806_s11 + $0x40] sm:$0x1] }
  0x27   : > { %v486_v47 = vmax.f32 %v435_v50, 0.0  ;;  %v718_v58 = vmul.f32 %v1788_v0, %v670_v48  ;;  %v765_v33 = vadd.f32 %v1801_v1, %v717_v51  ;;  %v1182_v59 = vmax.f32 %v989_v49, %v1076_v45  ;;  %v672_v50 = vld [vmem:[%s1824_s18 + $0x30] sm:$0xff] }
  0x28   : > { %v1541_v57 = vmax.f32 %v1349_v23, %v1431_v7  ;;  %v1212_v60 = vmax.f32 %v1180_v31, %v1853_v34  ;;  %v894_v61 = vmul.f32 %v1788_v0, %v862_v52  ;;  %v1077_v3 = vrot.slane %v485_v54, 1 }
  0x29   : > { %v1948_v63 = vadd.f32 %v1801_v1, %v718_v58  ;;  %v813_v2 = vmax.f32 %v765_v33, 0.0  ;;  %v1078_v4 = vrot.slane %v486_v47, 1  ;;  %v1213_v8 = vmax.f32 %v1181_v15, %v485_v54  ;;  %v673_v33 = vld [vmem:[%s1824_s18 + $0x38] sm:$0xff] }
  0x2a   : > { %1574 = vst.msk [vmem:[%s1936_s23] sm:$0xff] %vm1573_vm1, %v1541_v57  ;;  %v1254_v5 = vmax.f32 %v1212_v60, %v1076_v45  ;;  %v926_v6 = vadd.f32 %v1801_v1, %v894_v61  ;;  %v379_v7 = vmul.f32 %v1788_v0, %v322_v39  ;;  %v569_v14 = vmul.f32 %v1788_v0, %v535_v62  ;;  %v536_v45 = vld [vmem:[%s1815_s15 + $0x30] sm:$0xff] }
  0x2b   : > { %v814_v34 = vmax.f32 %v1948_v63, 0.0  ;;  %v1079_v12 = vsel %vm1066_vm0, %v1077_v3, %v1078_v4  ;;  %v1434_v13 = vrot.slane %v813_v2, 1  ;;  %v636_v15 = vmax.f32 %v1939_v56, 0.0  ;;  %v864_v60 = vld [vmem:[%s1796_s30 + $0x30] sm:$0xff] }
  0x2c   : > { %v1286_v16 = vmax.f32 %v1254_v5, %v633_v20  ;;  %v958_v17 = vmax.f32 %v926_v6, 0.0  ;;  %v1255_v18 = vmax.f32 %v1213_v8, %v1079_v12  ;;  %v436_v19 = vadd.f32 %v1801_v1, %v379_v7  ;;  %v325_v8 = vld [vmem:[%s1806_s11 + $0x58] sm:$0x1] }
  0x2d   : > { %v1435_v21 = vrot.slane %v814_v34, 1  ;;  %v719_v22 = vmul.f32 %v1788_v0, %v671_v9  ;;  %v895_v24 = vmul.f32 %v1788_v0, %v863_v10  ;;  %v1972_v38 = vadd.f32 %v1801_v1, %v569_v14  ;;  %v537_v7 = vld [vmem:[%s1815_s15 + $0x38] sm:$0xff] }
  0x2e   : > { %v1318_v25 = vmax.f32 %v1286_v16, %v635_v27  ;;  %v990_v26 = vmax.f32 %v958_v17, %v485_v54  ;;  %v1287_v20 = vmax.f32 %v1255_v18, %v634_v55  ;;  %v487_v28 = vmax.f32 %v436_v19, 0.0 }
  0x2f   : > { %v1436_v32 = vsel %vm1066_vm0, %v1434_v13, %v1435_v21  ;;  %v767_v29 = vadd.f32 %v1801_v1, %v719_v22  ;;  %v927_v40 = vadd.f32 %v1801_v1, %v895_v24  ;;  %v1214_v48 = vmax.f32 %v1182_v59, %v486_v47  ;;  %v865_v24 = vld [vmem:[%s1796_s30 + $0x38] sm:$0xff] }
  0x30   : > { %v1350_v42 = vmax.f32 %v1318_v25, %v811_v44  ;;  %v1183_v36 = vmax.f32 %v990_v26, %v1079_v12  ;;  %v1319_v35 = vmax.f32 %v1287_v20, %v636_v15  ;;  %v1080_v55 = vrot.slane %v487_v28, 1  ;;  %v674_v12 = vld [vmem:[%s1824_s18 + $0x40] sm:$0x1] }
  0x31   : > { %v815_v43 = vmax.f32 %v767_v29, 0.0  ;;  %v959_v46 = vmax.f32 %v927_v40, 0.0  ;;  %v380_v49 = vmul.f32 %v1788_v0, %v323_v30  ;;  %v381_v44 = vmul.f32 %v1788_v0, %v324_v41 }
  0x32   : > { %v1542_v51 = vmax.f32 %v1350_v42, %v1929_v53  ;;  %v1351_v52 = vmax.f32 %v1319_v35, %v813_v2  ;;  %v1081_v37 = vsel %vm1066_vm0, %v1078_v4, %v1080_v55  ;;  %v570_v53 = vmul.f32 %v1788_v0, %v536_v45 }
  0x33   : > { %v991_v23 = vmax.f32 %v959_v46, %v486_v47  ;;  %v1256_v31 = vmax.f32 %v1214_v48, %v1081_v37  ;;  %v1437_v54 = vrot.slane %v815_v43, 1  ;;  %v437_v58 = vadd.f32 %v1801_v1, %v380_v49  ;;  %v327_v48 = vld [vmem:[%s1806_s11 + $0x68] sm:$0xff]  ;;  %v538_v49 = vld [vmem:[%s1815_s15 + $0x40] sm:$0xff] }
  0x34   : > { %1575 = vst.msk [vmem:[%s1936_s23 + $0x8] sm:$0xff] %vm1573_vm1, %v1542_v51  ;;  %v1543_v39 = vmax.f32 %v1351_v52, %v1436_v32  ;;  %v438_v57 = vadd.f32 %v1801_v1, %v381_v44  ;;  %v720_v59 = vmul.f32 %v1788_v0, %v672_v50  ;;  %v637_v47 = vmax.f32 %v1972_v38, 0.0  ;;  %v677_v38 = vld [vmem:[%s1824_s18 + $0x58] sm:$0x1] }
  0x35   : > { %v1184_v61 = vmax.f32 %v991_v23, %v1081_v37  ;;  %v1288_v62 = vmax.f32 %v1256_v31, %v635_v27  ;;  %v488_v2 = vmax.f32 %v437_v58, 0.0  ;;  %v1438_v3 = vsel %vm1066_vm0, %v1435_v21, %v1437_v54  ;;  %v675_v37 = vld [vmem:[%s1824_s18 + $0x48] sm:$0xff] }
  0x36   : > { %1576 = vst.msk [vmem:[%s1936_s23 + $0x10] sm:$0xff] %vm1573_vm1, %v1543_v39  ;;  %v489_v4 = vmax.f32 %v438_v57, 0.0  ;;  %v721_v5 = vmul.f32 %v1788_v0, %v673_v33  ;;  %v768_v6 = vadd.f32 %v1801_v1, %v720_v59  ;;  %v896_v10 = vmul.f32 %v1788_v0, %v864_v60  ;;  %v676_v39 = vld [vmem:[%s1824_s18 + $0x50] sm:$0xff] }
  0x37   : > { %v1320_v9 = vmax.f32 %v1288_v62, %v637_v47  ;;  %v1082_v11 = vrot.slane %v488_v2, 1  ;;  %v1215_v27 = vmax.f32 %v1183_v36, %v488_v2  ;;  %v2010_v13 = vadd.f32 %v1801_v1, %v570_v53  ;;  %v326_v36 = vld [vmem:[%s1806_s11 + $0x60] sm:$0xff] }
  0x38   : > { %v2013_v14 = vadd.f32 %v1801_v1, %v721_v5  ;;  %v816_v16 = vmax.f32 %v768_v6, 0.0  ;;  %v1083_v17 = vrot.slane %v489_v4, 1  ;;  %v928_v19 = vadd.f32 %v1801_v1, %v896_v10  ;;  %v866_v5 = vld [vmem:[%s1796_s30 + $0x40] sm:$0xff] }
  0x39   : > { %v1352_v18 = vmax.f32 %v1320_v9, %v814_v34  ;;  %v382_v21 = vmul.f32 %v1788_v0, %v325_v8  ;;  %v571_v22 = vmul.f32 %v1788_v0, %v537_v7  ;;  %v722_v28 = vmul.f32 %v1788_v0, %v674_v12  ;;  %v328_v12 = vld [vmem:[%s1806_s11 + $0x70] sm:$0x1] }
  0x3a   : > { %v817_v25 = vmax.f32 %v2013_v14, 0.0  ;;  %v1084_v26 = vsel %vm1066_vm0, %v1082_v11, %v1083_v17  ;;  %v1439_v20 = vrot.slane %v816_v16, 1  ;;  %v960_v34 = vmax.f32 %v928_v19, 0.0 }
  0x3b   : > { %v1544_v63 = vmax.f32 %v1352_v18, %v1438_v3  ;;  %v1257_v30 = vmax.f32 %v1215_v27, %v1084_v26  ;;  %v439_v32 = vadd.f32 %v1801_v1, %v382_v21  ;;  %v2028_v40 = vadd.f32 %v1801_v1, %v571_v22 }
  0x3c   : > { %v1440_v29 = vrot.slane %v817_v25, 1  ;;  %v770_v41 = vadd.f32 %v1801_v1, %v722_v28  ;;  %v897_v42 = vmul.f32 %v1788_v0, %v865_v24  ;;  %v638_v35 = vmax.f32 %v2010_v13, 0.0 }
  0x3d   : > { %1577 = vst.msk [vmem:[%s1936_s23 + $0x18] sm:$0xff] %vm1573_vm1, %v1544_v63  ;;  %v992_v55 = vmax.f32 %v960_v34, %v488_v2  ;;  %v1289_v43 = vmax.f32 %v1257_v30, %v636_v15  ;;  %v490_v46 = vmax.f32 %v439_v32, 0.0  ;;  %v1216_v52 = vmax.f32 %v1184_v61, %v489_v4  ;;  %v867_v30 = vld [vmem:[%s1796_s30 + $0x48] sm:$0xff] }
  0x3e   : > { %v1441_v45 = vsel %vm1066_vm0, %v1439_v20, %v1440_v29  ;;  %v818_v50 = vmax.f32 %v770_v41, 0.0  ;;  %v929_v51 = vadd.f32 %v1801_v1, %v897_v42  ;;  %v639_v23 = vmax.f32 %v2028_v40, 0.0  ;;  %v680_v40 = vld [vmem:[%s1824_s18 + $0x70] sm:$0x1] }
  0x3f   : > { %v1321_v44 = vmax.f32 %v1289_v43, %v638_v35  ;;  %v1085_v31 = vrot.slane %v490_v46, 1  ;;  %v383_v56 = vmul.f32 %v1788_v0, %v326_v36  ;;  %v384_v58 = vmul.f32 %v1788_v0, %v327_v48 }
  0x40   : > { %v961_v15 = vmax.f32 %v929_v51, 0.0  ;;  %v1442_v54 = vrot.slane %v818_v50, 1  ;;  %v572_v33 = vmul.f32 %v1788_v0, %v538_v49  ;;  %v723_v60 = vmul.f32 %v1788_v0, %v675_v37 }
  0x41   : > { %v1353_v57 = vmax.f32 %v1321_v44, %v816_v16  ;;  %v1086_v53 = vsel %vm1066_vm0, %v1083_v17, %v1085_v31  ;;  %v440_v59 = vadd.f32 %v1801_v1, %v383_v56  ;;  %v1185_v61 = vmax.f32 %v992_v55, %v1084_v26  ;;  %v539_v16 = vld [vmem:[%s1815_s15 + $0x48] sm:$0xff]  ;;  %v330_v44 = vld [vmem:[%s1806_s11 + $0x80] sm:$0xff]  ;;  %v540_v31 = vld [vmem:[%s1815_s15 + $0x50] sm:$0xff] }
  0x42   : > { %v993_v62 = vmax.f32 %v961_v15, %v489_v4  ;;  %v1258_v2 = vmax.f32 %v1216_v52, %v1086_v53  ;;  %v441_v3 = vadd.f32 %v1801_v1, %v384_v58  ;;  %v1443_v8 = vsel %vm1066_vm0, %v1440_v29, %v1442_v54 }
  0x43   : > { %v1545_v6 = vmax.f32 %v1353_v57, %v1441_v45  ;;  %v491_v7 = vmax.f32 %v440_v59, 0.0  ;;  %v724_v9 = vmul.f32 %v1788_v0, %v676_v39  ;;  %v2060_v27 = vadd.f32 %v1801_v1, %v572_v33  ;;  %v329_v45 = vld [vmem:[%s1806_s11 + $0x78] sm:$0xff]  ;;  %v678_v33 = vld [vmem:[%s1824_s18 + $0x60] sm:$0xff] }
  0x44   : > { %v1290_v10 = vmax.f32 %v1258_v2, %v637_v47  ;;  %v492_v11 = vmax.f32 %v441_v3, 0.0  ;;  %v771_v4 = vadd.f32 %v1801_v1, %v723_v60  ;;  %v1186_v17 = vmax.f32 %v993_v62, %v1086_v53  ;;  %v679_v62 = vld [vmem:[%s1824_s18 + $0x68] sm:$0xff] }
  0x45   : > { %1578 = vst.msk [vmem:[%s1936_s23 + $0x20] sm:$0xff] %vm1573_vm1, %v1545_v6  ;;  %v2068_v18 = vadd.f32 %v1801_v1, %v724_v9  ;;  %v898_v19 = vmul.f32 %v1788_v0, %v866_v5  ;;  %v1087_v21 = vrot.slane %v491_v7, 1  ;;  %v1217_v26 = vmax.f32 %v1185_v61, %v491_v7 }
  0x46   : > { %v1322_v47 = vmax.f32 %v1290_v10, %v639_v23  ;;  %v819_v22 = vmax.f32 %v771_v4, 0.0  ;;  %v1088_v24 = vrot.slane %v492_v11, 1  ;;  %v385_v63 = vmul.f32 %v1788_v0, %v328_v12  ;;  %v868_v4 = vld [vmem:[%s1796_s30 + $0x50] sm:$0xff] }
  0x47   : > { %v820_v20 = vmax.f32 %v2068_v18, 0.0  ;;  %v930_v28 = vadd.f32 %v1801_v1, %v898_v19  ;;  %v573_v34 = vmul.f32 %v1788_v0, %v539_v16  ;;  %v725_v42 = vmul.f32 %v1788_v0, %v677_v38 }
  0x48   : > { %v1354_v32 = vmax.f32 %v1322_v47, %v817_v25  ;;  %v1089_v29 = vsel %vm1066_vm0, %v1087_v21, %v1088_v24  ;;  %v1444_v41 = vrot.slane %v819_v22, 1  ;;  %v442_v46 = vadd.f32 %v1801_v1, %v385_v63 }
  0x49   : > { %v962_v36 = vmax.f32 %v930_v28, 0.0  ;;  %v1259_v55 = vmax.f32 %v1217_v26, %v1089_v29  ;;  %v1445_v43 = vrot.slane %v820_v20, 1  ;;  %v2087_v14 = vadd.f32 %v1801_v1, %v573_v34 }
  0x4a   : > { %v1546_v48 = vmax.f32 %v1354_v32, %v1443_v8  ;;  %v773_v25 = vadd.f32 %v1801_v1, %v725_v42  ;;  %v899_v49 = vmul.f32 %v1788_v0, %v867_v30  ;;  %v640_v50 = vmax.f32 %v2060_v27, 0.0 }
  0x4b   : > { %v994_v51 = vmax.f32 %v962_v36, %v491_v7  ;;  %v1291_v52 = vmax.f32 %v1259_v55, %v638_v35  ;;  %v493_v37 = vmax.f32 %v442_v46, 0.0  ;;  %v1446_v56 = vsel %vm1066_vm0, %v1444_v41, %v1445_v43 }
  0x4c   : > { %1579 = vst.msk [vmem:[%s1936_s23 + $0x28] sm:$0xff] %vm1573_vm1, %v1546_v48  ;;  %v821_v15 = vmax.f32 %v773_v25, 0.0  ;;  %v931_v54 = vadd.f32 %v1801_v1, %v899_v49  ;;  %v1218_v58 = vmax.f32 %v1186_v17, %v492_v11  ;;  %v641_v57 = vmax.f32 %v2087_v14, 0.0  ;;  %v683_v14 = vld [vmem:[%s1824_s18 + $0x88] sm:$0x1] }
  0x4d   : > { %v1323_v39 = vmax.f32 %v1291_v52, %v640_v50  ;;  %v1090_v13 = vrot.slane %v493_v37, 1  ;;  %v386_v35 = vmul.f32 %v1788_v0, %v329_v45  ;;  %v387_v60 = vmul.f32 %v1788_v0, %v330_v44 }
  0x4e   : > { %v963_v53 = vmax.f32 %v931_v54, 0.0  ;;  %v1447_v59 = vrot.slane %v821_v15, 1  ;;  %v574_v61 = vmul.f32 %v1788_v0, %v540_v31  ;;  %v726_v6 = vmul.f32 %v1788_v0, %v678_v33 }
  0x4f   : > { %v1355_v2 = vmax.f32 %v1323_v39, %v819_v22  ;;  %v1091_v3 = vsel %vm1066_vm0, %v1088_v24, %v1090_v13  ;;  %v443_v5 = vadd.f32 %v1801_v1, %v386_v35  ;;  %v1187_v8 = vmax.f32 %v994_v51, %v1089_v29  ;;  %v331_v22 = vld [vmem:[%s1806_s11 + $0x88] sm:$0x1]  ;;  %v541_v24 = vld [vmem:[%s1815_s15 + $0x58] sm:$0xff]  ;;  %v542_v13 = vld [vmem:[%s1815_s15 + $0x60] sm:$0xff] }
  0x50   : > { %v995_v7 = vmax.f32 %v963_v53, %v492_v11  ;;  %v1260_v9 = vmax.f32 %v1218_v58, %v1091_v3  ;;  %v444_v10 = vadd.f32 %v1801_v1, %v387_v60  ;;  %v1448_v16 = vsel %vm1066_vm0, %v1445_v43, %v1447_v59  ;;  %v869_v43 = vld [vmem:[%s1796_s30 + $0x58] sm:$0xff] }
  0x51   : > { %v1547_v12 = vmax.f32 %v1355_v2, %v1446_v56  ;;  %v494_v17 = vmax.f32 %v443_v5, 0.0  ;;  %v727_v19 = vmul.f32 %v1788_v0, %v679_v62  ;;  %v2119_v47 = vadd.f32 %v1801_v1, %v574_v61  ;;  %v332_v56 = vld [vmem:[%s1806_s11 + $0x90] sm:$0xff]  ;;  %v333_v39 = vld [vmem:[%s1806_s11 + $0x98] sm:$0xff] }
  0x52   : > { %v1292_v21 = vmax.f32 %v1260_v9, %v639_v23  ;;  %v495_v38 = vmax.f32 %v444_v10, 0.0  ;;  %v774_v11 = vadd.f32 %v1801_v1, %v726_v6  ;;  %v1188_v26 = vmax.f32 %v995_v7, %v1091_v3  ;;  %v681_v61 = vld [vmem:[%s1824_s18 + $0x78] sm:$0xff]  ;;  %v682_v7 = vld [vmem:[%s1824_s18 + $0x80] sm:$0xff] }
  0x53   : > { %1580 = vst.msk [vmem:[%s1936_s23 + $0x30] sm:$0xff] %vm1573_vm1, %v1547_v12  ;;  %v2127_v28 = vadd.f32 %v1801_v1, %v727_v19  ;;  %v900_v63 = vmul.f32 %v1788_v0, %v868_v4  ;;  %v1092_v34 = vrot.slane %v494_v17, 1  ;;  %v1219_v29 = vmax.f32 %v1187_v8, %v494_v17 }
  0x54   : > { %v1324_v23 = vmax.f32 %v1292_v21, %v641_v57  ;;  %v822_v30 = vmax.f32 %v774_v11, 0.0  ;;  %v1093_v32 = vrot.slane %v495_v38, 1  ;;  %v388_v36 = vmul.f32 %v1788_v0, %v331_v22  ;;  %v870_v11 = vld [vmem:[%s1796_s30 + $0x60] sm:$0xff] }
  0x55   : > { %v823_v41 = vmax.f32 %v2127_v28, 0.0  ;;  %v932_v42 = vadd.f32 %v1801_v1, %v900_v63  ;;  %v575_v55 = vmul.f32 %v1788_v0, %v541_v24  ;;  %v728_v49 = vmul.f32 %v1788_v0, %v680_v40 }
  0x56   : > { %v1356_v46 = vmax.f32 %v1324_v23, %v820_v20  ;;  %v1094_v48 = vsel %vm1066_vm0, %v1092_v34, %v1093_v32  ;;  %v1449_v25 = vrot.slane %v822_v30, 1  ;;  %v445_v37 = vadd.f32 %v1801_v1, %v388_v36 }
  0x57   : > { %v964_v45 = vmax.f32 %v932_v42, 0.0  ;;  %v1261_v51 = vmax.f32 %v1219_v29, %v1094_v48  ;;  %v1450_v52 = vrot.slane %v823_v41, 1  ;;  %v2146_v18 = vadd.f32 %v1801_v1, %v575_v55 }
  0x58   : > { %v1548_v44 = vmax.f32 %v1356_v46, %v1448_v16  ;;  %v776_v20 = vadd.f32 %v1801_v1, %v728_v49  ;;  %v901_v31 = vmul.f32 %v1788_v0, %v869_v43  ;;  %v642_v15 = vmax.f32 %v2119_v47, 0.0 }
  0x59   : > { %v996_v54 = vmax.f32 %v964_v45, %v494_v17  ;;  %v1293_v58 = vmax.f32 %v1261_v51, %v640_v50  ;;  %v496_v33 = vmax.f32 %v445_v37, 0.0  ;;  %v1451_v35 = vsel %vm1066_vm0, %v1449_v25, %v1450_v52 }
  0x5a   : > { %1581 = vst.msk [vmem:[%s1936_s23 + $0x38] sm:$0xff] %vm1573_vm1, %v1548_v44  ;;  %v824_v53 = vmax.f32 %v776_v20, 0.0  ;;  %v933_v59 = vadd.f32 %v1801_v1, %v901_v31  ;;  %v1220_v60 = vmax.f32 %v1188_v26, %v495_v38  ;;  %v643_v2 = vmax.f32 %v2146_v18, 0.0  ;;  %v686_v18 = vld [vmem:[%s1824_s18 + $0xa0] sm:$0x1] }
  0x5b   : > { %v1325_v62 = vmax.f32 %v1293_v58, %v642_v15  ;;  %v1095_v27 = vrot.slane %v496_v33, 1  ;;  %v389_v50 = vmul.f32 %v1788_v0, %v332_v56  ;;  %v390_v6 = vmul.f32 %v1788_v0, %v333_v39 }
  0x5c   : > { %v965_v3 = vmax.f32 %v933_v59, 0.0  ;;  %v1452_v5 = vrot.slane %v824_v53, 1  ;;  %v576_v8 = vmul.f32 %v1788_v0, %v542_v13  ;;  %v729_v12 = vmul.f32 %v1788_v0, %v681_v61 }
  0x5d   : > { %v1357_v9 = vmax.f32 %v1325_v62, %v822_v30  ;;  %v1096_v10 = vsel %vm1066_vm0, %v1093_v32, %v1095_v27  ;;  %v446_v4 = vadd.f32 %v1801_v1, %v389_v50  ;;  %v1189_v16 = vmax.f32 %v996_v54, %v1094_v48  ;;  %v334_v30 = vld [vmem:[%s1806_s11 + $0xa0] sm:$0x1]  ;;  %v543_v32 = vld [vmem:[%s1815_s15 + $0x68] sm:$0xff]  ;;  %v336_v62 = vld [vmem:[%s1806_s11 + $0xb0] sm:$0xff] }
  0x5e   : > { %v997_v17 = vmax.f32 %v965_v3, %v495_v38  ;;  %v1262_v19 = vmax.f32 %v1220_v60, %v1096_v10  ;;  %v447_v21 = vadd.f32 %v1801_v1, %v390_v6  ;;  %v1453_v24 = vsel %vm1066_vm0, %v1450_v52, %v1452_v5  ;;  %v871_v52 = vld [vmem:[%s1796_s30 + $0x68] sm:$0xff]  ;;  %v544_v27 = vld [vmem:[%s1815_s15 + $0x70] sm:$0xff] }
  0x5f   : > { %v1549_v22 = vmax.f32 %v1357_v9, %v1451_v35  ;;  %v497_v26 = vmax.f32 %v446_v4, 0.0  ;;  %v730_v63 = vmul.f32 %v1788_v0, %v682_v7  ;;  %v2178_v23 = vadd.f32 %v1801_v1, %v576_v8  ;;  %v335_v35 = vld [vmem:[%s1806_s11 + $0xa8] sm:$0xff]  ;;  %v684_v8 = vld [vmem:[%s1824_s18 + $0x90] sm:$0xff] }
  0x60   : > { %v1294_v34 = vmax.f32 %v1262_v19, %v641_v57  ;;  %v498_v40 = vmax.f32 %v447_v21, 0.0  ;;  %v777_v38 = vadd.f32 %v1801_v1, %v729_v12  ;;  %v1190_v29 = vmax.f32 %v997_v17, %v1096_v10  ;;  %v685_v17 = vld [vmem:[%s1824_s18 + $0x98] sm:$0xff] }
  0x61   : > { %1582 = vst.msk [vmem:[%s1936_s23 + $0x40] sm:$0xff] %vm1573_vm1, %v1549_v22  ;;  %v2186_v42 = vadd.f32 %v1801_v1, %v730_v63  ;;  %v902_v36 = vmul.f32 %v1788_v0, %v870_v11  ;;  %v1097_v55 = vrot.slane %v497_v26, 1  ;;  %v1221_v48 = vmax.f32 %v1189_v16, %v497_v26 }
  0x62   : > { %v1326_v57 = vmax.f32 %v1294_v34, %v643_v2  ;;  %v825_v43 = vmax.f32 %v777_v38, 0.0  ;;  %v1098_v46 = vrot.slane %v498_v40, 1  ;;  %v391_v45 = vmul.f32 %v1788_v0, %v334_v30  ;;  %v872_v38 = vld [vmem:[%s1796_s30 + $0x70] sm:$0xff] }
  0x63   : > { %v826_v25 = vmax.f32 %v2186_v42, 0.0  ;;  %v934_v49 = vadd.f32 %v1801_v1, %v902_v36  ;;  %v577_v51 = vmul.f32 %v1788_v0, %v543_v32  ;;  %v731_v31 = vmul.f32 %v1788_v0, %v683_v14 }
  0x64   : > { %v1358_v37 = vmax.f32 %v1326_v57, %v823_v41  ;;  %v1099_v44 = vsel %vm1066_vm0, %v1097_v55, %v1098_v46  ;;  %v1454_v20 = vrot.slane %v825_v43, 1  ;;  %v448_v33 = vadd.f32 %v1801_v1, %v391_v45 }
  0x65   : > { %v966_v56 = vmax.f32 %v934_v49, 0.0  ;;  %v1263_v54 = vmax.f32 %v1221_v48, %v1099_v44  ;;  %v1455_v58 = vrot.slane %v826_v25, 1  ;;  %v2205_v28 = vadd.f32 %v1801_v1, %v577_v51 }
  0x66   : > { %v1550_v39 = vmax.f32 %v1358_v37, %v1453_v24  ;;  %v779_v41 = vadd.f32 %v1801_v1, %v731_v31  ;;  %v903_v13 = vmul.f32 %v1788_v0, %v871_v52  ;;  %v644_v53 = vmax.f32 %v2178_v23, 0.0 }
  0x67   : > { %v998_v59 = vmax.f32 %v966_v56, %v497_v26  ;;  %v1295_v60 = vmax.f32 %v1263_v54, %v642_v15  ;;  %v499_v61 = vmax.f32 %v448_v33, 0.0  ;;  %v1456_v50 = vsel %vm1066_vm0, %v1454_v20, %v1455_v58 }
  0x68   : > { %1583 = vst.msk [vmem:[%s1936_s23 + $0x48] sm:$0xff] %vm1573_vm1, %v1550_v39  ;;  %v827_v3 = vmax.f32 %v779_v41, 0.0  ;;  %v935_v5 = vadd.f32 %v1801_v1, %v903_v13  ;;  %v1222_v6 = vmax.f32 %v1190_v29, %v498_v40  ;;  %v645_v9 = vmax.f32 %v2205_v28, 0.0  ;;  %v689_v28 = vld [vmem:[%s1824_s18 + $0xb8] sm:$0x1] }
  0x69   : > { %v1327_v7 = vmax.f32 %v1295_v60, %v644_v53  ;;  %v1100_v47 = vrot.slane %v499_v61, 1  ;;  %v392_v15 = vmul.f32 %v1788_v0, %v335_v35  ;;  %v393_v12 = vmul.f32 %v1788_v0, %v336_v62 }
  0x6a   : > { %v967_v10 = vmax.f32 %v935_v5, 0.0  ;;  %v1457_v4 = vrot.slane %v827_v3, 1  ;;  %v578_v16 = vmul.f32 %v1788_v0, %v544_v27  ;;  %v732_v22 = vmul.f32 %v1788_v0, %v684_v8 }
  0x6b   : > { %v1359_v19 = vmax.f32 %v1327_v7, %v825_v43  ;;  %v1101_v21 = vsel %vm1066_vm0, %v1098_v46, %v1100_v47  ;;  %v449_v11 = vadd.f32 %v1801_v1, %v392_v15  ;;  %v1191_v24 = vmax.f32 %v998_v59, %v1099_v44  ;;  %v337_v43 = vld [vmem:[%s1806_s11 + $0xb8] sm:$0x1]  ;;  %v339_v7 = vld [vmem:[%s1806_s11 + $0xc8] sm:$0xff]  ;;  %v546_v47 = vld [vmem:[%s1815_s15 + $0x80] sm:$0xff] }
  0x6c   : > { %v999_v26 = vmax.f32 %v967_v10, %v498_v40  ;;  %v1264_v63 = vmax.f32 %v1222_v6, %v1101_v21  ;;  %v450_v34 = vadd.f32 %v1801_v1, %v393_v12  ;;  %v1458_v32 = vsel %vm1066_vm0, %v1455_v58, %v1457_v4  ;;  %v545_v46 = vld [vmem:[%s1815_s15 + $0x78] sm:$0xff] }
  0x6d   : > { %v1551_v30 = vmax.f32 %v1359_v19, %v1456_v50  ;;  %v500_v29 = vmax.f32 %v449_v11, 0.0  ;;  %v733_v36 = vmul.f32 %v1788_v0, %v685_v17  ;;  %v2237_v57 = vadd.f32 %v1801_v1, %v578_v16  ;;  %v873_v58 = vld [vmem:[%s1796_s30 + $0x78] sm:$0xff]  ;;  %v338_v50 = vld [vmem:[%s1806_s11 + $0xc0] sm:$0xff] }
  0x6e   : > { %v1296_v55 = vmax.f32 %v1264_v63, %v643_v2  ;;  %v501_v14 = vmax.f32 %v450_v34, 0.0  ;;  %v780_v40 = vadd.f32 %v1801_v1, %v732_v22  ;;  %v1192_v48 = vmax.f32 %v999_v26, %v1101_v21  ;;  %v2298_v34 = vld [vmem:[%s2831_s5] ss:$0 sm:$0xff] }
  0x6f   : > { %1584 = vst.msk [vmem:[%s1936_s23 + $0x50] sm:$0xff] %vm1573_vm1, %v1551_v30  ;;  %v2245_v49 = vadd.f32 %v1801_v1, %v733_v36  ;;  %v904_v45 = vmul.f32 %v1788_v0, %v872_v38  ;;  %v1102_v51 = vrot.slane %v500_v29, 1  ;;  %v1223_v44 = vmax.f32 %v1191_v24, %v500_v29  ;;  %v688_v24 = vld [vmem:[%s1824_s18 + $0xb0] sm:$0xff] }
  0x70   : > { %v1328_v2 = vmax.f32 %v1296_v55, %v645_v9  ;;  %v828_v52 = vmax.f32 %v780_v40, 0.0  ;;  %v1103_v37 = vrot.slane %v501_v14, 1  ;;  %v394_v56 = vmul.f32 %v1788_v0, %v337_v43  ;;  %v874_v40 = vld [vmem:[%s1796_s30 + $0x80] sm:$0xff] }
  0x71   : > { %v829_v20 = vmax.f32 %v2245_v49, 0.0  ;;  %v936_v31 = vadd.f32 %v1801_v1, %v904_v45  ;;  %v579_v54 = vmul.f32 %v1788_v0, %v545_v46  ;;  %v734_v13 = vmul.f32 %v1788_v0, %v686_v18 }
  0x72   : > { %v1360_v33 = vmax.f32 %v1328_v2, %v826_v25  ;;  %v2259_v39 = vsel %vm1066_vm0, %v1102_v51, %v1103_v37  ;;  %v1459_v41 = vrot.slane %v828_v52, 1  ;;  %v451_v61 = vadd.f32 %v1801_v1, %v394_v56 }
  0x73   : > { %v968_v35 = vmax.f32 %v936_v31, 0.0  ;;  %v1265_v59 = vmax.f32 %v1223_v44, %v2259_v39  ;;  %v1460_v60 = vrot.slane %v829_v20, 1  ;;  %v2267_v42 = vadd.f32 %v1801_v1, %v579_v54 }
  0x74   : > { %v1552_v62 = vmax.f32 %v1360_v33, %v1458_v32  ;;  %v782_v25 = vadd.f32 %v1801_v1, %v734_v13  ;;  %v905_v27 = vmul.f32 %v1788_v0, %v873_v58  ;;  %v646_v3 = vmax.f32 %v2237_v57, 0.0  ;;  %v687_v0 = vld [vmem:[%s1824_s18 + $0xa8] sm:$0xff] }
  0x75   : > { %v1000_v5 = vmax.f32 %v968_v35, %v500_v29  ;;  %v1297_v6 = vmax.f32 %v1265_v59, %v644_v53  ;;  %v502_v8 = vmax.f32 %v451_v61, 0.0  ;;  %v1461_v15 = vsel %vm1066_vm0, %v1459_v41, %v1460_v60  ;;  %v2288_v53 = vld [vmem:[%s2830_s4] ss:$0 sm:$0xff] }
  0x76   : > { %1585 = vst.msk [vmem:[%s1936_s23 + $0x58] sm:$0xff] %vm1573_vm1, %v1552_v62  ;;  %v830_v10 = vmax.f32 %v782_v25, 0.0  ;;  %v937_v4 = vadd.f32 %v1801_v1, %v905_v27  ;;  %v1224_v12 = vmax.f32 %v1192_v48, %v501_v14  ;;  %v647_v17 = vmax.f32 %v2267_v42, 0.0  ;;  %v692_v42 = vld [vmem:[%s1824_s18 + $0xd0] sm:$0x1] }
  0x77   : > { %v1329_v16 = vmax.f32 %v1297_v6, %v646_v3  ;;  %v1105_v23 = vrot.slane %v502_v8, 1  ;;  %v395_v19 = vmul.f32 %v2288_v53, %v338_v50  ;;  %v396_v1 = vmul.f32 %v2288_v53, %v339_v7 }
  0x78   : > { %v969_v21 = vmax.f32 %v937_v4, 0.0  ;;  %v1462_v11 = vrot.slane %v830_v10, 1  ;;  %v580_v22 = vmul.f32 %v2288_v53, %v546_v47  ;;  %v735_v30 = vmul.f32 %v2288_v53, %v687_v0 }
  0x79   : > { %v1361_v26 = vmax.f32 %v1329_v16, %v828_v52  ;;  %v1106_v63 = vsel %vm1066_vm0, %v1103_v37, %v1105_v23  ;;  %v452_v38 = vadd.f32 %v2298_v34, %v395_v19  ;;  %v1193_v32 = vmax.f32 %v1000_v5, %v2259_v39  ;;  %v340_v52 = vld [vmem:[%s1806_s11 + $0xd0] sm:$0x1]  ;;  %v547_v37 = vld [vmem:[%s1815_s15 + $0x88] sm:$0xff]  ;;  %v342_v16 = vld [vmem:[%s1806_s11 + $0xe0] sm:$0xff] }
  0x7a   : > { %v1001_v29 = vmax.f32 %v969_v21, %v501_v14  ;;  %v1266_v36 = vmax.f32 %v1224_v12, %v1106_v63  ;;  %v453_v55 = vadd.f32 %v2298_v34, %v396_v1  ;;  %v1463_v46 = vsel %vm1066_vm0, %v1460_v60, %v1462_v11  ;;  %v875_v60 = vld [vmem:[%s1796_s30 + $0x88] sm:$0xff]  ;;  %v548_v23 = vld [vmem:[%s1815_s15 + $0x90] sm:$0xff] }
  0x7b   : > { %v1553_v43 = vmax.f32 %v1361_v26, %v1461_v15  ;;  %v503_v48 = vmax.f32 %v452_v38, 0.0  ;;  %v736_v45 = vmul.f32 %v2288_v53, %v688_v24  ;;  %v2310_v2 = vadd.f32 %v2298_v34, %v580_v22  ;;  %v341_v15 = vld [vmem:[%s1806_s11 + $0xd8] sm:$0xff]  ;;  %v690_v22 = vld [vmem:[%s1824_s18 + $0xc0] sm:$0xff] }
  0x7c   : > { %v1298_v51 = vmax.f32 %v1266_v36, %v645_v9  ;;  %v504_v18 = vmax.f32 %v453_v55, 0.0  ;;  %v783_v14 = vadd.f32 %v2298_v34, %v735_v30  ;;  %v1194_v44 = vmax.f32 %v1001_v29, %v1106_v63  ;;  %v691_v29 = vld [vmem:[%s1824_s18 + $0xc8] sm:$0xff] }
  0x7d   : > { %1586 = vst.msk [vmem:[%s1936_s23 + $0x60] sm:$0xff] %vm1573_vm1, %v1553_v43  ;;  %v2318_v31 = vadd.f32 %v2298_v34, %v736_v45  ;;  %v906_v56 = vmul.f32 %v2288_v53, %v874_v40  ;;  %v1107_v54 = vrot.slane %v503_v48, 1  ;;  %v1225_v39 = vmax.f32 %v1193_v32, %v503_v48 }
  0x7e   : > { %v1330_v9 = vmax.f32 %v1298_v51, %v647_v17  ;;  %v831_v58 = vmax.f32 %v783_v14, 0.0  ;;  %v1108_v33 = vrot.slane %v504_v18, 1  ;;  %v397_v35 = vmul.f32 %v2288_v53, %v340_v52  ;;  %v876_v14 = vld [vmem:[%s1796_s30 + $0x90] sm:$0xff] }
  0x7f   : > { %v832_v41 = vmax.f32 %v2318_v31, 0.0  ;;  %v938_v13 = vadd.f32 %v2298_v34, %v906_v56  ;;  %v581_v59 = vmul.f32 %v2288_v53, %v547_v37  ;;  %v737_v27 = vmul.f32 %v2288_v53, %v689_v28 }
  0x80   : > { %v1362_v61 = vmax.f32 %v1330_v9, %v829_v20  ;;  %v1109_v62 = vsel %vm1066_vm0, %v1107_v54, %v1108_v33  ;;  %v1464_v25 = vrot.slane %v831_v58, 1  ;;  %v454_v8 = vadd.f32 %v2298_v34, %v397_v35 }
  0x81   : > { %v970_v50 = vmax.f32 %v938_v13, 0.0  ;;  %v1267_v5 = vmax.f32 %v1225_v39, %v1109_v62  ;;  %v1465_v6 = vrot.slane %v832_v41, 1  ;;  %v2337_v49 = vadd.f32 %v2298_v34, %v581_v59 }
  0x82   : > { %v1554_v7 = vmax.f32 %v1362_v61, %v1463_v46  ;;  %v785_v20 = vadd.f32 %v2298_v34, %v737_v27  ;;  %v907_v47 = vmul.f32 %v2288_v53, %v875_v60  ;;  %v648_v10 = vmax.f32 %v2310_v2, 0.0 }
  0x83   : > { %v1002_v4 = vmax.f32 %v970_v50, %v503_v48  ;;  %v1299_v12 = vmax.f32 %v1267_v5, %v646_v3  ;;  %v505_v0 = vmax.f32 %v454_v8, 0.0  ;;  %v1466_v19 = vsel %vm1066_vm0, %v1464_v25, %v1465_v6 }
  0x84   : > { %1587 = vst.msk [vmem:[%s1936_s23 + $0x68] sm:$0xff] %vm1573_vm1, %v1554_v7  ;;  %v833_v21 = vmax.f32 %v785_v20, 0.0  ;;  %v939_v11 = vadd.f32 %v2298_v34, %v907_v47  ;;  %v1226_v1 = vmax.f32 %v1194_v44, %v504_v18  ;;  %v649_v26 = vmax.f32 %v2337_v49, 0.0  ;;  %v695_v49 = vld [vmem:[%s1824_s18 + $0xe8] sm:$0x1] }
  0x85   : > { %v1331_v24 = vmax.f32 %v1299_v12, %v648_v10  ;;  %v1110_v57 = vrot.slane %v505_v0, 1  ;;  %v398_v3 = vmul.f32 %v2288_v53, %v341_v15  ;;  %v399_v30 = vmul.f32 %v2288_v53, %v342_v16 }
  0x86   : > { %v971_v63 = vmax.f32 %v939_v11, 0.0  ;;  %v1467_v38 = vrot.slane %v833_v21, 1  ;;  %v582_v32 = vmul.f32 %v2288_v53, %v548_v23  ;;  %v738_v43 = vmul.f32 %v2288_v53, %v690_v22 }
  0x87   : > { %v1363_v36 = vmax.f32 %v1331_v24, %v831_v58  ;;  %v1111_v55 = vsel %vm1066_vm0, %v1108_v33, %v1110_v57  ;;  %v455_v40 = vadd.f32 %v2298_v34, %v398_v3  ;;  %v1195_v46 = vmax.f32 %v1002_v4, %v1109_v62  ;;  %v343_v58 = vld [vmem:[%s1806_s11 + $0xe8] sm:$0x1]  ;;  %v549_v33 = vld [vmem:[%s1815_s15 + $0x98] sm:$0xff]  ;;  %v550_v57 = vld [vmem:[%s1815_s15 + $0xa0] sm:$0xff] }
  0x88   : > { %v1003_v48 = vmax.f32 %v971_v63, %v504_v18  ;;  %v1268_v45 = vmax.f32 %v1226_v1, %v1111_v55  ;;  %v456_v51 = vadd.f32 %v2298_v34, %v399_v30  ;;  %v1468_v37 = vsel %vm1066_vm0, %v1465_v6, %v1467_v38  ;;  %v877_v6 = vld [vmem:[%s1796_s30 + $0x98] sm:$0xff] }
  0x89   : > { %v1555_v52 = vmax.f32 %v1363_v36, %v1466_v19  ;;  %v506_v44 = vmax.f32 %v455_v40, 0.0  ;;  %v739_v56 = vmul.f32 %v2288_v53, %v691_v29  ;;  %v2369_v9 = vadd.f32 %v2298_v34, %v582_v32  ;;  %v344_v19 = vld [vmem:[%s1806_s11 + $0xf0] sm:$0xff]  ;;  %v345_v24 = vld [vmem:[%s1806_s11 + $0xf8] sm:$0xff] }
  0x8a   : > { %v1300_v54 = vmax.f32 %v1268_v45, %v647_v17  ;;  %v507_v28 = vmax.f32 %v456_v51, 0.0  ;;  %v786_v18 = vadd.f32 %v2298_v34, %v738_v43  ;;  %v1196_v39 = vmax.f32 %v1003_v48, %v1111_v55  ;;  %v693_v32 = vld [vmem:[%s1824_s18 + $0xd8] sm:$0xff]  ;;  %v694_v48 = vld [vmem:[%s1824_s18 + $0xe0] sm:$0xff] }
  0x8b   : > { %1588 = vst.msk [vmem:[%s1936_s23 + $0x70] sm:$0xff] %vm1573_vm1, %v1555_v52  ;;  %v2377_v13 = vadd.f32 %v2298_v34, %v739_v56  ;;  %v908_v35 = vmul.f32 %v2288_v53, %v876_v14  ;;  %v1112_v59 = vrot.slane %v506_v44, 1  ;;  %v1227_v62 = vmax.f32 %v1195_v46, %v506_v44 }
  0x8c   : > { %v1332_v17 = vmax.f32 %v1300_v54, %v649_v26  ;;  %v834_v60 = vmax.f32 %v786_v18, 0.0  ;;  %v1113_v61 = vrot.slane %v507_v28, 1  ;;  %v400_v50 = vmul.f32 %v2288_v53, %v343_v58  ;;  %v878_v18 = vld [vmem:[%s1796_s30 + $0xa0] sm:$0xff] }
  0x8d   : > { %v835_v25 = vmax.f32 %v2377_v13, 0.0  ;;  %v940_v27 = vadd.f32 %v2298_v34, %v908_v35  ;;  %v583_v5 = vmul.f32 %v2288_v53, %v549_v33  ;;  %v740_v47 = vmul.f32 %v2288_v53, %v692_v42 }
  0x8e   : > { %v1364_v8 = vmax.f32 %v1332_v17, %v832_v41  ;;  %v1114_v7 = vsel %vm1066_vm0, %v1112_v59, %v1113_v61  ;;  %v1469_v20 = vrot.slane %v834_v60, 1  ;;  %v457_v0 = vadd.f32 %v2298_v34, %v400_v50 }
  0x8f   : > { %v972_v15 = vmax.f32 %v940_v27, 0.0  ;;  %v1269_v4 = vmax.f32 %v1227_v62, %v1114_v7  ;;  %v1470_v12 = vrot.slane %v835_v25, 1  ;;  %v2396_v31 = vadd.f32 %v2298_v34, %v583_v5 }
  0x90   : > { %v1556_v16 = vmax.f32 %v1364_v8, %v1468_v37  ;;  %v788_v41 = vadd.f32 %v2298_v34, %v740_v47  ;;  %v909_v23 = vmul.f32 %v2288_v53, %v877_v6  ;;  %v650_v21 = vmax.f32 %v2369_v9, 0.0 }
  0x91   : > { %v1004_v11 = vmax.f32 %v972_v15, %v506_v44  ;;  %v1301_v1 = vmax.f32 %v1269_v4, %v648_v10  ;;  %v508_v22 = vmax.f32 %v457_v0, 0.0  ;;  %v1471_v3 = vsel %vm1066_vm0, %v1469_v20, %v1470_v12 }
  0x92   : > { %1589 = vst.msk [vmem:[%s1936_s23 + $0x78] sm:$0xff] %vm1573_vm1, %v1556_v16  ;;  %v836_v63 = vmax.f32 %v788_v41, 0.0  ;;  %v941_v38 = vadd.f32 %v2298_v34, %v909_v23  ;;  %v1228_v30 = vmax.f32 %v1196_v39, %v507_v28  ;;  %v651_v36 = vmax.f32 %v2396_v31, 0.0  ;;  %v698_v31 = vld [vmem:[%s1824_s18 + $0x100] sm:$0x1] }
  0x93   : > { %v1333_v29 = vmax.f32 %v1301_v1, %v650_v21  ;;  %v1115_v2 = vrot.slane %v508_v22, 1  ;;  %v401_v10 = vmul.f32 %v2288_v53, %v344_v19  ;;  %v402_v43 = vmul.f32 %v2288_v53, %v345_v24 }
  0x94   : > { %v973_v55 = vmax.f32 %v941_v38, 0.0  ;;  %v1472_v40 = vrot.slane %v836_v63, 1  ;;  %v584_v46 = vmul.f32 %v2288_v53, %v550_v57  ;;  %v741_v52 = vmul.f32 %v2288_v53, %v693_v32 }
  0x95   : > { %v1365_v45 = vmax.f32 %v1333_v29, %v834_v60  ;;  %v1116_v51 = vsel %vm1066_vm0, %v1113_v61, %v1115_v2  ;;  %v458_v14 = vadd.f32 %v2298_v34, %v401_v10  ;;  %v1197_v37 = vmax.f32 %v1004_v11, %v1114_v7  ;;  %v346_v60 = vld [vmem:[%s1806_s11 + $0x100] sm:$0x1]  ;;  %v551_v61 = vld [vmem:[%s1815_s15 + $0xa8] sm:$0xff]  ;;  %v348_v29 = vld [vmem:[%s1806_s11 + $0x110] sm:$0xff] }
  0x96   : > { %v1005_v44 = vmax.f32 %v973_v55, %v507_v28  ;;  %v1270_v56 = vmax.f32 %v1228_v30, %v1116_v51  ;;  %v459_v54 = vadd.f32 %v2298_v34, %v402_v43  ;;  %v1473_v33 = vsel %vm1066_vm0, %v1470_v12, %v1472_v40  ;;  %v879_v12 = vld [vmem:[%s1796_s30 + $0xa8] sm:$0xff]  ;;  %v552_v2 = vld [vmem:[%s1815_s15 + $0xb0] sm:$0xff] }
  0x97   : > { %v1557_v58 = vmax.f32 %v1365_v45, %v1471_v3  ;;  %v509_v39 = vmax.f32 %v458_v14, 0.0  ;;  %v742_v35 = vmul.f32 %v2288_v53, %v694_v48  ;;  %v2428_v17 = vadd.f32 %v2298_v34, %v584_v46  ;;  %v347_v3 = vld [vmem:[%s1806_s11 + $0x108] sm:$0xff]  ;;  %v696_v46 = vld [vmem:[%s1824_s18 + $0xf0] sm:$0xff] }
  0x98   : > { %v1302_v59 = vmax.f32 %v1270_v56, %v649_v26  ;;  %v510_v42 = vmax.f32 %v459_v54, 0.0  ;;  %v789_v28 = vadd.f32 %v2298_v34, %v741_v52  ;;  %v1198_v62 = vmax.f32 %v1005_v44, %v1116_v51  ;;  %v697_v44 = vld [vmem:[%s1824_s18 + $0xf8] sm:$0xff] }
  0x99   : > { %1590 = vst.msk [vmem:[%s1936_s23 + $0x80] sm:$0xff] %vm1573_vm1, %v1557_v58  ;;  %v2436_v27 = vadd.f32 %v2298_v34, %v742_v35  ;;  %v910_v50 = vmul.f32 %v2288_v53, %v878_v18  ;;  %v1117_v5 = vrot.slane %v509_v39, 1  ;;  %v1229_v7 = vmax.f32 %v1197_v37, %v509_v39 }
  0x9a   : > { %v1334_v26 = vmax.f32 %v1302_v59, %v651_v36  ;;  %v837_v6 = vmax.f32 %v789_v28, 0.0  ;;  %v1118_v8 = vrot.slane %v510_v42, 1  ;;  %v403_v15 = vmul.f32 %v2288_v53, %v346_v60  ;;  %v880_v28 = vld [vmem:[%s1796_s30 + $0xb0] sm:$0xff] }
  0x9b   : > { %v838_v20 = vmax.f32 %v2436_v27, 0.0  ;;  %v942_v47 = vadd.f32 %v2298_v34, %v910_v50  ;;  %v585_v4 = vmul.f32 %v2288_v53, %v551_v61  ;;  %v743_v23 = vmul.f32 %v2288_v53, %v695_v49 }
  0x9c   : > { %v1366_v0 = vmax.f32 %v1334_v26, %v835_v25  ;;  %v1119_v16 = vsel %vm1066_vm0, %v1117_v5, %v1118_v8  ;;  %v1474_v41 = vrot.slane %v837_v6, 1  ;;  %v460_v22 = vadd.f32 %v2298_v34, %v403_v15 }
  0x9d   : > { %v974_v19 = vmax.f32 %v942_v47, 0.0  ;;  %v1271_v11 = vmax.f32 %v1229_v7, %v1119_v16  ;;  %v1475_v1 = vrot.slane %v838_v20, 1  ;;  %v2455_v13 = vadd.f32 %v2298_v34, %v585_v4 }
  0x9e   : > { %v1558_v24 = vmax.f32 %v1366_v0, %v1473_v33  ;;  %v791_v25 = vadd.f32 %v2298_v34, %v743_v23  ;;  %v911_v57 = vmul.f32 %v2288_v53, %v879_v12  ;;  %v652_v63 = vmax.f32 %v2428_v17, 0.0 }
  0x9f   : > { %v1006_v38 = vmax.f32 %v974_v19, %v509_v39  ;;  %v1303_v30 = vmax.f32 %v1271_v11, %v650_v21  ;;  %v511_v32 = vmax.f32 %v460_v22, 0.0  ;;  %v1476_v10 = vsel %vm1066_vm0, %v1474_v41, %v1475_v1 }
  0xa0   : > { %1591 = vst.msk [vmem:[%s1936_s23 + $0x88] sm:$0xff] %vm1573_vm1, %v1558_v24  ;;  %v839_v55 = vmax.f32 %v791_v25, 0.0  ;;  %v943_v40 = vadd.f32 %v2298_v34, %v911_v57  ;;  %v1230_v43 = vmax.f32 %v1198_v62, %v510_v42  ;;  %v653_v45 = vmax.f32 %v2455_v13, 0.0  ;;  %v701_v13 = vld [vmem:[%s1824_s18 + $0x118] sm:$0x1] }
  0xa1   : > { %v1335_v48 = vmax.f32 %v1303_v30, %v652_v63  ;;  %v1120_v9 = vrot.slane %v511_v32, 1  ;;  %v404_v21 = vmul.f32 %v2288_v53, %v347_v3  ;;  %v405_v52 = vmul.f32 %v2288_v53, %v348_v29 }
  0xa2   : > { %v975_v51 = vmax.f32 %v943_v40, 0.0  ;;  %v1477_v14 = vrot.slane %v839_v55, 1  ;;  %v586_v37 = vmul.f32 %v2288_v53, %v552_v2  ;;  %v744_v58 = vmul.f32 %v2288_v53, %v696_v46 }
  0xa3   : > { %v1367_v56 = vmax.f32 %v1335_v48, %v837_v6  ;;  %v1121_v54 = vsel %vm1066_vm0, %v1118_v8, %v1120_v9  ;;  %v461_v18 = vadd.f32 %v2298_v34, %v404_v21  ;;  %v1199_v33 = vmax.f32 %v1006_v38, %v1119_v16  ;;  %v349_v6 = vld [vmem:[%s1806_s11 + $0x118] sm:$0x1]  ;;  %v351_v48 = vld [vmem:[%s1806_s11 + $0x128] sm:$0xff]  ;;  %v554_v9 = vld [vmem:[%s1815_s15 + $0xc0] sm:$0xff] }
  0xa4   : > { %v1007_v39 = vmax.f32 %v975_v51, %v510_v42  ;;  %v1272_v35 = vmax.f32 %v1230_v43, %v1121_v54  ;;  %v462_v59 = vadd.f32 %v2298_v34, %v405_v52  ;;  %v1478_v61 = vsel %vm1066_vm0, %v1475_v1, %v1477_v14  ;;  %v553_v8 = vld [vmem:[%s1815_s15 + $0xb8] sm:$0xff] }
  0xa5   : > { %v1559_v60 = vmax.f32 %v1367_v56, %v1476_v10  ;;  %v512_v62 = vmax.f32 %v461_v18, 0.0  ;;  %v745_v50 = vmul.f32 %v2288_v53, %v697_v44  ;;  %v2487_v26 = vadd.f32 %v2298_v34, %v586_v37  ;;  %v881_v1 = vld [vmem:[%s1796_s30 + $0xb8] sm:$0xff]  ;;  %v350_v10 = vld [vmem:[%s1806_s11 + $0x120] sm:$0xff]  ;;  %v699_v37 = vld [vmem:[%s1824_s18 + $0x108] sm:$0xff] }
  0xa6   : > { %v1304_v5 = vmax.f32 %v1272_v35, %v651_v36  ;;  %v513_v49 = vmax.f32 %v462_v59, 0.0  ;;  %v792_v42 = vadd.f32 %v2298_v34, %v744_v58  ;;  %v1200_v7 = vmax.f32 %v1007_v39, %v1121_v54  ;;  %v700_v39 = vld [vmem:[%s1824_s18 + $0x110] sm:$0xff] }
  0xa7   : > { %1592 = vst.msk [vmem:[%s1936_s23 + $0x90] sm:$0xff] %vm1573_vm1, %v1559_v60  ;;  %v2495_v47 = vadd.f32 %v2298_v34, %v745_v50  ;;  %v912_v15 = vmul.f32 %v2288_v53, %v880_v28  ;;  %v1122_v4 = vrot.slane %v512_v62, 1  ;;  %v1231_v16 = vmax.f32 %v1199_v33, %v512_v62 }
  0xa8   : > { %v1336_v36 = vmax.f32 %v1304_v5, %v653_v45  ;;  %v840_v12 = vmax.f32 %v792_v42, 0.0  ;;  %v1123_v0 = vrot.slane %v513_v49, 1  ;;  %v406_v19 = vmul.f32 %v2288_v53, %v349_v6  ;;  %v882_v42 = vld [vmem:[%s1796_s30 + $0xc0] sm:$0xff] }
  0xa9   : > { %v841_v41 = vmax.f32 %v2495_v47, 0.0  ;;  %v944_v23 = vadd.f32 %v2298_v34, %v912_v15  ;;  %v587_v11 = vmul.f32 %v2288_v53, %v553_v8  ;;  %v746_v57 = vmul.f32 %v2288_v53, %v698_v31 }
  0xaa   : > { %v1368_v22 = vmax.f32 %v1336_v36, %v838_v20  ;;  %v1124_v24 = vsel %vm1066_vm0, %v1122_v4, %v1123_v0  ;;  %v1479_v25 = vrot.slane %v840_v12, 1  ;;  %v463_v32 = vadd.f32 %v2298_v34, %v406_v19 }
  0xab   : > { %v976_v3 = vmax.f32 %v944_v23, 0.0  ;;  %v1273_v38 = vmax.f32 %v1231_v16, %v1124_v24  ;;  %v1480_v30 = vrot.slane %v841_v41, 1  ;;  %v2514_v27 = vadd.f32 %v2298_v34, %v587_v11 }
  0xac   : > { %v1560_v29 = vmax.f32 %v1368_v22, %v1478_v61  ;;  %v794_v20 = vadd.f32 %v2298_v34, %v746_v57  ;;  %v913_v2 = vmul.f32 %v2288_v53, %v881_v1  ;;  %v654_v55 = vmax.f32 %v2487_v26, 0.0 }
  0xad   : > { %v1008_v40 = vmax.f32 %v976_v3, %v512_v62  ;;  %v1305_v43 = vmax.f32 %v1273_v38, %v652_v63  ;;  %v514_v46 = vmax.f32 %v463_v32, 0.0  ;;  %v1481_v21 = vsel %vm1066_vm0, %v1479_v25, %v1480_v30 }
  0xae   : > { %1593 = vst.msk [vmem:[%s1936_s23 + $0x98] sm:$0xff] %vm1573_vm1, %v1560_v29  ;;  %v842_v51 = vmax.f32 %v794_v20, 0.0  ;;  %v945_v14 = vadd.f32 %v2298_v34, %v913_v2  ;;  %v1232_v52 = vmax.f32 %v1200_v7, %v513_v49  ;;  %v655_v56 = vmax.f32 %v2514_v27, 0.0  ;;  %v704_v27 = vld [vmem:[%s1824_s18 + $0x130] sm:$0x1] }
  0xaf   : > { %v1337_v44 = vmax.f32 %v1305_v43, %v654_v55  ;;  %v1125_v17 = vrot.slane %v514_v46, 1  ;;  %v407_v63 = vmul.f32 %v2288_v53, %v350_v10  ;;  %v408_v58 = vmul.f32 %v2288_v53, %v351_v48 }
  0xb0   : > { %v977_v54 = vmax.f32 %v945_v14, 0.0  ;;  %v1482_v18 = vrot.slane %v842_v51, 1  ;;  %v588_v33 = vmul.f32 %v2288_v53, %v554_v9  ;;  %v747_v60 = vmul.f32 %v2288_v53, %v699_v37 }
  0xb1   : > { %v1369_v35 = vmax.f32 %v1337_v44, %v840_v12  ;;  %v1126_v59 = vsel %vm1066_vm0, %v1123_v0, %v1125_v17  ;;  %v464_v28 = vadd.f32 %v2298_v34, %v407_v63  ;;  %v1201_v61 = vmax.f32 %v1008_v40, %v1124_v24  ;;  %v352_v12 = vld [vmem:[%s1806_s11 + $0x130] sm:$0x1]  ;;  %v555_v0 = vld [vmem:[%s1815_s15 + $0xc8] sm:$0xff]  ;;  %v354_v44 = vld [vmem:[%s1806_s11 + $0x140] sm:$0xff] }
  0xb2   : > { %v1009_v62 = vmax.f32 %v977_v54, %v513_v49  ;;  %v1274_v50 = vmax.f32 %v1232_v52, %v1126_v59  ;;  %v465_v5 = vadd.f32 %v2298_v34, %v408_v58  ;;  %v1483_v8 = vsel %vm1066_vm0, %v1480_v30, %v1482_v18  ;;  %v883_v30 = vld [vmem:[%s1796_s30 + $0xc8] sm:$0xff]  ;;  %v556_v17 = vld [vmem:[%s1815_s15 + $0xd0] sm:$0xff] }
  0xb3   : > { %v1561_v6 = vmax.f32 %v1369_v35, %v1481_v21  ;;  %v515_v7 = vmax.f32 %v464_v28, 0.0  ;;  %v748_v15 = vmul.f32 %v2288_v53, %v700_v39  ;;  %v2546_v36 = vadd.f32 %v2298_v34, %v588_v33  ;;  %v353_v21 = vld [vmem:[%s1806_s11 + $0x138] sm:$0xff]  ;;  %v702_v33 = vld [vmem:[%s1824_s18 + $0x120] sm:$0xff] }
  0xb4   : > { %v1306_v4 = vmax.f32 %v1274_v50, %v653_v45  ;;  %v516_v31 = vmax.f32 %v465_v5, 0.0  ;;  %v795_v49 = vadd.f32 %v2298_v34, %v747_v60  ;;  %v1202_v16 = vmax.f32 %v1009_v62, %v1126_v59  ;;  %v703_v62 = vld [vmem:[%s1824_s18 + $0x128] sm:$0xff] }
  0xb5   : > { %1594 = vst.msk [vmem:[%s1936_s23 + $0xa0] sm:$0xff] %vm1573_vm1, %v1561_v6  ;;  %v2554_v23 = vadd.f32 %v2298_v34, %v748_v15  ;;  %v914_v19 = vmul.f32 %v2288_v53, %v882_v42  ;;  %v1127_v11 = vrot.slane %v515_v7, 1  ;;  %v1233_v24 = vmax.f32 %v1201_v61, %v515_v7 }
  0xb6   : > { %v1338_v45 = vmax.f32 %v1306_v4, %v655_v56  ;;  %v843_v1 = vmax.f32 %v795_v49, 0.0  ;;  %v1128_v22 = vrot.slane %v516_v31, 1  ;;  %v409_v3 = vmul.f32 %v2288_v53, %v352_v12  ;;  %v884_v49 = vld [vmem:[%s1796_s30 + $0xd0] sm:$0xff] }
  0xb7   : > { %v844_v25 = vmax.f32 %v2554_v23, 0.0  ;;  %v946_v57 = vadd.f32 %v2298_v34, %v914_v19  ;;  %v589_v38 = vmul.f32 %v2288_v53, %v555_v0  ;;  %v749_v2 = vmul.f32 %v2288_v53, %v701_v13 }
  0xb8   : > { %v1370_v32 = vmax.f32 %v1338_v45, %v841_v41  ;;  %v1129_v29 = vsel %vm1066_vm0, %v1127_v11, %v1128_v22  ;;  %v1484_v20 = vrot.slane %v843_v1, 1  ;;  %v466_v46 = vadd.f32 %v2298_v34, %v409_v3 }
  0xb9   : > { %v978_v10 = vmax.f32 %v946_v57, 0.0  ;;  %v1275_v40 = vmax.f32 %v1233_v24, %v1129_v29  ;;  %v1485_v43 = vrot.slane %v844_v25, 1  ;;  %v2573_v47 = vadd.f32 %v2298_v34, %v589_v38 }
  0xba   : > { %v1562_v48 = vmax.f32 %v1370_v32, %v1483_v8  ;;  %v797_v41 = vadd.f32 %v2298_v34, %v749_v2  ;;  %v915_v9 = vmul.f32 %v2288_v53, %v883_v30  ;;  %v656_v51 = vmax.f32 %v2546_v36, 0.0 }
  0xbb   : > { %v1010_v14 = vmax.f32 %v978_v10, %v515_v7  ;;  %v1307_v52 = vmax.f32 %v1275_v40, %v654_v55  ;;  %v517_v37 = vmax.f32 %v466_v46, 0.0  ;;  %v1486_v63 = vsel %vm1066_vm0, %v1484_v20, %v1485_v43 }
  0xbc   : > { %1595 = vst.msk [vmem:[%s1936_s23 + $0xa8] sm:$0xff] %vm1573_vm1, %v1562_v48  ;;  %v845_v54 = vmax.f32 %v797_v41, 0.0  ;;  %v947_v18 = vadd.f32 %v2298_v34, %v915_v9  ;;  %v1234_v58 = vmax.f32 %v1202_v16, %v516_v31  ;;  %v657_v35 = vmax.f32 %v2573_v47, 0.0  ;;  %v707_v47 = vld [vmem:[%s1824_s18 + $0x148] sm:$0x1] }
  0xbd   : > { %v1339_v39 = vmax.f32 %v1307_v52, %v656_v51  ;;  %v1130_v26 = vrot.slane %v517_v37, 1  ;;  %v410_v55 = vmul.f32 %v2288_v53, %v353_v21  ;;  %v411_v60 = vmul.f32 %v2288_v53, %v354_v44 }
  0xbe   : > { %v979_v59 = vmax.f32 %v947_v18, 0.0  ;;  %v1487_v28 = vrot.slane %v845_v54, 1  ;;  %v590_v61 = vmul.f32 %v2288_v53, %v556_v17  ;;  %v750_v6 = vmul.f32 %v2288_v53, %v702_v33 }
  0xbf   : > { %v1371_v50 = vmax.f32 %v1339_v39, %v843_v1  ;;  %v1131_v5 = vsel %vm1066_vm0, %v1128_v22, %v1130_v26  ;;  %v467_v42 = vadd.f32 %v2298_v34, %v410_v55  ;;  %v1203_v8 = vmax.f32 %v1010_v14, %v1129_v29  ;;  %v355_v1 = vld [vmem:[%s1806_s11 + $0x148] sm:$0x1]  ;;  %v557_v22 = vld [vmem:[%s1815_s15 + $0xd8] sm:$0xff]  ;;  %v558_v26 = vld [vmem:[%s1815_s15 + $0xe0] sm:$0xff] }
  0xc0   : > { %v1011_v7 = vmax.f32 %v979_v59, %v516_v31  ;;  %v1276_v15 = vmax.f32 %v1234_v58, %v1131_v5  ;;  %v468_v4 = vadd.f32 %v2298_v34, %v411_v60  ;;  %v1488_v0 = vsel %vm1066_vm0, %v1485_v43, %v1487_v28  ;;  %v885_v43 = vld [vmem:[%s1796_s30 + $0xd8] sm:$0xff] }
  0xc1   : > { %v1563_v12 = vmax.f32 %v1371_v50, %v1486_v63  ;;  %v518_v16 = vmax.f32 %v467_v42, 0.0  ;;  %v751_v19 = vmul.f32 %v2288_v53, %v703_v62  ;;  %v2605_v45 = vadd.f32 %v2298_v34, %v590_v61  ;;  %v356_v63 = vld [vmem:[%s1806_s11 + $0x150] sm:$0xff]  ;;  %v357_v39 = vld [vmem:[%s1806_s11 + $0x158] sm:$0xff] }
  0xc2   : > { %v1308_v11 = vmax.f32 %v1276_v15, %v655_v56  ;;  %v519_v13 = vmax.f32 %v468_v4, 0.0  ;;  %v798_v31 = vadd.f32 %v2298_v34, %v750_v6  ;;  %v1204_v24 = vmax.f32 %v1011_v7, %v1131_v5  ;;  %v705_v61 = vld [vmem:[%s1824_s18 + $0x138] sm:$0xff]  ;;  %v706_v7 = vld [vmem:[%s1824_s18 + $0x140] sm:$0xff] }
  0xc3   : > { %1596 = vst.msk [vmem:[%s1936_s23 + $0xb0] sm:$0xff] %vm1573_vm1, %v1563_v12  ;;  %v2613_v57 = vadd.f32 %v2298_v34, %v751_v19  ;;  %v916_v3 = vmul.f32 %v2288_v53, %v884_v49  ;;  %v1132_v38 = vrot.slane %v518_v16, 1  ;;  %v1235_v29 = vmax.f32 %v1203_v8, %v518_v16 }
  0xc4   : > { %v1340_v56 = vmax.f32 %v1308_v11, %v657_v35  ;;  %v846_v30 = vmax.f32 %v798_v31, 0.0  ;;  %v1133_v32 = vrot.slane %v519_v13, 1  ;;  %v412_v10 = vmul.f32 %v2288_v53, %v355_v1  ;;  %v886_v31 = vld [vmem:[%s1796_s30 + $0xe0] sm:$0xff] }
  0xc5   : > { %v847_v20 = vmax.f32 %v2613_v57, 0.0  ;;  %v948_v2 = vadd.f32 %v2298_v34, %v916_v3  ;;  %v591_v40 = vmul.f32 %v2288_v53, %v557_v22  ;;  %v752_v9 = vmul.f32 %v2288_v53, %v704_v27 }
  0xc6   : > { %v1372_v46 = vmax.f32 %v1340_v56, %v844_v25  ;;  %v1134_v48 = vsel %vm1066_vm0, %v1132_v38, %v1133_v32  ;;  %v1489_v41 = vrot.slane %v846_v30, 1  ;;  %v469_v37 = vadd.f32 %v2298_v34, %v412_v10 }
  0xc7   : > { %v980_v21 = vmax.f32 %v948_v2, 0.0  ;;  %v1277_v14 = vmax.f32 %v1235_v29, %v1134_v48  ;;  %v1490_v52 = vrot.slane %v847_v20, 1  ;;  %v2632_v23 = vadd.f32 %v2298_v34, %v591_v40 }
  0xc8   : > { %v1564_v44 = vmax.f32 %v1372_v46, %v1488_v0  ;;  %v800_v25 = vadd.f32 %v2298_v34, %v752_v9  ;;  %v917_v17 = vmul.f32 %v2288_v53, %v885_v43  ;;  %v658_v54 = vmax.f32 %v2605_v45, 0.0 }
  0xc9   : > { %v1012_v18 = vmax.f32 %v980_v21, %v518_v16  ;;  %v1309_v58 = vmax.f32 %v1277_v14, %v656_v51  ;;  %v520_v33 = vmax.f32 %v469_v37, 0.0  ;;  %v1491_v55 = vsel %vm1066_vm0, %v1489_v41, %v1490_v52 }
  0xca   : > { %1597 = vst.msk [vmem:[%s1936_s23 + $0xb8] sm:$0xff] %vm1573_vm1, %v1564_v44  ;;  %v848_v59 = vmax.f32 %v800_v25, 0.0  ;;  %v949_v28 = vadd.f32 %v2298_v34, %v917_v17  ;;  %v1236_v60 = vmax.f32 %v1204_v24, %v519_v13  ;;  %v659_v50 = vmax.f32 %v2632_v23, 0.0 }
  0xcb   : > { %v1341_v62 = vmax.f32 %v1309_v58, %v658_v54  ;;  %v1135_v36 = vrot.slane %v520_v33, 1  ;;  %v413_v51 = vmul.f32 %v2288_v53, %v356_v63  ;;  %v414_v6 = vmul.f32 %v2288_v53, %v357_v39 }
  0xcc   : > { %v981_v5 = vmax.f32 %v949_v28, 0.0  ;;  %v1492_v42 = vrot.slane %v848_v59, 1  ;;  %v592_v8 = vmul.f32 %v2288_v53, %v558_v26  ;;  %v753_v12 = vmul.f32 %v2288_v53, %v705_v61 }
  0xcd   : > { %v1373_v15 = vmax.f32 %v1341_v62, %v846_v30  ;;  %v1136_v4 = vsel %vm1066_vm0, %v1133_v32, %v1135_v36  ;;  %v470_v49 = vadd.f32 %v2298_v34, %v413_v51  ;;  %v1205_v0 = vmax.f32 %v1012_v18, %v1134_v48  ;;  %v358_v30 = vld [vmem:[%s1806_s11 + $0x160] sm:$0x1]  ;;  %v559_v32 = vld [vmem:[%s1815_s15 + $0xe8] sm:$0xff]  ;;  %v360_v62 = vld [vmem:[%s1806_s11 + $0x170] sm:$0xff] }
  0xce   : > { %v1013_v16 = vmax.f32 %v981_v5, %v519_v13  ;;  %v1278_v19 = vmax.f32 %v1236_v60, %v1136_v4  ;;  %v471_v11 = vadd.f32 %v2298_v34, %v414_v6  ;;  %v1493_v22 = vsel %vm1066_vm0, %v1490_v52, %v1492_v42  ;;  %v887_v52 = vld [vmem:[%s1796_s30 + $0xe8] sm:$0xff]  ;;  %v560_v36 = vld [vmem:[%s1815_s15 + $0xf0] sm:$0xff] }
  0xcf   : > { %v1565_v1 = vmax.f32 %v1373_v15, %v1491_v55  ;;  %v521_v24 = vmax.f32 %v470_v49, 0.0  ;;  %v754_v3 = vmul.f32 %v2288_v53, %v706_v7  ;;  %v2664_v56 = vadd.f32 %v2298_v34, %v592_v8  ;;  %v359_v55 = vld [vmem:[%s1806_s11 + $0x168] sm:$0xff]  ;;  %v708_v8 = vld [vmem:[%s1824_s18 + $0x150] sm:$0xff] }
  0xd0   : > { %v1310_v38 = vmax.f32 %v1278_v19, %v657_v35  ;;  %v522_v27 = vmax.f32 %v471_v11, 0.0  ;;  %v801_v13 = vadd.f32 %v2298_v34, %v753_v12  ;;  %v1206_v29 = vmax.f32 %v1013_v16, %v1136_v4  ;;  %v709_v16 = vld [vmem:[%s1824_s18 + $0x158] sm:$0xff] }
  0xd1   : > { %1598 = vst.msk [vmem:[%s1936_s23 + $0xc0] sm:$0xff] %vm1573_vm1, %v1565_v1  ;;  %v2672_v2 = vadd.f32 %v2298_v34, %v754_v3  ;;  %v918_v10 = vmul.f32 %v2288_v53, %v886_v31  ;;  %v1137_v40 = vrot.slane %v521_v24, 1  ;;  %v1237_v48 = vmax.f32 %v1205_v0, %v521_v24 }
  0xd2   : > { %v1342_v35 = vmax.f32 %v1310_v38, %v659_v50  ;;  %v849_v43 = vmax.f32 %v801_v13, 0.0  ;;  %v1138_v46 = vrot.slane %v522_v27, 1  ;;  %v415_v21 = vmul.f32 %v2288_v53, %v358_v30  ;;  %v888_v13 = vld [vmem:[%s1796_s30 + $0xf0] sm:$0xff] }
  0xd3   : > { %v850_v41 = vmax.f32 %v2672_v2, 0.0  ;;  %v950_v9 = vadd.f32 %v2298_v34, %v918_v10  ;;  %v593_v14 = vmul.f32 %v2288_v53, %v559_v32  ;;  %v755_v17 = vmul.f32 %v2288_v53, %v707_v47 }
  0xd4   : > { %v1374_v37 = vmax.f32 %v1342_v35, %v847_v20  ;;  %v1139_v44 = vsel %vm1066_vm0, %v1137_v40, %v1138_v46  ;;  %v1494_v25 = vrot.slane %v849_v43, 1  ;;  %v472_v33 = vadd.f32 %v2298_v34, %v415_v21 }
  0xd5   : > { %v982_v63 = vmax.f32 %v950_v9, 0.0  ;;  %v1279_v18 = vmax.f32 %v1237_v48, %v1139_v44  ;;  %v1495_v58 = vrot.slane %v850_v41, 1  ;;  %v2691_v57 = vadd.f32 %v2298_v34, %v593_v14 }
  0xd6   : > { %v1566_v39 = vmax.f32 %v1374_v37, %v1493_v22  ;;  %v803_v20 = vadd.f32 %v2298_v34, %v755_v17  ;;  %v919_v26 = vmul.f32 %v2288_v53, %v887_v52  ;;  %v660_v59 = vmax.f32 %v2664_v56, 0.0 }
  0xd7   : > { %v1014_v28 = vmax.f32 %v982_v63, %v521_v24  ;;  %v1311_v60 = vmax.f32 %v1279_v18, %v658_v54  ;;  %v523_v61 = vmax.f32 %v472_v33, 0.0  ;;  %v1496_v51 = vsel %vm1066_vm0, %v1494_v25, %v1495_v58  ;;  %v2745_v63 = vld [vmem:[%s2830_s4] ss:$0 sm:$0xff] }
  0xd8   : > { %1599 = vst.msk [vmem:[%s1936_s23 + $0xc8] sm:$0xff] %vm1573_vm1, %v1566_v39  ;;  %v851_v5 = vmax.f32 %v803_v20, 0.0  ;;  %v951_v42 = vadd.f32 %v2298_v34, %v919_v26  ;;  %v1238_v6 = vmax.f32 %v1206_v29, %v522_v27  ;;  %v661_v15 = vmax.f32 %v2691_v57, 0.0 }
  0xd9   : > { %v1343_v7 = vmax.f32 %v1311_v60, %v660_v59  ;;  %v1140_v45 = vrot.slane %v523_v61, 1  ;;  %v416_v54 = vmul.f32 %v2288_v53, %v359_v55  ;;  %v417_v12 = vmul.f32 %v2288_v53, %v360_v62  ;;  %v2759_v60 = vld [vmem:[%s2831_s5] ss:$0 sm:$0xff] }
  0xda   : > { %v983_v4 = vmax.f32 %v951_v42, 0.0  ;;  %v1497_v49 = vrot.slane %v851_v5, 1  ;;  %v594_v0 = vmul.f32 %v2288_v53, %v560_v36  ;;  %v756_v1 = vmul.f32 %v2288_v53, %v708_v8 }
  0xdb   : > { %v1375_v19 = vmax.f32 %v1343_v7, %v849_v43  ;;  %v1141_v11 = vsel %vm1066_vm0, %v1138_v46, %v1140_v45  ;;  %v473_v31 = vadd.f32 %v2298_v34, %v416_v54  ;;  %v1207_v22 = vmax.f32 %v1014_v28, %v1139_v44  ;;  %v361_v43 = vld [vmem:[%s1806_s11 + $0x178] sm:$0x1]  ;;  %v363_v7 = vld [vmem:[%s1806_s11 + $0x188] sm:$0xff]  ;;  %v562_v45 = vld [vmem:[%s1815_s15 + $0x100] sm:$0xff] }
  0xdc   : > { %v1015_v24 = vmax.f32 %v983_v4, %v522_v27  ;;  %v1280_v3 = vmax.f32 %v1238_v6, %v1141_v11  ;;  %v474_v38 = vadd.f32 %v2298_v34, %v417_v12  ;;  %v1498_v32 = vsel %vm1066_vm0, %v1495_v58, %v1497_v49  ;;  %v561_v46 = vld [vmem:[%s1815_s15 + $0xf8] sm:$0xff] }
  0xdd   : > { %v1567_v30 = vmax.f32 %v1375_v19, %v1496_v51  ;;  %v524_v29 = vmax.f32 %v473_v31, 0.0  ;;  %v757_v10 = vmul.f32 %v2288_v53, %v709_v16  ;;  %v2725_v35 = vadd.f32 %v2298_v34, %v594_v0  ;;  %v889_v58 = vld [vmem:[%s1796_s30 + $0xf8] sm:$0xff]  ;;  %v362_v51 = vld [vmem:[%s1806_s11 + $0x180] sm:$0xff]  ;;  %v711_v0 = vld [vmem:[%s1824_s18 + $0x168] sm:$0xff] }
  0xde   : > { %v1312_v40 = vmax.f32 %v1280_v3, %v659_v50  ;;  %v2722_v47 = vmax.f32 %v474_v38, 0.0  ;;  %v804_v27 = vadd.f32 %v2298_v34, %v756_v1  ;;  %v1208_v48 = vmax.f32 %v1015_v24, %v1141_v11  ;;  %v710_v50 = vld [vmem:[%s1824_s18 + $0x160] sm:$0x1]  ;;  %v712_v24 = vld [vmem:[%s1824_s18 + $0x170] sm:$0xff] }
  0xdf   : > { %1600 = vst.msk [vmem:[%s1936_s23 + $0xd0] sm:$0xff] %vm1573_vm1, %v1567_v30  ;;  %v2733_v9 = vadd.f32 %v2298_v34, %v757_v10  ;;  %v920_v21 = vmul.f32 %v2288_v53, %v888_v13  ;;  %v1142_v23 = vrot.slane %v524_v29, 1  ;;  %v1239_v44 = vmax.f32 %v1207_v22, %v524_v29 }
  0xe0   : > { %v1344_v14 = vmax.f32 %v1312_v40, %v661_v15  ;;  %v852_v52 = vmax.f32 %v804_v27, 0.0  ;;  %v1143_v37 = vrot.slane %v2722_v47, 1  ;;  %v418_v53 = vmul.f32 %v2745_v63, %v361_v43 }
  0xe1   : > { %v853_v25 = vmax.f32 %v2733_v9, 0.0  ;;  %v952_v17 = vadd.f32 %v2298_v34, %v920_v21  ;;  %v595_v18 = vmul.f32 %v2745_v63, %v561_v46  ;;  %v758_v34 = vmul.f32 %v2745_v63, %v710_v50 }
  0xe2   : > { %v1376_v33 = vmax.f32 %v1344_v14, %v850_v41  ;;  %v1144_v39 = vsel %vm1066_vm0, %v1142_v23, %v1143_v37  ;;  %v1499_v20 = vrot.slane %v852_v52, 1  ;;  %v475_v2 = vadd.f32 %v2759_v60, %v418_v53 }
  0xe3   : > { %v984_v26 = vmax.f32 %v952_v17, 0.0  ;;  %v1281_v55 = vmax.f32 %v1239_v44, %v1144_v39  ;;  %v1500_v28 = vrot.slane %v853_v25, 1  ;;  %v662_v61 = vmax.f32 %v2725_v35, 0.0 }
  0xe4   : > { %v1568_v41 = vmax.f32 %v1376_v33, %v1498_v32  ;;  %v806_v62 = vadd.f32 %v2759_v60, %v758_v34  ;;  %v921_v36 = vmul.f32 %v2745_v63, %v889_v58  ;;  %v526_v6 = vmax.f32 %v475_v2, 0.0 }
  0xe5   : > { %v1016_v5 = vmax.f32 %v984_v26, %v524_v29  ;;  %v1313_v42 = vmax.f32 %v1281_v55, %v660_v59  ;;  %v2769_v8 = vadd.f32 %v2759_v60, %v595_v18  ;;  %v1501_v54 = vsel %vm1066_vm0, %v1499_v20, %v1500_v28 }
  0xe6   : > { %1601 = vst.msk [vmem:[%s1936_s23 + $0xd8] sm:$0xff] %vm1573_vm1, %v1568_v41  ;;  %v854_v4 = vmax.f32 %v806_v62, 0.0  ;;  %v953_v49 = vadd.f32 %v2759_v60, %v921_v36  ;;  %v1240_v12 = vmax.f32 %v1208_v48, %v2722_v47  ;;  %v1145_v59 = vrot.slane %v526_v6, 1  ;;  %v364_v48 = vld [vmem:[%s1806_s11 + $0x190] sm:$0x1] }
  0xe7   : > { %v1209_v16 = vmax.f32 %v1016_v5, %v1144_v39  ;;  %v1345_v56 = vmax.f32 %v1313_v42, %v662_v61  ;;  %v419_v19 = vmul.f32 %v2745_v63, %v362_v51  ;;  %v420_v1 = vmul.f32 %v2745_v63, %v363_v7 }
  0xe8   : > { %v985_v11 = vmax.f32 %v953_v49, 0.0  ;;  %v1502_v31 = vrot.slane %v854_v4, 1  ;;  %v596_v22 = vmul.f32 %v2745_v63, %v562_v45  ;;  %v1146_v38 = vsel %vm1066_vm0, %v1143_v37, %v1145_v59  ;;  %v713_v37 = vld [vmem:[%s1824_s18 + $0x178] sm:$0x1] }
  0xe9   : > { %v1377_v3 = vmax.f32 %v1345_v56, %v852_v52  ;;  %v476_v13 = vadd.f32 %v2759_v60, %v419_v19  ;;  %v759_v30 = vmul.f32 %v2745_v63, %v711_v0  ;;  %v663_v32 = vmax.f32 %v2769_v8, 0.0  ;;  %v563_v52 = vld [vmem:[%s1815_s15 + $0x108] sm:$0xff] }
  0xea   : > { %v1282_v29 = vmax.f32 %v1240_v12, %v1146_v38  ;;  %v477_v10 = vadd.f32 %v2759_v60, %v420_v1  ;;  %v1017_v27 = vmax.f32 %v985_v11, %v2722_v47  ;;  %v760_v46 = vmul.f32 %v2745_v63, %v712_v24 }
  0xeb   : > { %v1569_v40 = vmax.f32 %v1377_v3, %v1501_v54  ;;  %v527_v43 = vmax.f32 %v476_v13, 0.0  ;;  %v1503_v23 = vsel %vm1066_vm0, %v1500_v28, %v1502_v31  ;;  %v807_v14 = vadd.f32 %v2759_v60, %v759_v30 }
  0xec   : > { %v1314_v21 = vmax.f32 %v1282_v29, %v661_v15  ;;  %v528_v50 = vmax.f32 %v477_v10, 0.0  ;;  %v630_v44 = vadd.f32 %v2759_v60, %v596_v22  ;;  %v808_v47 = vadd.f32 %v2759_v60, %v760_v46 }
  0xed   : > { %1602 = vst.msk [vmem:[%s1936_s23 + $0xe0] sm:$0xff] %vm1573_vm1, %v1569_v40  ;;  %v1241_v17 = vmax.f32 %v1209_v16, %v527_v43  ;;  %v1246_v53 = vrot.slane %v527_v43, 1  ;;  %v855_v58 = vmax.f32 %v807_v14, 0.0  ;;  %v421_v57 = vmul.f32 %v2745_v63, %v364_v48 }
  0xee   : > { %v1346_v18 = vmax.f32 %v1314_v21, %v663_v32  ;;  %v1247_v33 = vrot.slane %v528_v50, 1  ;;  %v1210_v15 = vmax.f32 %v1017_v27, %v1146_v38  ;;  %v856_v39 = vmax.f32 %v808_v47, 0.0 }
  0xef   : > { %v597_v20 = vmul.f32 %v2745_v63, %v563_v52  ;;  %v761_v34 = vmul.f32 %v2745_v63, %v713_v37  ;;  %v478_v28 = vadd.f32 %v2759_v60, %v421_v57  ;;  %v664_v2 = vmax.f32 %v630_v44, 0.0 }
  0xf0   : > { %v1378_v26 = vmax.f32 %v1346_v18, %v853_v25  ;;  %v1248_v55 = vsel %vm1066_vm0, %v1246_v53, %v1247_v33  ;;  %v1504_v51 = vrot.slane %v855_v58, 1  ;;  %v1505_v5 = vrot.slane %v856_v39, 1 }
  0xf1   : > { %v1283_v41 = vmax.f32 %v1241_v17, %v1248_v55  ;;  %v809_v62 = vadd.f32 %v2759_v60, %v761_v34  ;;  %v529_v42 = vmax.f32 %v478_v28, 0.0  ;;  %v631_v63 = vadd.f32 %v2759_v60, %v597_v20 }
  0xf2   : > { %v1570_v36 = vmax.f32 %v1378_v26, %v1503_v23  ;;  %v1242_v9 = vmax.f32 %v1210_v15, %v528_v50  ;;  %v1506_v45 = vsel %vm1066_vm0, %v1504_v51, %v1505_v5 }
  0xf3   : > { %v1315_v6 = vmax.f32 %v1283_v41, %v662_v61  ;;  %v857_v25 = vmax.f32 %v809_v62, 0.0  ;;  %v1249_v8 = vrot.slane %v529_v42, 1  ;;  %v665_v49 = vmax.f32 %v631_v63, 0.0 }
  0xf4   : > { %1603 = vst.msk [vmem:[%s1936_s23 + $0xe8] sm:$0xff] %vm1573_vm1, %v1570_v36 }
  0xf5   : > { %v1347_v7 = vmax.f32 %v1315_v6, %v664_v2  ;;  %v1250_v54 = vsel %vm1066_vm0, %v1247_v33, %v1249_v8  ;;  %v1507_v0 = vrot.slane %v857_v25, 1 }
  0xf6   : > { %v1284_v12 = vmax.f32 %v1242_v9, %v1250_v54 }
  0xf7   : > { %v1379_v4 = vmax.f32 %v1347_v7, %v855_v58  ;;  %v1508_v61 = vsel %vm1066_vm0, %v1505_v5, %v1507_v0 }
  0xf8   : > { %v1316_v16 = vmax.f32 %v1284_v12, %v663_v32 }
  0xf9   : > { %v1571_v35 = vmax.f32 %v1379_v4, %v1506_v45 }
  0xfa   : > { %v1348_v60 = vmax.f32 %v1316_v16, %v665_v49 }
  0xfb   : > { %1604 = vst.msk [vmem:[%s1936_s23 + $0xf0] sm:$0xff] %vm1573_vm1, %v1571_v35 }
  0xfc   : > { %v1380_v56 = vmax.f32 %v1348_v60, %v856_v39 }
  0xfe   : > { %v1572_v59 = vmax.f32 %v1380_v56, %v1508_v61 }
 0x100   : > { %1605 = vst.msk [vmem:[%s1936_s23 + $0xf8] sm:$0xff] %vm1573_vm1, %v1572_v59 }
 0x101 PF: > { %s16_s21 = sadd.s32 1, %s1736_s21  }
 0x102   : > { %p13_p4 = scmp.ge.s32.totalorder %s16_s21, 4  }
 0x104   :  { %15 = sbr.rel (!%p13_p4) target bundleno = 1 (0x1), region = 83 }

// kernel: base_model_autoencoder_forward.8
= control target key start
LH: loop header
LB: loop body
LE: loop exit
PB: predicated region body
PF: predicated region fallthrough
CT: control target
= control target key end

     0   :  { %v3379_v0 = vmov 0   ;;  %vm1294_vm0 = vcmask 523264   ;;  %vm2657_vm1 = vcmask 1040384   ;;  %vm2659_vm2 = vcmask 1041408   ;;  %s4775_s1 = inlined_call_operand.vmem [shape: bf16[576,64], index: 1, kind: input, shape index: {}]   ;;  %s4776_s0 = inlined_call_operand.vmem [shape: bf16[512,576], index: 0, kind: input, shape index: {}]   ;;  %s4777_s2 = inlined_call_operand.vmem [shape: f32[512,64], index: 2, kind: output, shape index: {0}]   ;;  %s4778_s3 = inlined_call_operand.vmem [shape: f32[1,8,128], index: 3, kind: output, shape index: {1}]  }
   0x1   :  { %1391 = vmatprep.subr.bf16.mxu0 %v3379_v0  ;;  %3006 = vmatprep.subr.bf16.mxu1 %v3379_v0  ;;  %v3119_v1 = vld [vmem:[%s4775_s1] sm:$0xff]   ;;  %v3120_v2 = vld [vmem:[%s4775_s1 + $0x8] sm:$0xff]   ;;  %v3121_v3 = vld [vmem:[%s4775_s1 + $0x10] sm:$0xff]  }
   0x2   :  { %1392 = vmatpush1.bf16.msra.mxu0 %v3119_v1  ;;  %3022 = vmatpush1.bf16.msra.mxu1 %v3119_v1  ;;  %v3122_v4 = vld [vmem:[%s4775_s1 + $0x18] sm:$0xff]   ;;  %v3123_v5 = vld [vmem:[%s4775_s1 + $0x20] sm:$0xff]   ;;  %v3124_v7 = vld [vmem:[%s4775_s1 + $0x28] sm:$0xff]  }
   0x3   :  { %1393 = vmatprep.subr.bf16.mxu0 %v3379_v0  ;;  %3007 = vmatprep.subr.bf16.mxu1 %v3379_v0  ;;  %v3137_v6 = vld [vmem:[%s4776_s0 + $0x4] ss:$20 sps:$4 sm:$0xff]   ;;  %v3125_v9 = vld [vmem:[%s4775_s1 + $0x30] sm:$0xff]   ;;  %v3128_v12 = vld [vmem:[%s4775_s1 + $0x48] sm:$0xff]  }
   0x4   :  { %v3140_v8 = vld [vmem:[%s4776_s0 + $0x144] ss:$20 sps:$4 sm:$0xff]   ;;  %1423 = vmatprep.mubr.bf16.mxu0 %v3137_v6  ;;  %v3129_v13 = vld [vmem:[%s4775_s1 + $0x50] sm:$0xff]   ;;  %v3132_v16 = vld [vmem:[%s4775_s1 + $0x68] sm:$0xff]  }
   0x5   :  { %1487 = vmatprep.mubr.bf16.mxu1 %v3140_v8  ;;  %v3126_v10 = vld [vmem:[%s4775_s1 + $0x38] sm:$0xff]   ;;  %v3127_v11 = vld [vmem:[%s4775_s1 + $0x40] sm:$0xff]   ;;  %v3133_v17 = vld [vmem:[%s4775_s1 + $0x70] sm:$0xff]  }
   0x6   :  { %1394 = vmatpush1.bf16.msra.mxu0 %v3120_v2  ;;  %3023 = vmatpush1.bf16.msra.mxu1 %v3120_v2  ;;  %v3130_v14 = vld [vmem:[%s4775_s1 + $0x58] sm:$0xff]   ;;  %v3131_v15 = vld [vmem:[%s4775_s1 + $0x60] sm:$0xff]   ;;  %v3190_v25 = vld [vmem:[%s4775_s1 + $0x108] sm:$0xff]  }
   0x7   :  { %1395 = vmatprep.subr.bf16.mxu0 %v3379_v0  ;;  %3008 = vmatprep.subr.bf16.mxu1 %v3379_v0  ;;  %v3134_v18 = vld [vmem:[%s4775_s1 + $0x78] sm:$0xff]   ;;  %v3141_v19 = vld [vmem:[%s4775_s1 + $0x100] sm:$0xff]   ;;  %v3143_v26 = vld [vmem:[%s4775_s1 + $0x88] sm:$0xff]  }
   0x8   :  { %v3135_v20 = vld [vmem:[%s4776_s0] ss:$20 sps:$4 sm:$0xff]   ;;  %v3148_v27 = vld [vmem:[%s4776_s0 + $0x28] ss:$20 sps:$4 sm:$0xff]   ;;  %v3156_v34 = vld [vmem:[%s4776_s0 + $0x50] ss:$20 sps:$4 sm:$0xff]  }
   0x9   :  { %v3138_v21 = vld [vmem:[%s4776_s0 + $0x140] ss:$20 sps:$4 sm:$0xff]   ;;  %v3149_v28 = vld [vmem:[%s4776_s0 + $0x168] ss:$20 sps:$4 sm:$0xff]   ;;  %v3157_v35 = vld [vmem:[%s4776_s0 + $0x190] ss:$20 sps:$4 sm:$0xff]  }
   0xa   :  { %1396 = vmatpush1.bf16.msra.mxu0 %v3121_v3  ;;  %3024 = vmatpush1.bf16.msra.mxu1 %v3121_v3  ;;  %v3142_v22 = vld [vmem:[%s4775_s1 + $0x80] sm:$0xff]   ;;  %v3150_v29 = vld [vmem:[%s4775_s1 + $0x90] sm:$0xff]   ;;  %v3151_v33 = vld [vmem:[%s4775_s1 + $0x98] sm:$0xff]  }
   0xb   :  { %1397 = vmatprep.subr.bf16.mxu0 %v3379_v0  ;;  %3009 = vmatprep.subr.bf16.mxu1 %v3379_v0  ;;  %v3144_v23 = vld [vmem:[%s4776_s0 + $0x2c] ss:$20 sps:$4 sm:$0xff]   ;;  %v3231_v30 = vld [vmem:[%s4775_s1 + $0x110] sm:$0xff]   ;;  %v3168_v43 = vld [vmem:[%s4776_s0 + $0xa4] ss:$20 sps:$4 sm:$0xff]  }
   0xc   :  { %v3146_v24 = vld [vmem:[%s4776_s0 + $0x16c] ss:$20 sps:$4 sm:$0xff]   ;;  %v3152_v31 = vld [vmem:[%s4776_s0 + $0x54] ss:$20 sps:$4 sm:$0xff]   ;;  %v3160_v37 = vld [vmem:[%s4776_s0 + $0x7c] ss:$20 sps:$4 sm:$0xff]  }
   0xd   :  { %v3154_v32 = vld [vmem:[%s4776_s0 + $0x194] ss:$20 sps:$4 sm:$0xff]   ;;  %v3158_v36 = vld [vmem:[%s4775_s1 + $0xa0] sm:$0xff]   ;;  %v3162_v38 = vld [vmem:[%s4776_s0 + $0x1bc] ss:$20 sps:$4 sm:$0xff]  }
   0xe   :  { %1398 = vmatpush1.bf16.msra.mxu0 %v3122_v4  ;;  %3025 = vmatpush1.bf16.msra.mxu1 %v3122_v4  ;;  %v3159_v39 = vld [vmem:[%s4775_s1 + $0xa8] sm:$0xff]   ;;  %v3166_v42 = vld [vmem:[%s4775_s1 + $0xb0] sm:$0xff]   ;;  %v3268_v44 = vld [vmem:[%s4775_s1 + $0x118] sm:$0xff]  }
   0xf   :  { %1399 = vmatprep.subr.bf16.mxu0 %v3379_v0  ;;  %3010 = vmatprep.subr.bf16.mxu1 %v3379_v0  ;;  %v3164_v40 = vld [vmem:[%s4776_s0 + $0x78] ss:$20 sps:$4 sm:$0xff]   ;;  %v3172_v47 = vld [vmem:[%s4776_s0 + $0xa0] ss:$20 sps:$4 sm:$0xff]   ;;  %v3180_v53 = vld [vmem:[%s4776_s0 + $0xc8] ss:$20 sps:$4 sm:$0xff]  }
  0x10   :  { %v3165_v41 = vld [vmem:[%s4776_s0 + $0x1b8] ss:$20 sps:$4 sm:$0xff]   ;;  %v3173_v48 = vld [vmem:[%s4776_s0 + $0x1e0] ss:$20 sps:$4 sm:$0xff]   ;;  %v3181_v54 = vld [vmem:[%s4776_s0 + $0x208] ss:$20 sps:$4 sm:$0xff]  }
  0x11   :  { %v3170_v45 = vld [vmem:[%s4776_s0 + $0x1e4] ss:$20 sps:$4 sm:$0xff]   ;;  %v3176_v50 = vld [vmem:[%s4776_s0 + $0xcc] ss:$20 sps:$4 sm:$0xff]   ;;  %v3182_v55 = vld [vmem:[%s4775_s1 + $0xd0] sm:$0xff]  }
  0x12   :  { %1400 = vmatpush1.bf16.msra.mxu0 %v3123_v5  ;;  %3026 = vmatpush1.bf16.msra.mxu1 %v3123_v5  ;;  %v3167_v46 = vld [vmem:[%s4775_s1 + $0xb8] sm:$0xff]   ;;  %v3174_v49 = vld [vmem:[%s4775_s1 + $0xc0] sm:$0xff]   ;;  %v3175_v52 = vld [vmem:[%s4775_s1 + $0xc8] sm:$0xff]  }
  0x13   :  { %1401 = vmatprep.subr.bf16.mxu0 %v3379_v0  ;;  %3011 = vmatprep.subr.bf16.mxu1 %v3379_v0  ;;  %v3178_v51 = vld [vmem:[%s4776_s0 + $0x20c] ss:$20 sps:$4 sm:$0xff]   ;;  %v3184_v56 = vld [vmem:[%s4776_s0 + $0xf4] ss:$20 sps:$4 sm:$0xff]   ;;  %v3183_v58 = vld [vmem:[%s4775_s1 + $0xd8] sm:$0xff]  }
  0x14   :  { %v3186_v57 = vld [vmem:[%s4776_s0 + $0x234] ss:$20 sps:$4 sm:$0xff]   ;;  %v3188_v59 = vld [vmem:[%s4776_s0 + $0xf0] ss:$20 sps:$4 sm:$0xff]   ;;  %v3197_v2 = vld [vmem:[%s4776_s0 + $0x118] ss:$20 sps:$4 sm:$0xff]  }
  0x15   :  { %v3189_v60 = vld [vmem:[%s4776_s0 + $0x230] ss:$20 sps:$4 sm:$0xff]   ;;  %v3192_v1 = vld [vmem:[%s4775_s1 + $0xe8] sm:$0xff]  }
  0x16   :  { %1402 = vmatpush1.bf16.msra.mxu0 %v3124_v7  ;;  %3027 = vmatpush1.bf16.msra.mxu1 %v3124_v7  ;;  %v3191_v61 = vld [vmem:[%s4775_s1 + $0xe0] sm:$0xff]   ;;  %v3193_v62 = vld [vmem:[%s4776_s0 + $0x11c] ss:$20 sps:$4 sm:$0xff]   ;;  %v3198_v3 = vld [vmem:[%s4776_s0 + $0x258] ss:$20 sps:$4 sm:$0xff]  }
  0x17   :  { %1403 = vmatprep.subr.bf16.mxu0 %v3379_v0  ;;  %3012 = vmatprep.subr.bf16.mxu1 %v3379_v0  ;;  %v3195_v63 = vld [vmem:[%s4776_s0 + $0x25c] ss:$20 sps:$4 sm:$0xff]   ;;  %v3201_v5 = vld [vmem:[%s4776_s0 + $0x284] ss:$20 sps:$4 sm:$0xff]   ;;  %v3205_v6 = vld [vmem:[%s4776_s0 + $0xc] ss:$20 sps:$4 sm:$0xff]  }
  0x18   :  { %v3199_v4 = vld [vmem:[%s4775_s1 + $0xf0] sm:$0xff]   ;;  %v3200_v7 = vld [vmem:[%s4775_s1 + $0xf8] sm:$0xff]  }
  0x19   :  { %v3203_v8 = vld [vmem:[%s4776_s0 + $0x8] ss:$20 sps:$4 sm:$0xff]  }
  0x1a   :  { %1404 = vmatpush1.bf16.msra.mxu0 %v3125_v9  ;;  %3028 = vmatpush1.bf16.msra.mxu1 %v3125_v9  ;;  %v3206_v9 = vld [vmem:[%s4776_s0 + $0x280] ss:$20 sps:$4 sm:$0xff]  }
  0x1b   :  { %1405 = vmatprep.subr.bf16.mxu0 %v3379_v0  ;;  %3013 = vmatprep.subr.bf16.mxu1 %v3379_v0 }
  0x1e   :  { %1406 = vmatpush1.bf16.msra.mxu0 %v3126_v10  ;;  %3029 = vmatpush1.bf16.msra.mxu1 %v3126_v10  ;;  %v3207_v10 = vld [vmem:[%s4776_s0 + $0x2ac] ss:$20 sps:$4 sm:$0xff]  }
  0x1f   :  { %1407 = vmatprep.subr.bf16.mxu0 %v3379_v0  ;;  %3014 = vmatprep.subr.bf16.mxu1 %v3379_v0 }
  0x22   :  { %1408 = vmatpush1.bf16.msra.mxu0 %v3127_v11  ;;  %3030 = vmatpush1.bf16.msra.mxu1 %v3127_v11  ;;  %v3209_v11 = vld [vmem:[%s4776_s0 + $0x34] ss:$20 sps:$4 sm:$0xff]  }
  0x23   :  { %1409 = vmatprep.subr.bf16.mxu0 %v3379_v0  ;;  %3015 = vmatprep.subr.bf16.mxu1 %v3379_v0 }
  0x26   :  { %1410 = vmatpush1.bf16.msra.mxu0 %v3128_v12  ;;  %3031 = vmatpush1.bf16.msra.mxu1 %v3128_v12  ;;  %v3212_v12 = vld [vmem:[%s4776_s0 + $0x30] ss:$20 sps:$4 sm:$0xff]  }
  0x27   :  { %1411 = vmatprep.subr.bf16.mxu0 %v3379_v0  ;;  %3016 = vmatprep.subr.bf16.mxu1 %v3379_v0 }
  0x2a   :  { %1412 = vmatpush1.bf16.msra.mxu0 %v3129_v13  ;;  %3032 = vmatpush1.bf16.msra.mxu1 %v3129_v13  ;;  %v3213_v13 = vld [vmem:[%s4776_s0 + $0x2d4] ss:$20 sps:$4 sm:$0xff]  }
  0x2b   :  { %1413 = vmatprep.subr.bf16.mxu0 %v3379_v0  ;;  %3017 = vmatprep.subr.bf16.mxu1 %v3379_v0 }
  0x2e   :  { %1414 = vmatpush1.bf16.msra.mxu0 %v3130_v14  ;;  %3033 = vmatpush1.bf16.msra.mxu1 %v3130_v14  ;;  %v3215_v14 = vld [vmem:[%s4776_s0 + $0x5c] ss:$20 sps:$4 sm:$0xff]  }
  0x2f   :  { %1415 = vmatprep.subr.bf16.mxu0 %v3379_v0  ;;  %3018 = vmatprep.subr.bf16.mxu1 %v3379_v0 }
  0x32   :  { %1416 = vmatpush1.bf16.msra.mxu0 %v3131_v15  ;;  %3034 = vmatpush1.bf16.msra.mxu1 %v3131_v15  ;;  %v3217_v15 = vld [vmem:[%s4776_s0 + $0x2d0] ss:$20 sps:$4 sm:$0xff]  }
  0x33   :  { %1417 = vmatprep.subr.bf16.mxu0 %v3379_v0  ;;  %3019 = vmatprep.subr.bf16.mxu1 %v3379_v0 }
  0x36   :  { %1418 = vmatpush1.bf16.msra.mxu0 %v3132_v16  ;;  %3035 = vmatpush1.bf16.msra.mxu1 %v3132_v16  ;;  %v3218_v16 = vld [vmem:[%s4776_s0 + $0x58] ss:$20 sps:$4 sm:$0xff]  }
  0x37   :  { %1419 = vmatprep.subr.bf16.mxu0 %v3379_v0  ;;  %3020 = vmatprep.subr.bf16.mxu1 %v3379_v0 }
  0x3a   :  { %1420 = vmatpush1.bf16.msra.mxu0 %v3133_v17  ;;  %3036 = vmatpush1.bf16.msra.mxu1 %v3133_v17  ;;  %v3219_v17 = vld [vmem:[%s4776_s0 + $0x2fc] ss:$20 sps:$4 sm:$0xff]  }
  0x3b   :  { %1421 = vmatprep.subr.bf16.mxu0 %v3379_v0  ;;  %3021 = vmatprep.subr.bf16.mxu1 %v3379_v0 }
  0x3e   :  { %1422 = vmatpush1.bf16.msra.mxu0 %v3134_v18  ;;  %3037 = vmatpush1.bf16.msra.mxu1 %v3134_v18  ;;  %v3221_v18 = vld [vmem:[%s4776_s0 + $0x84] ss:$20 sps:$4 sm:$0xff]  }
  0x3f   :  { %1680 = vmatprep.subr.bf16.mxu0 %v3379_v0  ;;  %2934 = vmatprep.subr.bf16.mxu1 %v3141_v19 }
  0x41   :  { %1424 = vmatmul.mubr.bf16.vlgmr.msra.gmra.mrb[0].mxu0 %v3135_v20  ;;  %1488 = vmatmul.mubr.bf16.vlgmr.msra.gmra.mrb[0].mxu1 %v3138_v21  ;;  %v3224_v20 = vld [vmem:[%s4776_s0 + $0x80] ss:$20 sps:$4 sm:$0xff]   ;;  %v3225_v21 = vld [vmem:[%s4776_s0 + $0x324] ss:$20 sps:$4 sm:$0xff]  }
  0x42   :  { %1681 = vmatpush1.bf16.msra.mxu0 %v3142_v22  ;;  %2935 = vmatpush3.bf16.msra.mxu1 %v3141_v19  ;;  %v3223_v19 = vld [vmem:[%s4776_s0 + $0x2f8] ss:$20 sps:$4 sm:$0xff]  }
  0x43   :  { %1682 = vmatprep.subr.bf16.mxu0 %v3379_v0  ;;  %1431 = vmatprep.mubr.bf16.mxu0 %v3144_v23  ;;  %v3227_v22 = vld [vmem:[%s4776_s0 + $0xac] ss:$20 sps:$4 sm:$0xff]  }
  0x44   :  { %1495 = vmatprep.mubr.bf16.mxu1 %v3146_v24  ;;  %2936 = vmatprep.subr.bf16.mxu1 %v3190_v25  ;;  %v3229_v23 = vld [vmem:[%s4776_s0 + $0x320] ss:$20 sps:$4 sm:$0xff]   ;;  %v3230_v24 = vld [vmem:[%s4776_s0 + $0xa8] ss:$20 sps:$4 sm:$0xff]  }
  0x46   :  { %1683 = vmatpush1.bf16.msra.mxu0 %v3143_v26  ;;  %2937 = vmatpush3.bf16.msra.mxu1 %v3190_v25  ;;  %v3232_v25 = vld [vmem:[%s4776_s0 + $0x34c] ss:$20 sps:$4 sm:$0xff]   ;;  %v3234_v26 = vld [vmem:[%s4776_s0 + $0xd4] ss:$20 sps:$4 sm:$0xff]  }
  0x47   :  { %1684 = vmatprep.subr.bf16.mxu0 %v3379_v0  ;;  %2938 = vmatprep.subr.bf16.mxu1 %v3231_v30 }
  0x49   :  { %1432 = vmatmul.mubr.bf16.gmra.mrb[4].mxu0 %v3148_v27  ;;  %1496 = vmatmul.mubr.bf16.gmra.mrb[4].mxu1 %v3149_v28  ;;  %v3236_v27 = vld [vmem:[%s4776_s0 + $0x348] ss:$20 sps:$4 sm:$0xff]   ;;  %v3237_v28 = vld [vmem:[%s4776_s0 + $0xd0] ss:$20 sps:$4 sm:$0xff]  }
  0x4a   :  { %1685 = vmatpush1.bf16.msra.mxu0 %v3150_v29  ;;  %1439 = vmatprep.mubr.bf16.mxu0 %v3152_v31  ;;  %v3238_v29 = vld [vmem:[%s4776_s0 + $0x374] ss:$20 sps:$4 sm:$0xff]   ;;  %v3242_v31 = vld [vmem:[%s4776_s0 + $0x370] ss:$20 sps:$4 sm:$0xff]  }
  0x4b   :  { %1686 = vmatprep.subr.bf16.mxu0 %v3379_v0  ;;  %1503 = vmatprep.mubr.bf16.mxu1 %v3154_v32  ;;  %v3243_v32 = vld [vmem:[%s4776_s0 + $0xf8] ss:$20 sps:$4 sm:$0xff]  }
  0x4c   :  { %2939 = vmatpush3.bf16.msra.mxu1 %v3231_v30  ;;  %v3240_v30 = vld [vmem:[%s4776_s0 + $0xfc] ss:$20 sps:$4 sm:$0xff]  }
  0x4d   :  { %2940 = vmatprep.subr.bf16.mxu1 %v3268_v44 }
  0x4e   :  { %1687 = vmatpush1.bf16.msra.mxu0 %v3151_v33  ;;  %v3244_v33 = vld [vmem:[%s4776_s0 + $0x39c] ss:$20 sps:$4 sm:$0xff]  }
  0x4f   :  { %1688 = vmatprep.subr.bf16.mxu0 %v3379_v0 }
  0x50   :  { %2941 = vmatpush3.bf16.msra.mxu1 %v3268_v44  ;;  %v3261_v44 = vld [vmem:[%s4776_s0 + $0x170] ss:$20 sps:$4 sm:$0xff]  }
  0x51   :  { %1440 = vmatmul.mubr.bf16.gmra.mrb[8].mxu0 %v3156_v34  ;;  %1504 = vmatmul.mubr.bf16.gmra.mrb[8].mxu1 %v3157_v35  ;;  %v3246_v34 = vld [vmem:[%s4776_s0 + $0x124] ss:$20 sps:$4 sm:$0xff]  }
  0x52   :  { %1689 = vmatpush1.bf16.msra.mxu0 %v3158_v36  ;;  %1447 = vmatprep.mubr.bf16.mxu0 %v3160_v37  ;;  %v3248_v35 = vld [vmem:[%s4776_s0 + $0x398] ss:$20 sps:$4 sm:$0xff]   ;;  %v3249_v36 = vld [vmem:[%s4776_s0 + $0x120] ss:$20 sps:$4 sm:$0xff]  }
  0x53   :  { %1690 = vmatprep.subr.bf16.mxu0 %v3379_v0  ;;  %1511 = vmatprep.mubr.bf16.mxu1 %v3162_v38  ;;  %v3250_v37 = vld [vmem:[%s4776_s0 + $0x3c4] ss:$20 sps:$4 sm:$0xff]   ;;  %v3252_v38 = vld [vmem:[%s4776_s0 + $0x14c] ss:$20 sps:$4 sm:$0xff]  }
  0x56   :  { %1691 = vmatpush1.bf16.msra.mxu0 %v3159_v39  ;;  %v3254_v39 = vld [vmem:[%s4776_s0 + $0x3c0] ss:$20 sps:$4 sm:$0xff]  }
  0x57   :  { %1692 = vmatprep.subr.bf16.mxu0 %v3379_v0 }
  0x59   :  { %1448 = vmatmul.mubr.bf16.gmra.mrb[12].mxu0 %v3164_v40  ;;  %1512 = vmatmul.mubr.bf16.gmra.mrb[12].mxu1 %v3165_v41  ;;  %v3255_v40 = vld [vmem:[%s4776_s0 + $0x148] ss:$20 sps:$4 sm:$0xff]   ;;  %v3256_v41 = vld [vmem:[%s4776_s0 + $0x3ec] ss:$20 sps:$4 sm:$0xff]  }
  0x5a   :  { %1693 = vmatpush1.bf16.msra.mxu0 %v3166_v42  ;;  %1455 = vmatprep.mubr.bf16.mxu0 %v3168_v43  ;;  %v3258_v42 = vld [vmem:[%s4776_s0 + $0x174] ss:$20 sps:$4 sm:$0xff]  }
  0x5b   :  { %1694 = vmatprep.subr.bf16.mxu0 %v3379_v0  ;;  %1519 = vmatprep.mubr.bf16.mxu1 %v3170_v45  ;;  %v3260_v43 = vld [vmem:[%s4776_s0 + $0x3e8] ss:$20 sps:$4 sm:$0xff]  }
  0x5c   :  { %v3262_v45 = vld [vmem:[%s4776_s0 + $0x414] ss:$20 sps:$4 sm:$0xff]  }
  0x5e   :  { %1695 = vmatpush1.bf16.msra.mxu0 %v3167_v46  ;;  %v3264_v46 = vld [vmem:[%s4776_s0 + $0x19c] ss:$20 sps:$4 sm:$0xff]  }
  0x5f   :  { %1696 = vmatprep.subr.bf16.mxu0 %v3379_v0 }
  0x61   :  { %1456 = vmatmul.mubr.bf16.gmra.mrb[16].mxu0 %v3172_v47  ;;  %1520 = vmatmul.mubr.bf16.gmra.mrb[16].mxu1 %v3173_v48  ;;  %v3266_v47 = vld [vmem:[%s4776_s0 + $0x410] ss:$20 sps:$4 sm:$0xff]   ;;  %v3267_v48 = vld [vmem:[%s4776_s0 + $0x198] ss:$20 sps:$4 sm:$0xff]  }
  0x62   :  { %1697 = vmatpush1.bf16.msra.mxu0 %v3174_v49  ;;  %1463 = vmatprep.mubr.bf16.mxu0 %v3176_v50  ;;  %v3269_v49 = vld [vmem:[%s4776_s0 + $0x43c] ss:$20 sps:$4 sm:$0xff]   ;;  %v3271_v50 = vld [vmem:[%s4776_s0 + $0x1c4] ss:$20 sps:$4 sm:$0xff]  }
  0x63   :  { %1698 = vmatprep.subr.bf16.mxu0 %v3379_v0  ;;  %1527 = vmatprep.mubr.bf16.mxu1 %v3178_v51  ;;  %v3273_v51 = vld [vmem:[%s4776_s0 + $0x438] ss:$20 sps:$4 sm:$0xff]  }
  0x66   :  { %1699 = vmatpush1.bf16.msra.mxu0 %v3175_v52  ;;  %v3274_v52 = vld [vmem:[%s4776_s0 + $0x1c0] ss:$20 sps:$4 sm:$0xff]  }
  0x67   :  { %1700 = vmatprep.subr.bf16.mxu0 %v3379_v0 }
  0x69   :  { %1464 = vmatmul.mubr.bf16.gmra.mrb[20].mxu0 %v3180_v53  ;;  %1528 = vmatmul.mubr.bf16.gmra.mrb[20].mxu1 %v3181_v54  ;;  %v3275_v53 = vld [vmem:[%s4776_s0 + $0x464] ss:$20 sps:$4 sm:$0xff]   ;;  %v3277_v54 = vld [vmem:[%s4776_s0 + $0x1ec] ss:$20 sps:$4 sm:$0xff]  }
  0x6a   :  { %1701 = vmatpush1.bf16.msra.mxu0 %v3182_v55  ;;  %1471 = vmatprep.mubr.bf16.mxu0 %v3184_v56  ;;  %v3279_v55 = vld [vmem:[%s4776_s0 + $0x460] ss:$20 sps:$4 sm:$0xff]   ;;  %v3280_v56 = vld [vmem:[%s4776_s0 + $0x1e8] ss:$20 sps:$4 sm:$0xff]  }
  0x6b   :  { %1702 = vmatprep.subr.bf16.mxu0 %v3379_v0  ;;  %1535 = vmatprep.mubr.bf16.mxu1 %v3186_v57  ;;  %v3281_v57 = vld [vmem:[%s4776_s0 + $0x48c] ss:$20 sps:$4 sm:$0xff]  }
  0x6e   :  { %1703 = vmatpush1.bf16.msra.mxu0 %v3183_v58  ;;  %v3283_v58 = vld [vmem:[%s4776_s0 + $0x214] ss:$20 sps:$4 sm:$0xff]  }
  0x6f   :  { %1704 = vmatprep.subr.bf16.mxu0 %v3379_v0 }
  0x71   :  { %1472 = vmatmul.mubr.bf16.gmra.mrb[24].mxu0 %v3188_v59  ;;  %1536 = vmatmul.mubr.bf16.gmra.mrb[24].mxu1 %v3189_v60  ;;  %v3285_v59 = vld [vmem:[%s4776_s0 + $0x488] ss:$20 sps:$4 sm:$0xff]   ;;  %v3286_v60 = vld [vmem:[%s4776_s0 + $0x210] ss:$20 sps:$4 sm:$0xff]  }
  0x72   :  { %1705 = vmatpush1.bf16.msra.mxu0 %v3191_v61  ;;  %1479 = vmatprep.mubr.bf16.mxu0 %v3193_v62  ;;  %v3287_v61 = vld [vmem:[%s4776_s0 + $0x4b4] ss:$20 sps:$4 sm:$0xff]   ;;  %v3289_v62 = vld [vmem:[%s4776_s0 + $0x23c] ss:$20 sps:$4 sm:$0xff]  }
  0x73   :  { %1706 = vmatprep.subr.bf16.mxu0 %v3379_v0  ;;  %1543 = vmatprep.mubr.bf16.mxu1 %v3195_v63  ;;  %v3291_v63 = vld [vmem:[%s4776_s0 + $0x4b0] ss:$20 sps:$4 sm:$0xff]  }
  0x76   :  { %1707 = vmatpush1.bf16.msra.mxu0 %v3192_v1  ;;  %v3292_v1 = vld [vmem:[%s4776_s0 + $0x238] ss:$20 sps:$4 sm:$0xff]  }
  0x77   :  { %1708 = vmatprep.subr.bf16.mxu0 %v3379_v0 }
  0x79   :  { %1480 = vmatmul.mubr.bf16.gmra.mrb[28].mxu0 %v3197_v2  ;;  %1544 = vmatmul.mubr.bf16.gmra.mrb[28].mxu1 %v3198_v3  ;;  %v3293_v2 = vld [vmem:[%s4776_s0 + $0x4dc] ss:$20 sps:$4 sm:$0xff]   ;;  %v3295_v3 = vld [vmem:[%s4776_s0 + $0x264] ss:$20 sps:$4 sm:$0xff]  }
  0x7a   :  { %1709 = vmatpush1.bf16.msra.mxu0 %v3199_v4  ;;  %1551 = vmatprep.mubr.bf16.mxu1 %v3201_v5  ;;  %v3297_v4 = vld [vmem:[%s4776_s0 + $0x4d8] ss:$20 sps:$4 sm:$0xff]   ;;  %v3298_v5 = vld [vmem:[%s4776_s0 + $0x260] ss:$20 sps:$4 sm:$0xff]  }
  0x7b   :  { %1710 = vmatprep.subr.bf16.mxu0 %v3379_v0  ;;  %1712 = vmatprep.mubr.bf16.mxu0 %v3205_v6  ;;  %v3211_v0 = vld [vmem:[%s4776_s0 + $0x2a8] ss:$20 sps:$4 sm:$0xff]   ;;  %v3299_v6 = vld [vmem:[%s4776_s0 + $0x28c] ss:$20 sps:$4 sm:$0xff]  }
  0x7e   :  { %1711 = vmatpush1.bf16.msra.mxu0 %v3200_v7  ;;  %v3301_v7 = vld [vmem:[%s4776_s0 + $0x10] ss:$20 sps:$4 sm:$0xff]  }
  0x81   :  { %1552 = vmatmul.mubr.bf16.gmra.mrb[32].mxu1 %v3206_v9  ;;  %1713 = vmatmul.mubr.bf16.vlgmr.msra.gmra.mrb[0].mxu0 %v3203_v8  ;;  %v3302_v8 = vld [vmem:[%s4776_s0 + $0x288] ss:$20 sps:$4 sm:$0xff]   ;;  %v3303_v9 = vld [vmem:[%s4776_s0 + $0x38] ss:$20 sps:$4 sm:$0xff]  }
  0x82   :  { %1559 = vmatprep.mubr.bf16.mxu1 %v3207_v10  ;;  %1720 = vmatprep.mubr.bf16.mxu0 %v3209_v11  ;;  %v3304_v10 = vld [vmem:[%s4776_s0 + $0x2b4] ss:$20 sps:$4 sm:$0xff]  }
  0x83   :  { %v3306_v11 = vld [vmem:[%s4776_s0 + $0x60] ss:$20 sps:$4 sm:$0xff]  }
  0x89   :  { %1560 = vmatmul.mubr.bf16.gmra.mrb[36].mxu1 %v3211_v0  ;;  %1721 = vmatmul.mubr.bf16.gmra.mrb[4].mxu0 %v3212_v12  ;;  %v3307_v0 = vld [vmem:[%s4776_s0 + $0x2b0] ss:$20 sps:$4 sm:$0xff]   ;;  %v3308_v12 = vld [vmem:[%s4776_s0 + $0x88] ss:$20 sps:$4 sm:$0xff]  }
  0x8a   :  { %1567 = vmatprep.mubr.bf16.mxu1 %v3213_v13  ;;  %1728 = vmatprep.mubr.bf16.mxu0 %v3215_v14  ;;  %v3309_v13 = vld [vmem:[%s4776_s0 + $0x2dc] ss:$20 sps:$4 sm:$0xff]  }
  0x8b   :  { %v3311_v14 = vld [vmem:[%s4776_s0 + $0xb0] ss:$20 sps:$4 sm:$0xff]  }
  0x91   :  { %1568 = vmatmul.mubr.bf16.gmra.mrb[40].mxu1 %v3217_v15  ;;  %1729 = vmatmul.mubr.bf16.gmra.mrb[8].mxu0 %v3218_v16  ;;  %v3312_v15 = vld [vmem:[%s4776_s0 + $0x2d8] ss:$20 sps:$4 sm:$0xff]  }
  0x92   :  { %1575 = vmatprep.mubr.bf16.mxu1 %v3219_v17  ;;  %1736 = vmatprep.mubr.bf16.mxu0 %v3221_v18  ;;  %v3313_v16 = vld [vmem:[%s4776_s0 + $0xd8] ss:$20 sps:$4 sm:$0xff]   ;;  %v3316_v18 = vld [vmem:[%s4776_s0 + $0x100] ss:$20 sps:$4 sm:$0xff]  }
  0x93   :  { %v3314_v17 = vld [vmem:[%s4776_s0 + $0x304] ss:$20 sps:$4 sm:$0xff]  }
  0x99   :  { %1576 = vmatmul.mubr.bf16.gmra.mrb[44].mxu1 %v3223_v19  ;;  %1737 = vmatmul.mubr.bf16.gmra.mrb[12].mxu0 %v3224_v20 }
  0x9a   :  { %1583 = vmatprep.mubr.bf16.mxu1 %v3225_v21  ;;  %1744 = vmatprep.mubr.bf16.mxu0 %v3227_v22  ;;  %v3317_v21 = vld [vmem:[%s4776_s0 + $0x300] ss:$20 sps:$4 sm:$0xff]   ;;  %v3318_v22 = vld [vmem:[%s4776_s0 + $0x128] ss:$20 sps:$4 sm:$0xff]  }
  0xa1   :  { %1584 = vmatmul.mubr.bf16.gmra.mrb[48].mxu1 %v3229_v23  ;;  %1745 = vmatmul.mubr.bf16.gmra.mrb[16].mxu0 %v3230_v24  ;;  %v3319_v24 = vld [vmem:[%s4776_s0 + $0x32c] ss:$20 sps:$4 sm:$0xff]  }
  0xa2   :  { %1591 = vmatprep.mubr.bf16.mxu1 %v3232_v25  ;;  %1752 = vmatprep.mubr.bf16.mxu0 %v3234_v26  ;;  %v3321_v25 = vld [vmem:[%s4776_s0 + $0x150] ss:$20 sps:$4 sm:$0xff]  }
  0xa9   :  { %1592 = vmatmul.mubr.bf16.gmra.mrb[52].mxu1 %v3236_v27  ;;  %1753 = vmatmul.mubr.bf16.gmra.mrb[20].mxu0 %v3237_v28 }
  0xaa   :  { %1599 = vmatprep.mubr.bf16.mxu1 %v3238_v29  ;;  %1760 = vmatprep.mubr.bf16.mxu0 %v3240_v30  ;;  %v3322_v29 = vld [vmem:[%s4776_s0 + $0x328] ss:$20 sps:$4 sm:$0xff]   ;;  %v3323_v30 = vld [vmem:[%s4776_s0 + $0x178] ss:$20 sps:$4 sm:$0xff]  }
  0xb1   :  { %1600 = vmatmul.mubr.bf16.gmra.mrb[56].mxu1 %v3242_v31  ;;  %1761 = vmatmul.mubr.bf16.gmra.mrb[24].mxu0 %v3243_v32  ;;  %v3324_v32 = vld [vmem:[%s4776_s0 + $0x354] ss:$20 sps:$4 sm:$0xff]  }
  0xb2   :  { %1607 = vmatprep.mubr.bf16.mxu1 %v3244_v33  ;;  %1768 = vmatprep.mubr.bf16.mxu0 %v3246_v34  ;;  %v3326_v33 = vld [vmem:[%s4776_s0 + $0x1a0] ss:$20 sps:$4 sm:$0xff]  }
  0xb9   :  { %1608 = vmatmul.mubr.bf16.gmra.mrb[60].mxu1 %v3248_v35  ;;  %1769 = vmatmul.mubr.bf16.gmra.mrb[28].mxu0 %v3249_v36 }
  0xba   :  { %1615 = vmatprep.mubr.bf16.mxu1 %v3250_v37  ;;  %1776 = vmatprep.mubr.bf16.mxu0 %v3252_v38  ;;  %v3327_v37 = vld [vmem:[%s4776_s0 + $0x350] ss:$20 sps:$4 sm:$0xff]   ;;  %v3328_v38 = vld [vmem:[%s4776_s0 + $0x1c8] ss:$20 sps:$4 sm:$0xff]  }
  0xc1   :  { %1616 = vmatmul.mubr.bf16.gmra.mrb[64].mxu1 %v3254_v39  ;;  %1777 = vmatmul.mubr.bf16.gmra.mrb[32].mxu0 %v3255_v40  ;;  %v3329_v40 = vld [vmem:[%s4776_s0 + $0x37c] ss:$20 sps:$4 sm:$0xff]  }
  0xc2   :  { %1623 = vmatprep.mubr.bf16.mxu1 %v3256_v41  ;;  %1784 = vmatprep.mubr.bf16.mxu0 %v3258_v42  ;;  %v3331_v41 = vld [vmem:[%s4776_s0 + $0x1f0] ss:$20 sps:$4 sm:$0xff]  }
  0xc9   :  { %1624 = vmatmul.mubr.bf16.gmra.mrb[68].mxu1 %v3260_v43  ;;  %1785 = vmatmul.mubr.bf16.gmra.mrb[36].mxu0 %v3261_v44 }
  0xca   :  { %1631 = vmatprep.mubr.bf16.mxu1 %v3262_v45  ;;  %1792 = vmatprep.mubr.bf16.mxu0 %v3264_v46  ;;  %v3332_v45 = vld [vmem:[%s4776_s0 + $0x378] ss:$20 sps:$4 sm:$0xff]  }
  0xcb   :  { %v3333_v46 = vld [vmem:[%s4776_s0 + $0x218] ss:$20 sps:$4 sm:$0xff]  }
  0xd1   :  { %1632 = vmatmul.mubr.bf16.gmra.mrb[72].mxu1 %v3266_v47  ;;  %1793 = vmatmul.mubr.bf16.gmra.mrb[40].mxu0 %v3267_v48  ;;  %v3334_v48 = vld [vmem:[%s4776_s0 + $0x3a4] ss:$20 sps:$4 sm:$0xff]  }
  0xd2   :  { %1639 = vmatprep.mubr.bf16.mxu1 %v3269_v49  ;;  %1800 = vmatprep.mubr.bf16.mxu0 %v3271_v50  ;;  %v3336_v49 = vld [vmem:[%s4776_s0 + $0x240] ss:$20 sps:$4 sm:$0xff]  }
  0xd9   :  { %1640 = vmatmul.mubr.bf16.gmra.mrb[76].mxu1 %v3273_v51  ;;  %1801 = vmatmul.mubr.bf16.gmra.mrb[44].mxu0 %v3274_v52 }
  0xda   :  { %1647 = vmatprep.mubr.bf16.mxu1 %v3275_v53  ;;  %1808 = vmatprep.mubr.bf16.mxu0 %v3277_v54  ;;  %v3337_v53 = vld [vmem:[%s4776_s0 + $0x3a0] ss:$20 sps:$4 sm:$0xff]   ;;  %v3338_v54 = vld [vmem:[%s4776_s0 + $0x268] ss:$20 sps:$4 sm:$0xff]  }
  0xe1   :  { %1648 = vmatmul.mubr.bf16.gmra.mrb[80].mxu1 %v3279_v55  ;;  %1809 = vmatmul.mubr.bf16.gmra.mrb[48].mxu0 %v3280_v56  ;;  %v3339_v56 = vld [vmem:[%s4776_s0 + $0x3cc] ss:$20 sps:$4 sm:$0xff]  }
  0xe2   :  { %1655 = vmatprep.mubr.bf16.mxu1 %v3281_v57  ;;  %1816 = vmatprep.mubr.bf16.mxu0 %v3283_v58  ;;  %v3341_v57 = vld [vmem:[%s4776_s0 + $0x290] ss:$20 sps:$4 sm:$0xff]  }
  0xe9   :  { %1656 = vmatmul.mubr.bf16.gmra.mrb[84].mxu1 %v3285_v59  ;;  %1817 = vmatmul.mubr.bf16.gmra.mrb[52].mxu0 %v3286_v60 }
  0xea   :  { %1663 = vmatprep.mubr.bf16.mxu1 %v3287_v61  ;;  %1824 = vmatprep.mubr.bf16.mxu0 %v3289_v62  ;;  %v3342_v61 = vld [vmem:[%s4776_s0 + $0x3c8] ss:$20 sps:$4 sm:$0xff]   ;;  %v3343_v62 = vld [vmem:[%s4776_s0 + $0x2b8] ss:$20 sps:$4 sm:$0xff]  }
  0xf1   :  { %1664 = vmatmul.mubr.bf16.gmra.mrb[88].mxu1 %v3291_v63  ;;  %1825 = vmatmul.mubr.bf16.gmra.mrb[56].mxu0 %v3292_v1  ;;  %v3344_v1 = vld [vmem:[%s4776_s0 + $0x3f4] ss:$20 sps:$4 sm:$0xff]  }
  0xf2   :  { %1671 = vmatprep.mubr.bf16.mxu1 %v3293_v2  ;;  %1832 = vmatprep.mubr.bf16.mxu0 %v3295_v3  ;;  %v3346_v2 = vld [vmem:[%s4776_s0 + $0x2e0] ss:$20 sps:$4 sm:$0xff]  }
  0xf9   :  { %1672 = vmatmul.mubr.bf16.gmra.mrb[92].mxu1 %v3297_v4  ;;  %1833 = vmatmul.mubr.bf16.gmra.mrb[60].mxu0 %v3298_v5 }
  0xfa   :  { %1840 = vmatprep.mubr.bf16.mxu0 %v3299_v6  ;;  %2942 = vmatprep.mubr.msk.bf16.mxu1 %vm1294_vm0, %v3301_v7  ;;  %v3347_v6 = vld [vmem:[%s4776_s0 + $0x3f0] ss:$20 sps:$4 sm:$0xff]   ;;  %v3348_v7 = vld [vmem:[%s4776_s0 + $0x308] ss:$20 sps:$4 sm:$0xff]  }
 0x101   :  { %1841 = vmatmul.mubr.bf16.gmra.mrb[64].mxu0 %v3302_v8  ;;  %2943 = vmatmul.mubr.msk.bf16.vlgmr.msra.gmra.mrb[96].mxu1 %vm1294_vm0, %v3303_v9  ;;  %v3349_v9 = vld [vmem:[%s4776_s0 + $0x41c] ss:$20 sps:$4 sm:$0xff]  }
 0x102   :  { %1848 = vmatprep.mubr.bf16.mxu0 %v3304_v10  ;;  %2946 = vmatprep.mubr.msk.bf16.mxu1 %vm1294_vm0, %v3306_v11  ;;  %v3351_v10 = vld [vmem:[%s4776_s0 + $0x330] ss:$20 sps:$4 sm:$0xff]  }
 0x109   :  { %1849 = vmatmul.mubr.bf16.gmra.mrb[68].mxu0 %v3307_v0  ;;  %2947 = vmatmul.mubr.msk.bf16.gmra.mrb[100].mxu1 %vm1294_vm0, %v3308_v12 }
 0x10a   :  { %1856 = vmatprep.mubr.bf16.mxu0 %v3309_v13  ;;  %2950 = vmatprep.mubr.msk.bf16.mxu1 %vm1294_vm0, %v3311_v14  ;;  %v3352_v13 = vld [vmem:[%s4776_s0 + $0x418] ss:$20 sps:$4 sm:$0xff]  }
 0x10b   :  { %v3353_v14 = vld [vmem:[%s4776_s0 + $0x358] ss:$20 sps:$4 sm:$0xff]  }
 0x111   :  { %1857 = vmatmul.mubr.bf16.gmra.mrb[72].mxu0 %v3312_v15  ;;  %2951 = vmatmul.mubr.msk.bf16.gmra.mrb[104].mxu1 %vm1294_vm0, %v3313_v16  ;;  %v3354_v16 = vld [vmem:[%s4776_s0 + $0x444] ss:$20 sps:$4 sm:$0xff]  }
 0x112   :  { %1864 = vmatprep.mubr.bf16.mxu0 %v3314_v17  ;;  %2954 = vmatprep.mubr.msk.bf16.mxu1 %vm1294_vm0, %v3316_v18  ;;  %v3356_v17 = vld [vmem:[%s4776_s0 + $0x380] ss:$20 sps:$4 sm:$0xff]  }
 0x114   :  { %v3893_v19 = vpop.f32.mrb[0].mxu1 }
 0x115   :  { %v1491_v20 = vpop.f32.mrb[1].mxu1 }
 0x116   :  { %v3901_v23 = vpop.f32.mrb[2].mxu1 }
 0x117   :  { %v1494_v26 = vpop.f32.mrb[3].mxu1 }
 0x118   :  { %v3358_v26 = vld [vmem:[%s4776_s0 + $0x3a8] ss:$20 sps:$4 sm:$0xff]  }
 0x119   :  { %1865 = vmatmul.mubr.bf16.gmra.mrb[76].mxu0 %v3317_v21  ;;  %2955 = vmatmul.mubr.msk.bf16.gmra.mrb[108].mxu1 %vm1294_vm0, %v3318_v22 }
 0x11a   :  { %1872 = vmatprep.mubr.bf16.mxu0 %v3319_v24  ;;  %2958 = vmatprep.mubr.msk.bf16.mxu1 %vm1294_vm0, %v3321_v25  ;;  %v3357_v25 = vld [vmem:[%s4776_s0 + $0x440] ss:$20 sps:$4 sm:$0xff]  }
 0x11c   :  { %v3911_v27 = vpop.f32.mrb[4].mxu1 }
 0x11d   :  { %v1499_v28 = vpop.f32.mrb[5].mxu1 }
 0x11e   :  { %v3919_v31 = vpop.f32.mrb[6].mxu1 }
 0x11f   :  { %v1502_v34 = vpop.f32.mrb[7].mxu1 }
 0x121   :  { %1873 = vmatmul.mubr.bf16.gmra.mrb[80].mxu0 %v3322_v29  ;;  %2959 = vmatmul.mubr.msk.bf16.gmra.mrb[112].mxu1 %vm1294_vm0, %v3323_v30  ;;  %v3359_v30 = vld [vmem:[%s4776_s0 + $0x46c] ss:$20 sps:$4 sm:$0xff]  }
 0x122   :  { %1880 = vmatprep.mubr.bf16.mxu0 %v3324_v32  ;;  %2962 = vmatprep.mubr.msk.bf16.mxu1 %vm1294_vm0, %v3326_v33  ;;  %v3361_v32 = vld [vmem:[%s4776_s0 + $0x3d0] ss:$20 sps:$4 sm:$0xff]  }
 0x124   :  { %v3929_v35 = vpop.f32.mrb[8].mxu1 }
 0x125   :  { %v1507_v36 = vpop.f32.mrb[9].mxu1 }
 0x126   :  { %v3937_v39 = vpop.f32.mrb[10].mxu1 }
 0x127   :  { %v1510_v42 = vpop.f32.mrb[11].mxu1 }
 0x128   :  { %v3363_v42 = vld [vmem:[%s4776_s0 + $0x3f8] ss:$20 sps:$4 sm:$0xff]  }
 0x129   :  { %1881 = vmatmul.mubr.bf16.gmra.mrb[84].mxu0 %v3327_v37  ;;  %2963 = vmatmul.mubr.msk.bf16.gmra.mrb[116].mxu1 %vm1294_vm0, %v3328_v38 }
 0x12a   :  { %1888 = vmatprep.mubr.bf16.mxu0 %v3329_v40  ;;  %2966 = vmatprep.mubr.msk.bf16.mxu1 %vm1294_vm0, %v3331_v41  ;;  %v3362_v41 = vld [vmem:[%s4776_s0 + $0x468] ss:$20 sps:$4 sm:$0xff]  }
 0x12c   :  { %v3947_v43 = vpop.f32.mrb[12].mxu1 }
 0x12d   :  { %v1515_v44 = vpop.f32.mrb[13].mxu1 }
 0x12e   :  { %v3955_v47 = vpop.f32.mrb[14].mxu1 }
 0x12f   :  { %v1518_v50 = vpop.f32.mrb[15].mxu1 }
 0x131   :  { %1889 = vmatmul.mubr.bf16.gmra.mrb[88].mxu0 %v3332_v45  ;;  %2967 = vmatmul.mubr.msk.bf16.gmra.mrb[120].mxu1 %vm1294_vm0, %v3333_v46  ;;  %v3364_v46 = vld [vmem:[%s4776_s0 + $0x494] ss:$20 sps:$4 sm:$0xff]  }
 0x132   :  { %1896 = vmatprep.mubr.bf16.mxu0 %v3334_v48  ;;  %2970 = vmatprep.mubr.msk.bf16.mxu1 %vm1294_vm0, %v3336_v49  ;;  %v3366_v48 = vld [vmem:[%s4776_s0 + $0x420] ss:$20 sps:$4 sm:$0xff]  }
 0x134   :  { %v3965_v51 = vpop.f32.mrb[16].mxu1 }
 0x135   :  { %v1523_v52 = vpop.f32.mrb[17].mxu1 }
 0x136   :  { %v3973_v55 = vpop.f32.mrb[18].mxu1 }
 0x137   :  { %v1526_v58 = vpop.f32.mrb[19].mxu1 }
 0x138   :  { %v3368_v58 = vld [vmem:[%s4776_s0 + $0x448] ss:$20 sps:$4 sm:$0xff]  }
 0x139   :  { %1897 = vmatmul.mubr.bf16.gmra.mrb[92].mxu0 %v3337_v53  ;;  %2971 = vmatmul.mubr.msk.bf16.gmra.mrb[124].mxu1 %vm1294_vm0, %v3338_v54 }
 0x13a   :  { %1904 = vmatprep.mubr.bf16.mxu0 %v3339_v56  ;;  %2974 = vmatprep.mubr.msk.bf16.mxu1 %vm1294_vm0, %v3341_v57  ;;  %v3367_v57 = vld [vmem:[%s4776_s0 + $0x490] ss:$20 sps:$4 sm:$0xff]  }
 0x13c   :  { %v3983_v59 = vpop.f32.mrb[20].mxu1 }
 0x13d   :  { %v1531_v60 = vpop.f32.mrb[21].mxu1 }
 0x13e   :  { %v3991_v63 = vpop.f32.mrb[22].mxu1 }
 0x13f   :  { %v1534_v3 = vpop.f32.mrb[23].mxu1 }
 0x141   :  { %1905 = vmatmul.mubr.bf16.gmra.mrb[96].mxu0 %v3342_v61  ;;  %2975 = vmatmul.mubr.msk.bf16.gmra.mrb[128].mxu1 %vm1294_vm0, %v3343_v62  ;;  %v3369_v62 = vld [vmem:[%s4776_s0 + $0x4bc] ss:$20 sps:$4 sm:$0xff]  }
 0x142   :  { %1912 = vmatprep.mubr.bf16.mxu0 %v3344_v1  ;;  %2978 = vmatprep.mubr.msk.bf16.mxu1 %vm1294_vm0, %v3346_v2  ;;  %v3371_v1 = vld [vmem:[%s4776_s0 + $0x470] ss:$20 sps:$4 sm:$0xff]  }
 0x144   :  { %v4001_v4 = vpop.f32.mrb[24].mxu1 }
 0x145   :  { %v1539_v5 = vpop.f32.mrb[25].mxu1 }
 0x146   :  { %v4009_v8 = vpop.f32.mrb[26].mxu1 }
 0x147   :  { %v1542_v11 = vpop.f32.mrb[27].mxu1 }
 0x148   :  { %v3373_v11 = vld [vmem:[%s4776_s0 + $0x498] ss:$20 sps:$4 sm:$0xff]  }
 0x149   :  { %1913 = vmatmul.mubr.bf16.gmra.mrb[100].mxu0 %v3347_v6  ;;  %2979 = vmatmul.mubr.msk.bf16.gmra.mrb[132].mxu1 %vm1294_vm0, %v3348_v7 }
 0x14a   :  { %1920 = vmatprep.mubr.bf16.mxu0 %v3349_v9  ;;  %2982 = vmatprep.mubr.msk.bf16.mxu1 %vm1294_vm0, %v3351_v10  ;;  %v3372_v10 = vld [vmem:[%s4776_s0 + $0x4b8] ss:$20 sps:$4 sm:$0xff]  }
 0x14c   :  { %v4019_v0 = vpop.f32.mrb[28].mxu1 }
 0x14d   :  { %v1547_v12 = vpop.f32.mrb[29].mxu1 }
 0x14e   :  { %v4027_v15 = vpop.f32.mrb[30].mxu1 }
 0x14f   :  { %v1550_v18 = vpop.f32.mrb[31].mxu1 }
 0x151   :  { %1921 = vmatmul.mubr.bf16.gmra.mrb[104].mxu0 %v3352_v13  ;;  %2983 = vmatmul.mubr.msk.bf16.gmra.mrb[136].mxu1 %vm1294_vm0, %v3353_v14  ;;  %v3374_v14 = vld [vmem:[%s4776_s0 + $0x4e4] ss:$20 sps:$4 sm:$0xff]  }
 0x152   :  { %1928 = vmatprep.mubr.bf16.mxu0 %v3354_v16  ;;  %2986 = vmatprep.mubr.msk.bf16.mxu1 %vm1294_vm0, %v3356_v17  ;;  %v3376_v16 = vld [vmem:[%s4776_s0 + $0x4c0] ss:$20 sps:$4 sm:$0xff]  }
 0x154   :  { %v4037_v20 = vpop.f32.mrb[32].mxu1  ;;  %v4039_v21 = vpop.f32.mrb[0].mxu0 }
 0x155   :  { %v1555_v22 = vpop.f32.mrb[33].mxu1  ;;  %v1716_v24 = vpop.f32.mrb[1].mxu0 }
 0x156   :  { %v4047_v28 = vpop.f32.mrb[34].mxu1  ;;  %v4049_v29 = vpop.f32.mrb[2].mxu0 }
 0x157   :  { %v1558_v33 = vpop.f32.mrb[35].mxu1  ;;  %v1719_v34 = vpop.f32.mrb[3].mxu0 }
 0x159   :  { %1929 = vmatmul.mubr.bf16.gmra.mrb[108].mxu0 %v3357_v25  ;;  %2987 = vmatmul.mubr.msk.bf16.gmra.mrb[140].mxu1 %vm1294_vm0, %v3358_v26 }
 0x15a   :  { %1936 = vmatprep.mubr.bf16.mxu0 %v3359_v30  ;;  %2990 = vmatprep.mubr.msk.bf16.mxu1 %vm1294_vm0, %v3361_v32  ;;  %v3377_v30 = vld [vmem:[%s4776_s0 + $0x4e0] ss:$20 sps:$4 sm:$0xff]   ;;  %v3378_v32 = vld [vmem:[%s4776_s0 + $0x4e8] ss:$20 sps:$4 sm:$0xff]  }
 0x15c   :  { %v4059_v36 = vpop.f32.mrb[36].mxu1  ;;  %v4061_v37 = vpop.f32.mrb[4].mxu0 }
 0x15d   :  { %v1563_v38 = vpop.f32.mrb[37].mxu1  ;;  %v1724_v40 = vpop.f32.mrb[5].mxu0 }
 0x15e   :  { %v4069_v44 = vpop.f32.mrb[38].mxu1  ;;  %v4071_v45 = vpop.f32.mrb[6].mxu0 }
 0x15f   :  { %v1566_v49 = vpop.f32.mrb[39].mxu1  ;;  %v1727_v50 = vpop.f32.mrb[7].mxu0 }
 0x161   :  { %1937 = vmatmul.mubr.bf16.gmra.mrb[112].mxu0 %v3362_v41  ;;  %2991 = vmatmul.mubr.msk.bf16.gmra.mrb[144].mxu1 %vm1294_vm0, %v3363_v42 }
 0x162   :  { %1944 = vmatprep.mubr.bf16.mxu0 %v3364_v46  ;;  %2994 = vmatprep.mubr.msk.bf16.mxu1 %vm1294_vm0, %v3366_v48 }
 0x164   :  { %v4081_v52 = vpop.f32.mrb[40].mxu1  ;;  %v4083_v53 = vpop.f32.mrb[8].mxu0 }
 0x165   :  { %v1571_v54 = vpop.f32.mrb[41].mxu1  ;;  %v1732_v56 = vpop.f32.mrb[9].mxu0 }
 0x166   :  { %v4091_v60 = vpop.f32.mrb[42].mxu1  ;;  %v4093_v61 = vpop.f32.mrb[10].mxu0 }
 0x167   :  { %v1574_v2 = vpop.f32.mrb[43].mxu1  ;;  %v1735_v3 = vpop.f32.mrb[11].mxu0 }
 0x169   :  { %1945 = vmatmul.mubr.bf16.gmra.mrb[116].mxu0 %v3367_v57  ;;  %2995 = vmatmul.mubr.msk.bf16.gmra.mrb[148].mxu1 %vm1294_vm0, %v3368_v58 }
 0x16a   :  { %1952 = vmatprep.mubr.bf16.mxu0 %v3369_v62  ;;  %2998 = vmatprep.mubr.msk.bf16.mxu1 %vm1294_vm0, %v3371_v1 }
 0x16c   :  { %v4103_v5 = vpop.f32.mrb[44].mxu1  ;;  %v4105_v6 = vpop.f32.mrb[12].mxu0 }
 0x16d   :  { %v1579_v7 = vpop.f32.mrb[45].mxu1  ;;  %v1740_v9 = vpop.f32.mrb[13].mxu0 }
 0x16e   :  { %v4113_v12 = vpop.f32.mrb[46].mxu1  ;;  %v4115_v13 = vpop.f32.mrb[14].mxu0 }
 0x16f   :  { %v1582_v17 = vpop.f32.mrb[47].mxu1  ;;  %v1743_v18 = vpop.f32.mrb[15].mxu0 }
 0x171   :  { %1953 = vmatmul.mubr.bf16.gmra.mrb[120].mxu0 %v3372_v10  ;;  %2999 = vmatmul.mubr.msk.bf16.gmra.mrb[152].mxu1 %vm1294_vm0, %v3373_v11 }
 0x172   :  { %1960 = vmatprep.mubr.bf16.mxu0 %v3374_v14  ;;  %3002 = vmatprep.mubr.msk.bf16.mxu1 %vm1294_vm0, %v3376_v16 }
 0x174   :  { %v4125_v22 = vpop.f32.mrb[48].mxu1  ;;  %v4127_v24 = vpop.f32.mrb[16].mxu0 }
 0x175   :  { %v1587_v25 = vpop.f32.mrb[49].mxu1  ;;  %v1748_v26 = vpop.f32.mrb[17].mxu0 }
 0x176   :  { %v4135_v33 = vpop.f32.mrb[50].mxu1  ;;  %v4137_v34 = vpop.f32.mrb[18].mxu0 }
 0x177   :  { %v1590_v38 = vpop.f32.mrb[51].mxu1  ;;  %v1751_v40 = vpop.f32.mrb[19].mxu0 }
 0x179   :  { %1961 = vmatmul.mubr.bf16.gmra.mrb[124].mxu0 %v3377_v30  ;;  %3003 = vmatmul.mubr.msk.bf16.gmra.mrb[156].mxu1 %vm1294_vm0, %v3378_v32 }
 0x17c   :  { %v4140_v41 = vpop.f32.mrb[52].mxu1  ;;  %v4142_v42 = vpop.f32.mrb[20].mxu0 }
 0x17d   :  { %v1595_v46 = vpop.f32.mrb[53].mxu1  ;;  %v1756_v48 = vpop.f32.mrb[21].mxu0 }
 0x17e   :  { %v4144_v49 = vpop.f32.mrb[54].mxu1  ;;  %v4146_v50 = vpop.f32.mrb[22].mxu0 }
 0x17f   :  { %v1598_v54 = vpop.f32.mrb[55].mxu1  ;;  %v1759_v56 = vpop.f32.mrb[23].mxu0 }
 0x184   :  { %v4148_v57 = vpop.f32.mrb[56].mxu1  ;;  %v4150_v58 = vpop.f32.mrb[24].mxu0 }
 0x185   :  { %v1603_v62 = vpop.f32.mrb[57].mxu1  ;;  %v1764_v1 = vpop.f32.mrb[25].mxu0 }
 0x186   :  { %v4152_v2 = vpop.f32.mrb[58].mxu1  ;;  %v4154_v3 = vpop.f32.mrb[26].mxu0 }
 0x187   :  { %v1606_v7 = vpop.f32.mrb[59].mxu1  ;;  %v1767_v9 = vpop.f32.mrb[27].mxu0 }
 0x18c   :  { %v4156_v10 = vpop.f32.mrb[60].mxu1  ;;  %v4158_v11 = vpop.f32.mrb[28].mxu0 }
 0x18d   :  { %v1611_v14 = vpop.f32.mrb[61].mxu1  ;;  %v1772_v16 = vpop.f32.mrb[29].mxu0 }
 0x18e   :  { %v4160_v17 = vpop.f32.mrb[62].mxu1  ;;  %v4162_v18 = vpop.f32.mrb[30].mxu0 }
 0x18f   :  { %v1614_v25 = vpop.f32.mrb[63].mxu1  ;;  %v1775_v26 = vpop.f32.mrb[31].mxu0 }
 0x194   :  { %v4164_v30 = vpop.f32.mrb[64].mxu1  ;;  %v1778_v32 = vpop.f32.mrb[32].mxu0 }
 0x195   :  { %4779 = vst [vmem:[#allocation2_spill] sm:$0xff] %v4164_v30  ;;  %v4167_v38 = vadd.f32 %v1778_v32, %v3893_v19  ;;  %v1619_v40 = vpop.f32.mrb[65].mxu1  ;;  %v1780_v46 = vpop.f32.mrb[33].mxu0 }
 0x196   :  { %v4169_v48 = vpop.f32.mrb[66].mxu1  ;;  %v1781_v54 = vpop.f32.mrb[34].mxu0 }
 0x197   :  { %4780 = vst [vmem:[#allocation3_spill] sm:$0xff] %v4169_v48  ;;  %v4172_v56 = vadd.f32 %v1781_v54, %v3901_v23  ;;  %v1622_v62 = vpop.f32.mrb[67].mxu1  ;;  %v1783_v1 = vpop.f32.mrb[35].mxu0 }
 0x19c   :  { %v4174_v7 = vpop.f32.mrb[68].mxu1  ;;  %v1786_v9 = vpop.f32.mrb[36].mxu0 }
 0x19d   :  { %4781 = vst [vmem:[#allocation4_spill] sm:$0xff] %v4174_v7  ;;  %v4177_v14 = vadd.f32 %v1786_v9, %v3911_v27  ;;  %v1627_v16 = vpop.f32.mrb[69].mxu1  ;;  %v1788_v25 = vpop.f32.mrb[37].mxu0 }
 0x19e   :  { %v4179_v19 = vpop.f32.mrb[70].mxu1  ;;  %v1789_v26 = vpop.f32.mrb[38].mxu0 }
 0x19f   :  { %4782 = vst [vmem:[#allocation5_spill] sm:$0xff] %v4179_v19  ;;  %v4182_v32 = vadd.f32 %v1789_v26, %v3919_v31  ;;  %v1630_v40 = vpop.f32.mrb[71].mxu1  ;;  %v1791_v46 = vpop.f32.mrb[39].mxu0 }
 0x1a4   :  { %v4184_v23 = vpop.f32.mrb[72].mxu1  ;;  %v1794_v54 = vpop.f32.mrb[40].mxu0 }
 0x1a5   :  { %4783 = vst [vmem:[#allocation6_spill] sm:$0xff] %v4184_v23  ;;  %v4187_v62 = vadd.f32 %v1794_v54, %v3929_v35  ;;  %v1635_v1 = vpop.f32.mrb[73].mxu1  ;;  %v1796_v7 = vpop.f32.mrb[41].mxu0 }
 0x1a6   :  { %v4189_v27 = vpop.f32.mrb[74].mxu1  ;;  %v1797_v9 = vpop.f32.mrb[42].mxu0 }
 0x1a7   :  { %4784 = vst [vmem:[#allocation7_spill] sm:$0xff] %v4189_v27  ;;  %v4192_v16 = vadd.f32 %v1797_v9, %v3937_v39  ;;  %v1638_v25 = vpop.f32.mrb[75].mxu1  ;;  %v1799_v19 = vpop.f32.mrb[43].mxu0 }
 0x1ac   :  { %v4194_v31 = vpop.f32.mrb[76].mxu1  ;;  %v1802_v26 = vpop.f32.mrb[44].mxu0 }
 0x1ad   :  { %4785 = vst [vmem:[#allocation8_spill] sm:$0xff] %v4194_v31  ;;  %v4197_v40 = vadd.f32 %v1802_v26, %v3947_v43  ;;  %v1643_v46 = vpop.f32.mrb[77].mxu1  ;;  %v1804_v23 = vpop.f32.mrb[45].mxu0 }
 0x1ae   :  { %v4199_v35 = vpop.f32.mrb[78].mxu1  ;;  %v1805_v54 = vpop.f32.mrb[46].mxu0 }
 0x1af   :  { %4786 = vst [vmem:[#allocation9_spill] sm:$0xff] %v4199_v35  ;;  %v4202_v7 = vadd.f32 %v1805_v54, %v3955_v47  ;;  %v1646_v1 = vpop.f32.mrb[79].mxu1  ;;  %v1807_v27 = vpop.f32.mrb[47].mxu0 }
 0x1b4   :  { %v4204_v39 = vpop.f32.mrb[80].mxu1  ;;  %v1810_v9 = vpop.f32.mrb[48].mxu0 }
 0x1b5   :  { %4787 = vst [vmem:[#allocation10_spill] sm:$0xff] %v4204_v39  ;;  %v4207_v19 = vadd.f32 %v1810_v9, %v3965_v51  ;;  %v1651_v25 = vpop.f32.mrb[81].mxu1  ;;  %v1812_v31 = vpop.f32.mrb[49].mxu0 }
 0x1b6   :  { %v4209_v43 = vpop.f32.mrb[82].mxu1  ;;  %v1813_v26 = vpop.f32.mrb[50].mxu0 }
 0x1b7   :  { %4788 = vst [vmem:[#allocation11_spill] sm:$0xff] %v4209_v43  ;;  %v4212_v23 = vadd.f32 %v1813_v26, %v3973_v55  ;;  %v1654_v46 = vpop.f32.mrb[83].mxu1  ;;  %v1815_v35 = vpop.f32.mrb[51].mxu0 }
 0x1bc   :  { %v4214_v47 = vpop.f32.mrb[84].mxu1  ;;  %v1818_v54 = vpop.f32.mrb[52].mxu0 }
 0x1bd   :  { %4789 = vst [vmem:[#allocation12_spill] sm:$0xff] %v4214_v47  ;;  %v4217_v27 = vadd.f32 %v1818_v54, %v3983_v59  ;;  %v1659_v1 = vpop.f32.mrb[85].mxu1  ;;  %v1820_v39 = vpop.f32.mrb[53].mxu0 }
 0x1be   :  { %v4219_v51 = vpop.f32.mrb[86].mxu1  ;;  %v1821_v9 = vpop.f32.mrb[54].mxu0 }
 0x1bf   :  { %4790 = vst [vmem:[#allocation13_spill] sm:$0xff] %v4219_v51  ;;  %v4222_v31 = vadd.f32 %v1821_v9, %v3991_v63  ;;  %v1662_v25 = vpop.f32.mrb[87].mxu1  ;;  %v1823_v43 = vpop.f32.mrb[55].mxu0 }
 0x1c4   :  { %v4224_v55 = vpop.f32.mrb[88].mxu1  ;;  %v1826_v26 = vpop.f32.mrb[56].mxu0 }
 0x1c5   :  { %4791 = vst [vmem:[#allocation14_spill] sm:$0xff] %v4224_v55  ;;  %v4227_v35 = vadd.f32 %v1826_v26, %v4001_v4  ;;  %v1667_v46 = vpop.f32.mrb[89].mxu1  ;;  %v1828_v47 = vpop.f32.mrb[57].mxu0 }
 0x1c6   :  { %v4229_v59 = vpop.f32.mrb[90].mxu1  ;;  %v1829_v54 = vpop.f32.mrb[58].mxu0 }
 0x1c7   :  { %4792 = vst [vmem:[#allocation15_spill] sm:$0xff] %v4229_v59  ;;  %v4232_v39 = vadd.f32 %v1829_v54, %v4009_v8  ;;  %v1670_v1 = vpop.f32.mrb[91].mxu1  ;;  %v1831_v51 = vpop.f32.mrb[59].mxu0 }
 0x1cc   :  { %v4234_v63 = vpop.f32.mrb[92].mxu1  ;;  %v1834_v9 = vpop.f32.mrb[60].mxu0 }
 0x1cd   :  { %4793 = vst [vmem:[#allocation16_spill] sm:$0xff] %v4234_v63  ;;  %v4237_v43 = vadd.f32 %v1834_v9, %v4019_v0  ;;  %v1675_v25 = vpop.f32.mrb[93].mxu1  ;;  %v1836_v55 = vpop.f32.mrb[61].mxu0 }
 0x1ce   :  { %v4239_v4 = vpop.f32.mrb[94].mxu1  ;;  %v1837_v26 = vpop.f32.mrb[62].mxu0 }
 0x1cf   :  { %4794 = vst [vmem:[#allocation17_spill] sm:$0xff] %v4239_v4  ;;  %v4242_v47 = vadd.f32 %v1837_v26, %v4027_v15  ;;  %v1678_v46 = vpop.f32.mrb[95].mxu1  ;;  %v1839_v59 = vpop.f32.mrb[63].mxu0 }
 0x1d4   :  { %v1842_v8 = vpop.f32.mrb[64].mxu0  ;;  %v2944_v54 = vpop.f32.mrb[96].mxu1 }
 0x1d5   :  { %v4245_v51 = vadd.f32 %v1842_v8, %v4037_v20  ;;  %v2012_v1 = vadd.f32 %v2944_v54, %v4061_v37  ;;  %v1844_v63 = vpop.f32.mrb[65].mxu0  ;;  %v2003_v0 = vpop.f32.mrb[97].mxu1 }
 0x1d6   :  { %v2004_v9 = vadd.f32 %v2003_v0, %v4039_v21  ;;  %v1845_v55 = vpop.f32.mrb[66].mxu0  ;;  %v2945_v25 = vpop.f32.mrb[98].mxu1 }
 0x1d7   :  { %4795 = vst [vmem:[#allocation18_spill] sm:$0xff] %v4245_v51  ;;  %2260 = vst.msk [vmem:[%s4777_s2 + $0x10] sm:$0xff] %vm1294_vm0, %v2012_v1  ;;  %v4254_v15 = vadd.f32 %v1845_v55, %v4047_v28  ;;  %v2015_v59 = vadd.f32 %v2945_v25, %v4071_v45  ;;  %v2006_v20 = vpop.f32.mrb[99].mxu1  ;;  %v1847_v26 = vpop.f32.mrb[67].mxu0  ;;  %v2457_v63 = vmul.f32 %v2012_v1, %v2012_v1 }
 0x1d8   :  { %2258 = vst.msk [vmem:[%s4777_s2] sm:$0xff] %vm1294_vm0, %v2004_v9  ;;  %v2455_v21 = vmul.f32 %v2004_v9, %v2004_v9  ;;  %v2007_v37 = vadd.f32 %v2006_v20, %v4049_v29  ;;  %v2322_v28 = vsel %vm1294_vm0, %v2004_v9, 0.0  ;;  %v2325_v29 = vsel %vm1294_vm0, %v2012_v1, 0.0 }
 0x1d9   :  { %4796 = vst [vmem:[#allocation19_spill] sm:$0xff] %v4254_v15  ;;  %2261 = vst.msk [vmem:[%s4777_s2 + $0x18] sm:$0xff] %vm1294_vm0, %v2015_v59  ;;  %v2458_v8 = vmul.f32 %v2015_v59, %v2015_v59 }
 0x1da   :  { %2259 = vst.msk [vmem:[%s4777_s2 + $0x8] sm:$0xff] %vm1294_vm0, %v2007_v37  ;;  %v2323_v45 = vsel %vm1294_vm0, %v2007_v37, 0.0  ;;  %v2456_v46 = vmul.f32 %v2007_v37, %v2007_v37  ;;  %v2519_v0 = vsel %vm1294_vm0, %v2455_v21, 0.0  ;;  %v2522_v37 = vsel %vm1294_vm0, %v2457_v63, 0.0 }
 0x1db   :  { %v2324_v54 = vadd.f32 %v2323_v45, %v2322_v28  ;;  %v2327_v28 = vsel %vm1294_vm0, %v2015_v59, 0.0 }
 0x1dc   :  { %v2520_v55 = vsel %vm1294_vm0, %v2456_v46, 0.0  ;;  %v1850_v25 = vpop.f32.mrb[68].mxu0  ;;  %v2948_v20 = vpop.f32.mrb[100].mxu1  ;;  %v2524_v46 = vsel %vm1294_vm0, %v2458_v8, 0.0 }
 0x1dd   :  { %v2326_v26 = vadd.f32 %v2325_v29, %v2324_v54  ;;  %v2521_v9 = vadd.f32 %v2520_v55, %v2519_v0  ;;  %v4276_v4 = vadd.f32 %v1850_v25, %v4059_v36  ;;  %v2028_v15 = vadd.f32 %v2948_v20, %v4105_v6  ;;  %v1852_v48 = vpop.f32.mrb[69].mxu0  ;;  %v2019_v51 = vpop.f32.mrb[101].mxu1 }
 0x1de   :  { %v2020_v1 = vadd.f32 %v2019_v51, %v4083_v53  ;;  %v1853_v21 = vpop.f32.mrb[70].mxu0  ;;  %v2949_v45 = vpop.f32.mrb[102].mxu1 }
 0x1df   :  { %v2523_v30 = vadd.f32 %v2522_v37, %v2521_v9  ;;  %2264 = vst.msk [vmem:[%s4777_s2 + $0x30] sm:$0xff] %vm1294_vm0, %v2028_v15  ;;  %v2328_v36 = vadd.f32 %v2327_v28, %v2326_v26  ;;  %v2022_v6 = vpop.f32.mrb[103].mxu1  ;;  %v1855_v48 = vpop.f32.mrb[71].mxu0  ;;  %v4293_v59 = vadd.f32 %v1853_v21, %v4069_v44  ;;  %v2031_v63 = vadd.f32 %v2949_v45, %v4115_v13 }
 0x1e0   :  { %2262 = vst.msk [vmem:[%s4777_s2 + $0x20] sm:$0xff] %vm1294_vm0, %v2020_v1  ;;  %v2329_v53 = vsel %vm1294_vm0, %v2020_v1, 0.0  ;;  %v2459_v51 = vmul.f32 %v2020_v1, %v2020_v1  ;;  %v2023_v29 = vadd.f32 %v2022_v6, %v4093_v61  ;;  %v2461_v55 = vmul.f32 %v2028_v15, %v2028_v15 }
 0x1e1   :  { %v2330_v8 = vadd.f32 %v2329_v53, %v2328_v36  ;;  %v2525_v54 = vadd.f32 %v2524_v46, %v2523_v30  ;;  %2265 = vst.msk [vmem:[%s4777_s2 + $0x38] sm:$0xff] %vm1294_vm0, %v2031_v63  ;;  %v2333_v30 = vsel %vm1294_vm0, %v2028_v15, 0.0  ;;  %v2462_v9 = vmul.f32 %v2031_v63, %v2031_v63 }
 0x1e2   :  { %v2526_v0 = vsel %vm1294_vm0, %v2459_v51, 0.0  ;;  %2263 = vst.msk [vmem:[%s4777_s2 + $0x28] sm:$0xff] %vm1294_vm0, %v2023_v29  ;;  %v2331_v44 = vsel %vm1294_vm0, %v2023_v29, 0.0  ;;  %v2460_v13 = vmul.f32 %v2023_v29, %v2023_v29  ;;  %v2530_v15 = vsel %vm1294_vm0, %v2461_v55, 0.0 }
 0x1e3   :  { %v2527_v25 = vadd.f32 %v2526_v0, %v2525_v54  ;;  %v2332_v61 = vadd.f32 %v2331_v44, %v2330_v8  ;;  %v2335_v51 = vsel %vm1294_vm0, %v2031_v63, 0.0  ;;  %v2532_v55 = vsel %vm1294_vm0, %v2462_v9, 0.0 }
 0x1e4   :  { %v1858_v20 = vpop.f32.mrb[72].mxu0  ;;  %v2952_v26 = vpop.f32.mrb[104].mxu1  ;;  %v2528_v37 = vsel %vm1294_vm0, %v2460_v13, 0.0 }
 0x1e5   :  { %v4310_v28 = vadd.f32 %v1858_v20, %v4081_v52  ;;  %v2044_v1 = vadd.f32 %v2952_v26, %v4142_v42  ;;  %v1860_v21 = vpop.f32.mrb[73].mxu0  ;;  %v2035_v45 = vpop.f32.mrb[105].mxu1  ;;  %v2334_v46 = vadd.f32 %v2333_v30, %v2332_v61  ;;  %v2529_v36 = vadd.f32 %v2528_v37, %v2527_v25 }
 0x1e6   :  { %v2036_v6 = vadd.f32 %v2035_v45, %v4127_v24  ;;  %v1861_v48 = vpop.f32.mrb[74].mxu0  ;;  %v2953_v53 = vpop.f32.mrb[106].mxu1 }
 0x1e7   :  { %2268 = vst.msk [vmem:[%s4777_s2 + $0x50] sm:$0xff] %vm1294_vm0, %v2044_v1  ;;  %v4321_v52 = vadd.f32 %v1861_v48, %v4091_v60  ;;  %v2047_v42 = vadd.f32 %v2953_v53, %v4146_v50  ;;  %v2038_v8 = vpop.f32.mrb[107].mxu1  ;;  %v1863_v54 = vpop.f32.mrb[75].mxu0  ;;  %v2531_v29 = vadd.f32 %v2530_v15, %v2529_v36  ;;  %v2336_v24 = vadd.f32 %v2335_v51, %v2334_v46 }
 0x1e8   :  { %2266 = vst.msk [vmem:[%s4777_s2 + $0x40] sm:$0xff] %vm1294_vm0, %v2036_v6  ;;  %v2337_v63 = vsel %vm1294_vm0, %v2036_v6, 0.0  ;;  %v2463_v0 = vmul.f32 %v2036_v6, %v2036_v6  ;;  %v2039_v60 = vadd.f32 %v2038_v8, %v4137_v34  ;;  %v2465_v13 = vmul.f32 %v2044_v1, %v2044_v1 }
 0x1e9   :  { %2269 = vst.msk [vmem:[%s4777_s2 + $0x58] sm:$0xff] %vm1294_vm0, %v2047_v42  ;;  %v2338_v50 = vadd.f32 %v2337_v63, %v2336_v24  ;;  %v2533_v25 = vadd.f32 %v2532_v55, %v2531_v29  ;;  %v2341_v20 = vsel %vm1294_vm0, %v2044_v1, 0.0  ;;  %v2466_v34 = vmul.f32 %v2047_v42, %v2047_v42 }
 0x1ea   :  { %v2534_v44 = vsel %vm1294_vm0, %v2463_v0, 0.0  ;;  %2267 = vst.msk [vmem:[%s4777_s2 + $0x48] sm:$0xff] %vm1294_vm0, %v2039_v60  ;;  %v2339_v30 = vsel %vm1294_vm0, %v2039_v60, 0.0  ;;  %v2464_v61 = vmul.f32 %v2039_v60, %v2039_v60  ;;  %v2538_v54 = vsel %vm1294_vm0, %v2465_v13, 0.0 }
 0x1eb   :  { %v2535_v26 = vadd.f32 %v2534_v44, %v2533_v25  ;;  %v2340_v9 = vadd.f32 %v2339_v30, %v2338_v50  ;;  %v2343_v29 = vsel %vm1294_vm0, %v2047_v42, 0.0  ;;  %v2540_v60 = vsel %vm1294_vm0, %v2466_v34, 0.0 }
 0x1ec   :  { %v1866_v37 = vpop.f32.mrb[76].mxu0  ;;  %v2956_v21 = vpop.f32.mrb[108].mxu1  ;;  %v2536_v45 = vsel %vm1294_vm0, %v2464_v61, 0.0 }
 0x1ed   :  { %v4344_v46 = vadd.f32 %v1866_v37, %v4103_v5  ;;  %v2060_v36 = vadd.f32 %v2956_v21, %v4158_v11  ;;  %v1868_v6 = vpop.f32.mrb[77].mxu0  ;;  %v2051_v48 = vpop.f32.mrb[109].mxu1  ;;  %v2342_v53 = vadd.f32 %v2341_v20, %v2340_v9  ;;  %v2537_v15 = vadd.f32 %v2536_v45, %v2535_v26 }
 0x1ee   :  { %v2052_v51 = vadd.f32 %v2051_v48, %v4150_v58  ;;  %v1869_v8 = vpop.f32.mrb[78].mxu0  ;;  %v2957_v1 = vpop.f32.mrb[110].mxu1 }
 0x1ef   :  { %2272 = vst.msk [vmem:[%s4777_s2 + $0x70] sm:$0xff] %vm1294_vm0, %v2060_v36  ;;  %v4355_v5 = vadd.f32 %v1869_v8, %v4113_v12  ;;  %v2063_v11 = vadd.f32 %v2957_v1, %v4162_v18  ;;  %v2054_v24 = vpop.f32.mrb[111].mxu1  ;;  %v1871_v63 = vpop.f32.mrb[79].mxu0  ;;  %v2539_v0 = vadd.f32 %v2538_v54, %v2537_v15  ;;  %v2344_v58 = vadd.f32 %v2343_v29, %v2342_v53 }
 0x1f0   :  { %2270 = vst.msk [vmem:[%s4777_s2 + $0x60] sm:$0xff] %vm1294_vm0, %v2052_v51  ;;  %v2345_v42 = vsel %vm1294_vm0, %v2052_v51, 0.0  ;;  %v2467_v55 = vmul.f32 %v2052_v51, %v2052_v51  ;;  %v2055_v12 = vadd.f32 %v2054_v24, %v4154_v3  ;;  %v2469_v44 = vmul.f32 %v2060_v36, %v2060_v36 }
 0x1f1   :  { %2273 = vst.msk [vmem:[%s4777_s2 + $0x78] sm:$0xff] %vm1294_vm0, %v2063_v11  ;;  %v2346_v18 = vadd.f32 %v2345_v42, %v2344_v58  ;;  %v2541_v50 = vadd.f32 %v2540_v60, %v2539_v0  ;;  %v2349_v61 = vsel %vm1294_vm0, %v2060_v36, 0.0  ;;  %v2470_v3 = vmul.f32 %v2063_v11, %v2063_v11 }
 0x1f2   :  { %v2542_v25 = vsel %vm1294_vm0, %v2467_v55, 0.0  ;;  %2271 = vst.msk [vmem:[%s4777_s2 + $0x68] sm:$0xff] %vm1294_vm0, %v2055_v12  ;;  %v2347_v13 = vsel %vm1294_vm0, %v2055_v12, 0.0  ;;  %v2468_v30 = vmul.f32 %v2055_v12, %v2055_v12  ;;  %v2546_v1 = vsel %vm1294_vm0, %v2469_v44, 0.0 }
 0x1f3   :  { %v2543_v20 = vadd.f32 %v2542_v25, %v2541_v50  ;;  %v2348_v26 = vadd.f32 %v2347_v13, %v2346_v18  ;;  %v2351_v54 = vsel %vm1294_vm0, %v2063_v11, 0.0  ;;  %v2548_v58 = vsel %vm1294_vm0, %v2470_v3, 0.0 }
 0x1f4   :  { %v1874_v9 = vpop.f32.mrb[80].mxu0  ;;  %v2960_v37 = vpop.f32.mrb[112].mxu1  ;;  %v2544_v21 = vsel %vm1294_vm0, %v2468_v30, 0.0 }
 0x1f5   :  { %v4378_v34 = vadd.f32 %v1874_v9, %v4125_v22  ;;  %v2076_v45 = vadd.f32 %v2960_v37, %v4177_v14  ;;  %v1876_v6 = vpop.f32.mrb[81].mxu0  ;;  %v2067_v48 = vpop.f32.mrb[113].mxu1  ;;  %v2350_v53 = vadd.f32 %v2349_v61, %v2348_v26  ;;  %v2545_v15 = vadd.f32 %v2544_v21, %v2543_v20 }
 0x1f6   :  { %v2068_v51 = vadd.f32 %v2067_v48, %v4167_v38  ;;  %v1877_v8 = vpop.f32.mrb[82].mxu0  ;;  %v2961_v36 = vpop.f32.mrb[114].mxu1 }
 0x1f7   :  { %2276 = vst.msk [vmem:[%s4777_s2 + $0x90] sm:$0xff] %vm1294_vm0, %v2076_v45  ;;  %v4389_v22 = vadd.f32 %v1877_v8, %v4135_v33  ;;  %v2079_v14 = vadd.f32 %v2961_v36, %v4182_v32  ;;  %v2070_v29 = vpop.f32.mrb[115].mxu1  ;;  %v1879_v24 = vpop.f32.mrb[83].mxu0  ;;  %v2547_v63 = vadd.f32 %v2546_v1, %v2545_v15  ;;  %v2352_v38 = vadd.f32 %v2351_v54, %v2350_v53 }
 0x1f8   :  { %2274 = vst.msk [vmem:[%s4777_s2 + $0x80] sm:$0xff] %vm1294_vm0, %v2068_v51  ;;  %v2353_v11 = vsel %vm1294_vm0, %v2068_v51, 0.0  ;;  %v2471_v0 = vmul.f32 %v2068_v51, %v2068_v51  ;;  %v2071_v33 = vadd.f32 %v2070_v29, %v4172_v56  ;;  %v2473_v60 = vmul.f32 %v2076_v45, %v2076_v45 }
 0x1f9   :  { %2277 = vst.msk [vmem:[%s4777_s2 + $0x98] sm:$0xff] %vm1294_vm0, %v2079_v14  ;;  %v2354_v32 = vadd.f32 %v2353_v11, %v2352_v38  ;;  %v2549_v42 = vadd.f32 %v2548_v58, %v2547_v63  ;;  %v2357_v50 = vsel %vm1294_vm0, %v2076_v45, 0.0  ;;  %v2474_v56 = vmul.f32 %v2079_v14, %v2079_v14 }
 0x1fa   :  { %v2550_v55 = vsel %vm1294_vm0, %v2471_v0, 0.0  ;;  %2275 = vst.msk [vmem:[%s4777_s2 + $0x88] sm:$0xff] %vm1294_vm0, %v2071_v33  ;;  %v2355_v12 = vsel %vm1294_vm0, %v2071_v33, 0.0  ;;  %v2472_v18 = vmul.f32 %v2071_v33, %v2071_v33  ;;  %v2554_v53 = vsel %vm1294_vm0, %v2473_v60, 0.0 }
 0x1fb   :  { %v2551_v25 = vadd.f32 %v2550_v55, %v2549_v42  ;;  %v2356_v44 = vadd.f32 %v2355_v12, %v2354_v32  ;;  %v2359_v15 = vsel %vm1294_vm0, %v2079_v14, 0.0  ;;  %v2556_v14 = vsel %vm1294_vm0, %v2474_v56, 0.0 }
 0x1fc   :  { %v1882_v13 = vpop.f32.mrb[84].mxu0  ;;  %v2964_v30 = vpop.f32.mrb[116].mxu1  ;;  %v2552_v61 = vsel %vm1294_vm0, %v2472_v18, 0.0 }
 0x1fd   :  { %v4412_v20 = vadd.f32 %v1882_v13, %v4140_v41  ;;  %v2092_v26 = vadd.f32 %v2964_v30, %v4197_v40  ;;  %v1884_v9 = vpop.f32.mrb[85].mxu0  ;;  %v2083_v37 = vpop.f32.mrb[117].mxu1  ;;  %v2358_v3 = vadd.f32 %v2357_v50, %v2356_v44  ;;  %v2553_v21 = vadd.f32 %v2552_v61, %v2551_v25 }
 0x1fe   :  { %v2084_v6 = vadd.f32 %v2083_v37, %v4187_v62  ;;  %v1885_v48 = vpop.f32.mrb[86].mxu0  ;;  %v2965_v45 = vpop.f32.mrb[118].mxu1 }
 0x1ff   :  { %2280 = vst.msk [vmem:[%s4777_s2 + $0xb0] sm:$0xff] %vm1294_vm0, %v2092_v26  ;;  %v4423_v41 = vadd.f32 %v1885_v48, %v4144_v49  ;;  %v2095_v40 = vadd.f32 %v2965_v45, %v4202_v7  ;;  %v2086_v51 = vpop.f32.mrb[119].mxu1  ;;  %v1887_v8 = vpop.f32.mrb[87].mxu0  ;;  %v2555_v36 = vadd.f32 %v2554_v53, %v2553_v21  ;;  %v2360_v62 = vadd.f32 %v2359_v15, %v2358_v3 }
 0x200   :  { %2278 = vst.msk [vmem:[%s4777_s2 + $0xa0] sm:$0xff] %vm1294_vm0, %v2084_v6  ;;  %v2361_v1 = vsel %vm1294_vm0, %v2084_v6, 0.0  ;;  %v2475_v54 = vmul.f32 %v2084_v6, %v2084_v6  ;;  %v2087_v49 = vadd.f32 %v2086_v51, %v4192_v16  ;;  %v2477_v63 = vmul.f32 %v2092_v26, %v2092_v26 }
 0x201   :  { %2281 = vst.msk [vmem:[%s4777_s2 + $0xb8] sm:$0xff] %vm1294_vm0, %v2095_v40  ;;  %v2362_v7 = vadd.f32 %v2361_v1, %v2360_v62  ;;  %v2557_v29 = vadd.f32 %v2556_v14, %v2555_v36  ;;  %v2365_v0 = vsel %vm1294_vm0, %v2092_v26, 0.0  ;;  %v2478_v16 = vmul.f32 %v2095_v40, %v2095_v40 }
 0x202   :  { %v2558_v24 = vsel %vm1294_vm0, %v2475_v54, 0.0  ;;  %2279 = vst.msk [vmem:[%s4777_s2 + $0xa8] sm:$0xff] %vm1294_vm0, %v2087_v49  ;;  %v2363_v38 = vsel %vm1294_vm0, %v2087_v49, 0.0  ;;  %v2476_v11 = vmul.f32 %v2087_v49, %v2087_v49  ;;  %v2562_v61 = vsel %vm1294_vm0, %v2477_v63, 0.0 }
 0x203   :  { %v2559_v58 = vadd.f32 %v2558_v24, %v2557_v29  ;;  %v2364_v33 = vadd.f32 %v2363_v38, %v2362_v7  ;;  %v2367_v26 = vsel %vm1294_vm0, %v2095_v40, 0.0  ;;  %v2564_v48 = vsel %vm1294_vm0, %v2478_v16, 0.0 }
 0x204   :  { %v1890_v32 = vpop.f32.mrb[88].mxu0  ;;  %v2968_v42 = vpop.f32.mrb[120].mxu1  ;;  %v2560_v55 = vsel %vm1294_vm0, %v2476_v11, 0.0 }
 0x205   :  { %v4446_v60 = vadd.f32 %v1890_v32, %v4148_v57  ;;  %v2108_v12 = vadd.f32 %v2968_v42, %v4217_v27  ;;  %v1892_v18 = vpop.f32.mrb[89].mxu0  ;;  %v2099_v50 = vpop.f32.mrb[121].mxu1  ;;  %v2366_v25 = vadd.f32 %v2365_v0, %v2364_v33  ;;  %v2561_v44 = vadd.f32 %v2560_v55, %v2559_v58 }
 0x206   :  { %v2100_v13 = vadd.f32 %v2099_v50, %v4207_v19  ;;  %v1893_v30 = vpop.f32.mrb[90].mxu0  ;;  %v2969_v56 = vpop.f32.mrb[122].mxu1 }
 0x207   :  { %2284 = vst.msk [vmem:[%s4777_s2 + $0xd0] sm:$0xff] %vm1294_vm0, %v2108_v12  ;;  %v4457_v57 = vadd.f32 %v1893_v30, %v4152_v2  ;;  %v2111_v27 = vadd.f32 %v2969_v56, %v4222_v31  ;;  %v2102_v9 = vpop.f32.mrb[123].mxu1  ;;  %v1895_v37 = vpop.f32.mrb[91].mxu0  ;;  %v2563_v3 = vadd.f32 %v2562_v61, %v2561_v44  ;;  %v2368_v19 = vadd.f32 %v2367_v26, %v2366_v25 }
 0x208   :  { %2282 = vst.msk [vmem:[%s4777_s2 + $0xc0] sm:$0xff] %vm1294_vm0, %v2100_v13  ;;  %v2369_v21 = vsel %vm1294_vm0, %v2100_v13, 0.0  ;;  %v2479_v6 = vmul.f32 %v2100_v13, %v2100_v13  ;;  %v2103_v2 = vadd.f32 %v2102_v9, %v4212_v23  ;;  %v2481_v15 = vmul.f32 %v2108_v12, %v2108_v12 }
 0x209   :  { %2285 = vst.msk [vmem:[%s4777_s2 + $0xd8] sm:$0xff] %vm1294_vm0, %v2111_v27  ;;  %v2370_v31 = vadd.f32 %v2369_v21, %v2368_v19  ;;  %v2565_v45 = vadd.f32 %v2564_v48, %v2563_v3  ;;  %v2373_v8 = vsel %vm1294_vm0, %v2108_v12, 0.0  ;;  %v2482_v23 = vmul.f32 %v2111_v27, %v2111_v27  ;;  %v4797_v19 = vld [vmem:[#allocation2_spill] sm:$0xff] }
 0x20a   :  { %v2566_v53 = vsel %vm1294_vm0, %v2479_v6, 0.0  ;;  %2283 = vst.msk [vmem:[%s4777_s2 + $0xc8] sm:$0xff] %vm1294_vm0, %v2103_v2  ;;  %v2371_v40 = vsel %vm1294_vm0, %v2103_v2, 0.0  ;;  %v2480_v51 = vmul.f32 %v2103_v2, %v2103_v2  ;;  %v2570_v33 = vsel %vm1294_vm0, %v2481_v15, 0.0 }
 0x20b   :  { %v2567_v36 = vadd.f32 %v2566_v53, %v2565_v45  ;;  %v2372_v62 = vadd.f32 %v2371_v40, %v2370_v31  ;;  %v2375_v32 = vsel %vm1294_vm0, %v2111_v27, 0.0  ;;  %v2572_v50 = vsel %vm1294_vm0, %v2482_v23, 0.0  ;;  %v4798_v53 = vld [vmem:[#allocation18_spill] sm:$0xff] }
 0x20c   :  { %v1898_v1 = vpop.f32.mrb[92].mxu0  ;;  %v2972_v54 = vpop.f32.mrb[124].mxu1  ;;  %v2568_v14 = vsel %vm1294_vm0, %v2480_v51, 0.0 }
 0x20d   :  { %v4480_v49 = vadd.f32 %v1898_v1, %v4156_v10  ;;  %v2124_v7 = vadd.f32 %v2972_v54, %v4237_v43  ;;  %v1900_v29 = vpop.f32.mrb[93].mxu0  ;;  %v2115_v24 = vpop.f32.mrb[125].mxu1  ;;  %v2374_v63 = vadd.f32 %v2373_v8, %v2372_v62  ;;  %v2569_v38 = vadd.f32 %v2568_v14, %v2567_v36  ;;  %v4799_v62 = vld [vmem:[#allocation3_spill] sm:$0xff] }
 0x20e   :  { %v2116_v11 = vadd.f32 %v2115_v24, %v4227_v35  ;;  %v1901_v0 = vpop.f32.mrb[94].mxu0  ;;  %v2973_v58 = vpop.f32.mrb[126].mxu1 }
 0x20f   :  { %2288 = vst.msk [vmem:[%s4777_s2 + $0xf0] sm:$0xff] %vm1294_vm0, %v2124_v7  ;;  %v4491_v10 = vadd.f32 %v1901_v0, %v4160_v17  ;;  %v2127_v43 = vadd.f32 %v2973_v58, %v4242_v47  ;;  %v2118_v42 = vpop.f32.mrb[127].mxu1  ;;  %v1903_v16 = vpop.f32.mrb[95].mxu0  ;;  %v2571_v55 = vadd.f32 %v2570_v33, %v2569_v38  ;;  %v2376_v35 = vadd.f32 %v2375_v32, %v2374_v63 }
 0x210   :  { %2286 = vst.msk [vmem:[%s4777_s2 + $0xe0] sm:$0xff] %vm1294_vm0, %v2116_v11  ;;  %v2377_v12 = vsel %vm1294_vm0, %v2116_v11, 0.0  ;;  %v2483_v18 = vmul.f32 %v2116_v11, %v2116_v11  ;;  %v2119_v17 = vadd.f32 %v2118_v42, %v4232_v39  ;;  %v2485_v13 = vmul.f32 %v2124_v7, %v2124_v7 }
 0x211   :  { %2289 = vst.msk [vmem:[%s4777_s2 + $0xf8] sm:$0xff] %vm1294_vm0, %v2127_v43  ;;  %v2378_v47 = vadd.f32 %v2377_v12, %v2376_v35  ;;  %v2573_v25 = vadd.f32 %v2572_v50, %v2571_v55  ;;  %v2381_v61 = vsel %vm1294_vm0, %v2124_v7, 0.0  ;;  %v2486_v39 = vmul.f32 %v2127_v43, %v2127_v43 }
 0x212   :  { %v2574_v44 = vsel %vm1294_vm0, %v2483_v18, 0.0  ;;  %2287 = vst.msk [vmem:[%s4777_s2 + $0xe8] sm:$0xff] %vm1294_vm0, %v2119_v17  ;;  %v2379_v30 = vsel %vm1294_vm0, %v2119_v17, 0.0  ;;  %v2484_v56 = vmul.f32 %v2119_v17, %v2119_v17  ;;  %v2578_v8 = vsel %vm1294_vm0, %v2485_v13, 0.0  ;;  %v4801_v17 = vld [vmem:[#allocation4_spill] sm:$0xff] }
 0x213   :  { %v2575_v26 = vadd.f32 %v2574_v44, %v2573_v25  ;;  %v2380_v27 = vadd.f32 %v2379_v30, %v2378_v47  ;;  %v2383_v36 = vsel %vm1294_vm0, %v2127_v43, 0.0  ;;  %v2580_v63 = vsel %vm1294_vm0, %v2486_v39, 0.0  ;;  %v4802_v39 = vld [vmem:[#allocation5_spill] sm:$0xff] }
 0x214   :  { %v1906_v9 = vpop.f32.mrb[96].mxu0  ;;  %v2976_v37 = vpop.f32.mrb[128].mxu1  ;;  %v2576_v3 = vsel %vm1294_vm0, %v2484_v56, 0.0 }
 0x215   :  { %v4514_v21 = vadd.f32 %v1906_v9, %v4797_v19  ;;  %v2140_v6 = vadd.f32 %v2976_v37, %v4276_v4  ;;  %v1908_v48 = vpop.f32.mrb[97].mxu0  ;;  %v2131_v2 = vpop.f32.mrb[129].mxu1  ;;  %v2382_v31 = vadd.f32 %v2381_v61, %v2380_v27  ;;  %v2577_v45 = vadd.f32 %v2576_v3, %v2575_v26 }
 0x216   :  { %v2132_v15 = vadd.f32 %v2131_v2, %v4798_v53  ;;  %v1909_v40 = vpop.f32.mrb[98].mxu0  ;;  %v2977_v51 = vpop.f32.mrb[130].mxu1 }
 0x217   :  { %2292 = vst.msk [vmem:[%s4777_s2 + $0x110] sm:$0xff] %vm1294_vm0, %v2140_v6  ;;  %v4525_v1 = vadd.f32 %v1909_v40, %v4799_v62  ;;  %v2143_v4 = vadd.f32 %v2977_v51, %v4293_v59  ;;  %v2134_v54 = vpop.f32.mrb[131].mxu1  ;;  %v1911_v23 = vpop.f32.mrb[99].mxu0  ;;  %v2579_v14 = vadd.f32 %v2578_v8, %v2577_v45  ;;  %v2384_v7 = vadd.f32 %v2383_v36, %v2382_v31  ;;  %v4800_v59 = vld [vmem:[#allocation19_spill] sm:$0xff] }
 0x218   :  { %2290 = vst.msk [vmem:[%s4777_s2 + $0x100] sm:$0xff] %vm1294_vm0, %v2132_v15  ;;  %v2385_v29 = vsel %vm1294_vm0, %v2132_v15, 0.0  ;;  %v2487_v24 = vmul.f32 %v2132_v15, %v2132_v15  ;;  %v2135_v38 = vadd.f32 %v2134_v54, %v4800_v59  ;;  %v2489_v33 = vmul.f32 %v2140_v6, %v2140_v6 }
 0x219   :  { %2293 = vst.msk [vmem:[%s4777_s2 + $0x118] sm:$0xff] %vm1294_vm0, %v2143_v4  ;;  %v2386_v11 = vadd.f32 %v2385_v29, %v2384_v7  ;;  %v2581_v0 = vadd.f32 %v2580_v63, %v2579_v14  ;;  %v2389_v42 = vsel %vm1294_vm0, %v2140_v6, 0.0  ;;  %v2490_v18 = vmul.f32 %v2143_v4, %v2143_v4  ;;  %v4803_v29 = vld [vmem:[#allocation6_spill] sm:$0xff] }
 0x21a   :  { %v2582_v58 = vsel %vm1294_vm0, %v2487_v24, 0.0  ;;  %2291 = vst.msk [vmem:[%s4777_s2 + $0x108] sm:$0xff] %vm1294_vm0, %v2135_v38  ;;  %v2387_v32 = vsel %vm1294_vm0, %v2135_v38, 0.0  ;;  %v2488_v43 = vmul.f32 %v2135_v38, %v2135_v38  ;;  %v2586_v9 = vsel %vm1294_vm0, %v2489_v33, 0.0 }
 0x21b   :  { %v2583_v16 = vadd.f32 %v2582_v58, %v2581_v0  ;;  %v2388_v55 = vadd.f32 %v2387_v32, %v2386_v11  ;;  %v2391_v37 = vsel %vm1294_vm0, %v2143_v4, 0.0  ;;  %v2588_v45 = vsel %vm1294_vm0, %v2490_v18, 0.0 }
 0x21c   :  { %v1914_v35 = vpop.f32.mrb[100].mxu0  ;;  %v2980_v12 = vpop.f32.mrb[132].mxu1  ;;  %v2584_v50 = vsel %vm1294_vm0, %v2488_v43, 0.0 }
 0x21d   :  { %v4548_v47 = vadd.f32 %v1914_v35, %v4801_v17  ;;  %v2156_v25 = vadd.f32 %v2980_v12, %v4344_v46  ;;  %v1916_v44 = vpop.f32.mrb[101].mxu0  ;;  %v2147_v13 = vpop.f32.mrb[133].mxu1  ;;  %v2390_v30 = vadd.f32 %v2389_v42, %v2388_v55  ;;  %v2585_v56 = vadd.f32 %v2584_v50, %v2583_v16  ;;  %v4804_v16 = vld [vmem:[#allocation7_spill] sm:$0xff] }
 0x21e   :  { %v2148_v61 = vadd.f32 %v2147_v13, %v4310_v28  ;;  %v1917_v26 = vpop.f32.mrb[102].mxu0  ;;  %v2981_v27 = vpop.f32.mrb[134].mxu1 }
 0x21f   :  { %2296 = vst.msk [vmem:[%s4777_s2 + $0x130] sm:$0xff] %vm1294_vm0, %v2156_v25  ;;  %v4559_v3 = vadd.f32 %v1917_v26, %v4802_v39  ;;  %v2159_v46 = vadd.f32 %v2981_v27, %v4355_v5  ;;  %v2150_v19 = vpop.f32.mrb[135].mxu1  ;;  %v1919_v6 = vpop.f32.mrb[103].mxu0  ;;  %v2587_v48 = vadd.f32 %v2586_v9, %v2585_v56  ;;  %v2392_v28 = vadd.f32 %v2391_v37, %v2390_v30 }
 0x220   :  { %2294 = vst.msk [vmem:[%s4777_s2 + $0x120] sm:$0xff] %vm1294_vm0, %v2148_v61  ;;  %v2393_v2 = vsel %vm1294_vm0, %v2148_v61, 0.0  ;;  %v2491_v31 = vmul.f32 %v2148_v61, %v2148_v61  ;;  %v2151_v5 = vadd.f32 %v2150_v19, %v4321_v52  ;;  %v2493_v51 = vmul.f32 %v2156_v25, %v2156_v25  ;;  %v4805_v6 = vld [vmem:[#allocation8_spill] sm:$0xff] }
 0x221   :  { %2297 = vst.msk [vmem:[%s4777_s2 + $0x138] sm:$0xff] %vm1294_vm0, %v2159_v46  ;;  %v2394_v53 = vadd.f32 %v2393_v2, %v2392_v28  ;;  %v2589_v15 = vadd.f32 %v2588_v45, %v2587_v48  ;;  %v2397_v62 = vsel %vm1294_vm0, %v2156_v25, 0.0  ;;  %v2494_v52 = vmul.f32 %v2159_v46, %v2159_v46 }
 0x222   :  { %v2590_v40 = vsel %vm1294_vm0, %v2491_v31, 0.0  ;;  %2295 = vst.msk [vmem:[%s4777_s2 + $0x128] sm:$0xff] %vm1294_vm0, %v2151_v5  ;;  %v2395_v8 = vsel %vm1294_vm0, %v2151_v5, 0.0  ;;  %v2492_v36 = vmul.f32 %v2151_v5, %v2151_v5  ;;  %v2594_v43 = vsel %vm1294_vm0, %v2493_v51, 0.0 }
 0x223   :  { %v2591_v4 = vadd.f32 %v2590_v40, %v2589_v15  ;;  %v2396_v54 = vadd.f32 %v2395_v8, %v2394_v53  ;;  %v2399_v42 = vsel %vm1294_vm0, %v2159_v46, 0.0  ;;  %v2596_v25 = vsel %vm1294_vm0, %v2494_v52, 0.0 }
 0x224   :  { %v1922_v23 = vpop.f32.mrb[104].mxu0  ;;  %v2984_v14 = vpop.f32.mrb[136].mxu1  ;;  %v2592_v7 = vsel %vm1294_vm0, %v2492_v36, 0.0  ;;  %v4806_v36 = vld [vmem:[#allocation9_spill] sm:$0xff] }
 0x225   :  { %v4582_v24 = vadd.f32 %v1922_v23, %v4803_v29  ;;  %v2172_v63 = vadd.f32 %v2984_v14, %v4412_v20  ;;  %v1924_v59 = vpop.f32.mrb[105].mxu0  ;;  %v2163_v38 = vpop.f32.mrb[137].mxu1  ;;  %v2398_v11 = vadd.f32 %v2397_v62, %v2396_v54  ;;  %v2593_v0 = vadd.f32 %v2592_v7, %v2591_v4 }
 0x226   :  { %v2164_v58 = vadd.f32 %v2163_v38, %v4378_v34  ;;  %v1925_v33 = vpop.f32.mrb[106].mxu0  ;;  %v2985_v32 = vpop.f32.mrb[138].mxu1 }
 0x227   :  { %2300 = vst.msk [vmem:[%s4777_s2 + $0x150] sm:$0xff] %vm1294_vm0, %v2172_v63  ;;  %v4593_v55 = vadd.f32 %v1925_v33, %v4804_v16  ;;  %v2175_v20 = vadd.f32 %v2985_v32, %v4423_v41  ;;  %v2166_v35 = vpop.f32.mrb[139].mxu1  ;;  %v1927_v12 = vpop.f32.mrb[107].mxu0  ;;  %v2595_v18 = vadd.f32 %v2594_v43, %v2593_v0  ;;  %v2400_v34 = vadd.f32 %v2399_v42, %v2398_v11 }
 0x228   :  { %2298 = vst.msk [vmem:[%s4777_s2 + $0x140] sm:$0xff] %vm1294_vm0, %v2164_v58  ;;  %v2401_v50 = vsel %vm1294_vm0, %v2164_v58, 0.0  ;;  %v2495_v17 = vmul.f32 %v2164_v58, %v2164_v58  ;;  %v2167_v41 = vadd.f32 %v2166_v35, %v4389_v22  ;;  %v2497_v56 = vmul.f32 %v2172_v63, %v2172_v63 }
 0x229   :  { %2301 = vst.msk [vmem:[%s4777_s2 + $0x158] sm:$0xff] %vm1294_vm0, %v2175_v20  ;;  %v2402_v44 = vadd.f32 %v2401_v50, %v2400_v34  ;;  %v2597_v13 = vadd.f32 %v2596_v25, %v2595_v18  ;;  %v2405_v27 = vsel %vm1294_vm0, %v2172_v63, 0.0  ;;  %v2498_v22 = vmul.f32 %v2175_v20, %v2175_v20 }
 0x22a   :  { %v2598_v30 = vsel %vm1294_vm0, %v2495_v17, 0.0  ;;  %2299 = vst.msk [vmem:[%s4777_s2 + $0x148] sm:$0xff] %vm1294_vm0, %v2167_v41  ;;  %v2403_v61 = vsel %vm1294_vm0, %v2167_v41, 0.0  ;;  %v2496_v26 = vmul.f32 %v2167_v41, %v2167_v41  ;;  %v2602_v51 = vsel %vm1294_vm0, %v2497_v56, 0.0  ;;  %v4808_v56 = vld [vmem:[#allocation11_spill] sm:$0xff] }
 0x22b   :  { %v2599_v9 = vadd.f32 %v2598_v30, %v2597_v13  ;;  %v2404_v37 = vadd.f32 %v2403_v61, %v2402_v44  ;;  %v2407_v8 = vsel %vm1294_vm0, %v2175_v20, 0.0  ;;  %v2604_v7 = vsel %vm1294_vm0, %v2498_v22, 0.0  ;;  %v4807_v20 = vld [vmem:[#allocation10_spill] sm:$0xff] }
 0x22c   :  { %v1930_v39 = vpop.f32.mrb[108].mxu0  ;;  %v2988_v46 = vpop.f32.mrb[140].mxu1  ;;  %v2600_v19 = vsel %vm1294_vm0, %v2496_v26, 0.0 }
 0x22d   :  { %v4616_v48 = vadd.f32 %v1930_v39, %v4805_v6  ;;  %v2188_v28 = vadd.f32 %v2988_v46, %v4480_v49  ;;  %v1932_v2 = vpop.f32.mrb[109].mxu0  ;;  %v2179_v31 = vpop.f32.mrb[141].mxu1  ;;  %v2406_v45 = vadd.f32 %v2405_v27, %v2404_v37  ;;  %v2601_v5 = vadd.f32 %v2600_v19, %v2599_v9 }
 0x22e   :  { %v2180_v53 = vadd.f32 %v2179_v31, %v4446_v60  ;;  %v1933_v15 = vpop.f32.mrb[110].mxu0  ;;  %v2989_v40 = vpop.f32.mrb[142].mxu1 }
 0x22f   :  { %2304 = vst.msk [vmem:[%s4777_s2 + $0x170] sm:$0xff] %vm1294_vm0, %v2188_v28  ;;  %v4627_v62 = vadd.f32 %v1933_v15, %v4806_v36  ;;  %v2191_v49 = vadd.f32 %v2989_v40, %v4491_v10  ;;  %v2182_v4 = vpop.f32.mrb[143].mxu1  ;;  %v1935_v54 = vpop.f32.mrb[111].mxu0  ;;  %v2603_v23 = vadd.f32 %v2602_v51, %v2601_v5  ;;  %v2408_v60 = vadd.f32 %v2407_v8, %v2406_v45  ;;  %v4809_v8 = vld [vmem:[#allocation12_spill] sm:$0xff] }
 0x230   :  { %2302 = vst.msk [vmem:[%s4777_s2 + $0x160] sm:$0xff] %vm1294_vm0, %v2180_v53  ;;  %v2409_v14 = vsel %vm1294_vm0, %v2180_v53, 0.0  ;;  %v2499_v52 = vmul.f32 %v2180_v53, %v2180_v53  ;;  %v2183_v10 = vadd.f32 %v2182_v4, %v4457_v57  ;;  %v2501_v38 = vmul.f32 %v2188_v28, %v2188_v28 }
 0x231   :  { %2305 = vst.msk [vmem:[%s4777_s2 + $0x178] sm:$0xff] %vm1294_vm0, %v2191_v49  ;;  %v2410_v29 = vadd.f32 %v2409_v14, %v2408_v60  ;;  %v2605_v63 = vadd.f32 %v2604_v7, %v2603_v23  ;;  %v2413_v58 = vsel %vm1294_vm0, %v2188_v28, 0.0  ;;  %v2502_v57 = vmul.f32 %v2191_v49, %v2191_v49 }
 0x232   :  { %v2606_v59 = vsel %vm1294_vm0, %v2499_v52, 0.0  ;;  %2303 = vst.msk [vmem:[%s4777_s2 + $0x168] sm:$0xff] %vm1294_vm0, %v2183_v10  ;;  %v2411_v11 = vsel %vm1294_vm0, %v2183_v10, 0.0  ;;  %v2500_v0 = vmul.f32 %v2183_v10, %v2183_v10  ;;  %v2610_v13 = vsel %vm1294_vm0, %v2501_v38, 0.0 }
 0x233   :  { %v2607_v33 = vadd.f32 %v2606_v59, %v2605_v63  ;;  %v2412_v32 = vadd.f32 %v2411_v11, %v2410_v29  ;;  %v2415_v30 = vsel %vm1294_vm0, %v2191_v49, 0.0  ;;  %v2612_v46 = vsel %vm1294_vm0, %v2502_v57, 0.0  ;;  %v4810_v63 = vld [vmem:[#allocation13_spill] sm:$0xff] }
 0x234   :  { %v1938_v43 = vpop.f32.mrb[112].mxu0  ;;  %v2992_v42 = vpop.f32.mrb[144].mxu1  ;;  %v2608_v16 = vsel %vm1294_vm0, %v2500_v0, 0.0 }
 0x235   :  { %v4650_v35 = vadd.f32 %v1938_v43, %v4807_v20  ;;  %v2204_v12 = vadd.f32 %v2992_v42, %v4548_v47  ;;  %v1940_v18 = vpop.f32.mrb[113].mxu0  ;;  %v2195_v34 = vpop.f32.mrb[145].mxu1  ;;  %v2414_v50 = vadd.f32 %v2413_v58, %v2412_v32  ;;  %v2609_v17 = vadd.f32 %v2608_v16, %v2607_v33 }
 0x236   :  { %v2196_v25 = vadd.f32 %v2195_v34, %v4514_v21  ;;  %v1941_v41 = vpop.f32.mrb[114].mxu0  ;;  %v2993_v44 = vpop.f32.mrb[146].mxu1 }
 0x237   :  { %2308 = vst.msk [vmem:[%s4777_s2 + $0x190] sm:$0xff] %vm1294_vm0, %v2204_v12  ;;  %v4661_v61 = vadd.f32 %v1941_v41, %v4808_v56  ;;  %v2207_v47 = vadd.f32 %v2993_v44, %v4559_v3  ;;  %v2198_v26 = vpop.f32.mrb[147].mxu1  ;;  %v1943_v27 = vpop.f32.mrb[115].mxu0  ;;  %v2611_v9 = vadd.f32 %v2610_v13, %v2609_v17  ;;  %v2416_v21 = vadd.f32 %v2415_v30, %v2414_v50  ;;  %v4811_v44 = vld [vmem:[#allocation14_spill] sm:$0xff] }
 0x238   :  { %2306 = vst.msk [vmem:[%s4777_s2 + $0x180] sm:$0xff] %vm1294_vm0, %v2196_v25  ;;  %v2417_v37 = vsel %vm1294_vm0, %v2196_v25, 0.0  ;;  %v2503_v39 = vmul.f32 %v2196_v25, %v2196_v25  ;;  %v2199_v3 = vadd.f32 %v2198_v26, %v4525_v1  ;;  %v2505_v28 = vmul.f32 %v2204_v12, %v2204_v12 }
 0x239   :  { %2309 = vst.msk [vmem:[%s4777_s2 + $0x198] sm:$0xff] %vm1294_vm0, %v2207_v47  ;;  %v2418_v22 = vadd.f32 %v2417_v37, %v2416_v21  ;;  %v2613_v19 = vadd.f32 %v2612_v46, %v2611_v9  ;;  %v2421_v45 = vsel %vm1294_vm0, %v2204_v12, 0.0  ;;  %v2506_v1 = vmul.f32 %v2207_v47, %v2207_v47 }
 0x23a   :  { %v2614_v6 = vsel %vm1294_vm0, %v2503_v39, 0.0  ;;  %2307 = vst.msk [vmem:[%s4777_s2 + $0x188] sm:$0xff] %vm1294_vm0, %v2199_v3  ;;  %v2419_v2 = vsel %vm1294_vm0, %v2199_v3, 0.0  ;;  %v2504_v31 = vmul.f32 %v2199_v3, %v2199_v3  ;;  %v2618_v10 = vsel %vm1294_vm0, %v2505_v28, 0.0  ;;  %v4812_v3 = vld [vmem:[#allocation15_spill] sm:$0xff] }
 0x23b   :  { %v2615_v5 = vadd.f32 %v2614_v6, %v2613_v19  ;;  %v2420_v53 = vadd.f32 %v2419_v2, %v2418_v22  ;;  %v2423_v29 = vsel %vm1294_vm0, %v2207_v47, 0.0  ;;  %v2620_v32 = vsel %vm1294_vm0, %v2506_v1, 0.0 }
 0x23c   :  { %v1946_v15 = vpop.f32.mrb[116].mxu0  ;;  %v2996_v40 = vpop.f32.mrb[148].mxu1  ;;  %v2616_v51 = vsel %vm1294_vm0, %v2504_v31, 0.0 }
 0x23d   :  { %v1947_v36 = vadd.f32 %v1946_v15, %v4809_v8  ;;  %v2220_v49 = vadd.f32 %v2996_v40, %v4616_v48  ;;  %v1948_v4 = vpop.f32.mrb[117].mxu0  ;;  %v2211_v54 = vpop.f32.mrb[149].mxu1  ;;  %v2422_v23 = vadd.f32 %v2421_v45, %v2420_v53  ;;  %v2617_v60 = vadd.f32 %v2616_v51, %v2615_v5 }
 0x23e   :  { %v2212_v14 = vadd.f32 %v2211_v54, %v4582_v24  ;;  %v1949_v52 = vpop.f32.mrb[118].mxu0  ;;  %v2997_v7 = vpop.f32.mrb[150].mxu1 }
 0x23f   :  { %2312 = vst.msk [vmem:[%s4777_s2 + $0x1b0] sm:$0xff] %vm1294_vm0, %v2220_v49  ;;  %v1950_v59 = vadd.f32 %v1949_v52, %v4810_v63  ;;  %v2223_v48 = vadd.f32 %v2997_v7, %v4627_v62  ;;  %v2214_v38 = vpop.f32.mrb[151].mxu1  ;;  %v1951_v11 = vpop.f32.mrb[119].mxu0  ;;  %v2619_v0 = vadd.f32 %v2618_v10, %v2617_v60  ;;  %v2424_v24 = vadd.f32 %v2423_v29, %v2422_v23  ;;  %v4813_v52 = vld [vmem:[#allocation16_spill] sm:$0xff] }
 0x240   :  { %2310 = vst.msk [vmem:[%s4777_s2 + $0x1a0] sm:$0xff] %vm1294_vm0, %v2212_v14  ;;  %v2425_v58 = vsel %vm1294_vm0, %v2212_v14, 0.0  ;;  %v2507_v33 = vmul.f32 %v2212_v14, %v2212_v14  ;;  %v2215_v62 = vadd.f32 %v2214_v38, %v4593_v55  ;;  %v2509_v16 = vmul.f32 %v2220_v49, %v2220_v49 }
 0x241   :  { %2313 = vst.msk [vmem:[%s4777_s2 + $0x1b8] sm:$0xff] %vm1294_vm0, %v2223_v48  ;;  %v2426_v43 = vadd.f32 %v2425_v58, %v2424_v24  ;;  %v2621_v42 = vadd.f32 %v2620_v32, %v2619_v0  ;;  %v2429_v18 = vsel %vm1294_vm0, %v2220_v49, 0.0  ;;  %v2510_v55 = vmul.f32 %v2223_v48, %v2223_v48 }
 0x242   :  { %v2622_v57 = vsel %vm1294_vm0, %v2507_v33, 0.0  ;;  %2311 = vst.msk [vmem:[%s4777_s2 + $0x1a8] sm:$0xff] %vm1294_vm0, %v2215_v62  ;;  %v2427_v20 = vsel %vm1294_vm0, %v2215_v62, 0.0  ;;  %v2508_v12 = vmul.f32 %v2215_v62, %v2215_v62  ;;  %v2626_v39 = vsel %vm1294_vm0, %v2509_v16, 0.0  ;;  %v4814_v33 = vld [vmem:[#allocation17_spill] sm:$0xff] }
 0x243   :  { %v2623_v34 = vadd.f32 %v2622_v57, %v2621_v42  ;;  %v2428_v50 = vadd.f32 %v2427_v20, %v2426_v43  ;;  %v2431_v46 = vsel %vm1294_vm0, %v2223_v48, 0.0  ;;  %v2628_v5 = vsel %vm1294_vm0, %v2510_v55, 0.0 }
 0x244   :  { %v1954_v17 = vpop.f32.mrb[120].mxu0  ;;  %v3000_v25 = vpop.f32.mrb[152].mxu1  ;;  %v2624_v41 = vsel %vm1294_vm0, %v2508_v12, 0.0 }
 0x245   :  { %v1955_v13 = vadd.f32 %v1954_v17, %v4811_v44  ;;  %v2236_v30 = vadd.f32 %v3000_v25, %v1947_v36  ;;  %v1956_v56 = vpop.f32.mrb[121].mxu0  ;;  %v2227_v47 = vpop.f32.mrb[153].mxu1  ;;  %v2430_v26 = vadd.f32 %v2429_v18, %v2428_v50  ;;  %v2625_v27 = vadd.f32 %v2624_v41, %v2623_v34 }
 0x246   :  { %v2228_v9 = vadd.f32 %v2227_v47, %v4650_v35  ;;  %v1957_v21 = vpop.f32.mrb[122].mxu0  ;;  %v3001_v37 = vpop.f32.mrb[154].mxu1 }
 0x247   :  { %2316 = vst.msk [vmem:[%s4777_s2 + $0x1d0] sm:$0xff] %vm1294_vm0, %v2236_v30  ;;  %v1958_v22 = vadd.f32 %v1957_v21, %v4812_v3  ;;  %v2239_v19 = vadd.f32 %v3001_v37, %v1950_v59  ;;  %v2230_v6 = vpop.f32.mrb[155].mxu1  ;;  %v1959_v28 = vpop.f32.mrb[123].mxu0  ;;  %v2627_v2 = vadd.f32 %v2626_v39, %v2625_v27  ;;  %v2432_v35 = vadd.f32 %v2431_v46, %v2430_v26 }
 0x248   :  { %2314 = vst.msk [vmem:[%s4777_s2 + $0x1c0] sm:$0xff] %vm1294_vm0, %v2228_v9  ;;  %v2433_v31 = vsel %vm1294_vm0, %v2228_v9, 0.0  ;;  %v2511_v45 = vmul.f32 %v2228_v9, %v2228_v9  ;;  %v2231_v53 = vadd.f32 %v2230_v6, %v4661_v61  ;;  %v2513_v51 = vmul.f32 %v2236_v30, %v2236_v30 }
 0x249   :  { %2317 = vst.msk [vmem:[%s4777_s2 + $0x1d8] sm:$0xff] %vm1294_vm0, %v2239_v19  ;;  %v2434_v15 = vadd.f32 %v2433_v31, %v2432_v35  ;;  %v2629_v40 = vadd.f32 %v2628_v5, %v2627_v2  ;;  %v2437_v60 = vsel %vm1294_vm0, %v2236_v30, 0.0  ;;  %v2514_v61 = vmul.f32 %v2239_v19, %v2239_v19 }
 0x24a   :  { %v2630_v1 = vsel %vm1294_vm0, %v2511_v45, 0.0  ;;  %2315 = vst.msk [vmem:[%s4777_s2 + $0x1c8] sm:$0xff] %vm1294_vm0, %v2231_v53  ;;  %v2435_v8 = vsel %vm1294_vm0, %v2231_v53, 0.0  ;;  %v2512_v36 = vmul.f32 %v2231_v53, %v2231_v53  ;;  %v2634_v0 = vsel %vm1294_vm0, %v2513_v51, 0.0 }
 0x24b   :  { %v2631_v49 = vadd.f32 %v2630_v1, %v2629_v40  ;;  %v2436_v4 = vadd.f32 %v2435_v8, %v2434_v15  ;;  %v2439_v24 = vsel %vm1294_vm0, %v2239_v19, 0.0  ;;  %v2636_v12 = vsel %vm1294_vm0, %v2514_v61, 0.0 }
 0x24c   :  { %v1962_v54 = vpop.f32.mrb[124].mxu0  ;;  %v3004_v23 = vpop.f32.mrb[156].mxu1  ;;  %v2632_v14 = vsel %vm1294_vm0, %v2512_v36, 0.0 }
 0x24d   :  { %v1963_v7 = vadd.f32 %v1962_v54, %v4813_v52  ;;  %v1964_v10 = vpop.f32.mrb[125].mxu0  ;;  %v2243_v29 = vpop.f32.mrb[157].mxu1  ;;  %v2438_v63 = vadd.f32 %v2437_v60, %v2436_v4  ;;  %v2633_v59 = vadd.f32 %v2632_v14, %v2631_v49 }
 0x24e   :  { %v2244_v48 = vadd.f32 %v2243_v29, %v1955_v13  ;;  %v1965_v38 = vpop.f32.mrb[126].mxu0  ;;  %v3005_v11 = vpop.f32.mrb[158].mxu1 }
 0x24f   :  { %v2252_v58 = vadd.f32 %v3004_v23, %v1963_v7  ;;  %v1966_v32 = vadd.f32 %v1965_v38, %v4814_v33  ;;  %v2246_v62 = vpop.f32.mrb[159].mxu1  ;;  %v1967_v43 = vpop.f32.mrb[127].mxu0  ;;  %v2635_v42 = vadd.f32 %v2634_v0, %v2633_v59  ;;  %v2440_v57 = vadd.f32 %v2439_v24, %v2438_v63 }
 0x250   :  { %2318 = vst.msk [vmem:[%s4777_s2 + $0x1e0] sm:$0xff] %vm1294_vm0, %v2244_v48  ;;  %v2441_v16 = vsel %vm1294_vm0, %v2244_v48, 0.0  ;;  %v2515_v20 = vmul.f32 %v2244_v48, %v2244_v48  ;;  %v2247_v34 = vadd.f32 %v2246_v62, %v1958_v22 }
 0x251   :  { %2320 = vst.msk [vmem:[%s4777_s2 + $0x1f0] sm:$0xff] %vm1294_vm0, %v2252_v58  ;;  %v2255_v18 = vadd.f32 %v3005_v11, %v1966_v32  ;;  %v2442_v50 = vadd.f32 %v2441_v16, %v2440_v57  ;;  %v2637_v17 = vadd.f32 %v2636_v12, %v2635_v42  ;;  %v2517_v41 = vmul.f32 %v2252_v58, %v2252_v58 }
 0x252   :  { %v2638_v25 = vsel %vm1294_vm0, %v2515_v20, 0.0  ;;  %2319 = vst.msk [vmem:[%s4777_s2 + $0x1e8] sm:$0xff] %vm1294_vm0, %v2247_v34  ;;  %v2443_v55 = vsel %vm1294_vm0, %v2247_v34, 0.0  ;;  %v2516_v30 = vmul.f32 %v2247_v34, %v2247_v34  ;;  %v2445_v56 = vsel %vm1294_vm0, %v2252_v58, 0.0 }
 0x253   :  { %2321 = vst.msk [vmem:[%s4777_s2 + $0x1f8] sm:$0xff] %vm1294_vm0, %v2255_v18  ;;  %v2639_v44 = vadd.f32 %v2638_v25, %v2637_v17  ;;  %v2444_v13 = vadd.f32 %v2443_v55, %v2442_v50  ;;  %v2518_v47 = vmul.f32 %v2255_v18, %v2255_v18  ;;  %v2447_v9 = vsel %vm1294_vm0, %v2255_v18, 0.0 }
 0x254   :  { %v2640_v27 = vsel %vm1294_vm0, %v2516_v30, 0.0  ;;  %v2642_v37 = vsel %vm1294_vm0, %v2517_v41, 0.0 }
 0x255   :  { %v2446_v26 = vadd.f32 %v2445_v56, %v2444_v13  ;;  %v2641_v21 = vadd.f32 %v2640_v27, %v2639_v44  ;;  %v2644_v3 = vsel %vm1294_vm0, %v2518_v47, 0.0 }
 0x257   :  { %v2448_v39 = vadd.f32 %v2447_v9, %v2446_v26  ;;  %v2643_v46 = vadd.f32 %v2642_v37, %v2641_v21 }
 0x259   :  { %v2449_v22 = vrot.slane %v2448_v39, 4  ;;  %v2645_v19 = vadd.f32 %v2644_v3, %v2643_v46 }
 0x25b   :  { %v2450_v6 = vadd.f32 %v2449_v22, %v2448_v39  ;;  %v2646_v28 = vrot.slane %v2645_v19, 4 }
 0x25d   :  { %v2451_v2 = vrot.slane %v2450_v6, 2  ;;  %v2647_v35 = vadd.f32 %v2646_v28, %v2645_v19 }
 0x25f   :  { %v2452_v31 = vadd.f32 %v2451_v2, %v2450_v6  ;;  %v2648_v45 = vrot.slane %v2647_v35, 2 }
 0x261   :  { %v2453_v5 = vrot.slane %v2452_v31, 1  ;;  %v2649_v53 = vadd.f32 %v2648_v45, %v2647_v35 }
 0x263   :  { %v2650_v15 = vrot.slane %v2649_v53, 1  ;;  %v2454_v40 = vadd.f32 %v2453_v5, %v2452_v31 }
 0x265   :  { %v2651_v1 = vadd.f32 %v2650_v15, %v2649_v53  ;;  %v2652_v36 = vsel %vm1294_vm0, %v2454_v40, 0.0 }
 0x267   :  { %v2653_v51 = vsel %vm1294_vm0, %v2651_v1, 0.0 }
 0x268   :  { %v2655_v8 = vrot.slane %v2653_v51, 7 }
 0x26a   :  { %v2658_v49 = vsel %vm2657_vm1, %v2652_v36, %v2655_v8 }
 0x26b   :  { %v2660_v4 = vsel %vm2659_vm2, %v2658_v49, 0.0 }
 0x26c   :  { %2661 = vst [vmem:[%s4778_s3] sm:$0xff] %v2660_v4 }

// kernel: base_model_autoencoder_forward.9
= control target key start
LH: loop header
LB: loop body
LE: loop exit
PB: predicated region body
PF: predicated region fallthrough
CT: control target
= control target key end

     0   :  { %s716_s21 = smov 0   ;;  %s874_s0 = inlined_call_operand.vmem [shape: f32[2,8,8,64], index: 0, kind: input, shape index: {}]   ;;  %s875_s1 = inlined_call_operand.vmem [shape: f32[2,8,7,64], index: 1, kind: input, shape index: {}]   ;;  %s876_s2 = inlined_call_operand.vmem [shape: f32[2,7,8,64], index: 2, kind: input, shape index: {}]   ;;  %s877_s3 = inlined_call_operand.vmem [shape: f32[2,7,7,64], index: 3, kind: input, shape index: {}]   ;;  %s878_s4 = inlined_call_operand.vmem [shape: f32[1,64], index: 4, kind: input, shape index: {}]   ;;  %s879_s5 = inlined_call_operand.vmem [shape: f32[1,64], index: 5, kind: input, shape index: {}]   ;;  %s880_s6 = inlined_call_operand.vmem [shape: f32[2,7,7,64], index: 6, kind: output, shape index: {}]  }
   0x1 LB: > { %s646_s22 = sadd.s32 4294967295, %s679_s21   ;;  %p650_p0 = scmp.ge.s32.totalorder %s679_s21, 1  ;;  %s679_s21 = sphi %s716_s21, %s16_s21  }
   0x2   : > { %p242_p1 = scmp.lt.s32.totalorder %s679_s21, 3 }
   0x4   : > { %p243_p2 = pnand %p650_p0, %p242_p1 }
   0x5   : > { %p287_p3 = scmp.lt.s32.totalorder (!%p243_p2), %s646_s22, 1  ;;  %v729_v0 = vld [vmem:[%s878_s4] ss:$0 sm:$0xff] (!%p243_p2)  ;;  %vm547_vm0 = vcmask (!%p243_p2), 522240  }
   0x6   : > { %246 = sbr.rel (%p243_p2) target bundleno = 68 (0x44), region = 44  ;;  %v744_v1 = vld [vmem:[%s879_s5] ss:$0 sm:$0xff] (!%p243_p2) }
   0xd   : > { %s882_s22 = smov (!%p287_p3, %s646_s22), 1 }
   0xe   : > { %s662_s23 = sshll.u32 %s882_s22, 6  ;;  %s724_s24 = smul.u32 56, %s882_s22 }
   0xf   : > { %s734_s29 = scalar_lea.vmem %s874_s0, %s662_s23  ;;  %s739_s8 = scalar_lea.vmem %s875_s1, %s662_s23 }
  0x10   : > { %s750_s13 = scalar_lea.vmem %s876_s2, %s724_s24  ;;  %s756_s16 = scalar_lea.vmem %s877_s3, %s724_s24  ;;  %v314_v2 = vld [vmem:[%s734_s29] sm:$0xff]  ;;  %v315_v3 = vld [vmem:[%s734_s29 + $0x8] sm:$0xff]  ;;  %v316_v10 = vld [vmem:[%s734_s29 + $0x10] sm:$0xff] }
  0x11   : > { %v358_v4 = vld [vmem:[%s739_s8] sm:$0x7f]  ;;  %v328_v5 = vmul.f32 %v729_v0, %v314_v2  ;;  %v329_v6 = vmul.f32 %v729_v0, %v315_v3  ;;  %v330_v14 = vmul.f32 %v729_v0, %v316_v10  ;;  %v359_v16 = vld [vmem:[%s739_s8 + $0x8] sm:$0x7f]  ;;  %v360_v22 = vld [vmem:[%s739_s8 + $0x10] sm:$0x7f]  ;;  %s818_s19 = scalar_lea.vmem %s880_s6, %s724_s24 }
  0x12   : > { %v390_v7 = vld [vmem:[%s750_s13] sm:$0xff]  ;;  %v366_v12 = vmul.f32 %v729_v0, %v358_v4  ;;  %v419_v20 = vld [vmem:[%s756_s16 + $0x8] sm:$0x7f]  ;;  %v317_v24 = vld [vmem:[%s734_s29 + $0x18] sm:$0xff]  ;;  %v367_v25 = vmul.f32 %v729_v0, %v359_v16  ;;  %v368_v34 = vmul.f32 %v729_v0, %v360_v22 }
  0x13   : > { %v418_v8 = vld [vmem:[%s756_s16] sm:$0x7f]  ;;  %v342_v11 = vadd.f32 %v744_v1, %v328_v5  ;;  %v397_v13 = vmul.f32 %v729_v0, %v390_v7  ;;  %v343_v15 = vadd.f32 %v744_v1, %v329_v6  ;;  %v344_v19 = vadd.f32 %v744_v1, %v330_v14  ;;  %v391_v23 = vld [vmem:[%s750_s13 + $0x8] sm:$0xff]  ;;  %v420_v29 = vld [vmem:[%s756_s16 + $0x10] sm:$0x7f] }
  0x14   : > { %v425_v9 = vmul.f32 %v729_v0, %v418_v8  ;;  %v374_v26 = vadd.f32 %v744_v1, %v366_v12  ;;  %v426_v32 = vmul.f32 %v729_v0, %v419_v20  ;;  %v398_v35 = vmul.f32 %v729_v0, %v391_v23  ;;  %v392_v39 = vld [vmem:[%s750_s13 + $0x10] sm:$0xff]  ;;  %v361_v45 = vld [vmem:[%s739_s8 + $0x18] sm:$0x7f]  ;;  %v318_v50 = vld [vmem:[%s734_s29 + $0x20] sm:$0xff] }
  0x15   : > { %v350_v18 = vmax.f32 %v342_v11, 0.0  ;;  %v404_v27 = vadd.f32 %v744_v1, %v397_v13  ;;  %v351_v30 = vmax.f32 %v343_v15, 0.0  ;;  %v352_v33 = vmax.f32 %v344_v19, 0.0  ;;  %v421_v59 = vld [vmem:[%s756_s16 + $0x18] sm:$0x7f]  ;;  %v319_v10 = vld [vmem:[%s734_s29 + $0x28] sm:$0xff] }
  0x16   : > { %v432_v17 = vadd.f32 %v744_v1, %v425_v9  ;;  %v331_v36 = vmul.f32 %v729_v0, %v317_v24  ;;  %v433_v38 = vadd.f32 %v744_v1, %v426_v32  ;;  %v427_v40 = vmul.f32 %v729_v0, %v420_v29  ;;  %v393_v5 = vld [vmem:[%s750_s13 + $0x18] sm:$0xff]  ;;  %v362_v15 = vld [vmem:[%s739_s8 + $0x20] sm:$0x7f]  ;;  %v320_v29 = vld [vmem:[%s734_s29 + $0x30] sm:$0xff] }
  0x17   : > { %v460_v28 = vrot.slane %v350_v18, 1  ;;  %v375_v41 = vadd.f32 %v744_v1, %v367_v25  ;;  %v382_v42 = vmax.f32 %v374_v26, 0.0  ;;  %v411_v43 = vmax.f32 %v404_v27, 0.0  ;;  %v422_v24 = vld [vmem:[%s756_s16 + $0x20] sm:$0x7f] }
  0x18   : > { %v439_v21 = vmax.f32 %v432_v17, 0.0  ;;  %v345_v44 = vadd.f32 %v744_v1, %v331_v36  ;;  %v461_v46 = vrot.slane %v351_v30, 1  ;;  %v440_v48 = vmax.f32 %v433_v38, 0.0  ;;  %v394_v38 = vld [vmem:[%s750_s13 + $0x20] sm:$0xff] }
  0x19   : > { %v434_v49 = vadd.f32 %v744_v1, %v427_v40  ;;  %v376_v51 = vadd.f32 %v744_v1, %v368_v34  ;;  %v405_v52 = vadd.f32 %v744_v1, %v398_v35  ;;  %v462_v53 = vrot.slane %v352_v33, 1 }
  0x1a   : > { %v446_v31 = vmax.f32 %v439_v21, %v350_v18  ;;  %v399_v54 = vmul.f32 %v729_v0, %v392_v39  ;;  %v447_v56 = vmax.f32 %v440_v48, %v351_v30  ;;  %v369_v57 = vmul.f32 %v729_v0, %v361_v45 }
  0x1b   : > { %v441_v58 = vmax.f32 %v434_v49, 0.0  ;;  %v383_v60 = vmax.f32 %v375_v41, 0.0  ;;  %v353_v61 = vmax.f32 %v345_v44, 0.0  ;;  %v332_v62 = vmul.f32 %v729_v0, %v318_v50 }
  0x1c   : > { %v474_v37 = vmax.f32 %v446_v31, %v460_v28  ;;  %v526_v2 = vrot.slane %v411_v43, 1  ;;  %v475_v3 = vmax.f32 %v447_v56, %v461_v46  ;;  %v384_v6 = vmax.f32 %v376_v51, 0.0 }
  0x1d   : > { %v448_v4 = vmax.f32 %v441_v58, %v352_v33  ;;  %v412_v7 = vmax.f32 %v405_v52, 0.0  ;;  %v406_v8 = vadd.f32 %v744_v1, %v399_v54  ;;  %v428_v9 = vmul.f32 %v729_v0, %v421_v59  ;;  %v423_v52 = vld [vmem:[%s756_s16 + $0x28] sm:$0x7f] }
  0x1e   : > { %v481_v47 = vmax.f32 %v474_v37, %v351_v30  ;;  %v482_v12 = vmax.f32 %v475_v3, %v352_v33  ;;  %v806_v13 = vadd.f32 %v744_v1, %v369_v57  ;;  %v463_v16 = vrot.slane %v353_v61, 1  ;;  %v363_v37 = vld [vmem:[%s739_s8 + $0x28] sm:$0x7f]  ;;  %v321_v57 = vld [vmem:[%s734_s29 + $0x38] sm:$0xff] }
  0x1f   : > { %v476_v14 = vmax.f32 %v448_v4, %v462_v53  ;;  %v346_v17 = vadd.f32 %v744_v1, %v332_v62  ;;  %v400_v18 = vmul.f32 %v729_v0, %v393_v5  ;;  %v435_v19 = vadd.f32 %v744_v1, %v428_v9  ;;  %v424_v4 = vld [vmem:[%s756_s16 + $0x30] sm:$0x7f] }
  0x20   : > { %v491_v55 = vmax.f32 %v481_v47, %v461_v46  ;;  %v492_v21 = vmax.f32 %v482_v12, %v462_v53  ;;  %v333_v23 = vmul.f32 %v729_v0, %v319_v10  ;;  %v527_v25 = vrot.slane %v412_v7, 1 }
  0x21   : > { %v483_v22 = vmax.f32 %v476_v14, %v353_v61  ;;  %v413_v26 = vmax.f32 %v406_v8, 0.0  ;;  %v370_v27 = vmul.f32 %v729_v0, %v362_v15  ;;  %v442_v28 = vmax.f32 %v435_v19, 0.0  ;;  %v395_v8 = vld [vmem:[%s750_s13 + $0x28] sm:$0xff] }
  0x22   : > { %v498_v63 = vmax.f32 %v491_v55, %v382_v42  ;;  %v499_v31 = vmax.f32 %v492_v21, %v383_v60  ;;  %v385_v32 = vmax.f32 %v806_v13, 0.0  ;;  %v354_v34 = vmax.f32 %v346_v17, 0.0  ;;  %v364_v13 = vld [vmem:[%s739_s8 + $0x30] sm:$0x7f] }
  0x23   : > { %v493_v33 = vmax.f32 %v483_v22, %v463_v16  ;;  %v407_v35 = vadd.f32 %v744_v1, %v400_v18  ;;  %v449_v36 = vmax.f32 %v442_v28, %v353_v61  ;;  %v429_v39 = vmul.f32 %v729_v0, %v422_v24  ;;  %v396_v24 = vld [vmem:[%s750_s13 + $0x30] sm:$0xff] }
  0x24   : > { %v505_v11 = vmax.f32 %v498_v63, %v383_v60  ;;  %v506_v40 = vmax.f32 %v499_v31, %v384_v6  ;;  %v347_v42 = vadd.f32 %v744_v1, %v333_v23  ;;  %v528_v44 = vrot.slane %v413_v26, 1  ;;  %v365_v23 = vld [vmem:[%s739_s8 + $0x38] sm:$0x7f] }
  0x25   : > { %v500_v41 = vmax.f32 %v493_v33, %v384_v6  ;;  %v378_v45 = vadd.f32 %v744_v1, %v370_v27  ;;  %v477_v46 = vmax.f32 %v449_v36, %v463_v16  ;;  %v436_v47 = vadd.f32 %v744_v1, %v429_v39 }
  0x26   : > { %v512_v20 = vmax.f32 %v505_v11, %v411_v43  ;;  %v334_v43 = vmul.f32 %v729_v0, %v320_v29  ;;  %v513_v48 = vmax.f32 %v506_v40, %v412_v7  ;;  %v371_v50 = vmul.f32 %v729_v0, %v363_v37 }
  0x27   : > { %v507_v49 = vmax.f32 %v500_v41, %v385_v32  ;;  %v401_v51 = vmul.f32 %v729_v0, %v394_v38  ;;  %v464_v53 = vrot.slane %v354_v34, 1  ;;  %v484_v54 = vmax.f32 %v477_v46, %v354_v34 }
  0x28   : > { %v540_v30 = vmax.f32 %v512_v20, %v526_v2  ;;  %v443_v55 = vmax.f32 %v436_v47, 0.0  ;;  %v348_v56 = vadd.f32 %v744_v1, %v334_v43  ;;  %v541_v58 = vmax.f32 %v513_v48, %v527_v25 }
  0x29   : > { %v514_v59 = vmax.f32 %v507_v49, %v413_v26  ;;  %v414_v60 = vmax.f32 %v407_v35, 0.0  ;;  %v355_v61 = vmax.f32 %v347_v42, 0.0  ;;  %v386_v62 = vmax.f32 %v378_v45, 0.0 }
  0x2a   : > { %548 = vst.msk [vmem:[%s818_s19] sm:$0x7f] %vm547_vm0, %v540_v30  ;;  %v494_v63 = vmax.f32 %v484_v54, %v464_v53  ;;  %v450_v2 = vmax.f32 %v443_v55, %v354_v34  ;;  %v430_v3 = vmul.f32 %v729_v0, %v423_v52  ;;  %549 = vst.msk [vmem:[%s818_s19 + $0x8] sm:$0x7f] %vm547_vm0, %v541_v58  ;;  %v356_v12 = vmax.f32 %v348_v56, 0.0 }
  0x2b   : > { %v542_v5 = vmax.f32 %v514_v59, %v528_v44  ;;  %v379_v6 = vadd.f32 %v744_v1, %v371_v50  ;;  %v408_v7 = vadd.f32 %v744_v1, %v401_v51  ;;  %v335_v9 = vmul.f32 %v729_v0, %v321_v57 }
  0x2c   : > { %v501_v10 = vmax.f32 %v494_v63, %v385_v32  ;;  %v478_v11 = vmax.f32 %v450_v2, %v464_v53  ;;  %v437_v14 = vadd.f32 %v744_v1, %v430_v3  ;;  %v529_v15 = vrot.slane %v414_v60, 1 }
  0x2d   : > { %550 = vst.msk [vmem:[%s818_s19 + $0x10] sm:$0x7f] %vm547_vm0, %v542_v5  ;;  %v465_v16 = vrot.slane %v355_v61, 1  ;;  %v349_v17 = vadd.f32 %v744_v1, %v335_v9  ;;  %v431_v18 = vmul.f32 %v729_v0, %v424_v4  ;;  %v402_v21 = vmul.f32 %v729_v0, %v395_v8 }
  0x2e   : > { %v508_v19 = vmax.f32 %v501_v10, %v386_v62  ;;  %v485_v20 = vmax.f32 %v478_v11, %v355_v61  ;;  %v444_v22 = vmax.f32 %v437_v14, 0.0  ;;  %v387_v25 = vmax.f32 %v379_v6, 0.0 }
  0x2f   : > { %v415_v26 = vmax.f32 %v408_v7, 0.0  ;;  %v372_v27 = vmul.f32 %v729_v0, %v364_v13  ;;  %v438_v28 = vadd.f32 %v744_v1, %v431_v18  ;;  %v466_v32 = vrot.slane %v356_v12, 1 }
  0x30   : > { %v515_v29 = vmax.f32 %v508_v19, %v414_v60  ;;  %v495_v30 = vmax.f32 %v485_v20, %v465_v16  ;;  %v451_v31 = vmax.f32 %v444_v22, %v355_v61  ;;  %v357_v33 = vmax.f32 %v349_v17, 0.0 }
  0x31   : > { %v373_v34 = vmul.f32 %v729_v0, %v365_v23  ;;  %v403_v35 = vmul.f32 %v729_v0, %v396_v24  ;;  %v445_v36 = vmax.f32 %v438_v28, 0.0  ;;  %v409_v39 = vadd.f32 %v744_v1, %v402_v21 }
  0x32   : > { %v543_v37 = vmax.f32 %v515_v29, %v529_v15  ;;  %v502_v38 = vmax.f32 %v495_v30, %v386_v62  ;;  %v479_v40 = vmax.f32 %v451_v31, %v465_v16  ;;  %v380_v41 = vadd.f32 %v744_v1, %v372_v27 }
  0x33   : > { %v452_v42 = vmax.f32 %v445_v36, %v356_v12  ;;  %v530_v44 = vrot.slane %v415_v26, 1  ;;  %v381_v46 = vadd.f32 %v744_v1, %v373_v34  ;;  %v410_v47 = vadd.f32 %v744_v1, %v403_v35 }
  0x34   : > { %551 = vst.msk [vmem:[%s818_s19 + $0x18] sm:$0x7f] %vm547_vm0, %v543_v37  ;;  %v509_v43 = vmax.f32 %v502_v38, %v387_v25  ;;  %v486_v45 = vmax.f32 %v479_v40, %v356_v12  ;;  %v489_v48 = vrot.slane %v357_v33, 1  ;;  %v416_v50 = vmax.f32 %v409_v39, 0.0 }
  0x35   : > { %v480_v0 = vmax.f32 %v452_v42, %v466_v32  ;;  %v388_v52 = vmax.f32 %v380_v41, 0.0  ;;  %v389_v56 = vmax.f32 %v381_v46, 0.0  ;;  %v417_v57 = vmax.f32 %v410_v47, 0.0 }
  0x36   : > { %v516_v49 = vmax.f32 %v509_v43, %v415_v26  ;;  %v496_v51 = vmax.f32 %v486_v45, %v466_v32  ;;  %v531_v60 = vrot.slane %v416_v50, 1 }
  0x37   : > { %v487_v53 = vmax.f32 %v480_v0, %v357_v33  ;;  %v532_v63 = vrot.slane %v417_v57, 1 }
  0x38   : > { %v544_v54 = vmax.f32 %v516_v49, %v530_v44  ;;  %v503_v55 = vmax.f32 %v496_v51, %v387_v25 }
  0x39   : > { %v497_v58 = vmax.f32 %v487_v53, %v489_v48 }
  0x3a   : > { %552 = vst.msk [vmem:[%s818_s19 + $0x20] sm:$0x7f] %vm547_vm0, %v544_v54  ;;  %v510_v59 = vmax.f32 %v503_v55, %v388_v52 }
  0x3b   : > { %v504_v61 = vmax.f32 %v497_v58, %v388_v52 }
  0x3c   : > { %v517_v1 = vmax.f32 %v510_v59, %v416_v50 }
  0x3d   : > { %v511_v62 = vmax.f32 %v504_v61, %v389_v56 }
  0x3e   : > { %v545_v2 = vmax.f32 %v517_v1, %v531_v60 }
  0x3f   : > { %v518_v3 = vmax.f32 %v511_v62, %v417_v57 }
  0x40   : > { %553 = vst.msk [vmem:[%s818_s19 + $0x28] sm:$0x7f] %vm547_vm0, %v545_v2 }
  0x41   : > { %v546_v4 = vmax.f32 %v518_v3, %v532_v63 }
  0x43   : > { %554 = vst.msk [vmem:[%s818_s19 + $0x30] sm:$0x7f] %vm547_vm0, %v546_v4 }
  0x44 PF: > { %s16_s21 = sadd.s32 1, %s679_s21  }
  0x45   : > { %p13_p4 = scmp.ge.s32.totalorder %s16_s21, 4  }
  0x47   :  { %15 = sbr.rel (!%p13_p4) target bundleno = 1 (0x1), region = 83 }

// kernel: base_model_autoencoder_forward.10
= control target key start
LH: loop header
LB: loop body
LE: loop exit
PB: predicated region body
PF: predicated region fallthrough
CT: control target
= control target key end

     0   :  { %vm364_vm0 = vcmask 523264   ;;  %vm557_vm1 = vcmask 1040384   ;;  %vm559_vm2 = vcmask 1041408   ;;  %s931_s1 = inlined_call_operand.vmem [shape: bf16[576,64], index: 1, kind: input, shape index: {}]   ;;  %s932_s0 = inlined_call_operand.vmem [shape: bf16[32,576], index: 0, kind: input, shape index: {}]   ;;  %s933_s2 = inlined_call_operand.vmem [shape: f32[32,64], index: 2, kind: output, shape index: {0}]   ;;  %s934_s3 = inlined_call_operand.vmem [shape: f32[1,8,128], index: 3, kind: output, shape index: {1}]  }
   0x1   :  { %v692_v0 = vld [vmem:[%s931_s1 + $0x40] sm:$0xff]   ;;  %v696_v4 = vld [vmem:[%s931_s1 + $0x48] sm:$0xff]   ;;  %v700_v8 = vld [vmem:[%s931_s1 + $0x50] sm:$0xff]  }
   0x2   :  { %v693_v1 = vld [vmem:[%s931_s1 + $0xc0] sm:$0xff]   ;;  %618 = vmatprep.subr.bf16.mxu0 %v692_v0  ;;  %v697_v5 = vld [vmem:[%s931_s1 + $0xc8] sm:$0xff]   ;;  %v701_v9 = vld [vmem:[%s931_s1 + $0xd0] sm:$0xff]  }
   0x3   :  { %v694_v2 = vld [vmem:[%s931_s1] sm:$0xff]   ;;  %646 = vmatprep.subr.bf16.mxu1 %v693_v1  ;;  %v698_v6 = vld [vmem:[%s931_s1 + $0x8] sm:$0xff]   ;;  %v702_v10 = vld [vmem:[%s931_s1 + $0x10] sm:$0xff]  }
   0x4   :  { %v695_v3 = vld [vmem:[%s931_s1 + $0x80] sm:$0xff]   ;;  %619 = vmatpush3.bf16.msra.mxu0 %v694_v2  ;;  %v699_v7 = vld [vmem:[%s931_s1 + $0x88] sm:$0xff]   ;;  %v703_v11 = vld [vmem:[%s931_s1 + $0x90] sm:$0xff]  }
   0x5   :  { %647 = vmatpush3.bf16.msra.mxu1 %v695_v3  ;;  %620 = vmatprep.subr.bf16.mxu0 %v696_v4  ;;  %v704_v12 = vld [vmem:[%s931_s1 + $0x58] sm:$0xff]   ;;  %v708_v16 = vld [vmem:[%s931_s1 + $0x60] sm:$0xff]   ;;  %v712_v20 = vld [vmem:[%s931_s1 + $0x68] sm:$0xff]  }
   0x6   :  { %648 = vmatprep.subr.bf16.mxu1 %v697_v5  ;;  %v705_v13 = vld [vmem:[%s931_s1 + $0xd8] sm:$0xff]   ;;  %v709_v17 = vld [vmem:[%s931_s1 + $0xe0] sm:$0xff]   ;;  %v713_v21 = vld [vmem:[%s931_s1 + $0xe8] sm:$0xff]  }
   0x7   :  { %v706_v14 = vld [vmem:[%s931_s1 + $0x18] sm:$0xff]   ;;  %v710_v18 = vld [vmem:[%s931_s1 + $0x20] sm:$0xff]   ;;  %v714_v22 = vld [vmem:[%s931_s1 + $0x28] sm:$0xff]  }
   0x8   :  { %621 = vmatpush3.bf16.msra.mxu0 %v698_v6  ;;  %v707_v15 = vld [vmem:[%s931_s1 + $0x98] sm:$0xff]   ;;  %v711_v19 = vld [vmem:[%s931_s1 + $0xa0] sm:$0xff]   ;;  %v715_v23 = vld [vmem:[%s931_s1 + $0xa8] sm:$0xff]  }
   0x9   :  { %649 = vmatpush3.bf16.msra.mxu1 %v699_v7  ;;  %622 = vmatprep.subr.bf16.mxu0 %v700_v8  ;;  %v716_v24 = vld [vmem:[%s931_s1 + $0x70] sm:$0xff]   ;;  %v720_v28 = vld [vmem:[%s931_s1 + $0x78] sm:$0xff]   ;;  %v729_v35 = vld [vmem:[%s932_s0 + $0xc] ss:$20 sps:$4 sm:$0xff]  }
   0xa   :  { %650 = vmatprep.subr.bf16.mxu1 %v701_v9  ;;  %v717_v25 = vld [vmem:[%s931_s1 + $0xf0] sm:$0xff]   ;;  %v721_v29 = vld [vmem:[%s931_s1 + $0xf8] sm:$0xff]   ;;  %v730_v36 = vld [vmem:[%s931_s1 + $0x100] sm:$0xff]   ;;  %452 = vmatprep.mubr.bf16.mxu1 %v729_v35 }
   0xb   :  { %v718_v26 = vld [vmem:[%s931_s1 + $0x30] sm:$0xff]   ;;  %v722_v30 = vld [vmem:[%s931_s1 + $0x38] sm:$0xff]   ;;  %v731_v37 = vld [vmem:[%s931_s1 + $0x108] sm:$0xff]  }
   0xc   :  { %623 = vmatpush3.bf16.msra.mxu0 %v702_v10  ;;  %v719_v27 = vld [vmem:[%s931_s1 + $0xb0] sm:$0xff]   ;;  %v723_v31 = vld [vmem:[%s931_s1 + $0xb8] sm:$0xff]   ;;  %v732_v38 = vld [vmem:[%s932_s0 + $0x2c] ss:$20 sps:$4 sm:$0xff]  }
   0xd   :  { %651 = vmatpush3.bf16.msra.mxu1 %v703_v11  ;;  %624 = vmatprep.subr.bf16.mxu0 %v704_v12  ;;  %v724_v32 = vld [vmem:[%s932_s0] ss:$20 sps:$4 sm:$0xff]   ;;  %v726_v33 = vld [vmem:[%s932_s0 + $0x4] ss:$20 sps:$4 sm:$0xff]   ;;  %v727_v34 = vld [vmem:[%s932_s0 + $0x8] ss:$20 sps:$4 sm:$0xff]  }
   0xe   :  { %652 = vmatprep.subr.bf16.mxu1 %v705_v13  ;;  %403 = vmatprep.mubr.bf16.mxu0 %v726_v33  ;;  %v734_v39 = vld [vmem:[%s932_s0 + $0x34] ss:$20 sps:$4 sm:$0xff]   ;;  %v737_v42 = vld [vmem:[%s932_s0 + $0x30] ss:$20 sps:$4 sm:$0xff]   ;;  %v739_v44 = vld [vmem:[%s931_s1 + $0x118] sm:$0xff]  }
   0xf   :  { %v736_v40 = vld [vmem:[%s932_s0 + $0x28] ss:$20 sps:$4 sm:$0xff]   ;;  %v738_v41 = vld [vmem:[%s931_s1 + $0x110] sm:$0xff]   ;;  %v741_v45 = vld [vmem:[%s932_s0 + $0x38] ss:$20 sps:$4 sm:$0xff]  }
  0x10   :  { %625 = vmatpush3.bf16.msra.mxu0 %v706_v14  ;;  %v740_v43 = vld [vmem:[%s932_s0 + $0x10] ss:$20 sps:$4 sm:$0xff]  }
  0x11   :  { %653 = vmatpush3.bf16.msra.mxu1 %v707_v15  ;;  %626 = vmatprep.subr.bf16.mxu0 %v708_v16 }
  0x12   :  { %654 = vmatprep.subr.bf16.mxu1 %v709_v17 }
  0x14   :  { %627 = vmatpush3.bf16.msra.mxu0 %v710_v18 }
  0x15   :  { %655 = vmatpush3.bf16.msra.mxu1 %v711_v19  ;;  %628 = vmatprep.subr.bf16.mxu0 %v712_v20 }
  0x16   :  { %656 = vmatprep.subr.bf16.mxu1 %v713_v21 }
  0x18   :  { %629 = vmatpush3.bf16.msra.mxu0 %v714_v22 }
  0x19   :  { %657 = vmatpush3.bf16.msra.mxu1 %v715_v23  ;;  %630 = vmatprep.subr.bf16.mxu0 %v716_v24 }
  0x1a   :  { %658 = vmatprep.subr.bf16.mxu1 %v717_v25 }
  0x1c   :  { %631 = vmatpush3.bf16.msra.mxu0 %v718_v26 }
  0x1d   :  { %659 = vmatpush3.bf16.msra.mxu1 %v719_v27  ;;  %632 = vmatprep.subr.bf16.mxu0 %v720_v28 }
  0x1e   :  { %660 = vmatprep.subr.bf16.mxu1 %v721_v29 }
  0x20   :  { %633 = vmatpush3.bf16.msra.mxu0 %v722_v30 }
  0x21   :  { %661 = vmatpush3.bf16.msra.mxu1 %v723_v31  ;;  %680 = vmatprep.subr.bf16.mxu0 %v730_v36 }
  0x23   :  { %404 = vmatmul.mubr.bf16.vlgmr.msra.gmra.mrb[0].mxu0 %v724_v32 }
  0x24   :  { %453 = vmatmul.mubr.bf16.vlgmr.msra.gmra.mrb[0].mxu1 %v727_v34  ;;  %681 = vmatpush3.bf16.msra.mxu0 %v730_v36 }
  0x25   :  { %682 = vmatprep.subr.bf16.mxu0 %v731_v37  ;;  %411 = vmatprep.mubr.bf16.mxu0 %v732_v38 }
  0x26   :  { %460 = vmatprep.mubr.bf16.mxu1 %v734_v39 }
  0x28   :  { %683 = vmatpush3.bf16.msra.mxu0 %v731_v37 }
  0x29   :  { %684 = vmatprep.subr.bf16.mxu0 %v738_v41 }
  0x2b   :  { %412 = vmatmul.mubr.bf16.gmra.mrb[4].mxu0 %v736_v40 }
  0x2c   :  { %461 = vmatmul.mubr.bf16.gmra.mrb[4].mxu1 %v737_v42  ;;  %688 = vmatprep.mubr.msk.bf16.mxu0 %vm364_vm0, %v740_v43 }
  0x2d   :  { %685 = vmatpush3.bf16.msra.mxu0 %v738_v41 }
  0x2e   :  { %686 = vmatprep.subr.bf16.mxu0 %v739_v44 }
  0x31   :  { %687 = vmatpush3.bf16.msra.mxu0 %v739_v44 }
  0x34   :  { %689 = vmatmul.mubr.msk.bf16.vlgmr.msra.gmra.mrb[8].mxu0 %vm364_vm0, %v741_v45 }
  0xf6   :  { %v634_v46 = vpop.f32.mrb[0].mxu0 }
  0xf7   :  { %v662_v47 = vpop.f32.mrb[0].mxu1  ;;  %v635_v48 = vpop.f32.mrb[1].mxu0 }
  0xf8   :  { %v636_v49 = vadd.f32 %v635_v48, %v634_v46  ;;  %v663_v50 = vpop.f32.mrb[1].mxu1  ;;  %v637_v51 = vpop.f32.mrb[2].mxu0 }
  0xf9   :  { %v664_v52 = vadd.f32 %v663_v50, %v662_v47  ;;  %v665_v53 = vpop.f32.mrb[2].mxu1  ;;  %v638_v54 = vpop.f32.mrb[3].mxu0 }
  0xfa   :  { %v639_v55 = vadd.f32 %v638_v54, %v637_v51  ;;  %v666_v56 = vpop.f32.mrb[3].mxu1 }
  0xfb   :  { %v667_v57 = vadd.f32 %v666_v56, %v665_v53  ;;  %v455_v58 = vadd.f32 %v664_v52, %v636_v49 }
  0xfd   :  { %v458_v59 = vadd.f32 %v667_v57, %v639_v55 }
  0xfe   :  { %v640_v60 = vpop.f32.mrb[4].mxu0 }
  0xff   :  { %v668_v61 = vpop.f32.mrb[4].mxu1  ;;  %v641_v62 = vpop.f32.mrb[5].mxu0 }
 0x100   :  { %v642_v63 = vadd.f32 %v641_v62, %v640_v60  ;;  %v669_v0 = vpop.f32.mrb[5].mxu1  ;;  %v643_v1 = vpop.f32.mrb[6].mxu0 }
 0x101   :  { %v670_v2 = vadd.f32 %v669_v0, %v668_v61  ;;  %v671_v3 = vpop.f32.mrb[6].mxu1  ;;  %v644_v4 = vpop.f32.mrb[7].mxu0 }
 0x102   :  { %v645_v5 = vadd.f32 %v644_v4, %v643_v1  ;;  %v672_v6 = vpop.f32.mrb[7].mxu1 }
 0x103   :  { %v673_v7 = vadd.f32 %v672_v6, %v671_v3  ;;  %v463_v8 = vadd.f32 %v670_v2, %v642_v63 }
 0x105   :  { %v466_v9 = vadd.f32 %v673_v7, %v645_v5 }
 0x107   :  { %v690_v10 = vpop.f32.mrb[8].mxu0 }
 0x108   :  { %v512_v11 = vadd.f32 %v690_v10, %v463_v8  ;;  %v503_v12 = vpop.f32.mrb[9].mxu0 }
 0x109   :  { %v504_v13 = vadd.f32 %v503_v12, %v455_v58  ;;  %v691_v14 = vpop.f32.mrb[10].mxu0 }
 0x10a   :  { %520 = vst.msk [vmem:[%s933_s2 + $0x10] sm:$0xff] %vm364_vm0, %v512_v11  ;;  %v515_v15 = vadd.f32 %v691_v14, %v466_v9  ;;  %v506_v16 = vpop.f32.mrb[11].mxu0  ;;  %v537_v19 = vmul.f32 %v512_v11, %v512_v11  ;;  %v525_v24 = vsel %vm364_vm0, %v512_v11, 0.0 }
 0x10b   :  { %518 = vst.msk [vmem:[%s933_s2] sm:$0xff] %vm364_vm0, %v504_v13  ;;  %v535_v17 = vmul.f32 %v504_v13, %v504_v13  ;;  %v507_v18 = vadd.f32 %v506_v16, %v458_v59  ;;  %v522_v20 = vsel %vm364_vm0, %v504_v13, 0.0 }
 0x10c   :  { %521 = vst.msk [vmem:[%s933_s2 + $0x18] sm:$0xff] %vm364_vm0, %v515_v15  ;;  %v538_v26 = vmul.f32 %v515_v15, %v515_v15  ;;  %v542_v30 = vsel %vm364_vm0, %v537_v19, 0.0  ;;  %v527_v31 = vsel %vm364_vm0, %v515_v15, 0.0 }
 0x10d   :  { %519 = vst.msk [vmem:[%s933_s2 + $0x8] sm:$0xff] %vm364_vm0, %v507_v18  ;;  %v523_v21 = vsel %vm364_vm0, %v507_v18, 0.0  ;;  %v536_v22 = vmul.f32 %v507_v18, %v507_v18  ;;  %v539_v25 = vsel %vm364_vm0, %v535_v17, 0.0 }
 0x10e   :  { %v524_v23 = vadd.f32 %v523_v21, %v522_v20  ;;  %v544_v34 = vsel %vm364_vm0, %v538_v26, 0.0 }
 0x10f   :  { %v540_v27 = vsel %vm364_vm0, %v536_v22, 0.0 }
 0x110   :  { %v526_v28 = vadd.f32 %v525_v24, %v524_v23  ;;  %v541_v29 = vadd.f32 %v540_v27, %v539_v25 }
 0x112   :  { %v528_v32 = vadd.f32 %v527_v31, %v526_v28  ;;  %v543_v33 = vadd.f32 %v542_v30, %v541_v29 }
 0x114   :  { %v529_v35 = vrot.slane %v528_v32, 4  ;;  %v545_v36 = vadd.f32 %v544_v34, %v543_v33 }
 0x116   :  { %v530_v37 = vadd.f32 %v529_v35, %v528_v32  ;;  %v546_v38 = vrot.slane %v545_v36, 4 }
 0x118   :  { %v531_v39 = vrot.slane %v530_v37, 2  ;;  %v547_v40 = vadd.f32 %v546_v38, %v545_v36 }
 0x11a   :  { %v532_v41 = vadd.f32 %v531_v39, %v530_v37  ;;  %v548_v42 = vrot.slane %v547_v40, 2 }
 0x11c   :  { %v533_v43 = vrot.slane %v532_v41, 1  ;;  %v549_v44 = vadd.f32 %v548_v42, %v547_v40 }
 0x11e   :  { %v550_v45 = vrot.slane %v549_v44, 1  ;;  %v534_v46 = vadd.f32 %v533_v43, %v532_v41 }
 0x120   :  { %v551_v47 = vadd.f32 %v550_v45, %v549_v44  ;;  %v552_v50 = vsel %vm364_vm0, %v534_v46, 0.0 }
 0x122   :  { %v553_v48 = vsel %vm364_vm0, %v551_v47, 0.0 }
 0x123   :  { %v555_v49 = vrot.slane %v553_v48, 7 }
 0x125   :  { %v558_v51 = vsel %vm557_vm1, %v552_v50, %v555_v49 }
 0x126   :  { %v560_v52 = vsel %vm559_vm2, %v558_v51, 0.0 }
 0x127   :  { %561 = vst [vmem:[%s934_s3] sm:$0xff] %v560_v52 }

// kernel: base_model_autoencoder_forward.11
= control target key start
LH: loop header
LB: loop body
LE: loop exit
PB: predicated region body
PF: predicated region fallthrough
CT: control target
= control target key end

     0   :  { %11 = vsyncpa [#allocation3], 0  ;;  %s765_s0 = inlined_call_operand.vmem [shape: f32[2,2,2,64], index: 0, kind: input, shape index: {}]   ;;  %s766_s1 = inlined_call_operand.vmem [shape: f32[2,2,1,64], index: 1, kind: input, shape index: {}]   ;;  %s767_s2 = inlined_call_operand.vmem [shape: f32[2,1,2,64], index: 2, kind: input, shape index: {}]   ;;  %s768_s3 = inlined_call_operand.vmem [shape: f32[2,1,1,64], index: 3, kind: input, shape index: {}]   ;;  %s769_s4 = inlined_call_operand.vmem [shape: f32[1,64], index: 4, kind: input, shape index: {}]   ;;  %s770_s5 = inlined_call_operand.vmem [shape: f32[1,64], index: 5, kind: input, shape index: {}]   ;;  %s771_s6 = inlined_call_operand.hbm [shape: f32[2,1,1,64], index: 6, kind: output, shape index: {}]  }
   0x1   :  { %13 = vsyncpa [#allocation3 + $0x1], 0  ;;  %s650_s21 = smov 0   ;;  %s652_s22 = smov 0  }
   0x2   :  { %s654_s23 = smov 0   ;;  %s656_s24 = smov 0  }
   0x3 LB: > { %s671_s25 = sadd.s32 4294967295, %s611_s24   ;;  %s497_s26 = sadd.s32 4294967294, %s611_s24   ;;  %s611_s24 = sphi %s656_s24, %s777_s24   ;;  %s607_s23 = sphi %s654_s23, %s776_s23   ;;  %s603_s22 = sphi %s652_s22, %s775_s22   ;;  %s599_s21 = sphi %s650_s21, %s774_s21  }
   0x4   : > { %s675_s27 = sadd.s32 1, %s611_s24   ;;  %s172_s28 = sadd.s32 1, %s607_s23 }
   0x5   : > { %s169_s29 = ssub.s32 %s611_s24, %s675_s27  ;;  %p182_p0 = scmp.ne.s32.totalorder %s607_s23, %s603_s22 }
   0x6   : > { %p170_p1 = scmp.eq.s32.totalorder %s169_s29, 0  ;;  %p183_p2 = scmp.eq.s32.totalorder %s671_s25, 1 }
   0x7   : > { %p188_p3 = scmp.ne.s32.totalorder %s603_s22, %s599_s21  ;;  %p189_p4 = scmp.eq.s32.totalorder %s497_s26, 1 }
   0x8   : > { %s686_s30 = scalar_select %p170_p1, %s607_s23, %s172_s28  }
   0x9   : > { %p688_p5 = por %p183_p2, %p182_p0  ;;  %p692_p6 = por %p189_p4, %p188_p3 }
   0xa   : > { %p500_p7 = scmp.ge.s32.totalorder %s611_s24, 1  ;;  %p241_p8 = scmp.lt.s32.totalorder %s611_s24, 3 }
   0xc   : > { %p242_p9 = pnand %p500_p7, %p241_p8 }
   0xd   : > { %p281_p10 = scmp.lt.s32.totalorder (!%p242_p9), %s671_s25, 1  ;;  %v302_v0 = vlaneseq (!%p242_p9)  ;;  %v613_v2 = vmov (!%p242_p9), 1966171168   ;;  %v297_v4 = vld [vmem:[%s769_s4] sm:$0x1] (!%p242_p9)  ;;  %s505_s16 = sshll.u32 (!%p242_p9), %s671_s25, 4 }
   0xe   : > { %245 = sbr.rel (%p242_p9) target bundleno = 66 (0x42), region = 44  ;;  %v338_v3 = vunpack.c.l.s4 (!%p242_p9), %v613_v2  ;;  %v298_v5 = vld [vmem:[%s770_s5] sm:$0x1] (!%p242_p9)  ;;  %vm394_vm0 = vcmask (!%p242_p9), 516096   ;;  %s725_s19 = scalar_lea.hbm (!%p242_p9), %s771_s6, %s505_s16 }
   0xf   : > { %v303_v1 = vshrl.u32 (!%p242_p9), %v302_v0, 7 }
  0x10   : > { %v339_v11 = vunpack.c.0.s8 (!%p242_p9), %v338_v3 }
  0x11   : > { %v304_v6 = vsub.s32 (!%p242_p9), 0, %v303_v1 }
  0x12   : > { %v342_v20 = vsub.s32 (!%p242_p9), %v339_v11, %v303_v1 }
  0x13   : > { %v305_v9 = vrot.slane (!%p242_p9), %v297_v4, %v304_v6  ;;  %v313_v10 = vrot.slane (!%p242_p9), %v298_v5, %v304_v6 }
  0x15   : > { %s282_s9 = scalar_select %p281_p10, %s671_s25, 1 }
  0x16   : > { %s614_s25 = smov [#allocation2]  }
  0x17   : > { %s508_s14 = sshll.u32 %s282_s9, 2  ;;  %s503_s15 = sshll.u32 %s282_s9, 1 }
  0x18   : > { %s285_s18 = scalar_lea.vmem %s765_s0, %s508_s14  ;;  %s293_s26 = scalar_lea.vmem %s767_s2, %s503_s15 }
  0x19   : > { %s296_s10 = scalar_lea.vmem %s768_s3, %s282_s9  ;;  %v299_v7 = vld [vmem:[%s285_s18] sm:$0x3]  ;;  %v300_v8 = vld [vmem:[%s285_s18 + $0x2] sm:$0x3]  ;;  %s289_s13 = scalar_lea.vmem %s766_s1, %s503_s15 }
  0x1a   : > { %v327_v12 = vld [vmem:[%s293_s26] sm:$0x3]  ;;  %v307_v14 = vmul.f32 %v305_v9, %v299_v7  ;;  %v308_v15 = vmul.f32 %v305_v9, %v300_v8  ;;  %s279_s9 = sand.u32 1, %s603_s22   ;;  %s553_s28 = sshll.u32 %s614_s25, 4  ;;  %s554_s28 = int_to_ptr.vmem [resolvable:$false] %s553_s28 }
  0x1b   : > { %v331_v13 = vld [vmem:[%s296_s10] sm:$0x1]  ;;  %v328_v16 = vmul.f32 %v327_v12, %v305_v9  ;;  %v320_v25 = vld [vmem:[%s289_s13 + $0x1] sm:$0x1]  ;;  %s280_s14 = scalar_lea.vmem [#allocation2], %s279_s9  ;;  %s397_s20 = scalar_lea.sflag [#allocation3], %s279_s9 }
  0x1c   : > { %v332_v17 = vmul.f32 %v331_v13, %v297_v4  ;;  %v315_v18 = vadd.f32 %v313_v10, %v307_v14  ;;  %v316_v19 = vadd.f32 %v313_v10, %v308_v15  ;;  %v319_v21 = vld [vmem:[%s289_s13] sm:$0x1]  ;;  %v322_v31 = vmul.f32 %v320_v25, %v297_v4  ;;  %s409_s15 = sshll.u32 %s280_s14, 4  ;;  %s555_s29 = scalar_lea.vmem %s554_s28, 32  ;;  %s720_s15 = int_to_ptr.vmem [resolvable:$true] %s409_s15 }
  0x1d   : > { %v329_v26 = vadd.f32 %v328_v16, %v313_v10  ;;  %v321_v28 = vmul.f32 %v319_v21, %v297_v4  ;;  %s549_s26 = scalar_lea.vmem %s720_s15, 16  ;;  %p556_p0 = scmp.lt.s32.totalorder %s720_s15, %s554_s28 }
  0x1e   : > { %v333_v22 = vadd.f32 %v332_v17, %v298_v5  ;;  %v317_v23 = vmax.f32 %v315_v18, 0.0  ;;  %v318_v24 = vmax.f32 %v316_v19, 0.0  ;;  %v324_v38 = vadd.f32 %v322_v31, %v298_v5  ;;  %p550_p11 = scmp.ne.s32.totalorder %s720_s15, %s549_s26  ;;  %p557_p1 = scmp.lt.s32.totalorder %s555_s29, %s549_s26 }
  0x1f   : > { %v330_v32 = vmax.f32 %v329_v26, 0.0  ;;  %v323_v36 = vadd.f32 %v321_v28, %v298_v5 }
  0x20   : > { %v334_v27 = vmax.f32 %v333_v22, 0.0  ;;  %v343_v29 = vrot.slane %v317_v23, %v342_v20  ;;  %v362_v30 = vrot.slane %v318_v24, %v342_v20  ;;  %v326_v44 = vmax.f32 %v324_v38, 0.0  ;;  %p551_p12 = pnand %p550_p11, %p688_p5  ;;  %p558_p2 = por %p557_p1, %p556_p0 }
  0x21   : > { %v383_v41 = vrot.slane %v330_v32, %v342_v20  ;;  %v325_v42 = vmax.f32 %v323_v36, 0.0 }
  0x22   : > { %v335_v33 = vmax.f32 %v334_v27, %v317_v23  ;;  %v344_v34 = vcombine.high %v343_v29, %v343_v29  ;;  %v363_v35 = vcombine.high %v362_v30, %v362_v30  ;;  %p552_p13 = pneg %p551_p12 }
  0x23   : > { %v384_v46 = vcombine.high %v383_v41, %v383_v41 }
  0x24   : > { %v351_v37 = vrot.slane %v344_v34, %v342_v20  ;;  %v370_v40 = vrot.slane %v363_v35, %v342_v20  ;;  %p559_p3 = pnand %p558_p2, %p552_p13 }
  0x25   : > { %v391_v49 = vrot.slane %v384_v46, %v342_v20 }
  0x26   : > { %v353_v39 = vmax.f32 %v335_v33, %v351_v37 }
  0x28   : > { %v354_v43 = vmax.f32 %v353_v39, %v318_v24 }
  0x2a   : > { %v372_v45 = vmax.f32 %v354_v43, %v370_v40 }
  0x2c   : > { %v373_v47 = vmax.f32 %v372_v45, %v325_v42 }
  0x2e   : > { %v374_v48 = vmax.f32 %v373_v47, %v326_v44 }
  0x30   : > { %v375_v50 = vmax.f32 %v374_v48, %v330_v32 }
  0x32   : > { %v393_v51 = vmax.f32 %v375_v50, %v391_v49 }
  0x34   : > { %395 = vst.msk [vmem:[%s280_s14] sm:$0x1] %vm394_vm0, %v393_v51 }
  0x35   : > { %562 = shalt.err (!%p559_p3)
}
  0x36   : > { %s563_s10 = scalar_lea.hbm %s725_s19, 16  ;;  %s567_s13 = scalar_lea.hbm %s771_s6, 32 }
  0x37   : > { %p564_p4 = scmp.ne.s32.totalorder %s725_s19, %s563_s10  ;;  %p568_p9 = scmp.lt.u32.totalorder %s725_s19, %s771_s6 }
  0x38   : > { %p569_p10 = scmp.lt.u32.totalorder %s567_s13, %s563_s10  ;;  %p571_p12 = scmp.lt.u32.totalorder %s563_s10, %s725_s19 }
  0x39   : > { %p565_p7 = pnand %p564_p4, %p688_p5 }
  0x3a   : > { %p570_p11 = por %p569_p10, %p568_p9 }
  0x3b   : > { %p566_p8 = pneg %p565_p7 }
  0x3c   : > { %p572_p13 = por %p571_p12, %p570_p11 }
  0x3e   : > { %p573_p0 = pnand %p572_p13, %p566_p8 }
  0x40   : > { %576 = shalt.err (!%p573_p0)
}
  0x41   : > { %509 = dma.vmem_to_hbm [thread:$0]  (%p688_p5), %s720_s15, 16, %s725_s19, %s397_s20  }
  0x42 PF: > { %p515_p1 = scmp.ge.s32.totalorder %s611_s24, 2  ;;  %s421_s16 = sand.u32 1, %s599_s21  }
  0x43   : > { %s422_s17 = scalar_lea.sflag [#allocation3], %s421_s16 }
  0x44   : > { %p512_p2 = pnand %p515_p1, %p692_p6 }
  0x46   : > { %594 = dma.done.wait (!%p512_p2), %s422_s17, 16  }
  0x47   : > { %596 = vsyncadd (!%p512_p2), %s422_s17, 4294967280  ;;  %p16_p3 = scmp.ge.s32.totalorder %s675_s27, 4   ;;  %s774_s21 = smov %s603_s22 }
  0x48   : > { %s775_s22 = smov %s607_s23  ;;  %s776_s23 = smov %s686_s30 }
  0x49   : > { %s777_s24 = smov %s675_s27  ;;  %18 = sbr.rel (!%p16_p3) target bundleno = 3 (0x3), region = 88 }
  0x50   :  { %426 = vsyncpa [#allocation3], 1 }
  0x51   :  { %428 = vsyncpa [#allocation3 + $0x1], 1 }

</bundles_post_ra>
